<compile_context>
chip_gen: v7x
topology: tpu7x:2x2x1
jax: 0.10.0
libtpu: 0.0.40
codegen_flags: <defaults>
</compile_context>

<pallas_src>
import jax
import jax.numpy as jnp
from jax import lax
from jax.experimental import pallas as pl
from jax.experimental.pallas import tpu as pltpu

LANE = 128   # channel padding target (vreg lane / MXU width)
SUB = 8      # f32 sublane tile height


def _round_up(a, b):
    return (a + b - 1) // b * b


def _pick_chunk(hwp):
    """Largest multiple-of-8 divisor of hwp that is <= 128 (M-chunk size)."""
    for cand in (128, 120, 112, 104, 96, 88, 80, 72, 64, 56, 48, 40, 32, 24, 16, 8):
        if hwp % cand == 0:
            return cand
    return hwp


def _make_basic_block_kernel(H, W, Cpad):
    Wp = W + 2                      # padded row width (left + right pad)
    HWp = H * Wp                    # "extended" output rows per image
    OFF = (-(Wp + 1)) % SUB         # buffer offset so interior stores are 8-aligned
    STORE0 = OFF + Wp + 1           # buffer row holding padded cell (1, 1)
    PR = _round_up(OFF + HWp + 2 * Wp + 2, SUB)   # padded-buffer rows per image
    CH = _pick_chunk(HWp)           # extended rows per M-chunk
    NCH = HWp // CH

    def conv_chunk(src_ref, w_ref, q0):
        """f32 (CH, Cpad) accumulator for extended output rows [q0, q0+CH).

        3x3 conv as 9 shifted contiguous slices of the flat padded buffer:
          acc[r] = sum_{dy,dx} src[OFF + q0 + r + dy*Wp + dx] @ w[dy*3+dx]
        bf16 MXU operands, f32 accumulation.  Columns xe >= W of each extended
        row are garbage and are handled by the caller."""
        acc = jnp.zeros((CH, Cpad), jnp.float32)
        for dy in range(3):
            for dx in range(3):
                t = dy * 3 + dx
                s = OFF + q0 + dy * Wp + dx
                lhs = src_ref[s:s + CH, :].astype(jnp.bfloat16)
                acc = acc + jnp.dot(lhs, w_ref[t * Cpad:(t + 1) * Cpad, :],
                                    preferred_element_type=jnp.float32)
        return acc

    def kernel(xp_ref, xr_ref, w1_ref, b1_ref, w2_ref, b2_ref,
               out_ref, mid_ref):
        # Zero ONLY the top/bottom pad slabs of the reused padded scratch; the
        # interior (incl. the left/right pad cells) is fully overwritten by the
        # conv1 chunk stores below.  Done unconditionally every step, so it is
        # safe under megacore grid sharding.
        mid_ref[0:STORE0, :] = jnp.zeros((STORE0, Cpad), jnp.float32)
        mid_ref[STORE0 + HWp:PR, :] = jnp.zeros((PR - STORE0 - HWp, Cpad),
                                                jnp.float32)

        # ---- conv1 (BN1 scale folded) + shift + relu -> padded scratch ------
        for c in range(NCH):
            q0 = c * CH
            acc = conv_chunk(xp_ref, w1_ref, q0)
            mid = jnp.maximum(acc + b1_ref[...], 0.0)
            # zero the garbage columns (xe >= W): stored at STORE0+q they land
            # exactly on the pad cells of the padded layout reused by conv2.
            rows = lax.broadcasted_iota(jnp.int32, (CH, 1), 0) + q0
            mid = jnp.where((rows % Wp) < W, mid, 0.0)
            mid_ref[STORE0 + q0:STORE0 + q0 + CH, :] = mid

        # ---- conv2 (BN2 scale folded) + shift + residual + relu -> out ------
        for c in range(NCH):
            q0 = c * CH
            acc = conv_chunk(mid_ref, w2_ref, q0)
            y = jnp.maximum(acc + b2_ref[...] + xr_ref[q0:q0 + CH, :], 0.0)
            out_ref[q0:q0 + CH, :] = y.astype(out_ref.dtype)

    return kernel, PR, HWp, OFF


def fold_bn(gamma, beta, mean, var, eps=1e-5):
    scale = gamma / jnp.sqrt(var + eps)
    shift = beta - mean * scale
    return scale, shift


def _pad_lane(v, Cpad):
    # per-channel vector -> lane-dense (1, Cpad) f32 row (padded entries = 0)
    return jnp.pad(v.astype(jnp.float32), (0, Cpad - v.shape[0])).reshape(1, Cpad)


def _pack_weight(w_oihw, scale, Cpad):
    """(Cout,Cin,3,3) OIHW, BN scale folded per Cout -> tap-major (9*Cpad, Cpad) bf16."""
    Cout, Cin = w_oihw.shape[0], w_oihw.shape[1]
    w = w_oihw.astype(jnp.float32) * scale.reshape(Cout, 1, 1, 1)   # fold BN scale
    w = jnp.transpose(w, (2, 3, 1, 0))                              # (3,3,Cin,Cout)
    w = jnp.pad(w, ((0, 0), (0, 0), (0, Cpad - Cin), (0, Cpad - Cout)))
    return w.reshape(9 * Cpad, Cpad).astype(jnp.bfloat16)


@jax.jit
def basic_block_forward(x_nchw, params):
    """BasicBlock.forward (stride=1, downsample=None), NCHW in / NCHW out."""
    N, C, H, W = x_nchw.shape
    Cpad = _round_up(max(C, LANE), LANE)
    Hp, Wp = H + 2, W + 2

    kernel, PR, HWp, OFF = _make_basic_block_kernel(H, W, Cpad)
    assert HWp % SUB == 0, "H*(W+2) must be a multiple of 8 for lane-dense blocks"

    x = jnp.transpose(x_nchw, (0, 2, 3, 1))                          # NHWC
    x = jnp.pad(x, ((0, 0), (0, 0), (0, 0), (0, Cpad - C)))          # lane-pad C

    # conv1 input: fully padded flat layout, one (PR, Cpad) slab per image
    xp = jnp.pad(x, ((0, 0), (1, 1), (1, 1), (0, 0)))                # (N,Hp,Wp,Cpad)
    xp = xp.reshape(N, Hp * Wp, Cpad)
    xp = jnp.pad(xp, ((0, 0), (OFF, PR - OFF - Hp * Wp), (0, 0)))
    xp = xp.reshape(N * PR, Cpad).astype(jnp.float32)

    # residual input: "extended" layout (same rows as the output), exact f32
    xr = jnp.pad(x, ((0, 0), (0, 0), (0, Wp - W), (0, 0)))           # (N,H,Wp,Cpad)
    xr = xr.reshape(N * HWp, Cpad).astype(jnp.float32)

    s1, b1 = fold_bn(params["gamma1"], params["beta1"],
                     params["mean1"], params["var1"])
    s2, b2 = fold_bn(params["gamma2"], params["beta2"],
                     params["mean2"], params["var2"])

    def full2d(shape):
        return pl.BlockSpec(shape, lambda n: (0, 0))

    out2d = pl.pallas_call(
        kernel,
        out_shape=jax.ShapeDtypeStruct((N * HWp, Cpad), jnp.float32),
        grid_spec=pltpu.PrefetchScalarGridSpec(
            num_scalar_prefetch=0,
            grid=(N,),
            in_specs=[
                pl.BlockSpec((PR, Cpad), lambda n: (n, 0)),    # padded x (conv1 lhs)
                pl.BlockSpec((HWp, Cpad), lambda n: (n, 0)),   # residual x (f32)
                full2d((9 * Cpad, Cpad)),                      # w1 * s1 (bf16)
                full2d((1, Cpad)),                             # bn1 shift
                full2d((9 * Cpad, Cpad)),                      # w2 * s2 (bf16)
                full2d((1, Cpad)),                             # bn2 shift
            ],
            out_specs=pl.BlockSpec((HWp, Cpad), lambda n: (n, 0)),
            scratch_shapes=[pltpu.VMEM((PR, Cpad), jnp.float32)],   # padded conv1 out
        ),
        compiler_params=pltpu.CompilerParams(
            dimension_semantics=("parallel",)),
    )(xp, xr,
      _pack_weight(params["w1"], s1, Cpad), _pad_lane(b1, Cpad),
      _pack_weight(params["w2"], s2, Cpad), _pad_lane(b2, Cpad))

    out = out2d.reshape(N, H, Wp, Cpad)[:, :, :W, :C]
    return jnp.transpose(out, (0, 3, 1, 2)).astype(x_nchw.dtype)


def _reference_forward(x, params):
    """Pure-JAX NCHW f32 reference (lax conv) for verification."""
    s1, b1 = fold_bn(params["gamma1"], params["beta1"],
                     params["mean1"], params["var1"])
    s2, b2 = fold_bn(params["gamma2"], params["beta2"],
                     params["mean2"], params["var2"])

    def conv(inp, w):
        return lax.conv_general_dilated(
            inp, w, window_strides=(1, 1), padding=((1, 1), (1, 1)),
            dimension_numbers=("NCHW", "OIHW", "NCHW"))

    bshape = (1, -1, 1, 1)
    out = jnp.maximum(conv(x, params["w1"]) * s1.reshape(bshape)
                      + b1.reshape(bshape), 0.0)
    out = (conv(out, params["w2"]) * s2.reshape(bshape)
           + b2.reshape(bshape) + x)
    return jnp.maximum(out, 0.0)


if __name__ == "__main__":
    # Small shapes consistent with the module: N=2, inplanes=planes=4, 16x16,
    # stride=1, downsample=None.  Input in PyTorch NCHW layout.
    N, C, H, W = 2, 4, 16, 16

    key = jax.random.PRNGKey(0)
    ks = jax.random.split(key, 11)
    x = jax.random.normal(ks[0], (N, C, H, W), jnp.float32)

    params = {
        # conv weights in OIHW (PyTorch layout), no bias
        "w1": jax.random.normal(ks[1], (C, C, 3, 3), jnp.float32) * 0.2,
        "w2": jax.random.normal(ks[2], (C, C, 3, 3), jnp.float32) * 0.2,
        # BN (inference-mode running stats)
        "gamma1": 1.0 + 0.1 * jax.random.normal(ks[3], (C,), jnp.float32),
        "beta1": 0.1 * jax.random.normal(ks[4], (C,), jnp.float32),
        "mean1": 0.1 * jax.random.normal(ks[5], (C,), jnp.float32),
        "var1": 1.0 + 0.1 * jax.random.uniform(ks[6], (C,), jnp.float32),
        "gamma2": 1.0 + 0.1 * jax.random.normal(ks[7], (C,), jnp.float32),
        "beta2": 0.1 * jax.random.normal(ks[8], (C,), jnp.float32),
        "mean2": 0.1 * jax.random.normal(ks[9], (C,), jnp.float32),
        "var2": 1.0 + 0.1 * jax.random.uniform(ks[10], (C,), jnp.float32),
    }

    out = jax.block_until_ready(basic_block_forward(x, params))
    ref = jax.block_until_ready(_reference_forward(x, params))

    assert out.shape == (N, C, H, W)
    max_err = float(jnp.max(jnp.abs(out - ref)))
    # bf16 MXU operands (f32 accumulate) vs. the f32 reference: tolerance is
    # set for bf16-rounded conv operands; the residual path is exact f32.
    assert jnp.allclose(out, ref, atol=3e-2, rtol=3e-2), \
        f"mismatch vs JAX reference, max abs err = {max_err}"

    print("KERNEL_OK")
</pallas_src>

<mosaic_0001>
module attributes {stable_mosaic.version = 11 : i64} {
  func.func @kernel(%arg0: i32, %arg1: memref<336x128xf32, #tpu.memory_space<vmem>>, %arg2: memref<288x128xf32, #tpu.memory_space<vmem>>, %arg3: memref<1152x128xbf16, #tpu.memory_space<vmem>>, %arg4: memref<1x128xf32, #tpu.memory_space<vmem>>, %arg5: memref<1152x128xbf16, #tpu.memory_space<vmem>>, %arg6: memref<1x128xf32, #tpu.memory_space<vmem>>, %arg7: memref<288x128xf32, #tpu.memory_space<vmem>>, %arg8: memref<336x128xf32, #tpu.memory_space<vmem>>) attributes {dimension_semantics = [#tpu.dimension_semantics<parallel>], iteration_bounds = array<i64: 2>, scalar_prefetch = 0 : i64, scratch_operands = 1 : i64, tpu.core_type = #tpu.core_type<tc>, window_params = [{transform_indices = @transform_0, window_bounds = array<i64: 336, 128>}, {transform_indices = @transform_1, window_bounds = array<i64: 288, 128>}, {pipeline_mode = #tpu.pipeline_mode<synchronous>, transform_indices = @transform_2, window_bounds = array<i64: 1152, 128>}, {pipeline_mode = #tpu.pipeline_mode<synchronous>, transform_indices = @transform_3, window_bounds = array<i64: 1, 128>}, {pipeline_mode = #tpu.pipeline_mode<synchronous>, transform_indices = @transform_4, window_bounds = array<i64: 1152, 128>}, {pipeline_mode = #tpu.pipeline_mode<synchronous>, transform_indices = @transform_5, window_bounds = array<i64: 1, 128>}, {transform_indices = @transform_6, window_bounds = array<i64: 288, 128>}]} {
    %cst = arith.constant 0.000000e+00 : f32
    %0 = vector.broadcast %cst : f32 to vector<24x128xf32>
    %c0 = arith.constant 0 : index
    %c0_0 = arith.constant 0 : index
    %1 = vector.load %arg8[%c0, %c0_0] : memref<336x128xf32, #tpu.memory_space<vmem>>, vector<24x128xf32>
    tpu.vector_store %arg8[%c0, %c0_0], %0 {strides = array<i32>} : memref<336x128xf32, #tpu.memory_space<vmem>>, vector<24x128xf32>,
    %cst_1 = arith.constant 0.000000e+00 : f32
    %2 = vector.broadcast %cst_1 : f32 to vector<24x128xf32>
    %c312 = arith.constant 312 : index
    %c0_2 = arith.constant 0 : index
    %3 = vector.load %arg8[%c312, %c0_2] : memref<336x128xf32, #tpu.memory_space<vmem>>, vector<24x128xf32>
    tpu.vector_store %arg8[%c312, %c0_2], %2 {strides = array<i32>} : memref<336x128xf32, #tpu.memory_space<vmem>>, vector<24x128xf32>,
    %cst_3 = arith.constant 0.000000e+00 : f32
    %4 = vector.broadcast %cst_3 : f32 to vector<96x128xf32>
    %c5 = arith.constant 5 : index
    %c0_4 = arith.constant 0 : index
    %5 = vector.load %arg1[%c5, %c0_4] : memref<336x128xf32, #tpu.memory_space<vmem>>, vector<96x128xf32>
    %6 = arith.truncf %5 : vector<96x128xf32> to vector<96x128xbf16>
    %c0_5 = arith.constant 0 : index
    %c0_6 = arith.constant 0 : index
    %7 = vector.load %arg3[%c0_5, %c0_6] : memref<1152x128xbf16, #tpu.memory_space<vmem>>, vector<128x128xbf16>
    %cst_7 = arith.constant dense<0.000000e+00> : vector<96x128xf32>
    %8 = tpu.matmul %6, %7, %cst_7 {dimension_numbers = #tpu.dot_dimension_numbers<[1], [0], [0], [1], [0, 0, 1, 1], [], []>} : vector<96x128xbf16>, vector<128x128xbf16>, vector<96x128xf32> -> vector<96x128xf32>
    %9 = arith.addf %4, %8 : vector<96x128xf32>
    %c6 = arith.constant 6 : index
    %c0_8 = arith.constant 0 : index
    %10 = vector.load %arg1[%c6, %c0_8] : memref<336x128xf32, #tpu.memory_space<vmem>>, vector<96x128xf32>
    %11 = arith.truncf %10 : vector<96x128xf32> to vector<96x128xbf16>
    %c128 = arith.constant 128 : index
    %c0_9 = arith.constant 0 : index
    %12 = vector.load %arg3[%c128, %c0_9] : memref<1152x128xbf16, #tpu.memory_space<vmem>>, vector<128x128xbf16>
    %cst_10 = arith.constant dense<0.000000e+00> : vector<96x128xf32>
    %13 = tpu.matmul %11, %12, %cst_10 {dimension_numbers = #tpu.dot_dimension_numbers<[1], [0], [0], [1], [0, 0, 1, 1], [], []>} : vector<96x128xbf16>, vector<128x128xbf16>, vector<96x128xf32> -> vector<96x128xf32>
    %14 = arith.addf %9, %13 : vector<96x128xf32>
    %c7 = arith.constant 7 : index
    %c0_11 = arith.constant 0 : index
    %15 = vector.load %arg1[%c7, %c0_11] : memref<336x128xf32, #tpu.memory_space<vmem>>, vector<96x128xf32>
    %16 = arith.truncf %15 : vector<96x128xf32> to vector<96x128xbf16>
    %c256 = arith.constant 256 : index
    %c0_12 = arith.constant 0 : index
    %17 = vector.load %arg3[%c256, %c0_12] : memref<1152x128xbf16, #tpu.memory_space<vmem>>, vector<128x128xbf16>
    %cst_13 = arith.constant dense<0.000000e+00> : vector<96x128xf32>
    %18 = tpu.matmul %16, %17, %cst_13 {dimension_numbers = #tpu.dot_dimension_numbers<[1], [0], [0], [1], [0, 0, 1, 1], [], []>} : vector<96x128xbf16>, vector<128x128xbf16>, vector<96x128xf32> -> vector<96x128xf32>
    %19 = arith.addf %14, %18 : vector<96x128xf32>
    %c23 = arith.constant 23 : index
    %c0_14 = arith.constant 0 : index
    %20 = vector.load %arg1[%c23, %c0_14] : memref<336x128xf32, #tpu.memory_space<vmem>>, vector<96x128xf32>
    %21 = arith.truncf %20 : vector<96x128xf32> to vector<96x128xbf16>
    %c384 = arith.constant 384 : index
    %c0_15 = arith.constant 0 : index
    %22 = vector.load %arg3[%c384, %c0_15] : memref<1152x128xbf16, #tpu.memory_space<vmem>>, vector<128x128xbf16>
    %cst_16 = arith.constant dense<0.000000e+00> : vector<96x128xf32>
    %23 = tpu.matmul %21, %22, %cst_16 {dimension_numbers = #tpu.dot_dimension_numbers<[1], [0], [0], [1], [0, 0, 1, 1], [], []>} : vector<96x128xbf16>, vector<128x128xbf16>, vector<96x128xf32> -> vector<96x128xf32>
    %24 = arith.addf %19, %23 : vector<96x128xf32>
    %c24 = arith.constant 24 : index
    %c0_17 = arith.constant 0 : index
    %25 = vector.load %arg1[%c24, %c0_17] : memref<336x128xf32, #tpu.memory_space<vmem>>, vector<96x128xf32>
    %26 = arith.truncf %25 : vector<96x128xf32> to vector<96x128xbf16>
    %c512 = arith.constant 512 : index
    %c0_18 = arith.constant 0 : index
    %27 = vector.load %arg3[%c512, %c0_18] : memref<1152x128xbf16, #tpu.memory_space<vmem>>, vector<128x128xbf16>
    %cst_19 = arith.constant dense<0.000000e+00> : vector<96x128xf32>
    %28 = tpu.matmul %26, %27, %cst_19 {dimension_numbers = #tpu.dot_dimension_numbers<[1], [0], [0], [1], [0, 0, 1, 1], [], []>} : vector<96x128xbf16>, vector<128x128xbf16>, vector<96x128xf32> -> vector<96x128xf32>
    %29 = arith.addf %24, %28 : vector<96x128xf32>
    %c25 = arith.constant 25 : index
    %c0_20 = arith.constant 0 : index
    %30 = vector.load %arg1[%c25, %c0_20] : memref<336x128xf32, #tpu.memory_space<vmem>>, vector<96x128xf32>
    %31 = arith.truncf %30 : vector<96x128xf32> to vector<96x128xbf16>
    %c640 = arith.constant 640 : index
    %c0_21 = arith.constant 0 : index
    %32 = vector.load %arg3[%c640, %c0_21] : memref<1152x128xbf16, #tpu.memory_space<vmem>>, vector<128x128xbf16>
    %cst_22 = arith.constant dense<0.000000e+00> : vector<96x128xf32>
    %33 = tpu.matmul %31, %32, %cst_22 {dimension_numbers = #tpu.dot_dimension_numbers<[1], [0], [0], [1], [0, 0, 1, 1], [], []>} : vector<96x128xbf16>, vector<128x128xbf16>, vector<96x128xf32> -> vector<96x128xf32>
    %34 = arith.addf %29, %33 : vector<96x128xf32>
    %c41 = arith.constant 41 : index
    %c0_23 = arith.constant 0 : index
    %35 = vector.load %arg1[%c41, %c0_23] : memref<336x128xf32, #tpu.memory_space<vmem>>, vector<96x128xf32>
    %36 = arith.truncf %35 : vector<96x128xf32> to vector<96x128xbf16>
    %c768 = arith.constant 768 : index
    %c0_24 = arith.constant 0 : index
    %37 = vector.load %arg3[%c768, %c0_24] : memref<1152x128xbf16, #tpu.memory_space<vmem>>, vector<128x128xbf16>
    %cst_25 = arith.constant dense<0.000000e+00> : vector<96x128xf32>
    %38 = tpu.matmul %36, %37, %cst_25 {dimension_numbers = #tpu.dot_dimension_numbers<[1], [0], [0], [1], [0, 0, 1, 1], [], []>} : vector<96x128xbf16>, vector<128x128xbf16>, vector<96x128xf32> -> vector<96x128xf32>
    %39 = arith.addf %34, %38 : vector<96x128xf32>
    %c42 = arith.constant 42 : index
    %c0_26 = arith.constant 0 : index
    %40 = vector.load %arg1[%c42, %c0_26] : memref<336x128xf32, #tpu.memory_space<vmem>>, vector<96x128xf32>
    %41 = arith.truncf %40 : vector<96x128xf32> to vector<96x128xbf16>
    %c896 = arith.constant 896 : index
    %c0_27 = arith.constant 0 : index
    %42 = vector.load %arg3[%c896, %c0_27] : memref<1152x128xbf16, #tpu.memory_space<vmem>>, vector<128x128xbf16>
    %cst_28 = arith.constant dense<0.000000e+00> : vector<96x128xf32>
    %43 = tpu.matmul %41, %42, %cst_28 {dimension_numbers = #tpu.dot_dimension_numbers<[1], [0], [0], [1], [0, 0, 1, 1], [], []>} : vector<96x128xbf16>, vector<128x128xbf16>, vector<96x128xf32> -> vector<96x128xf32>
    %44 = arith.addf %39, %43 : vector<96x128xf32>
    %c43 = arith.constant 43 : index
    %c0_29 = arith.constant 0 : index
    %45 = vector.load %arg1[%c43, %c0_29] : memref<336x128xf32, #tpu.memory_space<vmem>>, vector<96x128xf32>
    %46 = arith.truncf %45 : vector<96x128xf32> to vector<96x128xbf16>
    %c1024 = arith.constant 1024 : index
    %c0_30 = arith.constant 0 : index
    %47 = vector.load %arg3[%c1024, %c0_30] : memref<1152x128xbf16, #tpu.memory_space<vmem>>, vector<128x128xbf16>
    %cst_31 = arith.constant dense<0.000000e+00> : vector<96x128xf32>
    %48 = tpu.matmul %46, %47, %cst_31 {dimension_numbers = #tpu.dot_dimension_numbers<[1], [0], [0], [1], [0, 0, 1, 1], [], []>} : vector<96x128xbf16>, vector<128x128xbf16>, vector<96x128xf32> -> vector<96x128xf32>
    %49 = arith.addf %44, %48 : vector<96x128xf32>
    %c0_32 = arith.constant 0 : index
    %c0_33 = arith.constant 0 : index
    %50 = vector.load %arg4[%c0_32, %c0_33] : memref<1x128xf32, #tpu.memory_space<vmem>>, vector<1x128xf32>
    %51 = vector.broadcast %50 : vector<1x128xf32> to vector<96x128xf32>
    %52 = arith.addf %49, %51 : vector<96x128xf32>
    %cst_34 = arith.constant 0.000000e+00 : f32
    %53 = vector.broadcast %cst_34 : f32 to vector<96x128xf32>
    %54 = arith.maximumf %52, %53 : vector<96x128xf32>
    %55 = tpu.iota {dimensions = array<i32: 0>} : vector<96x1xi32>
    %c0_i32 = arith.constant 0 : i32
    %56 = vector.broadcast %c0_i32 : i32 to vector<96x1xi32>
    %57 = arith.addi %55, %56 : vector<96x1xi32>
    %c18_i32 = arith.constant 18 : i32
    %c0_i32_35 = arith.constant 0 : i32
    %58 = arith.cmpi eq, %c18_i32, %c0_i32_35 : i32
    %c1_i32 = arith.constant 1 : i32
    %59 = arith.select %58, %c1_i32, %c18_i32 : i32
    %60 = vector.broadcast %59 : i32 to vector<96x1xi32>
    %61 = arith.remsi %57, %60 : vector<96x1xi32>
    %c0_i32_36 = arith.constant 0 : i32
    %62 = vector.broadcast %c0_i32_36 : i32 to vector<96x1xi32>
    %63 = arith.cmpi ne, %61, %62 : vector<96x1xi32>
    %c0_i32_37 = arith.constant 0 : i32
    %64 = vector.broadcast %c0_i32_37 : i32 to vector<96x1xi32>
    %65 = arith.cmpi slt, %61, %64 : vector<96x1xi32>
    %c0_i32_38 = arith.constant 0 : i32
    %66 = arith.cmpi slt, %59, %c0_i32_38 : i32
    %67 = vector.broadcast %66 : i1 to vector<96x1xi1>
    %68 = vector.broadcast %67 : vector<96x1xi1> to vector<96x1xi1>
    %69 = arith.xori %65, %68 : vector<96x1xi1>
    %70 = arith.andi %69, %63 : vector<96x1xi1>
    %71 = vector.broadcast %59 : i32 to vector<96x1xi32>
    %72 = arith.addi %61, %71 : vector<96x1xi32>
    %73 = arith.select %70, %72, %61 : vector<96x1xi1>, vector<96x1xi32>
    %c16_i32 = arith.constant 16 : i32
    %74 = vector.broadcast %c16_i32 : i32 to vector<96x1xi32>
    %75 = arith.cmpi slt, %73, %74 : vector<96x1xi32>
    %cst_39 = arith.constant 0.000000e+00 : f32
    %76 = vector.shape_cast %75 : vector<96x1xi1> to vector<96x1xi1>
    %77 = vector.broadcast %76 : vector<96x1xi1> to vector<96x128xi1>
    %78 = vector.broadcast %cst_39 : f32 to vector<96x128xf32>
    %79 = arith.select %77, %54, %78 : vector<96x128xi1>, vector<96x128xf32>
    %c24_40 = arith.constant 24 : index
    %c0_41 = arith.constant 0 : index
    %80 = vector.load %arg8[%c24_40, %c0_41] : memref<336x128xf32, #tpu.memory_space<vmem>>, vector<96x128xf32>
    tpu.vector_store %arg8[%c24_40, %c0_41], %79 {strides = array<i32>} : memref<336x128xf32, #tpu.memory_space<vmem>>, vector<96x128xf32>,
    %cst_42 = arith.constant 0.000000e+00 : f32
    %81 = vector.broadcast %cst_42 : f32 to vector<96x128xf32>
    %c101 = arith.constant 101 : index
    %c0_43 = arith.constant 0 : index
    %82 = vector.load %arg1[%c101, %c0_43] : memref<336x128xf32, #tpu.memory_space<vmem>>, vector<96x128xf32>
    %83 = arith.truncf %82 : vector<96x128xf32> to vector<96x128xbf16>
    %c0_44 = arith.constant 0 : index
    %c0_45 = arith.constant 0 : index
    %84 = vector.load %arg3[%c0_44, %c0_45] : memref<1152x128xbf16, #tpu.memory_space<vmem>>, vector<128x128xbf16>
    %cst_46 = arith.constant dense<0.000000e+00> : vector<96x128xf32>
    %85 = tpu.matmul %83, %84, %cst_46 {dimension_numbers = #tpu.dot_dimension_numbers<[1], [0], [0], [1], [0, 0, 1, 1], [], []>} : vector<96x128xbf16>, vector<128x128xbf16>, vector<96x128xf32> -> vector<96x128xf32>
    %86 = arith.addf %81, %85 : vector<96x128xf32>
    %c102 = arith.constant 102 : index
    %c0_47 = arith.constant 0 : index
    %87 = vector.load %arg1[%c102, %c0_47] : memref<336x128xf32, #tpu.memory_space<vmem>>, vector<96x128xf32>
    %88 = arith.truncf %87 : vector<96x128xf32> to vector<96x128xbf16>
    %c128_48 = arith.constant 128 : index
    %c0_49 = arith.constant 0 : index
    %89 = vector.load %arg3[%c128_48, %c0_49] : memref<1152x128xbf16, #tpu.memory_space<vmem>>, vector<128x128xbf16>
    %cst_50 = arith.constant dense<0.000000e+00> : vector<96x128xf32>
    %90 = tpu.matmul %88, %89, %cst_50 {dimension_numbers = #tpu.dot_dimension_numbers<[1], [0], [0], [1], [0, 0, 1, 1], [], []>} : vector<96x128xbf16>, vector<128x128xbf16>, vector<96x128xf32> -> vector<96x128xf32>
    %91 = arith.addf %86, %90 : vector<96x128xf32>
    %c103 = arith.constant 103 : index
    %c0_51 = arith.constant 0 : index
    %92 = vector.load %arg1[%c103, %c0_51] : memref<336x128xf32, #tpu.memory_space<vmem>>, vector<96x128xf32>
    %93 = arith.truncf %92 : vector<96x128xf32> to vector<96x128xbf16>
    %c256_52 = arith.constant 256 : index
    %c0_53 = arith.constant 0 : index
    %94 = vector.load %arg3[%c256_52, %c0_53] : memref<1152x128xbf16, #tpu.memory_space<vmem>>, vector<128x128xbf16>
    %cst_54 = arith.constant dense<0.000000e+00> : vector<96x128xf32>
    %95 = tpu.matmul %93, %94, %cst_54 {dimension_numbers = #tpu.dot_dimension_numbers<[1], [0], [0], [1], [0, 0, 1, 1], [], []>} : vector<96x128xbf16>, vector<128x128xbf16>, vector<96x128xf32> -> vector<96x128xf32>
    %96 = arith.addf %91, %95 : vector<96x128xf32>
    %c119 = arith.constant 119 : index
    %c0_55 = arith.constant 0 : index
    %97 = vector.load %arg1[%c119, %c0_55] : memref<336x128xf32, #tpu.memory_space<vmem>>, vector<96x128xf32>
    %98 = arith.truncf %97 : vector<96x128xf32> to vector<96x128xbf16>
    %c384_56 = arith.constant 384 : index
    %c0_57 = arith.constant 0 : index
    %99 = vector.load %arg3[%c384_56, %c0_57] : memref<1152x128xbf16, #tpu.memory_space<vmem>>, vector<128x128xbf16>
    %cst_58 = arith.constant dense<0.000000e+00> : vector<96x128xf32>
    %100 = tpu.matmul %98, %99, %cst_58 {dimension_numbers = #tpu.dot_dimension_numbers<[1], [0], [0], [1], [0, 0, 1, 1], [], []>} : vector<96x128xbf16>, vector<128x128xbf16>, vector<96x128xf32> -> vector<96x128xf32>
    %101 = arith.addf %96, %100 : vector<96x128xf32>
    %c120 = arith.constant 120 : index
    %c0_59 = arith.constant 0 : index
    %102 = vector.load %arg1[%c120, %c0_59] : memref<336x128xf32, #tpu.memory_space<vmem>>, vector<96x128xf32>
    %103 = arith.truncf %102 : vector<96x128xf32> to vector<96x128xbf16>
    %c512_60 = arith.constant 512 : index
    %c0_61 = arith.constant 0 : index
    %104 = vector.load %arg3[%c512_60, %c0_61] : memref<1152x128xbf16, #tpu.memory_space<vmem>>, vector<128x128xbf16>
    %cst_62 = arith.constant dense<0.000000e+00> : vector<96x128xf32>
    %105 = tpu.matmul %103, %104, %cst_62 {dimension_numbers = #tpu.dot_dimension_numbers<[1], [0], [0], [1], [0, 0, 1, 1], [], []>} : vector<96x128xbf16>, vector<128x128xbf16>, vector<96x128xf32> -> vector<96x128xf32>
    %106 = arith.addf %101, %105 : vector<96x128xf32>
    %c121 = arith.constant 121 : index
    %c0_63 = arith.constant 0 : index
    %107 = vector.load %arg1[%c121, %c0_63] : memref<336x128xf32, #tpu.memory_space<vmem>>, vector<96x128xf32>
    %108 = arith.truncf %107 : vector<96x128xf32> to vector<96x128xbf16>
    %c640_64 = arith.constant 640 : index
    %c0_65 = arith.constant 0 : index
    %109 = vector.load %arg3[%c640_64, %c0_65] : memref<1152x128xbf16, #tpu.memory_space<vmem>>, vector<128x128xbf16>
    %cst_66 = arith.constant dense<0.000000e+00> : vector<96x128xf32>
    %110 = tpu.matmul %108, %109, %cst_66 {dimension_numbers = #tpu.dot_dimension_numbers<[1], [0], [0], [1], [0, 0, 1, 1], [], []>} : vector<96x128xbf16>, vector<128x128xbf16>, vector<96x128xf32> -> vector<96x128xf32>
    %111 = arith.addf %106, %110 : vector<96x128xf32>
    %c137 = arith.constant 137 : index
    %c0_67 = arith.constant 0 : index
    %112 = vector.load %arg1[%c137, %c0_67] : memref<336x128xf32, #tpu.memory_space<vmem>>, vector<96x128xf32>
    %113 = arith.truncf %112 : vector<96x128xf32> to vector<96x128xbf16>
    %c768_68 = arith.constant 768 : index
    %c0_69 = arith.constant 0 : index
    %114 = vector.load %arg3[%c768_68, %c0_69] : memref<1152x128xbf16, #tpu.memory_space<vmem>>, vector<128x128xbf16>
    %cst_70 = arith.constant dense<0.000000e+00> : vector<96x128xf32>
    %115 = tpu.matmul %113, %114, %cst_70 {dimension_numbers = #tpu.dot_dimension_numbers<[1], [0], [0], [1], [0, 0, 1, 1], [], []>} : vector<96x128xbf16>, vector<128x128xbf16>, vector<96x128xf32> -> vector<96x128xf32>
    %116 = arith.addf %111, %115 : vector<96x128xf32>
    %c138 = arith.constant 138 : index
    %c0_71 = arith.constant 0 : index
    %117 = vector.load %arg1[%c138, %c0_71] : memref<336x128xf32, #tpu.memory_space<vmem>>, vector<96x128xf32>
    %118 = arith.truncf %117 : vector<96x128xf32> to vector<96x128xbf16>
    %c896_72 = arith.constant 896 : index
    %c0_73 = arith.constant 0 : index
    %119 = vector.load %arg3[%c896_72, %c0_73] : memref<1152x128xbf16, #tpu.memory_space<vmem>>, vector<128x128xbf16>
    %cst_74 = arith.constant dense<0.000000e+00> : vector<96x128xf32>
    %120 = tpu.matmul %118, %119, %cst_74 {dimension_numbers = #tpu.dot_dimension_numbers<[1], [0], [0], [1], [0, 0, 1, 1], [], []>} : vector<96x128xbf16>, vector<128x128xbf16>, vector<96x128xf32> -> vector<96x128xf32>
    %121 = arith.addf %116, %120 : vector<96x128xf32>
    %c139 = arith.constant 139 : index
    %c0_75 = arith.constant 0 : index
    %122 = vector.load %arg1[%c139, %c0_75] : memref<336x128xf32, #tpu.memory_space<vmem>>, vector<96x128xf32>
    %123 = arith.truncf %122 : vector<96x128xf32> to vector<96x128xbf16>
    %c1024_76 = arith.constant 1024 : index
    %c0_77 = arith.constant 0 : index
    %124 = vector.load %arg3[%c1024_76, %c0_77] : memref<1152x128xbf16, #tpu.memory_space<vmem>>, vector<128x128xbf16>
    %cst_78 = arith.constant dense<0.000000e+00> : vector<96x128xf32>
    %125 = tpu.matmul %123, %124, %cst_78 {dimension_numbers = #tpu.dot_dimension_numbers<[1], [0], [0], [1], [0, 0, 1, 1], [], []>} : vector<96x128xbf16>, vector<128x128xbf16>, vector<96x128xf32> -> vector<96x128xf32>
    %126 = arith.addf %121, %125 : vector<96x128xf32>
    %c0_79 = arith.constant 0 : index
    %c0_80 = arith.constant 0 : index
    %127 = vector.load %arg4[%c0_79, %c0_80] : memref<1x128xf32, #tpu.memory_space<vmem>>, vector<1x128xf32>
    %128 = vector.broadcast %127 : vector<1x128xf32> to vector<96x128xf32>
    %129 = arith.addf %126, %128 : vector<96x128xf32>
    %cst_81 = arith.constant 0.000000e+00 : f32
    %130 = vector.broadcast %cst_81 : f32 to vector<96x128xf32>
    %131 = arith.maximumf %129, %130 : vector<96x128xf32>
    %132 = tpu.iota {dimensions = array<i32: 0>} : vector<96x1xi32>
    %c96_i32 = arith.constant 96 : i32
    %133 = vector.broadcast %c96_i32 : i32 to vector<96x1xi32>
    %134 = arith.addi %132, %133 : vector<96x1xi32>
    %c18_i32_82 = arith.constant 18 : i32
    %c0_i32_83 = arith.constant 0 : i32
    %135 = arith.cmpi eq, %c18_i32_82, %c0_i32_83 : i32
    %c1_i32_84 = arith.constant 1 : i32
    %136 = arith.select %135, %c1_i32_84, %c18_i32_82 : i32
    %137 = vector.broadcast %136 : i32 to vector<96x1xi32>
    %138 = arith.remsi %134, %137 : vector<96x1xi32>
    %c0_i32_85 = arith.constant 0 : i32
    %139 = vector.broadcast %c0_i32_85 : i32 to vector<96x1xi32>
    %140 = arith.cmpi ne, %138, %139 : vector<96x1xi32>
    %c0_i32_86 = arith.constant 0 : i32
    %141 = vector.broadcast %c0_i32_86 : i32 to vector<96x1xi32>
    %142 = arith.cmpi slt, %138, %141 : vector<96x1xi32>
    %c0_i32_87 = arith.constant 0 : i32
    %143 = arith.cmpi slt, %136, %c0_i32_87 : i32
    %144 = vector.broadcast %143 : i1 to vector<96x1xi1>
    %145 = vector.broadcast %144 : vector<96x1xi1> to vector<96x1xi1>
    %146 = arith.xori %142, %145 : vector<96x1xi1>
    %147 = arith.andi %146, %140 : vector<96x1xi1>
    %148 = vector.broadcast %136 : i32 to vector<96x1xi32>
    %149 = arith.addi %138, %148 : vector<96x1xi32>
    %150 = arith.select %147, %149, %138 : vector<96x1xi1>, vector<96x1xi32>
    %c16_i32_88 = arith.constant 16 : i32
    %151 = vector.broadcast %c16_i32_88 : i32 to vector<96x1xi32>
    %152 = arith.cmpi slt, %150, %151 : vector<96x1xi32>
    %cst_89 = arith.constant 0.000000e+00 : f32
    %153 = vector.shape_cast %152 : vector<96x1xi1> to vector<96x1xi1>
    %154 = vector.broadcast %153 : vector<96x1xi1> to vector<96x128xi1>
    %155 = vector.broadcast %cst_89 : f32 to vector<96x128xf32>
    %156 = arith.select %154, %131, %155 : vector<96x128xi1>, vector<96x128xf32>
    %c120_90 = arith.constant 120 : index
    %c0_91 = arith.constant 0 : index
    %157 = vector.load %arg8[%c120_90, %c0_91] : memref<336x128xf32, #tpu.memory_space<vmem>>, vector<96x128xf32>
    tpu.vector_store %arg8[%c120_90, %c0_91], %156 {strides = array<i32>} : memref<336x128xf32, #tpu.memory_space<vmem>>, vector<96x128xf32>,
    %cst_92 = arith.constant 0.000000e+00 : f32
    %158 = vector.broadcast %cst_92 : f32 to vector<96x128xf32>
    %c197 = arith.constant 197 : index
    %c0_93 = arith.constant 0 : index
    %159 = vector.load %arg1[%c197, %c0_93] : memref<336x128xf32, #tpu.memory_space<vmem>>, vector<96x128xf32>
    %160 = arith.truncf %159 : vector<96x128xf32> to vector<96x128xbf16>
    %c0_94 = arith.constant 0 : index
    %c0_95 = arith.constant 0 : index
    %161 = vector.load %arg3[%c0_94, %c0_95] : memref<1152x128xbf16, #tpu.memory_space<vmem>>, vector<128x128xbf16>
    %cst_96 = arith.constant dense<0.000000e+00> : vector<96x128xf32>
    %162 = tpu.matmul %160, %161, %cst_96 {dimension_numbers = #tpu.dot_dimension_numbers<[1], [0], [0], [1], [0, 0, 1, 1], [], []>} : vector<96x128xbf16>, vector<128x128xbf16>, vector<96x128xf32> -> vector<96x128xf32>
    %163 = arith.addf %158, %162 : vector<96x128xf32>
    %c198 = arith.constant 198 : index
    %c0_97 = arith.constant 0 : index
    %164 = vector.load %arg1[%c198, %c0_97] : memref<336x128xf32, #tpu.memory_space<vmem>>, vector<96x128xf32>
    %165 = arith.truncf %164 : vector<96x128xf32> to vector<96x128xbf16>
    %c128_98 = arith.constant 128 : index
    %c0_99 = arith.constant 0 : index
    %166 = vector.load %arg3[%c128_98, %c0_99] : memref<1152x128xbf16, #tpu.memory_space<vmem>>, vector<128x128xbf16>
    %cst_100 = arith.constant dense<0.000000e+00> : vector<96x128xf32>
    %167 = tpu.matmul %165, %166, %cst_100 {dimension_numbers = #tpu.dot_dimension_numbers<[1], [0], [0], [1], [0, 0, 1, 1], [], []>} : vector<96x128xbf16>, vector<128x128xbf16>, vector<96x128xf32> -> vector<96x128xf32>
    %168 = arith.addf %163, %167 : vector<96x128xf32>
    %c199 = arith.constant 199 : index
    %c0_101 = arith.constant 0 : index
    %169 = vector.load %arg1[%c199, %c0_101] : memref<336x128xf32, #tpu.memory_space<vmem>>, vector<96x128xf32>
    %170 = arith.truncf %169 : vector<96x128xf32> to vector<96x128xbf16>
    %c256_102 = arith.constant 256 : index
    %c0_103 = arith.constant 0 : index
    %171 = vector.load %arg3[%c256_102, %c0_103] : memref<1152x128xbf16, #tpu.memory_space<vmem>>, vector<128x128xbf16>
    %cst_104 = arith.constant dense<0.000000e+00> : vector<96x128xf32>
    %172 = tpu.matmul %170, %171, %cst_104 {dimension_numbers = #tpu.dot_dimension_numbers<[1], [0], [0], [1], [0, 0, 1, 1], [], []>} : vector<96x128xbf16>, vector<128x128xbf16>, vector<96x128xf32> -> vector<96x128xf32>
    %173 = arith.addf %168, %172 : vector<96x128xf32>
    %c215 = arith.constant 215 : index
    %c0_105 = arith.constant 0 : index
    %174 = vector.load %arg1[%c215, %c0_105] : memref<336x128xf32, #tpu.memory_space<vmem>>, vector<96x128xf32>
    %175 = arith.truncf %174 : vector<96x128xf32> to vector<96x128xbf16>
    %c384_106 = arith.constant 384 : index
    %c0_107 = arith.constant 0 : index
    %176 = vector.load %arg3[%c384_106, %c0_107] : memref<1152x128xbf16, #tpu.memory_space<vmem>>, vector<128x128xbf16>
    %cst_108 = arith.constant dense<0.000000e+00> : vector<96x128xf32>
    %177 = tpu.matmul %175, %176, %cst_108 {dimension_numbers = #tpu.dot_dimension_numbers<[1], [0], [0], [1], [0, 0, 1, 1], [], []>} : vector<96x128xbf16>, vector<128x128xbf16>, vector<96x128xf32> -> vector<96x128xf32>
    %178 = arith.addf %173, %177 : vector<96x128xf32>
    %c216 = arith.constant 216 : index
    %c0_109 = arith.constant 0 : index
    %179 = vector.load %arg1[%c216, %c0_109] : memref<336x128xf32, #tpu.memory_space<vmem>>, vector<96x128xf32>
    %180 = arith.truncf %179 : vector<96x128xf32> to vector<96x128xbf16>
    %c512_110 = arith.constant 512 : index
    %c0_111 = arith.constant 0 : index
    %181 = vector.load %arg3[%c512_110, %c0_111] : memref<1152x128xbf16, #tpu.memory_space<vmem>>, vector<128x128xbf16>
    %cst_112 = arith.constant dense<0.000000e+00> : vector<96x128xf32>
    %182 = tpu.matmul %180, %181, %cst_112 {dimension_numbers = #tpu.dot_dimension_numbers<[1], [0], [0], [1], [0, 0, 1, 1], [], []>} : vector<96x128xbf16>, vector<128x128xbf16>, vector<96x128xf32> -> vector<96x128xf32>
    %183 = arith.addf %178, %182 : vector<96x128xf32>
    %c217 = arith.constant 217 : index
    %c0_113 = arith.constant 0 : index
    %184 = vector.load %arg1[%c217, %c0_113] : memref<336x128xf32, #tpu.memory_space<vmem>>, vector<96x128xf32>
    %185 = arith.truncf %184 : vector<96x128xf32> to vector<96x128xbf16>
    %c640_114 = arith.constant 640 : index
    %c0_115 = arith.constant 0 : index
    %186 = vector.load %arg3[%c640_114, %c0_115] : memref<1152x128xbf16, #tpu.memory_space<vmem>>, vector<128x128xbf16>
    %cst_116 = arith.constant dense<0.000000e+00> : vector<96x128xf32>
    %187 = tpu.matmul %185, %186, %cst_116 {dimension_numbers = #tpu.dot_dimension_numbers<[1], [0], [0], [1], [0, 0, 1, 1], [], []>} : vector<96x128xbf16>, vector<128x128xbf16>, vector<96x128xf32> -> vector<96x128xf32>
    %188 = arith.addf %183, %187 : vector<96x128xf32>
    %c233 = arith.constant 233 : index
    %c0_117 = arith.constant 0 : index
    %189 = vector.load %arg1[%c233, %c0_117] : memref<336x128xf32, #tpu.memory_space<vmem>>, vector<96x128xf32>
    %190 = arith.truncf %189 : vector<96x128xf32> to vector<96x128xbf16>
    %c768_118 = arith.constant 768 : index
    %c0_119 = arith.constant 0 : index
    %191 = vector.load %arg3[%c768_118, %c0_119] : memref<1152x128xbf16, #tpu.memory_space<vmem>>, vector<128x128xbf16>
    %cst_120 = arith.constant dense<0.000000e+00> : vector<96x128xf32>
    %192 = tpu.matmul %190, %191, %cst_120 {dimension_numbers = #tpu.dot_dimension_numbers<[1], [0], [0], [1], [0, 0, 1, 1], [], []>} : vector<96x128xbf16>, vector<128x128xbf16>, vector<96x128xf32> -> vector<96x128xf32>
    %193 = arith.addf %188, %192 : vector<96x128xf32>
    %c234 = arith.constant 234 : index
    %c0_121 = arith.constant 0 : index
    %194 = vector.load %arg1[%c234, %c0_121] : memref<336x128xf32, #tpu.memory_space<vmem>>, vector<96x128xf32>
    %195 = arith.truncf %194 : vector<96x128xf32> to vector<96x128xbf16>
    %c896_122 = arith.constant 896 : index
    %c0_123 = arith.constant 0 : index
    %196 = vector.load %arg3[%c896_122, %c0_123] : memref<1152x128xbf16, #tpu.memory_space<vmem>>, vector<128x128xbf16>
    %cst_124 = arith.constant dense<0.000000e+00> : vector<96x128xf32>
    %197 = tpu.matmul %195, %196, %cst_124 {dimension_numbers = #tpu.dot_dimension_numbers<[1], [0], [0], [1], [0, 0, 1, 1], [], []>} : vector<96x128xbf16>, vector<128x128xbf16>, vector<96x128xf32> -> vector<96x128xf32>
    %198 = arith.addf %193, %197 : vector<96x128xf32>
    %c235 = arith.constant 235 : index
    %c0_125 = arith.constant 0 : index
    %199 = vector.load %arg1[%c235, %c0_125] : memref<336x128xf32, #tpu.memory_space<vmem>>, vector<96x128xf32>
    %200 = arith.truncf %199 : vector<96x128xf32> to vector<96x128xbf16>
    %c1024_126 = arith.constant 1024 : index
    %c0_127 = arith.constant 0 : index
    %201 = vector.load %arg3[%c1024_126, %c0_127] : memref<1152x128xbf16, #tpu.memory_space<vmem>>, vector<128x128xbf16>
    %cst_128 = arith.constant dense<0.000000e+00> : vector<96x128xf32>
    %202 = tpu.matmul %200, %201, %cst_128 {dimension_numbers = #tpu.dot_dimension_numbers<[1], [0], [0], [1], [0, 0, 1, 1], [], []>} : vector<96x128xbf16>, vector<128x128xbf16>, vector<96x128xf32> -> vector<96x128xf32>
    %203 = arith.addf %198, %202 : vector<96x128xf32>
    %c0_129 = arith.constant 0 : index
    %c0_130 = arith.constant 0 : index
    %204 = vector.load %arg4[%c0_129, %c0_130] : memref<1x128xf32, #tpu.memory_space<vmem>>, vector<1x128xf32>
    %205 = vector.broadcast %204 : vector<1x128xf32> to vector<96x128xf32>
    %206 = arith.addf %203, %205 : vector<96x128xf32>
    %cst_131 = arith.constant 0.000000e+00 : f32
    %207 = vector.broadcast %cst_131 : f32 to vector<96x128xf32>
    %208 = arith.maximumf %206, %207 : vector<96x128xf32>
    %209 = tpu.iota {dimensions = array<i32: 0>} : vector<96x1xi32>
    %c192_i32 = arith.constant 192 : i32
    %210 = vector.broadcast %c192_i32 : i32 to vector<96x1xi32>
    %211 = arith.addi %209, %210 : vector<96x1xi32>
    %c18_i32_132 = arith.constant 18 : i32
    %c0_i32_133 = arith.constant 0 : i32
    %212 = arith.cmpi eq, %c18_i32_132, %c0_i32_133 : i32
    %c1_i32_134 = arith.constant 1 : i32
    %213 = arith.select %212, %c1_i32_134, %c18_i32_132 : i32
    %214 = vector.broadcast %213 : i32 to vector<96x1xi32>
    %215 = arith.remsi %211, %214 : vector<96x1xi32>
    %c0_i32_135 = arith.constant 0 : i32
    %216 = vector.broadcast %c0_i32_135 : i32 to vector<96x1xi32>
    %217 = arith.cmpi ne, %215, %216 : vector<96x1xi32>
    %c0_i32_136 = arith.constant 0 : i32
    %218 = vector.broadcast %c0_i32_136 : i32 to vector<96x1xi32>
    %219 = arith.cmpi slt, %215, %218 : vector<96x1xi32>
    %c0_i32_137 = arith.constant 0 : i32
    %220 = arith.cmpi slt, %213, %c0_i32_137 : i32
    %221 = vector.broadcast %220 : i1 to vector<96x1xi1>
    %222 = vector.broadcast %221 : vector<96x1xi1> to vector<96x1xi1>
    %223 = arith.xori %219, %222 : vector<96x1xi1>
    %224 = arith.andi %223, %217 : vector<96x1xi1>
    %225 = vector.broadcast %213 : i32 to vector<96x1xi32>
    %226 = arith.addi %215, %225 : vector<96x1xi32>
    %227 = arith.select %224, %226, %215 : vector<96x1xi1>, vector<96x1xi32>
    %c16_i32_138 = arith.constant 16 : i32
    %228 = vector.broadcast %c16_i32_138 : i32 to vector<96x1xi32>
    %229 = arith.cmpi slt, %227, %228 : vector<96x1xi32>
    %cst_139 = arith.constant 0.000000e+00 : f32
    %230 = vector.shape_cast %229 : vector<96x1xi1> to vector<96x1xi1>
    %231 = vector.broadcast %230 : vector<96x1xi1> to vector<96x128xi1>
    %232 = vector.broadcast %cst_139 : f32 to vector<96x128xf32>
    %233 = arith.select %231, %208, %232 : vector<96x128xi1>, vector<96x128xf32>
    %c216_140 = arith.constant 216 : index
    %c0_141 = arith.constant 0 : index
    %234 = vector.load %arg8[%c216_140, %c0_141] : memref<336x128xf32, #tpu.memory_space<vmem>>, vector<96x128xf32>
    tpu.vector_store %arg8[%c216_140, %c0_141], %233 {strides = array<i32>} : memref<336x128xf32, #tpu.memory_space<vmem>>, vector<96x128xf32>,
    %cst_142 = arith.constant 0.000000e+00 : f32
    %235 = vector.broadcast %cst_142 : f32 to vector<96x128xf32>
    %c5_143 = arith.constant 5 : index
    %c0_144 = arith.constant 0 : index
    %236 = vector.load %arg8[%c5_143, %c0_144] : memref<336x128xf32, #tpu.memory_space<vmem>>, vector<96x128xf32>
    %237 = arith.truncf %236 : vector<96x128xf32> to vector<96x128xbf16>
    %c0_145 = arith.constant 0 : index
    %c0_146 = arith.constant 0 : index
    %238 = vector.load %arg5[%c0_145, %c0_146] : memref<1152x128xbf16, #tpu.memory_space<vmem>>, vector<128x128xbf16>
    %cst_147 = arith.constant dense<0.000000e+00> : vector<96x128xf32>
    %239 = tpu.matmul %237, %238, %cst_147 {dimension_numbers = #tpu.dot_dimension_numbers<[1], [0], [0], [1], [0, 0, 1, 1], [], []>} : vector<96x128xbf16>, vector<128x128xbf16>, vector<96x128xf32> -> vector<96x128xf32>
    %240 = arith.addf %235, %239 : vector<96x128xf32>
    %c6_148 = arith.constant 6 : index
    %c0_149 = arith.constant 0 : index
    %241 = vector.load %arg8[%c6_148, %c0_149] : memref<336x128xf32, #tpu.memory_space<vmem>>, vector<96x128xf32>
    %242 = arith.truncf %241 : vector<96x128xf32> to vector<96x128xbf16>
    %c128_150 = arith.constant 128 : index
    %c0_151 = arith.constant 0 : index
    %243 = vector.load %arg5[%c128_150, %c0_151] : memref<1152x128xbf16, #tpu.memory_space<vmem>>, vector<128x128xbf16>
    %cst_152 = arith.constant dense<0.000000e+00> : vector<96x128xf32>
    %244 = tpu.matmul %242, %243, %cst_152 {dimension_numbers = #tpu.dot_dimension_numbers<[1], [0], [0], [1], [0, 0, 1, 1], [], []>} : vector<96x128xbf16>, vector<128x128xbf16>, vector<96x128xf32> -> vector<96x128xf32>
    %245 = arith.addf %240, %244 : vector<96x128xf32>
    %c7_153 = arith.constant 7 : index
    %c0_154 = arith.constant 0 : index
    %246 = vector.load %arg8[%c7_153, %c0_154] : memref<336x128xf32, #tpu.memory_space<vmem>>, vector<96x128xf32>
    %247 = arith.truncf %246 : vector<96x128xf32> to vector<96x128xbf16>
    %c256_155 = arith.constant 256 : index
    %c0_156 = arith.constant 0 : index
    %248 = vector.load %arg5[%c256_155, %c0_156] : memref<1152x128xbf16, #tpu.memory_space<vmem>>, vector<128x128xbf16>
    %cst_157 = arith.constant dense<0.000000e+00> : vector<96x128xf32>
    %249 = tpu.matmul %247, %248, %cst_157 {dimension_numbers = #tpu.dot_dimension_numbers<[1], [0], [0], [1], [0, 0, 1, 1], [], []>} : vector<96x128xbf16>, vector<128x128xbf16>, vector<96x128xf32> -> vector<96x128xf32>
    %250 = arith.addf %245, %249 : vector<96x128xf32>
    %c23_158 = arith.constant 23 : index
    %c0_159 = arith.constant 0 : index
    %251 = vector.load %arg8[%c23_158, %c0_159] : memref<336x128xf32, #tpu.memory_space<vmem>>, vector<96x128xf32>
    %252 = arith.truncf %251 : vector<96x128xf32> to vector<96x128xbf16>
    %c384_160 = arith.constant 384 : index
    %c0_161 = arith.constant 0 : index
    %253 = vector.load %arg5[%c384_160, %c0_161] : memref<1152x128xbf16, #tpu.memory_space<vmem>>, vector<128x128xbf16>
    %cst_162 = arith.constant dense<0.000000e+00> : vector<96x128xf32>
    %254 = tpu.matmul %252, %253, %cst_162 {dimension_numbers = #tpu.dot_dimension_numbers<[1], [0], [0], [1], [0, 0, 1, 1], [], []>} : vector<96x128xbf16>, vector<128x128xbf16>, vector<96x128xf32> -> vector<96x128xf32>
    %255 = arith.addf %250, %254 : vector<96x128xf32>
    %c24_163 = arith.constant 24 : index
    %c0_164 = arith.constant 0 : index
    %256 = vector.load %arg8[%c24_163, %c0_164] : memref<336x128xf32, #tpu.memory_space<vmem>>, vector<96x128xf32>
    %257 = arith.truncf %256 : vector<96x128xf32> to vector<96x128xbf16>
    %c512_165 = arith.constant 512 : index
    %c0_166 = arith.constant 0 : index
    %258 = vector.load %arg5[%c512_165, %c0_166] : memref<1152x128xbf16, #tpu.memory_space<vmem>>, vector<128x128xbf16>
    %cst_167 = arith.constant dense<0.000000e+00> : vector<96x128xf32>
    %259 = tpu.matmul %257, %258, %cst_167 {dimension_numbers = #tpu.dot_dimension_numbers<[1], [0], [0], [1], [0, 0, 1, 1], [], []>} : vector<96x128xbf16>, vector<128x128xbf16>, vector<96x128xf32> -> vector<96x128xf32>
    %260 = arith.addf %255, %259 : vector<96x128xf32>
    %c25_168 = arith.constant 25 : index
    %c0_169 = arith.constant 0 : index
    %261 = vector.load %arg8[%c25_168, %c0_169] : memref<336x128xf32, #tpu.memory_space<vmem>>, vector<96x128xf32>
    %262 = arith.truncf %261 : vector<96x128xf32> to vector<96x128xbf16>
    %c640_170 = arith.constant 640 : index
    %c0_171 = arith.constant 0 : index
    %263 = vector.load %arg5[%c640_170, %c0_171] : memref<1152x128xbf16, #tpu.memory_space<vmem>>, vector<128x128xbf16>
    %cst_172 = arith.constant dense<0.000000e+00> : vector<96x128xf32>
    %264 = tpu.matmul %262, %263, %cst_172 {dimension_numbers = #tpu.dot_dimension_numbers<[1], [0], [0], [1], [0, 0, 1, 1], [], []>} : vector<96x128xbf16>, vector<128x128xbf16>, vector<96x128xf32> -> vector<96x128xf32>
    %265 = arith.addf %260, %264 : vector<96x128xf32>
    %c41_173 = arith.constant 41 : index
    %c0_174 = arith.constant 0 : index
    %266 = vector.load %arg8[%c41_173, %c0_174] : memref<336x128xf32, #tpu.memory_space<vmem>>, vector<96x128xf32>
    %267 = arith.truncf %266 : vector<96x128xf32> to vector<96x128xbf16>
    %c768_175 = arith.constant 768 : index
    %c0_176 = arith.constant 0 : index
    %268 = vector.load %arg5[%c768_175, %c0_176] : memref<1152x128xbf16, #tpu.memory_space<vmem>>, vector<128x128xbf16>
    %cst_177 = arith.constant dense<0.000000e+00> : vector<96x128xf32>
    %269 = tpu.matmul %267, %268, %cst_177 {dimension_numbers = #tpu.dot_dimension_numbers<[1], [0], [0], [1], [0, 0, 1, 1], [], []>} : vector<96x128xbf16>, vector<128x128xbf16>, vector<96x128xf32> -> vector<96x128xf32>
    %270 = arith.addf %265, %269 : vector<96x128xf32>
    %c42_178 = arith.constant 42 : index
    %c0_179 = arith.constant 0 : index
    %271 = vector.load %arg8[%c42_178, %c0_179] : memref<336x128xf32, #tpu.memory_space<vmem>>, vector<96x128xf32>
    %272 = arith.truncf %271 : vector<96x128xf32> to vector<96x128xbf16>
    %c896_180 = arith.constant 896 : index
    %c0_181 = arith.constant 0 : index
    %273 = vector.load %arg5[%c896_180, %c0_181] : memref<1152x128xbf16, #tpu.memory_space<vmem>>, vector<128x128xbf16>
    %cst_182 = arith.constant dense<0.000000e+00> : vector<96x128xf32>
    %274 = tpu.matmul %272, %273, %cst_182 {dimension_numbers = #tpu.dot_dimension_numbers<[1], [0], [0], [1], [0, 0, 1, 1], [], []>} : vector<96x128xbf16>, vector<128x128xbf16>, vector<96x128xf32> -> vector<96x128xf32>
    %275 = arith.addf %270, %274 : vector<96x128xf32>
    %c43_183 = arith.constant 43 : index
    %c0_184 = arith.constant 0 : index
    %276 = vector.load %arg8[%c43_183, %c0_184] : memref<336x128xf32, #tpu.memory_space<vmem>>, vector<96x128xf32>
    %277 = arith.truncf %276 : vector<96x128xf32> to vector<96x128xbf16>
    %c1024_185 = arith.constant 1024 : index
    %c0_186 = arith.constant 0 : index
    %278 = vector.load %arg5[%c1024_185, %c0_186] : memref<1152x128xbf16, #tpu.memory_space<vmem>>, vector<128x128xbf16>
    %cst_187 = arith.constant dense<0.000000e+00> : vector<96x128xf32>
    %279 = tpu.matmul %277, %278, %cst_187 {dimension_numbers = #tpu.dot_dimension_numbers<[1], [0], [0], [1], [0, 0, 1, 1], [], []>} : vector<96x128xbf16>, vector<128x128xbf16>, vector<96x128xf32> -> vector<96x128xf32>
    %280 = arith.addf %275, %279 : vector<96x128xf32>
    %c0_188 = arith.constant 0 : index
    %c0_189 = arith.constant 0 : index
    %281 = vector.load %arg6[%c0_188, %c0_189] : memref<1x128xf32, #tpu.memory_space<vmem>>, vector<1x128xf32>
    %282 = vector.broadcast %281 : vector<1x128xf32> to vector<96x128xf32>
    %283 = arith.addf %280, %282 : vector<96x128xf32>
    %c0_190 = arith.constant 0 : index
    %c0_191 = arith.constant 0 : index
    %284 = vector.load %arg2[%c0_190, %c0_191] : memref<288x128xf32, #tpu.memory_space<vmem>>, vector<96x128xf32>
    %285 = arith.addf %283, %284 : vector<96x128xf32>
    %cst_192 = arith.constant 0.000000e+00 : f32
    %286 = vector.broadcast %cst_192 : f32 to vector<96x128xf32>
    %287 = arith.maximumf %285, %286 : vector<96x128xf32>
    %c0_193 = arith.constant 0 : index
    %c0_194 = arith.constant 0 : index
    %288 = vector.load %arg7[%c0_193, %c0_194] : memref<288x128xf32, #tpu.memory_space<vmem>>, vector<96x128xf32>
    tpu.vector_store %arg7[%c0_193, %c0_194], %287 {strides = array<i32>} : memref<288x128xf32, #tpu.memory_space<vmem>>, vector<96x128xf32>,
    %cst_195 = arith.constant 0.000000e+00 : f32
    %289 = vector.broadcast %cst_195 : f32 to vector<96x128xf32>
    %c101_196 = arith.constant 101 : index
    %c0_197 = arith.constant 0 : index
    %290 = vector.load %arg8[%c101_196, %c0_197] : memref<336x128xf32, #tpu.memory_space<vmem>>, vector<96x128xf32>
    %291 = arith.truncf %290 : vector<96x128xf32> to vector<96x128xbf16>
    %c0_198 = arith.constant 0 : index
    %c0_199 = arith.constant 0 : index
    %292 = vector.load %arg5[%c0_198, %c0_199] : memref<1152x128xbf16, #tpu.memory_space<vmem>>, vector<128x128xbf16>
    %cst_200 = arith.constant dense<0.000000e+00> : vector<96x128xf32>
    %293 = tpu.matmul %291, %292, %cst_200 {dimension_numbers = #tpu.dot_dimension_numbers<[1], [0], [0], [1], [0, 0, 1, 1], [], []>} : vector<96x128xbf16>, vector<128x128xbf16>, vector<96x128xf32> -> vector<96x128xf32>
    %294 = arith.addf %289, %293 : vector<96x128xf32>
    %c102_201 = arith.constant 102 : index
    %c0_202 = arith.constant 0 : index
    %295 = vector.load %arg8[%c102_201, %c0_202] : memref<336x128xf32, #tpu.memory_space<vmem>>, vector<96x128xf32>
    %296 = arith.truncf %295 : vector<96x128xf32> to vector<96x128xbf16>
    %c128_203 = arith.constant 128 : index
    %c0_204 = arith.constant 0 : index
    %297 = vector.load %arg5[%c128_203, %c0_204] : memref<1152x128xbf16, #tpu.memory_space<vmem>>, vector<128x128xbf16>
    %cst_205 = arith.constant dense<0.000000e+00> : vector<96x128xf32>
    %298 = tpu.matmul %296, %297, %cst_205 {dimension_numbers = #tpu.dot_dimension_numbers<[1], [0], [0], [1], [0, 0, 1, 1], [], []>} : vector<96x128xbf16>, vector<128x128xbf16>, vector<96x128xf32> -> vector<96x128xf32>
    %299 = arith.addf %294, %298 : vector<96x128xf32>
    %c103_206 = arith.constant 103 : index
    %c0_207 = arith.constant 0 : index
    %300 = vector.load %arg8[%c103_206, %c0_207] : memref<336x128xf32, #tpu.memory_space<vmem>>, vector<96x128xf32>
    %301 = arith.truncf %300 : vector<96x128xf32> to vector<96x128xbf16>
    %c256_208 = arith.constant 256 : index
    %c0_209 = arith.constant 0 : index
    %302 = vector.load %arg5[%c256_208, %c0_209] : memref<1152x128xbf16, #tpu.memory_space<vmem>>, vector<128x128xbf16>
    %cst_210 = arith.constant dense<0.000000e+00> : vector<96x128xf32>
    %303 = tpu.matmul %301, %302, %cst_210 {dimension_numbers = #tpu.dot_dimension_numbers<[1], [0], [0], [1], [0, 0, 1, 1], [], []>} : vector<96x128xbf16>, vector<128x128xbf16>, vector<96x128xf32> -> vector<96x128xf32>
    %304 = arith.addf %299, %303 : vector<96x128xf32>
    %c119_211 = arith.constant 119 : index
    %c0_212 = arith.constant 0 : index
    %305 = vector.load %arg8[%c119_211, %c0_212] : memref<336x128xf32, #tpu.memory_space<vmem>>, vector<96x128xf32>
    %306 = arith.truncf %305 : vector<96x128xf32> to vector<96x128xbf16>
    %c384_213 = arith.constant 384 : index
    %c0_214 = arith.constant 0 : index
    %307 = vector.load %arg5[%c384_213, %c0_214] : memref<1152x128xbf16, #tpu.memory_space<vmem>>, vector<128x128xbf16>
    %cst_215 = arith.constant dense<0.000000e+00> : vector<96x128xf32>
    %308 = tpu.matmul %306, %307, %cst_215 {dimension_numbers = #tpu.dot_dimension_numbers<[1], [0], [0], [1], [0, 0, 1, 1], [], []>} : vector<96x128xbf16>, vector<128x128xbf16>, vector<96x128xf32> -> vector<96x128xf32>
    %309 = arith.addf %304, %308 : vector<96x128xf32>
    %c120_216 = arith.constant 120 : index
    %c0_217 = arith.constant 0 : index
    %310 = vector.load %arg8[%c120_216, %c0_217] : memref<336x128xf32, #tpu.memory_space<vmem>>, vector<96x128xf32>
    %311 = arith.truncf %310 : vector<96x128xf32> to vector<96x128xbf16>
    %c512_218 = arith.constant 512 : index
    %c0_219 = arith.constant 0 : index
    %312 = vector.load %arg5[%c512_218, %c0_219] : memref<1152x128xbf16, #tpu.memory_space<vmem>>, vector<128x128xbf16>
    %cst_220 = arith.constant dense<0.000000e+00> : vector<96x128xf32>
    %313 = tpu.matmul %311, %312, %cst_220 {dimension_numbers = #tpu.dot_dimension_numbers<[1], [0], [0], [1], [0, 0, 1, 1], [], []>} : vector<96x128xbf16>, vector<128x128xbf16>, vector<96x128xf32> -> vector<96x128xf32>
    %314 = arith.addf %309, %313 : vector<96x128xf32>
    %c121_221 = arith.constant 121 : index
    %c0_222 = arith.constant 0 : index
    %315 = vector.load %arg8[%c121_221, %c0_222] : memref<336x128xf32, #tpu.memory_space<vmem>>, vector<96x128xf32>
    %316 = arith.truncf %315 : vector<96x128xf32> to vector<96x128xbf16>
    %c640_223 = arith.constant 640 : index
    %c0_224 = arith.constant 0 : index
    %317 = vector.load %arg5[%c640_223, %c0_224] : memref<1152x128xbf16, #tpu.memory_space<vmem>>, vector<128x128xbf16>
    %cst_225 = arith.constant dense<0.000000e+00> : vector<96x128xf32>
    %318 = tpu.matmul %316, %317, %cst_225 {dimension_numbers = #tpu.dot_dimension_numbers<[1], [0], [0], [1], [0, 0, 1, 1], [], []>} : vector<96x128xbf16>, vector<128x128xbf16>, vector<96x128xf32> -> vector<96x128xf32>
    %319 = arith.addf %314, %318 : vector<96x128xf32>
    %c137_226 = arith.constant 137 : index
    %c0_227 = arith.constant 0 : index
    %320 = vector.load %arg8[%c137_226, %c0_227] : memref<336x128xf32, #tpu.memory_space<vmem>>, vector<96x128xf32>
    %321 = arith.truncf %320 : vector<96x128xf32> to vector<96x128xbf16>
    %c768_228 = arith.constant 768 : index
    %c0_229 = arith.constant 0 : index
    %322 = vector.load %arg5[%c768_228, %c0_229] : memref<1152x128xbf16, #tpu.memory_space<vmem>>, vector<128x128xbf16>
    %cst_230 = arith.constant dense<0.000000e+00> : vector<96x128xf32>
    %323 = tpu.matmul %321, %322, %cst_230 {dimension_numbers = #tpu.dot_dimension_numbers<[1], [0], [0], [1], [0, 0, 1, 1], [], []>} : vector<96x128xbf16>, vector<128x128xbf16>, vector<96x128xf32> -> vector<96x128xf32>
    %324 = arith.addf %319, %323 : vector<96x128xf32>
    %c138_231 = arith.constant 138 : index
    %c0_232 = arith.constant 0 : index
    %325 = vector.load %arg8[%c138_231, %c0_232] : memref<336x128xf32, #tpu.memory_space<vmem>>, vector<96x128xf32>
    %326 = arith.truncf %325 : vector<96x128xf32> to vector<96x128xbf16>
    %c896_233 = arith.constant 896 : index
    %c0_234 = arith.constant 0 : index
    %327 = vector.load %arg5[%c896_233, %c0_234] : memref<1152x128xbf16, #tpu.memory_space<vmem>>, vector<128x128xbf16>
    %cst_235 = arith.constant dense<0.000000e+00> : vector<96x128xf32>
    %328 = tpu.matmul %326, %327, %cst_235 {dimension_numbers = #tpu.dot_dimension_numbers<[1], [0], [0], [1], [0, 0, 1, 1], [], []>} : vector<96x128xbf16>, vector<128x128xbf16>, vector<96x128xf32> -> vector<96x128xf32>
    %329 = arith.addf %324, %328 : vector<96x128xf32>
    %c139_236 = arith.constant 139 : index
    %c0_237 = arith.constant 0 : index
    %330 = vector.load %arg8[%c139_236, %c0_237] : memref<336x128xf32, #tpu.memory_space<vmem>>, vector<96x128xf32>
    %331 = arith.truncf %330 : vector<96x128xf32> to vector<96x128xbf16>
    %c1024_238 = arith.constant 1024 : index
    %c0_239 = arith.constant 0 : index
    %332 = vector.load %arg5[%c1024_238, %c0_239] : memref<1152x128xbf16, #tpu.memory_space<vmem>>, vector<128x128xbf16>
    %cst_240 = arith.constant dense<0.000000e+00> : vector<96x128xf32>
    %333 = tpu.matmul %331, %332, %cst_240 {dimension_numbers = #tpu.dot_dimension_numbers<[1], [0], [0], [1], [0, 0, 1, 1], [], []>} : vector<96x128xbf16>, vector<128x128xbf16>, vector<96x128xf32> -> vector<96x128xf32>
    %334 = arith.addf %329, %333 : vector<96x128xf32>
    %c0_241 = arith.constant 0 : index
    %c0_242 = arith.constant 0 : index
    %335 = vector.load %arg6[%c0_241, %c0_242] : memref<1x128xf32, #tpu.memory_space<vmem>>, vector<1x128xf32>
    %336 = vector.broadcast %335 : vector<1x128xf32> to vector<96x128xf32>
    %337 = arith.addf %334, %336 : vector<96x128xf32>
    %c96 = arith.constant 96 : index
    %c0_243 = arith.constant 0 : index
    %338 = vector.load %arg2[%c96, %c0_243] : memref<288x128xf32, #tpu.memory_space<vmem>>, vector<96x128xf32>
    %339 = arith.addf %337, %338 : vector<96x128xf32>
    %cst_244 = arith.constant 0.000000e+00 : f32
    %340 = vector.broadcast %cst_244 : f32 to vector<96x128xf32>
    %341 = arith.maximumf %339, %340 : vector<96x128xf32>
    %c96_245 = arith.constant 96 : index
    %c0_246 = arith.constant 0 : index
    %342 = vector.load %arg7[%c96_245, %c0_246] : memref<288x128xf32, #tpu.memory_space<vmem>>, vector<96x128xf32>
    tpu.vector_store %arg7[%c96_245, %c0_246], %341 {strides = array<i32>} : memref<288x128xf32, #tpu.memory_space<vmem>>, vector<96x128xf32>,
    %cst_247 = arith.constant 0.000000e+00 : f32
    %343 = vector.broadcast %cst_247 : f32 to vector<96x128xf32>
    %c197_248 = arith.constant 197 : index
    %c0_249 = arith.constant 0 : index
    %344 = vector.load %arg8[%c197_248, %c0_249] : memref<336x128xf32, #tpu.memory_space<vmem>>, vector<96x128xf32>
    %345 = arith.truncf %344 : vector<96x128xf32> to vector<96x128xbf16>
    %c0_250 = arith.constant 0 : index
    %c0_251 = arith.constant 0 : index
    %346 = vector.load %arg5[%c0_250, %c0_251] : memref<1152x128xbf16, #tpu.memory_space<vmem>>, vector<128x128xbf16>
    %cst_252 = arith.constant dense<0.000000e+00> : vector<96x128xf32>
    %347 = tpu.matmul %345, %346, %cst_252 {dimension_numbers = #tpu.dot_dimension_numbers<[1], [0], [0], [1], [0, 0, 1, 1], [], []>} : vector<96x128xbf16>, vector<128x128xbf16>, vector<96x128xf32> -> vector<96x128xf32>
    %348 = arith.addf %343, %347 : vector<96x128xf32>
    %c198_253 = arith.constant 198 : index
    %c0_254 = arith.constant 0 : index
    %349 = vector.load %arg8[%c198_253, %c0_254] : memref<336x128xf32, #tpu.memory_space<vmem>>, vector<96x128xf32>
    %350 = arith.truncf %349 : vector<96x128xf32> to vector<96x128xbf16>
    %c128_255 = arith.constant 128 : index
    %c0_256 = arith.constant 0 : index
    %351 = vector.load %arg5[%c128_255, %c0_256] : memref<1152x128xbf16, #tpu.memory_space<vmem>>, vector<128x128xbf16>
    %cst_257 = arith.constant dense<0.000000e+00> : vector<96x128xf32>
    %352 = tpu.matmul %350, %351, %cst_257 {dimension_numbers = #tpu.dot_dimension_numbers<[1], [0], [0], [1], [0, 0, 1, 1], [], []>} : vector<96x128xbf16>, vector<128x128xbf16>, vector<96x128xf32> -> vector<96x128xf32>
    %353 = arith.addf %348, %352 : vector<96x128xf32>
    %c199_258 = arith.constant 199 : index
    %c0_259 = arith.constant 0 : index
    %354 = vector.load %arg8[%c199_258, %c0_259] : memref<336x128xf32, #tpu.memory_space<vmem>>, vector<96x128xf32>
    %355 = arith.truncf %354 : vector<96x128xf32> to vector<96x128xbf16>
    %c256_260 = arith.constant 256 : index
    %c0_261 = arith.constant 0 : index
    %356 = vector.load %arg5[%c256_260, %c0_261] : memref<1152x128xbf16, #tpu.memory_space<vmem>>, vector<128x128xbf16>
    %cst_262 = arith.constant dense<0.000000e+00> : vector<96x128xf32>
    %357 = tpu.matmul %355, %356, %cst_262 {dimension_numbers = #tpu.dot_dimension_numbers<[1], [0], [0], [1], [0, 0, 1, 1], [], []>} : vector<96x128xbf16>, vector<128x128xbf16>, vector<96x128xf32> -> vector<96x128xf32>
    %358 = arith.addf %353, %357 : vector<96x128xf32>
    %c215_263 = arith.constant 215 : index
    %c0_264 = arith.constant 0 : index
    %359 = vector.load %arg8[%c215_263, %c0_264] : memref<336x128xf32, #tpu.memory_space<vmem>>, vector<96x128xf32>
    %360 = arith.truncf %359 : vector<96x128xf32> to vector<96x128xbf16>
    %c384_265 = arith.constant 384 : index
    %c0_266 = arith.constant 0 : index
    %361 = vector.load %arg5[%c384_265, %c0_266] : memref<1152x128xbf16, #tpu.memory_space<vmem>>, vector<128x128xbf16>
    %cst_267 = arith.constant dense<0.000000e+00> : vector<96x128xf32>
    %362 = tpu.matmul %360, %361, %cst_267 {dimension_numbers = #tpu.dot_dimension_numbers<[1], [0], [0], [1], [0, 0, 1, 1], [], []>} : vector<96x128xbf16>, vector<128x128xbf16>, vector<96x128xf32> -> vector<96x128xf32>
    %363 = arith.addf %358, %362 : vector<96x128xf32>
    %c216_268 = arith.constant 216 : index
    %c0_269 = arith.constant 0 : index
    %364 = vector.load %arg8[%c216_268, %c0_269] : memref<336x128xf32, #tpu.memory_space<vmem>>, vector<96x128xf32>
    %365 = arith.truncf %364 : vector<96x128xf32> to vector<96x128xbf16>
    %c512_270 = arith.constant 512 : index
    %c0_271 = arith.constant 0 : index
    %366 = vector.load %arg5[%c512_270, %c0_271] : memref<1152x128xbf16, #tpu.memory_space<vmem>>, vector<128x128xbf16>
    %cst_272 = arith.constant dense<0.000000e+00> : vector<96x128xf32>
    %367 = tpu.matmul %365, %366, %cst_272 {dimension_numbers = #tpu.dot_dimension_numbers<[1], [0], [0], [1], [0, 0, 1, 1], [], []>} : vector<96x128xbf16>, vector<128x128xbf16>, vector<96x128xf32> -> vector<96x128xf32>
    %368 = arith.addf %363, %367 : vector<96x128xf32>
    %c217_273 = arith.constant 217 : index
    %c0_274 = arith.constant 0 : index
    %369 = vector.load %arg8[%c217_273, %c0_274] : memref<336x128xf32, #tpu.memory_space<vmem>>, vector<96x128xf32>
    %370 = arith.truncf %369 : vector<96x128xf32> to vector<96x128xbf16>
    %c640_275 = arith.constant 640 : index
    %c0_276 = arith.constant 0 : index
    %371 = vector.load %arg5[%c640_275, %c0_276] : memref<1152x128xbf16, #tpu.memory_space<vmem>>, vector<128x128xbf16>
    %cst_277 = arith.constant dense<0.000000e+00> : vector<96x128xf32>
    %372 = tpu.matmul %370, %371, %cst_277 {dimension_numbers = #tpu.dot_dimension_numbers<[1], [0], [0], [1], [0, 0, 1, 1], [], []>} : vector<96x128xbf16>, vector<128x128xbf16>, vector<96x128xf32> -> vector<96x128xf32>
    %373 = arith.addf %368, %372 : vector<96x128xf32>
    %c233_278 = arith.constant 233 : index
    %c0_279 = arith.constant 0 : index
    %374 = vector.load %arg8[%c233_278, %c0_279] : memref<336x128xf32, #tpu.memory_space<vmem>>, vector<96x128xf32>
    %375 = arith.truncf %374 : vector<96x128xf32> to vector<96x128xbf16>
    %c768_280 = arith.constant 768 : index
    %c0_281 = arith.constant 0 : index
    %376 = vector.load %arg5[%c768_280, %c0_281] : memref<1152x128xbf16, #tpu.memory_space<vmem>>, vector<128x128xbf16>
    %cst_282 = arith.constant dense<0.000000e+00> : vector<96x128xf32>
    %377 = tpu.matmul %375, %376, %cst_282 {dimension_numbers = #tpu.dot_dimension_numbers<[1], [0], [0], [1], [0, 0, 1, 1], [], []>} : vector<96x128xbf16>, vector<128x128xbf16>, vector<96x128xf32> -> vector<96x128xf32>
    %378 = arith.addf %373, %377 : vector<96x128xf32>
    %c234_283 = arith.constant 234 : index
    %c0_284 = arith.constant 0 : index
    %379 = vector.load %arg8[%c234_283, %c0_284] : memref<336x128xf32, #tpu.memory_space<vmem>>, vector<96x128xf32>
    %380 = arith.truncf %379 : vector<96x128xf32> to vector<96x128xbf16>
    %c896_285 = arith.constant 896 : index
    %c0_286 = arith.constant 0 : index
    %381 = vector.load %arg5[%c896_285, %c0_286] : memref<1152x128xbf16, #tpu.memory_space<vmem>>, vector<128x128xbf16>
    %cst_287 = arith.constant dense<0.000000e+00> : vector<96x128xf32>
    %382 = tpu.matmul %380, %381, %cst_287 {dimension_numbers = #tpu.dot_dimension_numbers<[1], [0], [0], [1], [0, 0, 1, 1], [], []>} : vector<96x128xbf16>, vector<128x128xbf16>, vector<96x128xf32> -> vector<96x128xf32>
    %383 = arith.addf %378, %382 : vector<96x128xf32>
    %c235_288 = arith.constant 235 : index
    %c0_289 = arith.constant 0 : index
    %384 = vector.load %arg8[%c235_288, %c0_289] : memref<336x128xf32, #tpu.memory_space<vmem>>, vector<96x128xf32>
    %385 = arith.truncf %384 : vector<96x128xf32> to vector<96x128xbf16>
    %c1024_290 = arith.constant 1024 : index
    %c0_291 = arith.constant 0 : index
    %386 = vector.load %arg5[%c1024_290, %c0_291] : memref<1152x128xbf16, #tpu.memory_space<vmem>>, vector<128x128xbf16>
    %cst_292 = arith.constant dense<0.000000e+00> : vector<96x128xf32>
    %387 = tpu.matmul %385, %386, %cst_292 {dimension_numbers = #tpu.dot_dimension_numbers<[1], [0], [0], [1], [0, 0, 1, 1], [], []>} : vector<96x128xbf16>, vector<128x128xbf16>, vector<96x128xf32> -> vector<96x128xf32>
    %388 = arith.addf %383, %387 : vector<96x128xf32>
    %c0_293 = arith.constant 0 : index
    %c0_294 = arith.constant 0 : index
    %389 = vector.load %arg6[%c0_293, %c0_294] : memref<1x128xf32, #tpu.memory_space<vmem>>, vector<1x128xf32>
    %390 = vector.broadcast %389 : vector<1x128xf32> to vector<96x128xf32>
    %391 = arith.addf %388, %390 : vector<96x128xf32>
    %c192 = arith.constant 192 : index
    %c0_295 = arith.constant 0 : index
    %392 = vector.load %arg2[%c192, %c0_295] : memref<288x128xf32, #tpu.memory_space<vmem>>, vector<96x128xf32>
    %393 = arith.addf %391, %392 : vector<96x128xf32>
    %cst_296 = arith.constant 0.000000e+00 : f32
    %394 = vector.broadcast %cst_296 : f32 to vector<96x128xf32>
    %395 = arith.maximumf %393, %394 : vector<96x128xf32>
    %c192_297 = arith.constant 192 : index
    %c0_298 = arith.constant 0 : index
    %396 = vector.load %arg7[%c192_297, %c0_298] : memref<288x128xf32, #tpu.memory_space<vmem>>, vector<96x128xf32>
    tpu.vector_store %arg7[%c192_297, %c0_298], %395 {strides = array<i32>} : memref<288x128xf32, #tpu.memory_space<vmem>>, vector<96x128xf32>,
    return
  }
  func.func @transform_0(%arg0: i32) -> (i32, i32) {
    %c0_i32 = arith.constant 0 : i32
    %c0_i32_0 = arith.constant 0 : i32
    return %arg0, %c0_i32 : i32, i32
  }
  func.func @transform_1(%arg0: i32) -> (i32, i32) {
    %c0_i32 = arith.constant 0 : i32
    %c0_i32_0 = arith.constant 0 : i32
    return %arg0, %c0_i32 : i32, i32
  }
  func.func @transform_2(%arg0: i32) -> (i32, i32) {
    %c0_i32 = arith.constant 0 : i32
    %c0_i32_0 = arith.constant 0 : i32
    %c0_i32_1 = arith.constant 0 : i32
    return %c0_i32, %c0_i32_0 : i32, i32
  }
  func.func @transform_3(%arg0: i32) -> (i32, i32) {
    %c0_i32 = arith.constant 0 : i32
    %c0_i32_0 = arith.constant 0 : i32
    %c0_i32_1 = arith.constant 0 : i32
    return %c0_i32, %c0_i32_0 : i32, i32
  }
  func.func @transform_4(%arg0: i32) -> (i32, i32) {
    %c0_i32 = arith.constant 0 : i32
    %c0_i32_0 = arith.constant 0 : i32
    %c0_i32_1 = arith.constant 0 : i32
    return %c0_i32, %c0_i32_0 : i32, i32
  }
  func.func @transform_5(%arg0: i32) -> (i32, i32) {
    %c0_i32 = arith.constant 0 : i32
    %c0_i32_0 = arith.constant 0 : i32
    %c0_i32_1 = arith.constant 0 : i32
    return %c0_i32, %c0_i32_0 : i32, i32
  }
  func.func @transform_6(%arg0: i32) -> (i32, i32) {
    %c0_i32 = arith.constant 0 : i32
    %c0_i32_0 = arith.constant 0 : i32
    return %arg0, %c0_i32 : i32, i32
  }
}

</mosaic_0001>

<bundles_post_ra>
// kernel: basic_block_forward.1
= control target key start
LH: loop header
LB: loop body
LE: loop exit
PB: predicated region body
PF: predicated region fallthrough
CT: control target
= control target key end

     0   :  { %s14605_s21 = smov 0   ;;  %s17831_s0 = inlined_call_operand.vmem [shape: f32[672,128], index: 0, kind: input, shape index: {}]   ;;  %s17832_s1 = inlined_call_operand.vmem [shape: f32[576,128], index: 1, kind: input, shape index: {}]   ;;  %s17833_s2 = inlined_call_operand.vmem [shape: bf16[1152,128], index: 2, kind: input, shape index: {}]   ;;  %s17834_s3 = inlined_call_operand.vmem [shape: f32[1,128], index: 3, kind: input, shape index: {}]   ;;  %s17835_s4 = inlined_call_operand.vmem [shape: bf16[1152,128], index: 4, kind: input, shape index: {}]   ;;  %s17836_s5 = inlined_call_operand.vmem [shape: f32[1,128], index: 5, kind: input, shape index: {}]   ;;  %s17837_s6 = inlined_call_operand.vmem [shape: f32[576,128], index: 6, kind: output, shape index: {}]  }
   0x1 LB: > { %s10745_s22 = sadd.s32 4294967295, %s14566_s21   ;;  %p10749_p0 = scmp.ge.s32.totalorder %s14566_s21, 1  ;;  %s14566_s21 = sphi %s14605_s21, %s16_s21  }
   0x2   : > { %p224_p1 = scmp.lt.s32.totalorder %s14566_s21, 3 }
   0x4   : > { %p225_p2 = pnand %p10749_p0, %p224_p1 }
   0x6   : > { %228 = sbr.rel (%p225_p2) target bundleno = 1318 (0x526), region = 44 }
   0xd   : > { %v14118_v0 = vld [vmem:[%s17833_s2 + $0x40] sm:$0xff]   ;;  %s259_s25 = smul.u32 42, %s10745_s22  ;;  %v14120_v2 = vld [vmem:[%s17833_s2 + $0x48] sm:$0xff]   ;;  %v14122_v4 = vld [vmem:[%s17833_s2 + $0x50] sm:$0xff]  }
   0xe   : > { %v14119_v1 = vld [vmem:[%s17833_s2 + $0x40] sm:$0xff]   ;;  %11949 = vmatprep.subr.bf16.mxu0 %v14118_v0  ;;  %v14121_v3 = vld [vmem:[%s17833_s2 + $0x48] sm:$0xff]   ;;  %v14123_v5 = vld [vmem:[%s17833_s2 + $0x50] sm:$0xff]  }
   0xf   : > { %p260_p3 = scmp.lt.s32.totalorder %s259_s25, 83  ;;  %12201 = vmatprep.subr.bf16.mxu1 %v14119_v1  ;;  %11950 = vmatpush3.bf16.msra.mxu0 %v14118_v0  ;;  %v14124_v6 = vld [vmem:[%s17833_s2 + $0x58] sm:$0xff]   ;;  %v14126_v8 = vld [vmem:[%s17833_s2 + $0x60] sm:$0xff]   ;;  %v14128_v10 = vld [vmem:[%s17833_s2 + $0x68] sm:$0xff]  }
  0x10   : > { %12202 = vmatpush3.bf16.msra.mxu1 %v14119_v1  ;;  %11951 = vmatprep.subr.bf16.mxu0 %v14120_v2  ;;  %v14125_v7 = vld [vmem:[%s17833_s2 + $0x58] sm:$0xff]   ;;  %v14127_v9 = vld [vmem:[%s17833_s2 + $0x60] sm:$0xff]   ;;  %v14129_v13 = vld [vmem:[%s17833_s2 + $0x68] sm:$0xff]  }
  0x11   : > { %12203 = vmatprep.subr.bf16.mxu1 %v14121_v3  ;;  %s18095_s25 = smov (!%p260_p3, %s259_s25), 83  ;;  %v14130_v18 = vld [vmem:[%s17833_s2 + $0x70] sm:$0xff]   ;;  %v14132_v20 = vld [vmem:[%s17833_s2 + $0x78] sm:$0xff]   ;;  %v14134_v24 = vld [vmem:[%s17833_s2] sm:$0xff]  }
  0x12   : > { %s10750_s16 = sshll.u32 %s18095_s25, 3  ;;  %v14131_v19 = vld [vmem:[%s17833_s2 + $0x70] sm:$0xff]   ;;  %v14133_v21 = vld [vmem:[%s17833_s2 + $0x78] sm:$0xff]   ;;  %v14135_v27 = vld [vmem:[%s17833_s2] sm:$0xff]  }
  0x13   : > { %11952 = vmatpush3.bf16.msra.mxu0 %v14120_v2  ;;  %s14648_s26 = scalar_lea.vmem %s17831_s0, %s10750_s16  ;;  %v14136_v34 = vld [vmem:[%s17833_s2 + $0x8] sm:$0xff]   ;;  %v14138_v37 = vld [vmem:[%s17833_s2 + $0x10] sm:$0xff]   ;;  %v14140_v50 = vld [vmem:[%s17833_s2 + $0x18] sm:$0xff]   ;;  %s265_s16 = smul.u32 36, %s10745_s22 }
  0x14   : > { %12204 = vmatpush3.bf16.msra.mxu1 %v14121_v3  ;;  %11953 = vmatprep.subr.bf16.mxu0 %v14122_v4  ;;  %v318_v11 = vld [vmem:[%s14648_s26 + $0x6] sm:$0xff]  ;;  %v319_v12 = vld [vmem:[%s14648_s26 + $0xe] sm:$0xff]  ;;  %v320_v22 = vld [vmem:[%s14648_s26 + $0x16] sm:$0xff] }
  0x15   : > { %12205 = vmatprep.subr.bf16.mxu1 %v14123_v5  ;;  %v330_v14 = vpack.c.bf16 %v319_v12, %v318_v11  ;;  %v2165_v15 = vld [vmem:[%s14648_s26 + $0x66] sm:$0xff]  ;;  %v2166_v16 = vld [vmem:[%s14648_s26 + $0x6e] sm:$0xff]  ;;  %v321_v23 = vld [vmem:[%s14648_s26 + $0x1e] sm:$0xff]  ;;  %p266_p4 = scmp.lt.s32.totalorder %s265_s16, 71 }
  0x16   : > { %v2177_v17 = vpack.c.bf16 %v2166_v16, %v2165_v15  ;;  %v2167_v25 = vld [vmem:[%s14648_s26 + $0x76] sm:$0xff]  ;;  %v2168_v26 = vld [vmem:[%s14648_s26 + $0x7e] sm:$0xff]  ;;  %v331_v28 = vpack.c.bf16 %v321_v23, %v320_v22  ;;  %v322_v29 = vld [vmem:[%s14648_s26 + $0x26] sm:$0xff] }
  0x17   : > { %11954 = vmatpush3.bf16.msra.mxu0 %v14122_v4  ;;  %11965 = vmatprep.mubr.bf16.mxu0 %v330_v14  ;;  %v323_v30 = vld [vmem:[%s14648_s26 + $0x2e] sm:$0xff]  ;;  %v2169_v31 = vld [vmem:[%s14648_s26 + $0x86] sm:$0xff]  ;;  %v2178_v32 = vpack.c.bf16 %v2168_v26, %v2167_v25  ;;  %v324_v39 = vld [vmem:[%s14648_s26 + $0x36] sm:$0xff]  ;;  %s18097_s16 = smov (!%p266_p4, %s265_s16), 71 }
  0x18   : > { %12206 = vmatpush3.bf16.msra.mxu1 %v14123_v5  ;;  %11955 = vmatprep.subr.bf16.mxu0 %v14124_v6  ;;  %v2170_v33 = vld [vmem:[%s14648_s26 + $0x8e] sm:$0xff]  ;;  %v332_v36 = vpack.c.bf16 %v323_v30, %v322_v29  ;;  %v325_v40 = vld [vmem:[%s14648_s26 + $0x3e] sm:$0xff]  ;;  %v2171_v41 = vld [vmem:[%s14648_s26 + $0x96] sm:$0xff] }
  0x19   : > { %12207 = vmatprep.subr.bf16.mxu1 %v14125_v7  ;;  %12217 = vmatprep.mubr.bf16.mxu1 %v2177_v17  ;;  %v14137_v35 = vld [vmem:[%s17833_s2 + $0x8] sm:$0xff]   ;;  %v2179_v38 = vpack.c.bf16 %v2170_v33, %v2169_v31  ;;  %v2172_v42 = vld [vmem:[%s14648_s26 + $0x9e] sm:$0xff]  ;;  %v14139_v43 = vld [vmem:[%s17833_s2 + $0x10] sm:$0xff]   ;;  %v333_v46 = vpack.c.bf16 %v325_v40, %v324_v39 }
  0x1a   : > { %v326_v44 = vld [vmem:[%s14648_s26 + $0x46] sm:$0xff]  ;;  %v327_v45 = vld [vmem:[%s14648_s26 + $0x4e] sm:$0xff]  ;;  %v2180_v48 = vpack.c.bf16 %v2172_v42, %v2171_v41  ;;  %v14141_v51 = vld [vmem:[%s17833_s2 + $0x18] sm:$0xff]  }
  0x1b   : > { %11956 = vmatpush3.bf16.msra.mxu0 %v14124_v6  ;;  %v2173_v47 = vld [vmem:[%s14648_s26 + $0xa6] sm:$0xff]  ;;  %v2174_v49 = vld [vmem:[%s14648_s26 + $0xae] sm:$0xff]  ;;  %v334_v52 = vpack.c.bf16 %v327_v45, %v326_v44  ;;  %v328_v56 = vld [vmem:[%s14648_s26 + $0x56] sm:$0xff] }
  0x1c   : > { %12208 = vmatpush3.bf16.msra.mxu1 %v14125_v7  ;;  %11957 = vmatprep.subr.bf16.mxu0 %v14126_v8  ;;  %v14142_v53 = vld [vmem:[%s17833_s2 + $0x20] sm:$0xff]   ;;  %v2181_v54 = vpack.c.bf16 %v2174_v49, %v2173_v47  ;;  %v2175_v58 = vld [vmem:[%s14648_s26 + $0xb6] sm:$0xff]  ;;  %v285_v61 = vld [vmem:[%s14648_s26 + $0xd] sm:$0xff] }
  0x1d   : > { %12209 = vmatprep.subr.bf16.mxu1 %v14127_v9  ;;  %v14143_v55 = vld [vmem:[%s17833_s2 + $0x20] sm:$0xff]   ;;  %v2132_v1 = vld [vmem:[%s14648_s26 + $0x6d] sm:$0xff]  ;;  %v286_v11 = vld [vmem:[%s14648_s26 + $0x15] sm:$0xff] }
  0x1e   : > { %v329_v57 = vld [vmem:[%s14648_s26 + $0x5e] sm:$0xff]  ;;  %v14144_v2 = vld [vmem:[%s17833_s2 + $0x28] sm:$0xff]   ;;  %v14146_v6 = vld [vmem:[%s17833_s2 + $0x30] sm:$0xff]  }
  0x1f   : > { %11958 = vmatpush3.bf16.msra.mxu0 %v14126_v8  ;;  %v2176_v59 = vld [vmem:[%s14648_s26 + $0xbe] sm:$0xff]  ;;  %v335_v62 = vpack.c.bf16 %v329_v57, %v328_v56  ;;  %v14145_v3 = vld [vmem:[%s17833_s2 + $0x28] sm:$0xff]   ;;  %v14147_v7 = vld [vmem:[%s17833_s2 + $0x30] sm:$0xff]  }
  0x20   : > { %12210 = vmatpush3.bf16.msra.mxu1 %v14127_v9  ;;  %11959 = vmatprep.subr.bf16.mxu0 %v14128_v10  ;;  %v284_v60 = vld [vmem:[%s14648_s26 + $0x5] sm:$0xff]  ;;  %v2182_v0 = vpack.c.bf16 %v2176_v59, %v2175_v58  ;;  %v14148_v8 = vld [vmem:[%s17833_s2 + $0x38] sm:$0xff]   ;;  %v289_v17 = vld [vmem:[%s14648_s26 + $0x2d] sm:$0xff] }
  0x21   : > { %12211 = vmatprep.subr.bf16.mxu1 %v14129_v13  ;;  %v2131_v63 = vld [vmem:[%s14648_s26 + $0x65] sm:$0xff]  ;;  %v296_v4 = vpack.c.bf16 %v285_v61, %v284_v60  ;;  %v14149_v9 = vld [vmem:[%s17833_s2 + $0x38] sm:$0xff]   ;;  %v14154_v25 = vld [vmem:[%s17833_s2 + $0x90] sm:$0xff]  }
  0x22   : > { %v2143_v5 = vpack.c.bf16 %v2132_v1, %v2131_v63  ;;  %v287_v12 = vld [vmem:[%s14648_s26 + $0x1d] sm:$0xff]  ;;  %v288_v16 = vld [vmem:[%s14648_s26 + $0x25] sm:$0xff]  ;;  %v2137_v30 = vld [vmem:[%s14648_s26 + $0x95] sm:$0xff] }
  0x23   : > { %11960 = vmatpush3.bf16.msra.mxu0 %v14128_v10  ;;  %v14150_v10 = vld [vmem:[%s17833_s2 + $0x80] sm:$0xff]   ;;  %v14152_v22 = vld [vmem:[%s17833_s2 + $0x88] sm:$0xff]   ;;  %v14157_v39 = vld [vmem:[%s17833_s2 + $0x98] sm:$0xff]  }
  0x24   : > { %12212 = vmatpush3.bf16.msra.mxu1 %v14129_v13  ;;  %11961 = vmatprep.subr.bf16.mxu0 %v14130_v18  ;;  %v2133_v13 = vld [vmem:[%s14648_s26 + $0x75] sm:$0xff]  ;;  %v2134_v14 = vld [vmem:[%s14648_s26 + $0x7d] sm:$0xff]  ;;  %v14153_v23 = vld [vmem:[%s17833_s2 + $0x88] sm:$0xff]  }
  0x25   : > { %12213 = vmatprep.subr.bf16.mxu1 %v14131_v19  ;;  %v14151_v15 = vld [vmem:[%s17833_s2 + $0x80] sm:$0xff]   ;;  %v293_v33 = vld [vmem:[%s14648_s26 + $0x4d] sm:$0xff]  ;;  %v294_v42 = vld [vmem:[%s14648_s26 + $0x55] sm:$0xff] }
  0x26   : > { %v291_v29 = vld [vmem:[%s14648_s26 + $0x3d] sm:$0xff]  ;;  %v2141_v45 = vld [vmem:[%s14648_s26 + $0xb5] sm:$0xff]  ;;  %v610_v49 = vld [vmem:[%s14648_s26 + $0x7] sm:$0xff] }
  0x27   : > { %11962 = vmatpush3.bf16.msra.mxu0 %v14130_v18  ;;  %v297_v18 = vpack.c.bf16 %v287_v12, %v286_v11  ;;  %v2138_v31 = vld [vmem:[%s14648_s26 + $0x9d] sm:$0xff]  ;;  %v14162_v58 = vld [vmem:[%s17833_s2 + $0xb0] sm:$0xff]   ;;  %v14169_v11 = vld [vmem:[%s17833_s2 + $0xc8] sm:$0xff]  }
  0x28   : > { %12214 = vmatpush3.bf16.msra.mxu1 %v14131_v19  ;;  %11963 = vmatprep.subr.bf16.mxu0 %v14132_v20  ;;  %v2135_v19 = vld [vmem:[%s14648_s26 + $0x85] sm:$0xff]  ;;  %v14163_v59 = vld [vmem:[%s17833_s2 + $0xb0] sm:$0xff]   ;;  %v14164_v60 = vld [vmem:[%s17833_s2 + $0xb8] sm:$0xff]  }
  0x29   : > { %12215 = vmatprep.subr.bf16.mxu1 %v14133_v21  ;;  %v14158_v44 = vld [vmem:[%s17833_s2 + $0xa0] sm:$0xff]   ;;  %v14165_v61 = vld [vmem:[%s17833_s2 + $0xb8] sm:$0xff]  }
  0x2a   : > { %v14159_v47 = vld [vmem:[%s17833_s2 + $0xa0] sm:$0xff]   ;;  %v2459_v1 = vld [vmem:[%s14648_s26 + $0x77] sm:$0xff] }
  0x2b   : > { %11964 = vmatpush3.bf16.msra.mxu0 %v14132_v20  ;;  %v2144_v20 = vpack.c.bf16 %v2134_v14, %v2133_v13  ;;  %v613_v63 = vld [vmem:[%s14648_s26 + $0x1f] sm:$0xff]  ;;  %v616_v13 = vld [vmem:[%s14648_s26 + $0x37] sm:$0xff] }
  0x2c   : > { %12216 = vmatpush3.bf16.msra.mxu1 %v14133_v21  ;;  %11977 = vmatprep.subr.bf16.mxu0 %v14134_v24  ;;  %v2136_v21 = vld [vmem:[%s14648_s26 + $0x8d] sm:$0xff] }
  0x2d   : > { %12229 = vmatprep.subr.bf16.mxu1 %v14135_v27  ;;  %v2145_v26 = vpack.c.bf16 %v2136_v21, %v2135_v19  ;;  %v14170_v14 = vld [vmem:[%s17833_s2 + $0xd0] sm:$0xff]   ;;  %v2464_v19 = vld [vmem:[%s14648_s26 + $0x9f] sm:$0xff] }
  0x2e   : > { %11966 = vmatmul.mubr.bf16.vlgmr.msra.gmra.mrb[0].mxu0 %v331_v28  ;;  %v290_v28 = vld [vmem:[%s14648_s26 + $0x35] sm:$0xff] }
  0x2f   : > { %11978 = vmatpush3.bf16.msra.mxu0 %v14134_v24  ;;  %12218 = vmatmul.mubr.bf16.vlgmr.msra.gmra.mrb[0].mxu1 %v2178_v32  ;;  %v298_v24 = vpack.c.bf16 %v289_v17, %v288_v16  ;;  %v292_v32 = vld [vmem:[%s14648_s26 + $0x45] sm:$0xff]  ;;  %v14171_v17 = vld [vmem:[%s17833_s2 + $0xd0] sm:$0xff]  }
  0x30   : > { %12230 = vmatpush3.bf16.msra.mxu1 %v14135_v27  ;;  %11979 = vmatprep.subr.bf16.mxu0 %v14136_v34  ;;  %v14155_v27 = vld [vmem:[%s17833_s2 + $0x90] sm:$0xff]   ;;  %v300_v40 = vpack.c.bf16 %v293_v33, %v292_v32  ;;  %v617_v16 = vld [vmem:[%s14648_s26 + $0x3f] sm:$0xff] }
  0x31   : > { %12231 = vmatprep.subr.bf16.mxu1 %v14137_v35  ;;  %11969 = vmatprep.mubr.bf16.mxu0 %v332_v36  ;;  %v2146_v36 = vpack.c.bf16 %v2138_v31, %v2137_v30  ;;  %v14862_v21 = vpack.c.bf16 %v617_v16, %v616_v13  ;;  %v620_v30 = vld [vmem:[%s14648_s26 + $0x57] sm:$0xff]  ;;  %v621_v31 = vld [vmem:[%s14648_s26 + $0x5f] sm:$0xff] }
  0x32   : > { %12221 = vmatprep.mubr.bf16.mxu1 %v2179_v38  ;;  %v14156_v38 = vld [vmem:[%s17833_s2 + $0x98] sm:$0xff]   ;;  %v14174_v32 = vld [vmem:[%s17833_s2 + $0xe0] sm:$0xff]  }
  0x33   : > { %11980 = vmatpush3.bf16.msra.mxu0 %v14136_v34  ;;  %v299_v34 = vpack.c.bf16 %v291_v29, %v290_v28  ;;  %v2467_v33 = vld [vmem:[%s14648_s26 + $0xb7] sm:$0xff] }
  0x34   : > { %12232 = vmatpush3.bf16.msra.mxu1 %v14137_v35  ;;  %11981 = vmatprep.subr.bf16.mxu0 %v14138_v37  ;;  %v2139_v35 = vld [vmem:[%s14648_s26 + $0xa5] sm:$0xff] }
  0x35   : > { %12233 = vmatprep.subr.bf16.mxu1 %v14139_v43 }
  0x36   : > { %11970 = vmatmul.mubr.bf16.gmra.mrb[4].mxu0 %v333_v46  ;;  %v2142_v46 = vld [vmem:[%s14648_s26 + $0xbd] sm:$0xff] }
  0x37   : > { %11982 = vmatpush3.bf16.msra.mxu0 %v14138_v37  ;;  %12222 = vmatmul.mubr.bf16.gmra.mrb[4].mxu1 %v2180_v48  ;;  %v2140_v37 = vld [vmem:[%s14648_s26 + $0xad] sm:$0xff] }
  0x38   : > { %12234 = vmatpush3.bf16.msra.mxu1 %v14139_v43  ;;  %11983 = vmatprep.subr.bf16.mxu0 %v14140_v50  ;;  %v2147_v41 = vpack.c.bf16 %v2140_v37, %v2139_v35  ;;  %v295_v43 = vld [vmem:[%s14648_s26 + $0x5d] sm:$0xff] }
  0x39   : > { %12235 = vmatprep.subr.bf16.mxu1 %v14141_v51  ;;  %11973 = vmatprep.mubr.bf16.mxu0 %v334_v52  ;;  %v301_v48 = vpack.c.bf16 %v295_v43, %v294_v42  ;;  %v2148_v52 = vpack.c.bf16 %v2142_v46, %v2141_v45  ;;  %v14175_v35 = vld [vmem:[%s17833_s2 + $0xe0] sm:$0xff]   ;;  %v14180_v42 = vld [vmem:[%s17833_s2 + $0xf8] sm:$0xff]   ;;  %v14184_v46 = vld [vmem:[%s17833_s2 + $0x108] sm:$0xff]  }
  0x3a   : > { %12225 = vmatprep.mubr.bf16.mxu1 %v2181_v54  ;;  %v14160_v54 = vld [vmem:[%s17833_s2 + $0xa8] sm:$0xff]   ;;  %v14181_v43 = vld [vmem:[%s17833_s2 + $0xf8] sm:$0xff]   ;;  %v14183_v45 = vld [vmem:[%s17833_s2 + $0x100] sm:$0xff]  }
  0x3b   : > { %11984 = vmatpush3.bf16.msra.mxu0 %v14140_v50  ;;  %v611_v50 = vld [vmem:[%s14648_s26 + $0xf] sm:$0xff] }
  0x3c   : > { %12236 = vmatpush3.bf16.msra.mxu1 %v14141_v51  ;;  %11985 = vmatprep.subr.bf16.mxu0 %v14142_v53  ;;  %v2457_v51 = vld [vmem:[%s14648_s26 + $0x67] sm:$0xff]  ;;  %v622_v56 = vpack.c.bf16 %v611_v50, %v610_v49  ;;  %v14187_v49 = vld [vmem:[%s17833_s2 + $0x110] sm:$0xff]   ;;  %v14188_v50 = vld [vmem:[%s17833_s2 + $0x118] sm:$0xff]  }
  0x3d   : > { %12237 = vmatprep.subr.bf16.mxu1 %v14143_v55 }
  0x3e   : > { %11974 = vmatmul.mubr.bf16.gmra.mrb[8].mxu0 %v335_v62  ;;  %v612_v62 = vld [vmem:[%s14648_s26 + $0x17] sm:$0xff] }
  0x3f   : > { %11986 = vmatpush3.bf16.msra.mxu0 %v14142_v53  ;;  %12226 = vmatmul.mubr.bf16.gmra.mrb[8].mxu1 %v2182_v0  ;;  %v2458_v53 = vld [vmem:[%s14648_s26 + $0x6f] sm:$0xff]  ;;  %v14166_v0 = vld [vmem:[%s17833_s2 + $0xc0] sm:$0xff]  }
  0x40   : > { %12238 = vmatpush3.bf16.msra.mxu1 %v14143_v55  ;;  %11987 = vmatprep.subr.bf16.mxu0 %v14144_v2  ;;  %v14161_v55 = vld [vmem:[%s17833_s2 + $0xa8] sm:$0xff]   ;;  %v14804_v57 = vpack.c.bf16 %v2458_v53, %v2457_v51  ;;  %v14189_v51 = vld [vmem:[%s17833_s2 + $0x118] sm:$0xff]  }
  0x41   : > { %12239 = vmatprep.subr.bf16.mxu1 %v14145_v3  ;;  %11993 = vmatprep.mubr.bf16.mxu0 %v296_v4  ;;  %v614_v4 = vld [vmem:[%s14648_s26 + $0x27] sm:$0xff] }
  0x42   : > { %12245 = vmatprep.mubr.bf16.mxu1 %v2143_v5  ;;  %v615_v5 = vld [vmem:[%s14648_s26 + $0x2f] sm:$0xff]  ;;  %v2642_v53 = vld [vmem:[%s14648_s26 + $0xc7] sm:$0xff] }
  0x43   : > { %11988 = vmatpush3.bf16.msra.mxu0 %v14144_v2  ;;  %v14167_v2 = vld [vmem:[%s17833_s2 + $0xc0] sm:$0xff]   ;;  %v14843_v12 = vpack.c.bf16 %v615_v5, %v614_v4  ;;  %v14197_v4 = vld [vmem:[%s17833_s2 + $0x138] sm:$0xff]   ;;  %v962_v5 = vld [vmem:[%s14648_s26 + $0x28] sm:$0xff] }
  0x44   : > { %12240 = vmatpush3.bf16.msra.mxu1 %v14145_v3  ;;  %11989 = vmatprep.subr.bf16.mxu0 %v14146_v6  ;;  %v2460_v3 = vld [vmem:[%s14648_s26 + $0x7f] sm:$0xff] }
  0x45   : > { %12241 = vmatprep.subr.bf16.mxu1 %v14147_v7 }
  0x47   : > { %11990 = vmatpush3.bf16.msra.mxu0 %v14146_v6  ;;  %v14831_v6 = vpack.c.bf16 %v613_v63, %v612_v62  ;;  %v14192_v62 = vld [vmem:[%s17833_s2 + $0x128] sm:$0xff]  }
  0x48   : > { %12242 = vmatpush3.bf16.msra.mxu1 %v14147_v7  ;;  %11991 = vmatprep.subr.bf16.mxu0 %v14148_v8  ;;  %v14168_v7 = vld [vmem:[%s17833_s2 + $0xc8] sm:$0xff]  }
  0x49   : > { %12243 = vmatprep.subr.bf16.mxu1 %v14149_v9  ;;  %v14193_v63 = vld [vmem:[%s17833_s2 + $0x128] sm:$0xff]  }
  0x4b   : > { %11992 = vmatpush3.bf16.msra.mxu0 %v14148_v8  ;;  %v2461_v8 = vld [vmem:[%s14648_s26 + $0x87] sm:$0xff] }
  0x4c   : > { %12244 = vmatpush3.bf16.msra.mxu1 %v14149_v9  ;;  %12005 = vmatprep.subr.bf16.mxu0 %v14150_v10  ;;  %v14837_v9 = vpack.c.bf16 %v2460_v3, %v2459_v1  ;;  %v14195_v3 = vld [vmem:[%s17833_s2 + $0x130] sm:$0xff]  }
  0x4d   : > { %12257 = vmatprep.subr.bf16.mxu1 %v14151_v15 }
  0x4e   : > { %11994 = vmatmul.mubr.bf16.vlgmr.msra.gmra.mrb[0].mxu0 %v297_v18  ;;  %v2463_v18 = vld [vmem:[%s14648_s26 + $0x97] sm:$0xff] }
  0x4f   : > { %12006 = vmatpush3.bf16.msra.mxu0 %v14150_v10  ;;  %12246 = vmatmul.mubr.bf16.vlgmr.msra.gmra.mrb[0].mxu1 %v2144_v20  ;;  %v2462_v10 = vld [vmem:[%s14648_s26 + $0x8f] sm:$0xff]  ;;  %v618_v20 = vld [vmem:[%s14648_s26 + $0x47] sm:$0xff] }
  0x50   : > { %12258 = vmatpush3.bf16.msra.mxu1 %v14151_v15  ;;  %12007 = vmatprep.subr.bf16.mxu0 %v14152_v22  ;;  %v14850_v15 = vpack.c.bf16 %v2462_v10, %v2461_v8  ;;  %v2809_v8 = vld [vmem:[%s14648_s26 + $0x88] sm:$0xff]  ;;  %v2810_v10 = vld [vmem:[%s14648_s26 + $0x90] sm:$0xff] }
  0x51   : > { %12259 = vmatprep.subr.bf16.mxu1 %v14153_v23  ;;  %11997 = vmatprep.mubr.bf16.mxu0 %v298_v24  ;;  %v14866_v24 = vpack.c.bf16 %v2464_v19, %v2463_v18  ;;  %v2820_v16 = vpack.c.bf16 %v2810_v10, %v2809_v8  ;;  %v14201_v18 = vld [vmem:[%s17833_s2 + $0x148] sm:$0xff]   ;;  %v14218_v8 = vld [vmem:[%s17833_s2 + $0x190] sm:$0xff]  }
  0x52   : > { %12249 = vmatprep.mubr.bf16.mxu1 %v2145_v26  ;;  %v14172_v26 = vld [vmem:[%s17833_s2 + $0xd8] sm:$0xff]   ;;  %v1141_v10 = vld [vmem:[%s14648_s26 + $0x49] sm:$0xff] }
  0x53   : > { %12008 = vmatpush3.bf16.msra.mxu0 %v14152_v22  ;;  %v619_v22 = vld [vmem:[%s14648_s26 + $0x4f] sm:$0xff] }
  0x54   : > { %12260 = vmatpush3.bf16.msra.mxu1 %v14153_v23  ;;  %12009 = vmatprep.subr.bf16.mxu0 %v14154_v25  ;;  %v2465_v23 = vld [vmem:[%s14648_s26 + $0xa7] sm:$0xff]  ;;  %v14875_v28 = vpack.c.bf16 %v619_v22, %v618_v20 }
  0x55   : > { %12261 = vmatprep.subr.bf16.mxu1 %v14155_v27  ;;  %v966_v20 = vld [vmem:[%s14648_s26 + $0x48] sm:$0xff] }
  0x56   : > { %11998 = vmatmul.mubr.bf16.gmra.mrb[4].mxu0 %v299_v34  ;;  %v2468_v34 = vld [vmem:[%s14648_s26 + $0xbf] sm:$0xff] }
  0x57   : > { %12010 = vmatpush3.bf16.msra.mxu0 %v14154_v25  ;;  %12250 = vmatmul.mubr.bf16.gmra.mrb[4].mxu1 %v2146_v36  ;;  %v2466_v25 = vld [vmem:[%s14648_s26 + $0xaf] sm:$0xff]  ;;  %v627_v36 = vpack.c.bf16 %v621_v31, %v620_v30  ;;  %v2474_v37 = vpack.c.bf16 %v2468_v34, %v2467_v33  ;;  %v2815_v30 = vld [vmem:[%s14648_s26 + $0xb8] sm:$0xff] }
  0x58   : > { %12262 = vmatpush3.bf16.msra.mxu1 %v14155_v27  ;;  %12011 = vmatprep.subr.bf16.mxu0 %v14156_v38  ;;  %v14173_v27 = vld [vmem:[%s17833_s2 + $0xd8] sm:$0xff]   ;;  %v14878_v29 = vpack.c.bf16 %v2466_v25, %v2465_v23  ;;  %v967_v23 = vld [vmem:[%s14648_s26 + $0x50] sm:$0xff]  ;;  %v2813_v25 = vld [vmem:[%s14648_s26 + $0xa8] sm:$0xff] }
  0x59   : > { %12263 = vmatprep.subr.bf16.mxu1 %v14157_v39  ;;  %12001 = vmatprep.mubr.bf16.mxu0 %v300_v40  ;;  %v14178_v40 = vld [vmem:[%s17833_s2 + $0xf0] sm:$0xff]   ;;  %v14204_v33 = vld [vmem:[%s17833_s2 + $0x158] sm:$0xff]  }
  0x5a   : > { %12253 = vmatprep.mubr.bf16.mxu1 %v2147_v41  ;;  %v14179_v41 = vld [vmem:[%s17833_s2 + $0xf0] sm:$0xff]   ;;  %v14205_v34 = vld [vmem:[%s17833_s2 + $0x158] sm:$0xff]  }
  0x5b   : > { %12012 = vmatpush3.bf16.msra.mxu0 %v14156_v38  ;;  %v14176_v38 = vld [vmem:[%s17833_s2 + $0xe8] sm:$0xff]  }
  0x5c   : > { %12264 = vmatpush3.bf16.msra.mxu1 %v14157_v39  ;;  %12013 = vmatprep.subr.bf16.mxu0 %v14158_v44  ;;  %v14177_v39 = vld [vmem:[%s17833_s2 + $0xe8] sm:$0xff]  }
  0x5d   : > { %12265 = vmatprep.subr.bf16.mxu1 %v14159_v47 }
  0x5e   : > { %12002 = vmatmul.mubr.bf16.gmra.mrb[8].mxu0 %v301_v48  ;;  %v14186_v48 = vld [vmem:[%s17833_s2 + $0x110] sm:$0xff]  }
  0x5f   : > { %12014 = vmatpush3.bf16.msra.mxu0 %v14158_v44  ;;  %12254 = vmatmul.mubr.bf16.gmra.mrb[8].mxu1 %v2148_v52  ;;  %v14182_v44 = vld [vmem:[%s17833_s2 + $0x100] sm:$0xff]  }
  0x60   : > { %12266 = vmatpush3.bf16.msra.mxu1 %v14159_v47  ;;  %12015 = vmatprep.subr.bf16.mxu0 %v14160_v54  ;;  %v14185_v47 = vld [vmem:[%s17833_s2 + $0x108] sm:$0xff]   ;;  %v14190_v52 = vld [vmem:[%s17833_s2 + $0x120] sm:$0xff]  }
  0x61   : > { %12267 = vmatprep.subr.bf16.mxu1 %v14161_v55  ;;  %12021 = vmatprep.mubr.bf16.mxu0 %v622_v56  ;;  %v960_v56 = vld [vmem:[%s14648_s26 + $0x18] sm:$0xff] }
  0x62   : > { %12273 = vmatprep.mubr.bf16.mxu1 %v14804_v57 }
  0x63   : > { %12016 = vmatpush3.bf16.msra.mxu0 %v14160_v54  ;;  %v2643_v54 = vld [vmem:[%s14648_s26 + $0xcf] sm:$0xff] }
  0x64   : > { %12268 = vmatpush3.bf16.msra.mxu1 %v14161_v55  ;;  %12017 = vmatprep.subr.bf16.mxu0 %v14162_v58  ;;  %v14191_v55 = vld [vmem:[%s17833_s2 + $0x120] sm:$0xff]  }
  0x65   : > { %12269 = vmatprep.subr.bf16.mxu1 %v14163_v59 }
  0x67   : > { %12018 = vmatpush3.bf16.msra.mxu0 %v14162_v58  ;;  %v961_v58 = vld [vmem:[%s14648_s26 + $0x20] sm:$0xff] }
  0x68   : > { %12270 = vmatpush3.bf16.msra.mxu1 %v14163_v59  ;;  %12019 = vmatprep.subr.bf16.mxu0 %v14164_v60  ;;  %v2649_v59 = vpack.c.bf16 %v2643_v54, %v2642_v53  ;;  %v14210_v53 = vld [vmem:[%s17833_s2 + $0x170] sm:$0xff]  }
  0x69   : > { %12271 = vmatprep.subr.bf16.mxu1 %v14165_v61  ;;  %v14211_v54 = vld [vmem:[%s17833_s2 + $0x170] sm:$0xff]  }
  0x6b   : > { %12020 = vmatpush3.bf16.msra.mxu0 %v14164_v60  ;;  %v2807_v60 = vld [vmem:[%s14648_s26 + $0x78] sm:$0xff] }
  0x6c   : > { %12272 = vmatpush3.bf16.msra.mxu1 %v14165_v61  ;;  %12033 = vmatprep.subr.bf16.mxu0 %v14166_v0  ;;  %v2808_v61 = vld [vmem:[%s14648_s26 + $0x80] sm:$0xff] }
  0x6d   : > { %12285 = vmatprep.subr.bf16.mxu1 %v14167_v2  ;;  %v2819_v1 = vpack.c.bf16 %v2808_v61, %v2807_v60  ;;  %v1137_v60 = vld [vmem:[%s14648_s26 + $0x29] sm:$0xff]  ;;  %v1138_v61 = vld [vmem:[%s14648_s26 + $0x31] sm:$0xff] }
  0x6e   : > { %12022 = vmatmul.mubr.bf16.vlgmr.msra.gmra.mrb[0].mxu0 %v14831_v6 }
  0x6f   : > { %12034 = vmatpush3.bf16.msra.mxu0 %v14166_v0  ;;  %12274 = vmatmul.mubr.bf16.vlgmr.msra.gmra.mrb[0].mxu1 %v14837_v9  ;;  %v972_v0 = vpack.c.bf16 %v961_v58, %v960_v56  ;;  %v14213_v56 = vld [vmem:[%s17833_s2 + $0x178] sm:$0xff]   ;;  %v14214_v58 = vld [vmem:[%s17833_s2 + $0x180] sm:$0xff]  }
  0x70   : > { %12286 = vmatpush3.bf16.msra.mxu1 %v14167_v2  ;;  %12035 = vmatprep.subr.bf16.mxu0 %v14168_v7  ;;  %v14194_v2 = vld [vmem:[%s17833_s2 + $0x130] sm:$0xff]  }
  0x71   : > { %12287 = vmatprep.subr.bf16.mxu1 %v14169_v11  ;;  %12025 = vmatprep.mubr.bf16.mxu0 %v14843_v12 }
  0x72   : > { %12277 = vmatprep.mubr.bf16.mxu1 %v14850_v15 }
  0x73   : > { %12036 = vmatpush3.bf16.msra.mxu0 %v14168_v7  ;;  %v14198_v7 = vld [vmem:[%s17833_s2 + $0x140] sm:$0xff]  }
  0x74   : > { %12288 = vmatpush3.bf16.msra.mxu1 %v14169_v11  ;;  %12037 = vmatprep.subr.bf16.mxu0 %v14170_v14  ;;  %v964_v11 = vld [vmem:[%s14648_s26 + $0x38] sm:$0xff] }
  0x75   : > { %12289 = vmatprep.subr.bf16.mxu1 %v14171_v17 }
  0x76   : > { %12026 = vmatmul.mubr.bf16.gmra.mrb[4].mxu0 %v14862_v21 }
  0x77   : > { %12038 = vmatpush3.bf16.msra.mxu0 %v14170_v14  ;;  %12278 = vmatmul.mubr.bf16.gmra.mrb[4].mxu1 %v14866_v24  ;;  %v14200_v14 = vld [vmem:[%s17833_s2 + $0x148] sm:$0xff]  }
  0x78   : > { %12290 = vmatpush3.bf16.msra.mxu1 %v14171_v17  ;;  %12039 = vmatprep.subr.bf16.mxu0 %v14172_v26  ;;  %v2812_v17 = vld [vmem:[%s14648_s26 + $0xa0] sm:$0xff] }
  0x79   : > { %12291 = vmatprep.subr.bf16.mxu1 %v14173_v27  ;;  %12029 = vmatprep.mubr.bf16.mxu0 %v14875_v28 }
  0x7a   : > { %12281 = vmatprep.mubr.bf16.mxu1 %v14878_v29 }
  0x7b   : > { %12040 = vmatpush3.bf16.msra.mxu0 %v14172_v26  ;;  %v2814_v26 = vld [vmem:[%s14648_s26 + $0xb0] sm:$0xff] }
  0x7c   : > { %12292 = vmatpush3.bf16.msra.mxu1 %v14173_v27  ;;  %12041 = vmatprep.subr.bf16.mxu0 %v14174_v32  ;;  %v968_v27 = vld [vmem:[%s14648_s26 + $0x58] sm:$0xff]  ;;  %v2822_v31 = vpack.c.bf16 %v2814_v26, %v2813_v25  ;;  %v1145_v25 = vld [vmem:[%s14648_s26 + $0x69] sm:$0xff] }
  0x7d   : > { %12293 = vmatprep.subr.bf16.mxu1 %v14175_v35  ;;  %v1146_v26 = vld [vmem:[%s14648_s26 + $0x71] sm:$0xff] }
  0x7e   : > { %12030 = vmatmul.mubr.bf16.gmra.mrb[8].mxu0 %v627_v36 }
  0x7f   : > { %12042 = vmatpush3.bf16.msra.mxu0 %v14174_v32  ;;  %12282 = vmatmul.mubr.bf16.gmra.mrb[8].mxu1 %v2474_v37  ;;  %v2816_v32 = vld [vmem:[%s14648_s26 + $0xc0] sm:$0xff] }
  0x80   : > { %12294 = vmatpush3.bf16.msra.mxu1 %v14175_v35  ;;  %12043 = vmatprep.subr.bf16.mxu0 %v14176_v38 }
  0x81   : > { %12295 = vmatprep.subr.bf16.mxu1 %v14177_v39  ;;  %12049 = vmatprep.mubr.bf16.mxu0 %v14831_v6  ;;  %v963_v6 = vld [vmem:[%s14648_s26 + $0x30] sm:$0xff] }
  0x82   : > { %12301 = vmatprep.mubr.bf16.mxu1 %v14837_v9  ;;  %v14199_v9 = vld [vmem:[%s17833_s2 + $0x140] sm:$0xff]   ;;  %v973_v13 = vpack.c.bf16 %v963_v6, %v962_v5  ;;  %v14216_v5 = vld [vmem:[%s17833_s2 + $0x188] sm:$0xff]  }
  0x83   : > { %12044 = vmatpush3.bf16.msra.mxu0 %v14176_v38  ;;  %v970_v38 = vld [vmem:[%s14648_s26 + $0x68] sm:$0xff] }
  0x84   : > { %12296 = vmatpush3.bf16.msra.mxu1 %v14177_v39  ;;  %12045 = vmatprep.subr.bf16.mxu0 %v14178_v40  ;;  %v971_v39 = vld [vmem:[%s14648_s26 + $0x70] sm:$0xff]  ;;  %v14217_v6 = vld [vmem:[%s17833_s2 + $0x188] sm:$0xff]  }
  0x85   : > { %12297 = vmatprep.subr.bf16.mxu1 %v14179_v41 }
  0x87   : > { %12046 = vmatpush3.bf16.msra.mxu0 %v14178_v40  ;;  %v2817_v40 = vld [vmem:[%s14648_s26 + $0xc8] sm:$0xff] }
  0x88   : > { %12298 = vmatpush3.bf16.msra.mxu1 %v14179_v41  ;;  %12047 = vmatprep.subr.bf16.mxu0 %v14180_v42  ;;  %v2818_v41 = vld [vmem:[%s14648_s26 + $0xd0] sm:$0xff] }
  0x89   : > { %12299 = vmatprep.subr.bf16.mxu1 %v14181_v43 }
  0x8b   : > { %12048 = vmatpush3.bf16.msra.mxu0 %v14180_v42  ;;  %v14207_v42 = vld [vmem:[%s17833_s2 + $0x160] sm:$0xff]  }
  0x8c   : > { %12300 = vmatpush3.bf16.msra.mxu1 %v14181_v43  ;;  %12061 = vmatprep.subr.bf16.mxu0 %v14182_v44  ;;  %v1135_v43 = vld [vmem:[%s14648_s26 + $0x19] sm:$0xff] }
  0x8d   : > { %12313 = vmatprep.subr.bf16.mxu1 %v14183_v45 }
  0x8e   : > { %12050 = vmatmul.mubr.bf16.vlgmr.msra.gmra.mrb[0].mxu0 %v14843_v12  ;;  %v965_v12 = vld [vmem:[%s14648_s26 + $0x40] sm:$0xff] }
  0x8f   : > { %12062 = vmatpush3.bf16.msra.mxu0 %v14182_v44  ;;  %12302 = vmatmul.mubr.bf16.vlgmr.msra.gmra.mrb[0].mxu1 %v14850_v15  ;;  %v2811_v15 = vld [vmem:[%s14648_s26 + $0x98] sm:$0xff]  ;;  %v974_v19 = vpack.c.bf16 %v965_v12, %v964_v11  ;;  %v1136_v44 = vld [vmem:[%s14648_s26 + $0x21] sm:$0xff]  ;;  %v2988_v12 = vld [vmem:[%s14648_s26 + $0xa9] sm:$0xff] }
  0x90   : > { %12314 = vmatpush3.bf16.msra.mxu1 %v14183_v45  ;;  %12063 = vmatprep.subr.bf16.mxu0 %v14184_v46  ;;  %v2821_v22 = vpack.c.bf16 %v2812_v17, %v2811_v15  ;;  %v977_v45 = vpack.c.bf16 %v971_v39, %v970_v38  ;;  %v1142_v11 = vld [vmem:[%s14648_s26 + $0x51] sm:$0xff]  ;;  %v1144_v17 = vld [vmem:[%s14648_s26 + $0x61] sm:$0xff] }
  0x91   : > { %12315 = vmatprep.subr.bf16.mxu1 %v14185_v47  ;;  %12053 = vmatprep.mubr.bf16.mxu0 %v14862_v21  ;;  %v14202_v21 = vld [vmem:[%s17833_s2 + $0x150] sm:$0xff]   ;;  %v15091_v15 = vpack.c.bf16 %v1142_v11, %v1141_v10  ;;  %v14229_v38 = vld [vmem:[%s17833_s2 + $0x1b8] sm:$0xff]   ;;  %v14230_v39 = vld [vmem:[%s17833_s2 + $0x1c0] sm:$0xff]  }
  0x92   : > { %12305 = vmatprep.mubr.bf16.mxu1 %v14866_v24  ;;  %v14203_v24 = vld [vmem:[%s17833_s2 + $0x150] sm:$0xff]  }
  0x93   : > { %12064 = vmatpush3.bf16.msra.mxu0 %v14184_v46  ;;  %v2982_v46 = vld [vmem:[%s14648_s26 + $0x79] sm:$0xff]  ;;  %v3336_v10 = vld [vmem:[%s14648_s26 + $0xaa] sm:$0xff] }
  0x94   : > { %12316 = vmatpush3.bf16.msra.mxu1 %v14185_v47  ;;  %12065 = vmatprep.subr.bf16.mxu0 %v14186_v48  ;;  %v2824_v47 = vpack.c.bf16 %v2818_v41, %v2817_v40  ;;  %v14231_v40 = vld [vmem:[%s17833_s2 + $0x1c0] sm:$0xff]   ;;  %v14232_v41 = vld [vmem:[%s17833_s2 + $0x1c8] sm:$0xff]   ;;  %v3337_v11 = vld [vmem:[%s14648_s26 + $0xb2] sm:$0xff] }
  0x95   : > { %12317 = vmatprep.subr.bf16.mxu1 %v14187_v49 }
  0x96   : > { %12054 = vmatmul.mubr.bf16.gmra.mrb[4].mxu0 %v14875_v28  ;;  %v975_v28 = vpack.c.bf16 %v967_v23, %v966_v20  ;;  %v2991_v20 = vld [vmem:[%s14648_s26 + $0xc1] sm:$0xff] }
  0x97   : > { %12066 = vmatpush3.bf16.msra.mxu0 %v14186_v48  ;;  %12306 = vmatmul.mubr.bf16.gmra.mrb[4].mxu1 %v14878_v29  ;;  %v969_v29 = vld [vmem:[%s14648_s26 + $0x60] sm:$0xff] }
  0x98   : > { %12318 = vmatpush3.bf16.msra.mxu1 %v14187_v49  ;;  %12067 = vmatprep.subr.bf16.mxu0 %v14188_v50  ;;  %v976_v35 = vpack.c.bf16 %v969_v29, %v968_v27  ;;  %v2983_v48 = vld [vmem:[%s14648_s26 + $0x81] sm:$0xff]  ;;  %v2993_v29 = vld [vmem:[%s14648_s26 + $0xd1] sm:$0xff] }
  0x99   : > { %12319 = vmatprep.subr.bf16.mxu1 %v14189_v51  ;;  %12057 = vmatprep.mubr.bf16.mxu0 %v627_v36  ;;  %v14206_v36 = vld [vmem:[%s17833_s2 + $0x160] sm:$0xff]   ;;  %v14208_v49 = vld [vmem:[%s17833_s2 + $0x168] sm:$0xff]  }
  0x9a   : > { %12309 = vmatprep.mubr.bf16.mxu1 %v2474_v37  ;;  %v2823_v37 = vpack.c.bf16 %v2816_v32, %v2815_v30  ;;  %v14222_v27 = vld [vmem:[%s17833_s2 + $0x1a0] sm:$0xff]  }
  0x9b   : > { %12068 = vmatpush3.bf16.msra.mxu0 %v14188_v50  ;;  %v14209_v50 = vld [vmem:[%s17833_s2 + $0x168] sm:$0xff]   ;;  %v14223_v30 = vld [vmem:[%s17833_s2 + $0x1a0] sm:$0xff]  }
  0x9c   : > { %12320 = vmatpush3.bf16.msra.mxu1 %v14189_v51  ;;  %12069 = vmatprep.subr.bf16.mxu0 %v14190_v52  ;;  %v1147_v51 = vpack.c.bf16 %v1136_v44, %v1135_v43  ;;  %v14234_v43 = vld [vmem:[%s17833_s2 + $0x1d0] sm:$0xff]  }
  0x9d   : > { %12321 = vmatprep.subr.bf16.mxu1 %v14191_v55  ;;  %v14235_v44 = vld [vmem:[%s17833_s2 + $0x1d0] sm:$0xff]  }
  0x9e   : > { %12058 = vmatmul.mubr.bf16.gmra.mrb[8].mxu0 %v14804_v57  ;;  %v14196_v57 = vld [vmem:[%s17833_s2 + $0x138] sm:$0xff]  }
  0x9f   : > { %12070 = vmatpush3.bf16.msra.mxu0 %v14190_v52  ;;  %12310 = vmatmul.mubr.bf16.gmra.mrb[8].mxu1 %v2649_v59  ;;  %v15034_v52 = vpack.c.bf16 %v2983_v48, %v2982_v46  ;;  %v14215_v59 = vld [vmem:[%s17833_s2 + $0x180] sm:$0xff]   ;;  %v14237_v46 = vld [vmem:[%s17833_s2 + $0x1d8] sm:$0xff]  }
  0xa0   : > { %12322 = vmatpush3.bf16.msra.mxu1 %v14191_v55  ;;  %12071 = vmatprep.subr.bf16.mxu0 %v14192_v62  ;;  %v14212_v55 = vld [vmem:[%s17833_s2 + $0x178] sm:$0xff]  }
  0xa1   : > { %12323 = vmatprep.subr.bf16.mxu1 %v14193_v63  ;;  %12077 = vmatprep.mubr.bf16.mxu0 %v972_v0  ;;  %v1139_v0 = vld [vmem:[%s14648_s26 + $0x39] sm:$0xff] }
  0xa2   : > { %12329 = vmatprep.mubr.bf16.mxu1 %v2819_v1  ;;  %v1140_v1 = vld [vmem:[%s14648_s26 + $0x41] sm:$0xff]  ;;  %v3167_v48 = vld [vmem:[%s14648_s26 + $0xd9] sm:$0xff] }
  0xa3   : > { %12072 = vmatpush3.bf16.msra.mxu0 %v14192_v62  ;;  %v2984_v62 = vld [vmem:[%s14648_s26 + $0x89] sm:$0xff] }
  0xa4   : > { %12324 = vmatpush3.bf16.msra.mxu1 %v14193_v63  ;;  %12073 = vmatprep.subr.bf16.mxu0 %v14194_v2  ;;  %v2985_v63 = vld [vmem:[%s14648_s26 + $0x91] sm:$0xff] }
  0xa5   : > { %12325 = vmatprep.subr.bf16.mxu1 %v14195_v3 }
  0xa7   : > { %12074 = vmatpush3.bf16.msra.mxu0 %v14194_v2  ;;  %v15061_v2 = vpack.c.bf16 %v1138_v61, %v1137_v60  ;;  %v14242_v61 = vld [vmem:[%s17833_s2 + $0x1f0] sm:$0xff]  }
  0xa8   : > { %12326 = vmatpush3.bf16.msra.mxu1 %v14195_v3  ;;  %12075 = vmatprep.subr.bf16.mxu0 %v14196_v57  ;;  %v2986_v3 = vld [vmem:[%s14648_s26 + $0x99] sm:$0xff] }
  0xa9   : > { %12327 = vmatprep.subr.bf16.mxu1 %v14197_v4 }
  0xab   : > { %12076 = vmatpush3.bf16.msra.mxu0 %v14196_v57  ;;  %v15064_v57 = vpack.c.bf16 %v2985_v63, %v2984_v62  ;;  %v14243_v63 = vld [vmem:[%s17833_s2 + $0x1f0] sm:$0xff]  }
  0xac   : > { %12328 = vmatpush3.bf16.msra.mxu1 %v14197_v4  ;;  %12089 = vmatprep.subr.bf16.mxu0 %v14198_v7  ;;  %v2987_v4 = vld [vmem:[%s14648_s26 + $0xa1] sm:$0xff] }
  0xad   : > { %12341 = vmatprep.subr.bf16.mxu1 %v14199_v9 }
  0xae   : > { %12078 = vmatmul.mubr.bf16.vlgmr.msra.gmra.mrb[0].mxu0 %v973_v13  ;;  %v2989_v13 = vld [vmem:[%s14648_s26 + $0xb1] sm:$0xff] }
  0xaf   : > { %12090 = vmatpush3.bf16.msra.mxu0 %v14198_v7  ;;  %12330 = vmatmul.mubr.bf16.vlgmr.msra.gmra.mrb[0].mxu1 %v2820_v16  ;;  %v15073_v7 = vpack.c.bf16 %v1140_v1, %v1139_v0  ;;  %v1143_v16 = vld [vmem:[%s14648_s26 + $0x59] sm:$0xff] }
  0xb0   : > { %12342 = vmatpush3.bf16.msra.mxu1 %v14199_v9  ;;  %12091 = vmatprep.subr.bf16.mxu0 %v14200_v14  ;;  %v15079_v9 = vpack.c.bf16 %v2987_v4, %v2986_v3  ;;  %v15105_v23 = vpack.c.bf16 %v1144_v17, %v1143_v16  ;;  %v14245_v0 = vld [vmem:[%s17833_s2 + $0x1f8] sm:$0xff]   ;;  %v14246_v3 = vld [vmem:[%s17833_s2 + $0x200] sm:$0xff]   ;;  %v14250_v17 = vld [vmem:[%s17833_s2 + $0x210] sm:$0xff]  }
  0xb1   : > { %12343 = vmatprep.subr.bf16.mxu1 %v14201_v18  ;;  %12081 = vmatprep.mubr.bf16.mxu0 %v974_v19  ;;  %v2990_v19 = vld [vmem:[%s14648_s26 + $0xb9] sm:$0xff]  ;;  %v1492_v16 = vld [vmem:[%s14648_s26 + $0x62] sm:$0xff] }
  0xb2   : > { %12333 = vmatprep.mubr.bf16.mxu1 %v2821_v22  ;;  %v14221_v22 = vld [vmem:[%s17833_s2 + $0x198] sm:$0xff]   ;;  %v14247_v4 = vld [vmem:[%s17833_s2 + $0x200] sm:$0xff]  }
  0xb3   : > { %12092 = vmatpush3.bf16.msra.mxu0 %v14200_v14  ;;  %v14219_v14 = vld [vmem:[%s17833_s2 + $0x190] sm:$0xff]   ;;  %v1487_v1 = vld [vmem:[%s14648_s26 + $0x3a] sm:$0xff] }
  0xb4   : > { %12344 = vmatpush3.bf16.msra.mxu1 %v14201_v18  ;;  %12093 = vmatprep.subr.bf16.mxu0 %v14202_v21  ;;  %v15095_v18 = vpack.c.bf16 %v2989_v13, %v2988_v12  ;;  %v14248_v12 = vld [vmem:[%s17833_s2 + $0x208] sm:$0xff]  }
  0xb5   : > { %12345 = vmatprep.subr.bf16.mxu1 %v14203_v24  ;;  %v14249_v13 = vld [vmem:[%s17833_s2 + $0x208] sm:$0xff]  }
  0xb6   : > { %12082 = vmatmul.mubr.bf16.gmra.mrb[4].mxu0 %v975_v28  ;;  %v2992_v28 = vld [vmem:[%s14648_s26 + $0xc9] sm:$0xff] }
  0xb7   : > { %12094 = vmatpush3.bf16.msra.mxu0 %v14202_v21  ;;  %12334 = vmatmul.mubr.bf16.gmra.mrb[4].mxu1 %v2822_v31  ;;  %v14220_v21 = vld [vmem:[%s17833_s2 + $0x198] sm:$0xff]   ;;  %v15123_v31 = vpack.c.bf16 %v1146_v26, %v1145_v25  ;;  %v2999_v32 = vpack.c.bf16 %v2993_v29, %v2992_v28 }
  0xb8   : > { %12346 = vmatpush3.bf16.msra.mxu1 %v14203_v24  ;;  %12095 = vmatprep.subr.bf16.mxu0 %v14204_v33  ;;  %v15108_v24 = vpack.c.bf16 %v2991_v20, %v2990_v19  ;;  %v3338_v19 = vld [vmem:[%s14648_s26 + $0xba] sm:$0xff]  ;;  %v14251_v20 = vld [vmem:[%s17833_s2 + $0x210] sm:$0xff]  }
  0xb9   : > { %12347 = vmatprep.subr.bf16.mxu1 %v14205_v34  ;;  %12085 = vmatprep.mubr.bf16.mxu0 %v976_v35  ;;  %v14226_v35 = vld [vmem:[%s17833_s2 + $0x1b0] sm:$0xff]   ;;  %v14252_v25 = vld [vmem:[%s17833_s2 + $0x218] sm:$0xff]  }
  0xba   : > { %12337 = vmatprep.mubr.bf16.mxu1 %v2823_v37  ;;  %v14228_v37 = vld [vmem:[%s17833_s2 + $0x1b8] sm:$0xff]  }
  0xbb   : > { %12096 = vmatpush3.bf16.msra.mxu0 %v14204_v33  ;;  %v14224_v33 = vld [vmem:[%s17833_s2 + $0x1a8] sm:$0xff]   ;;  %v3341_v29 = vld [vmem:[%s14648_s26 + $0xd2] sm:$0xff] }
  0xbc   : > { %12348 = vmatpush3.bf16.msra.mxu1 %v14205_v34  ;;  %12097 = vmatprep.subr.bf16.mxu0 %v14206_v36  ;;  %v14225_v34 = vld [vmem:[%s17833_s2 + $0x1a8] sm:$0xff]  }
  0xbd   : > { %12349 = vmatprep.subr.bf16.mxu1 %v14207_v42 }
  0xbe   : > { %12086 = vmatmul.mubr.bf16.gmra.mrb[8].mxu0 %v977_v45  ;;  %v14236_v45 = vld [vmem:[%s17833_s2 + $0x1d8] sm:$0xff]  }
  0xbf   : > { %12098 = vmatpush3.bf16.msra.mxu0 %v14206_v36  ;;  %12338 = vmatmul.mubr.bf16.gmra.mrb[8].mxu1 %v2824_v47  ;;  %v14227_v36 = vld [vmem:[%s17833_s2 + $0x1b0] sm:$0xff]   ;;  %v14238_v47 = vld [vmem:[%s17833_s2 + $0x1e0] sm:$0xff]  }
  0xc0   : > { %12350 = vmatpush3.bf16.msra.mxu1 %v14207_v42  ;;  %12099 = vmatprep.subr.bf16.mxu0 %v14208_v49  ;;  %v14233_v42 = vld [vmem:[%s17833_s2 + $0x1c8] sm:$0xff]  }
  0xc1   : > { %12351 = vmatprep.subr.bf16.mxu1 %v14209_v50  ;;  %12105 = vmatprep.mubr.bf16.mxu0 %v1147_v51  ;;  %v1485_v51 = vld [vmem:[%s14648_s26 + $0x2a] sm:$0xff] }
  0xc2   : > { %12357 = vmatprep.mubr.bf16.mxu1 %v15034_v52 }
  0xc3   : > { %12100 = vmatpush3.bf16.msra.mxu0 %v14208_v49  ;;  %v14239_v49 = vld [vmem:[%s17833_s2 + $0x1e0] sm:$0xff]  }
  0xc4   : > { %12352 = vmatpush3.bf16.msra.mxu1 %v14209_v50  ;;  %12101 = vmatprep.subr.bf16.mxu0 %v14210_v53  ;;  %v3168_v50 = vld [vmem:[%s14648_s26 + $0xe1] sm:$0xff] }
  0xc5   : > { %12353 = vmatprep.subr.bf16.mxu1 %v14211_v54 }
  0xc7   : > { %12102 = vmatpush3.bf16.msra.mxu0 %v14210_v53  ;;  %v1486_v53 = vld [vmem:[%s14648_s26 + $0x32] sm:$0xff] }
  0xc8   : > { %12354 = vmatpush3.bf16.msra.mxu1 %v14211_v54  ;;  %12103 = vmatprep.subr.bf16.mxu0 %v14212_v55  ;;  %v3174_v54 = vpack.c.bf16 %v3168_v50, %v3167_v48  ;;  %v1497_v60 = vpack.c.bf16 %v1486_v53, %v1485_v51  ;;  %v14260_v50 = vld [vmem:[%s17833_s2 + $0x238] sm:$0xff]  }
  0xc9   : > { %12355 = vmatprep.subr.bf16.mxu1 %v14213_v56  ;;  %v14261_v51 = vld [vmem:[%s17833_s2 + $0x238] sm:$0xff]  }
  0xca   : > { %v1662_v53 = vld [vmem:[%s14648_s26 + $0x3b] sm:$0xff] }
  0xcb   : > { %12104 = vmatpush3.bf16.msra.mxu0 %v14212_v55  ;;  %v3332_v55 = vld [vmem:[%s14648_s26 + $0x8a] sm:$0xff] }
  0xcc   : > { %12356 = vmatpush3.bf16.msra.mxu1 %v14213_v56  ;;  %12117 = vmatprep.subr.bf16.mxu0 %v14214_v58  ;;  %v3333_v56 = vld [vmem:[%s14648_s26 + $0x92] sm:$0xff] }
  0xcd   : > { %12369 = vmatprep.subr.bf16.mxu1 %v14215_v59  ;;  %v3344_v62 = vpack.c.bf16 %v3333_v56, %v3332_v55  ;;  %v3509_v55 = vld [vmem:[%s14648_s26 + $0x9b] sm:$0xff]  ;;  %v3510_v56 = vld [vmem:[%s14648_s26 + $0xa3] sm:$0xff] }
  0xce   : > { %12106 = vmatmul.mubr.bf16.vlgmr.msra.gmra.mrb[0].mxu0 %v15061_v2 }
  0xcf   : > { %12118 = vmatpush3.bf16.msra.mxu0 %v14214_v58  ;;  %12358 = vmatmul.mubr.bf16.vlgmr.msra.gmra.mrb[0].mxu1 %v15064_v57  ;;  %v14240_v58 = vld [vmem:[%s17833_s2 + $0x1e8] sm:$0xff]  }
  0xd0   : > { %12370 = vmatpush3.bf16.msra.mxu1 %v14215_v59  ;;  %12119 = vmatprep.subr.bf16.mxu0 %v14216_v5  ;;  %v14241_v59 = vld [vmem:[%s17833_s2 + $0x1e8] sm:$0xff]  }
  0xd1   : > { %12371 = vmatprep.subr.bf16.mxu1 %v14217_v6  ;;  %12109 = vmatprep.mubr.bf16.mxu0 %v15073_v7 }
  0xd2   : > { %12361 = vmatprep.mubr.bf16.mxu1 %v15079_v9 }
  0xd3   : > { %12120 = vmatpush3.bf16.msra.mxu0 %v14216_v5  ;;  %v3335_v5 = vld [vmem:[%s14648_s26 + $0xa2] sm:$0xff] }
  0xd4   : > { %12372 = vmatpush3.bf16.msra.mxu1 %v14217_v6  ;;  %12121 = vmatprep.subr.bf16.mxu0 %v14218_v8  ;;  %v1489_v6 = vld [vmem:[%s14648_s26 + $0x4a] sm:$0xff] }
  0xd5   : > { %12373 = vmatprep.subr.bf16.mxu1 %v14219_v14 }
  0xd6   : > { %12110 = vmatmul.mubr.bf16.gmra.mrb[4].mxu0 %v15091_v15 }
  0xd7   : > { %12122 = vmatpush3.bf16.msra.mxu0 %v14218_v8  ;;  %12362 = vmatmul.mubr.bf16.gmra.mrb[4].mxu1 %v15095_v18 }
  0xd8   : > { %12374 = vmatpush3.bf16.msra.mxu1 %v14219_v14  ;;  %12123 = vmatprep.subr.bf16.mxu0 %v14220_v21 }
  0xd9   : > { %12375 = vmatprep.subr.bf16.mxu1 %v14221_v22  ;;  %12113 = vmatprep.mubr.bf16.mxu0 %v15105_v23 }
  0xda   : > { %12365 = vmatprep.mubr.bf16.mxu1 %v15108_v24 }
  0xdb   : > { %12124 = vmatpush3.bf16.msra.mxu0 %v14220_v21  ;;  %v3339_v21 = vld [vmem:[%s14648_s26 + $0xc2] sm:$0xff] }
  0xdc   : > { %12376 = vmatpush3.bf16.msra.mxu1 %v14221_v22  ;;  %12125 = vmatprep.subr.bf16.mxu0 %v14222_v27  ;;  %v1493_v22 = vld [vmem:[%s14648_s26 + $0x6a] sm:$0xff]  ;;  %v3347_v28 = vpack.c.bf16 %v3339_v21, %v3338_v19 }
  0xdd   : > { %12377 = vmatprep.subr.bf16.mxu1 %v14223_v30  ;;  %v3518_v19 = vld [vmem:[%s14648_s26 + $0xe3] sm:$0xff] }
  0xde   : > { %12114 = vmatmul.mubr.bf16.gmra.mrb[8].mxu0 %v15123_v31  ;;  %v4011_v21 = vld [vmem:[%s14648_s26 + $0xc6] sm:$0xff] }
  0xdf   : > { %12126 = vmatpush3.bf16.msra.mxu0 %v14222_v27  ;;  %12366 = vmatmul.mubr.bf16.gmra.mrb[8].mxu1 %v2999_v32  ;;  %v14253_v27 = vld [vmem:[%s17833_s2 + $0x218] sm:$0xff]  }
  0xe0   : > { %12378 = vmatpush3.bf16.msra.mxu1 %v14223_v30  ;;  %12127 = vmatprep.subr.bf16.mxu0 %v14224_v33 }
  0xe1   : > { %12379 = vmatprep.subr.bf16.mxu1 %v14225_v34  ;;  %12133 = vmatprep.mubr.bf16.mxu0 %v15061_v2  ;;  %v1488_v2 = vld [vmem:[%s14648_s26 + $0x42] sm:$0xff] }
  0xe2   : > { %12385 = vmatprep.mubr.bf16.mxu1 %v15064_v57  ;;  %v3334_v57 = vld [vmem:[%s14648_s26 + $0x9a] sm:$0xff]  ;;  %v1498_v8 = vpack.c.bf16 %v1488_v2, %v1487_v1 }
  0xe3   : > { %12128 = vmatpush3.bf16.msra.mxu0 %v14224_v33  ;;  %v14254_v33 = vld [vmem:[%s17833_s2 + $0x220] sm:$0xff]  }
  0xe4   : > { %12380 = vmatpush3.bf16.msra.mxu1 %v14225_v34  ;;  %12129 = vmatprep.subr.bf16.mxu0 %v14226_v35 }
  0xe5   : > { %12381 = vmatprep.subr.bf16.mxu1 %v14227_v36 }
  0xe7   : > { %12130 = vmatpush3.bf16.msra.mxu0 %v14226_v35  ;;  %v3342_v35 = vld [vmem:[%s14648_s26 + $0xda] sm:$0xff] }
  0xe8   : > { %12382 = vmatpush3.bf16.msra.mxu1 %v14227_v36  ;;  %12131 = vmatprep.subr.bf16.mxu0 %v14228_v37  ;;  %v14255_v36 = vld [vmem:[%s17833_s2 + $0x220] sm:$0xff]  }
  0xe9   : > { %12383 = vmatprep.subr.bf16.mxu1 %v14229_v38 }
  0xeb   : > { %12132 = vmatpush3.bf16.msra.mxu0 %v14228_v37  ;;  %v3343_v37 = vld [vmem:[%s14648_s26 + $0xe2] sm:$0xff] }
  0xec   : > { %12384 = vmatpush3.bf16.msra.mxu1 %v14229_v38  ;;  %12145 = vmatprep.subr.bf16.mxu0 %v14230_v39  ;;  %v1660_v38 = vld [vmem:[%s14648_s26 + $0x2b] sm:$0xff] }
  0xed   : > { %12397 = vmatprep.subr.bf16.mxu1 %v14231_v40 }
  0xee   : > { %12134 = vmatmul.mubr.bf16.vlgmr.msra.gmra.mrb[0].mxu0 %v15073_v7  ;;  %v1490_v7 = vld [vmem:[%s14648_s26 + $0x52] sm:$0xff] }
  0xef   : > { %12146 = vmatpush3.bf16.msra.mxu0 %v14230_v39  ;;  %12386 = vmatmul.mubr.bf16.vlgmr.msra.gmra.mrb[0].mxu1 %v15079_v9  ;;  %v3345_v9 = vpack.c.bf16 %v3335_v5, %v3334_v57  ;;  %v1499_v14 = vpack.c.bf16 %v1490_v7, %v1489_v6  ;;  %v1661_v39 = vld [vmem:[%s14648_s26 + $0x33] sm:$0xff]  ;;  %v1667_v57 = vld [vmem:[%s14648_s26 + $0x63] sm:$0xff]  ;;  %v1668_v7 = vld [vmem:[%s14648_s26 + $0x6b] sm:$0xff] }
  0xf0   : > { %12398 = vmatpush3.bf16.msra.mxu1 %v14231_v40  ;;  %12147 = vmatprep.subr.bf16.mxu0 %v14232_v41  ;;  %v3514_v5 = vld [vmem:[%s14648_s26 + $0xc3] sm:$0xff]  ;;  %v14264_v6 = vld [vmem:[%s17833_s2 + $0x50] sm:$0xff]  }
  0xf1   : > { %12399 = vmatprep.subr.bf16.mxu1 %v14233_v42  ;;  %12137 = vmatprep.mubr.bf16.mxu0 %v15091_v15  ;;  %v1491_v15 = vld [vmem:[%s14648_s26 + $0x5a] sm:$0xff] }
  0xf2   : > { %12389 = vmatprep.mubr.bf16.mxu1 %v15095_v18  ;;  %v3346_v18 = vpack.c.bf16 %v3337_v11, %v3336_v10  ;;  %v1500_v26 = vpack.c.bf16 %v1492_v16, %v1491_v15  ;;  %v3516_v10 = vld [vmem:[%s14648_s26 + $0xd3] sm:$0xff]  ;;  %v1670_v16 = vld [vmem:[%s14648_s26 + $0x7b] sm:$0xff] }
  0xf3   : > { %12148 = vmatpush3.bf16.msra.mxu0 %v14232_v41  ;;  %v3349_v41 = vpack.c.bf16 %v3343_v37, %v3342_v35  ;;  %v4017_v37 = vld [vmem:[%s14648_s26 + $0xf6] sm:$0xff] }
  0xf4   : > { %12400 = vmatpush3.bf16.msra.mxu1 %v14233_v42  ;;  %12149 = vmatprep.subr.bf16.mxu0 %v14234_v43  ;;  %v3507_v42 = vld [vmem:[%s14648_s26 + $0x8b] sm:$0xff] }
  0xf5   : > { %12401 = vmatprep.subr.bf16.mxu1 %v14235_v44 }
  0xf6   : > { %12138 = vmatmul.mubr.bf16.gmra.mrb[4].mxu0 %v15105_v23  ;;  %v1494_v23 = vld [vmem:[%s14648_s26 + $0x72] sm:$0xff] }
  0xf7   : > { %12150 = vmatpush3.bf16.msra.mxu0 %v14234_v43  ;;  %12390 = vmatmul.mubr.bf16.gmra.mrb[4].mxu1 %v15108_v24  ;;  %v3340_v24 = vld [vmem:[%s14648_s26 + $0xca] sm:$0xff]  ;;  %v1501_v30 = vpack.c.bf16 %v1494_v23, %v1493_v22  ;;  %v3508_v43 = vld [vmem:[%s14648_s26 + $0x93] sm:$0xff] }
  0xf8   : > { %12402 = vmatpush3.bf16.msra.mxu1 %v14235_v44  ;;  %12151 = vmatprep.subr.bf16.mxu0 %v14236_v45  ;;  %v3348_v34 = vpack.c.bf16 %v3341_v29, %v3340_v24  ;;  %v14256_v44 = vld [vmem:[%s17833_s2 + $0x228] sm:$0xff]   ;;  %v3519_v48 = vpack.c.bf16 %v3508_v43, %v3507_v42  ;;  %v4013_v29 = vld [vmem:[%s14648_s26 + $0xd6] sm:$0xff] }
  0xf9   : > { %12403 = vmatprep.subr.bf16.mxu1 %v14237_v46  ;;  %12141 = vmatprep.mubr.bf16.mxu0 %v15123_v31  ;;  %v1495_v31 = vld [vmem:[%s14648_s26 + $0x7a] sm:$0xff]  ;;  %v4012_v22 = vld [vmem:[%s14648_s26 + $0xce] sm:$0xff] }
  0xfa   : > { %12393 = vmatprep.mubr.bf16.mxu1 %v2999_v32  ;;  %v1496_v32 = vld [vmem:[%s14648_s26 + $0x82] sm:$0xff]  ;;  %v14273_v43 = vld [vmem:[%s17833_s2 + $0x18] sm:$0xff]  }
  0xfb   : > { %12152 = vmatpush3.bf16.msra.mxu0 %v14236_v45  ;;  %v1502_v40 = vpack.c.bf16 %v1496_v32, %v1495_v31  ;;  %v14257_v45 = vld [vmem:[%s17833_s2 + $0x228] sm:$0xff]   ;;  %v14270_v31 = vld [vmem:[%s17833_s2] sm:$0xff]  }
  0xfc   : > { %12404 = vmatpush3.bf16.msra.mxu1 %v14237_v46  ;;  %12153 = vmatprep.subr.bf16.mxu0 %v14238_v47  ;;  %v1672_v46 = vpack.c.bf16 %v1661_v39, %v1660_v38  ;;  %v4015_v32 = vld [vmem:[%s14648_s26 + $0xe6] sm:$0xff]  ;;  %v4018_v38 = vld [vmem:[%s14648_s26 + $0xfe] sm:$0xff]  ;;  %v14272_v39 = vld [vmem:[%s17833_s2 + $0x10] sm:$0xff]  }
  0xfd   : > { %12405 = vmatprep.subr.bf16.mxu1 %v14239_v49  ;;  %v4026_v42 = vpack.c.bf16 %v4018_v38, %v4017_v37  ;;  %v4312_v37 = vld [vmem:[%s14648_s26 + $0x10f] sm:$0xff] }
  0xfe   : > { %12142 = vmatmul.mubr.bf16.gmra.mrb[8].mxu0 %v15034_v52  ;;  %v14244_v52 = vld [vmem:[%s17833_s2 + $0x1f8] sm:$0xff]  }
  0xff   : > { %12154 = vmatpush3.bf16.msra.mxu0 %v14238_v47  ;;  %12394 = vmatmul.mubr.bf16.gmra.mrb[8].mxu1 %v3174_v54  ;;  %v14258_v47 = vld [vmem:[%s17833_s2 + $0x230] sm:$0xff]   ;;  %v1663_v54 = vld [vmem:[%s14648_s26 + $0x43] sm:$0xff] }
 0x100   : > { %12406 = vmatpush3.bf16.msra.mxu1 %v14239_v49  ;;  %12155 = vmatprep.subr.bf16.mxu0 %v14240_v58  ;;  %v14259_v49 = vld [vmem:[%s17833_s2 + $0x230] sm:$0xff]  }
 0x101   : > { %12407 = vmatprep.subr.bf16.mxu1 %v14241_v59  ;;  %12161 = vmatprep.mubr.bf16.mxu0 %v1497_v60  ;;  %v1665_v60 = vld [vmem:[%s14648_s26 + $0x53] sm:$0xff] }
 0x102   : > { %12413 = vmatprep.mubr.bf16.mxu1 %v3344_v62  ;;  %v3512_v62 = vld [vmem:[%s14648_s26 + $0xb3] sm:$0xff] }
 0x103   : > { %12156 = vmatpush3.bf16.msra.mxu0 %v14240_v58  ;;  %v14262_v58 = vld [vmem:[%s17833_s2 + $0x40] sm:$0xff]  }
 0x104   : > { %12408 = vmatpush3.bf16.msra.mxu1 %v14241_v59  ;;  %12157 = vmatprep.subr.bf16.mxu0 %v14242_v61  ;;  %v1664_v59 = vld [vmem:[%s14648_s26 + $0x4b] sm:$0xff] }
 0x105   : > { %12409 = vmatprep.subr.bf16.mxu1 %v14243_v63  ;;  %v1674_v1 = vpack.c.bf16 %v1665_v60, %v1664_v59  ;;  %v14278_v59 = vld [vmem:[%s17833_s2 + $0x80] sm:$0xff]  }
 0x106   : > { %v3981_v60 = vld [vmem:[%s14648_s26 + $0xe5] sm:$0xff] }
 0x107   : > { %12158 = vmatpush3.bf16.msra.mxu0 %v14242_v61  ;;  %v3511_v61 = vld [vmem:[%s14648_s26 + $0xab] sm:$0xff] }
 0x108   : > { %12410 = vmatpush3.bf16.msra.mxu1 %v14243_v63  ;;  %12159 = vmatprep.subr.bf16.mxu0 %v14244_v52  ;;  %v1673_v63 = vpack.c.bf16 %v1663_v54, %v1662_v53  ;;  %v3521_v2 = vpack.c.bf16 %v3512_v62, %v3511_v61  ;;  %v14275_v53 = vld [vmem:[%s17833_s2 + $0x28] sm:$0xff]   ;;  %v14276_v54 = vld [vmem:[%s17833_s2 + $0x30] sm:$0xff]  }
 0x109   : > { %12411 = vmatprep.subr.bf16.mxu1 %v14245_v0  ;;  %v3982_v61 = vld [vmem:[%s14648_s26 + $0xed] sm:$0xff] }
 0x10b   : > { %12160 = vmatpush3.bf16.msra.mxu0 %v14244_v52  ;;  %v3520_v52 = vpack.c.bf16 %v3510_v56, %v3509_v55  ;;  %v14277_v55 = vld [vmem:[%s17833_s2 + $0x38] sm:$0xff]  }
 0x10c   : > { %12412 = vmatpush3.bf16.msra.mxu1 %v14245_v0  ;;  %12173 = vmatprep.subr.bf16.mxu0 %v14246_v3  ;;  %v14263_v0 = vld [vmem:[%s17833_s2 + $0x48] sm:$0xff]   ;;  %v3979_v56 = vld [vmem:[%s14648_s26 + $0xd5] sm:$0xff] }
 0x10d   : > { %12425 = vmatprep.subr.bf16.mxu1 %v14247_v4 }
 0x10e   : > { %12162 = vmatmul.mubr.bf16.vlgmr.msra.gmra.mrb[0].mxu0 %v1498_v8  ;;  %v1669_v8 = vld [vmem:[%s14648_s26 + $0x73] sm:$0xff] }
 0x10f   : > { %12174 = vmatpush3.bf16.msra.mxu0 %v14246_v3  ;;  %12414 = vmatmul.mubr.bf16.vlgmr.msra.gmra.mrb[0].mxu1 %v3345_v9  ;;  %v1666_v3 = vld [vmem:[%s14648_s26 + $0x5b] sm:$0xff]  ;;  %v3515_v9 = vld [vmem:[%s14648_s26 + $0xcb] sm:$0xff] }
 0x110   : > { %12426 = vmatpush3.bf16.msra.mxu1 %v14247_v4  ;;  %12175 = vmatprep.subr.bf16.mxu0 %v14248_v12  ;;  %v3513_v4 = vld [vmem:[%s14648_s26 + $0xbb] sm:$0xff]  ;;  %v1675_v11 = vpack.c.bf16 %v1667_v57, %v1666_v3  ;;  %v3523_v15 = vpack.c.bf16 %v3516_v10, %v3515_v9  ;;  %v3985_v3 = vld [vmem:[%s14648_s26 + $0x105] sm:$0xff]  ;;  %v3986_v57 = vld [vmem:[%s14648_s26 + $0x10d] sm:$0xff] }
 0x111   : > { %12427 = vmatprep.subr.bf16.mxu1 %v14249_v13  ;;  %12165 = vmatprep.mubr.bf16.mxu0 %v1499_v14  ;;  %v1676_v14 = vpack.c.bf16 %v1669_v8, %v1668_v7  ;;  %v3993_v7 = vpack.c.bf16 %v3986_v57, %v3985_v3  ;;  %v3987_v8 = vld [vmem:[%s14648_s26 + $0x115] sm:$0xff]  ;;  %v14282_v9 = vld [vmem:[%s17833_s2 + $0xa0] sm:$0xff]   ;;  %v14314_v10 = vld [vmem:[%s17835_s4 + $0x48] sm:$0xff]  }
 0x112   : > { %12417 = vmatprep.mubr.bf16.mxu1 %v3346_v18  ;;  %v3517_v18 = vld [vmem:[%s14648_s26 + $0xdb] sm:$0xff] }
 0x113   : > { %12176 = vmatpush3.bf16.msra.mxu0 %v14248_v12  ;;  %v3522_v12 = vpack.c.bf16 %v3514_v5, %v3513_v4  ;;  %v3524_v24 = vpack.c.bf16 %v3518_v19, %v3517_v18  ;;  %v14312_v5 = vld [vmem:[%s17835_s4 + $0x40] sm:$0xff]   ;;  %v14318_v18 = vld [vmem:[%s17835_s4 + $0x58] sm:$0xff]   ;;  %v14284_v19 = vld [vmem:[%s17833_s2 + $0xb0] sm:$0xff]  }
 0x114   : > { %12428 = vmatpush3.bf16.msra.mxu1 %v14249_v13  ;;  %12177 = vmatprep.subr.bf16.mxu0 %v14250_v17  ;;  %v14265_v13 = vld [vmem:[%s17833_s2 + $0x58] sm:$0xff]  }
 0x115   : > { %12429 = vmatprep.subr.bf16.mxu1 %v14251_v20 }
 0x116   : > { %12166 = vmatmul.mubr.bf16.gmra.mrb[4].mxu0 %v1500_v26  ;;  %v4023_v26 = vpack.c.bf16 %v4012_v22, %v4011_v21  ;;  %v14285_v21 = vld [vmem:[%s17833_s2 + $0xb8] sm:$0xff]   ;;  %v14286_v22 = vld [vmem:[%s17833_s2 + $0xc0] sm:$0xff]  }
 0x117   : > { %12178 = vmatpush3.bf16.msra.mxu0 %v14250_v17  ;;  %12418 = vmatmul.mubr.bf16.gmra.mrb[4].mxu1 %v3347_v28  ;;  %v1671_v17 = vld [vmem:[%s14648_s26 + $0x83] sm:$0xff]  ;;  %v14269_v28 = vld [vmem:[%s17833_s2 + $0x78] sm:$0xff]  }
 0x118   : > { %12430 = vmatpush3.bf16.msra.mxu1 %v14251_v20  ;;  %12179 = vmatprep.subr.bf16.mxu0 %v14252_v25  ;;  %v14266_v20 = vld [vmem:[%s17833_s2 + $0x60] sm:$0xff]   ;;  %v1677_v23 = vpack.c.bf16 %v1671_v17, %v1670_v16  ;;  %v14283_v17 = vld [vmem:[%s17833_s2 + $0xa8] sm:$0xff]  }
 0x119   : > { %12431 = vmatprep.subr.bf16.mxu1 %v14253_v27  ;;  %12169 = vmatprep.mubr.bf16.mxu0 %v1501_v30  ;;  %v4014_v30 = vld [vmem:[%s14648_s26 + $0xde] sm:$0xff] }
 0x11a   : > { %12421 = vmatprep.mubr.bf16.mxu1 %v3348_v34  ;;  %v4024_v34 = vpack.c.bf16 %v4014_v30, %v4013_v29  ;;  %v14324_v29 = vld [vmem:[%s17835_s4 + $0x70] sm:$0xff]  }
 0x11b   : > { %12180 = vmatpush3.bf16.msra.mxu0 %v14252_v25  ;;  %v14267_v25 = vld [vmem:[%s17833_s2 + $0x68] sm:$0xff]  }
 0x11c   : > { %12432 = vmatpush3.bf16.msra.mxu1 %v14253_v27  ;;  %12181 = vmatprep.subr.bf16.mxu0 %v14254_v33  ;;  %v14268_v27 = vld [vmem:[%s17833_s2 + $0x70] sm:$0xff]  }
 0x11d   : > { %12433 = vmatprep.subr.bf16.mxu1 %v14255_v36 }
 0x11e   : > { %12170 = vmatmul.mubr.bf16.gmra.mrb[8].mxu0 %v1502_v40  ;;  %v4019_v40 = vld [vmem:[%s14648_s26 + $0x106] sm:$0xff] }
 0x11f   : > { %12182 = vmatpush3.bf16.msra.mxu0 %v14254_v33  ;;  %12422 = vmatmul.mubr.bf16.gmra.mrb[8].mxu1 %v3349_v41  ;;  %v4016_v33 = vld [vmem:[%s14648_s26 + $0xee] sm:$0xff] }
 0x120   : > { %12434 = vmatpush3.bf16.msra.mxu1 %v14255_v36  ;;  %12183 = vmatprep.subr.bf16.mxu0 %v14256_v44  ;;  %v4025_v35 = vpack.c.bf16 %v4016_v33, %v4015_v32  ;;  %v14271_v36 = vld [vmem:[%s17833_s2 + $0x8] sm:$0xff]   ;;  %v14288_v32 = vld [vmem:[%s17833_s2 + $0xd0] sm:$0xff]   ;;  %v14326_v33 = vld [vmem:[%s17835_s4 + $0x78] sm:$0xff]  }
 0x121   : > { %12435 = vmatprep.subr.bf16.mxu1 %v14257_v45  ;;  %12189 = vmatprep.mubr.bf16.mxu0 %v1672_v46  ;;  %v4020_v41 = vld [vmem:[%s14648_s26 + $0x10e] sm:$0xff]  ;;  %v4022_v46 = vld [vmem:[%s14648_s26 + $0x11e] sm:$0xff] }
 0x122   : > { %12441 = vmatprep.mubr.bf16.mxu1 %v3519_v48  ;;  %v3977_v48 = vld [vmem:[%s14648_s26 + $0xc5] sm:$0xff] }
 0x123   : > { %12184 = vmatpush3.bf16.msra.mxu0 %v14256_v44  ;;  %v4027_v44 = vpack.c.bf16 %v4020_v41, %v4019_v40  ;;  %v14289_v41 = vld [vmem:[%s17833_s2 + $0xd8] sm:$0xff]  }
 0x124   : > { %12436 = vmatpush3.bf16.msra.mxu1 %v14257_v45  ;;  %12185 = vmatprep.subr.bf16.mxu0 %v14258_v47  ;;  %v4021_v45 = vld [vmem:[%s14648_s26 + $0x116] sm:$0xff] }
 0x125   : > { %12437 = vmatprep.subr.bf16.mxu1 %v14259_v49 }
 0x127   : > { %12186 = vmatpush3.bf16.msra.mxu0 %v14258_v47  ;;  %v14274_v47 = vld [vmem:[%s17833_s2 + $0x20] sm:$0xff]  }
 0x128   : > { %12438 = vmatpush3.bf16.msra.mxu1 %v14259_v49  ;;  %12187 = vmatprep.subr.bf16.mxu0 %v14260_v50  ;;  %v3978_v49 = vld [vmem:[%s14648_s26 + $0xcd] sm:$0xff] }
 0x129   : > { %12439 = vmatprep.subr.bf16.mxu1 %v14261_v51 }
 0x12b   : > { %12188 = vmatpush3.bf16.msra.mxu0 %v14260_v50  ;;  %v4028_v50 = vpack.c.bf16 %v4022_v46, %v4021_v45  ;;  %v14291_v46 = vld [vmem:[%s17833_s2 + $0xe8] sm:$0xff]  }
 0x12c   : > { %12440 = vmatpush3.bf16.msra.mxu1 %v14261_v51  ;;  %12453 = vmatprep.subr.bf16.mxu0 %v14262_v58  ;;  %v3989_v51 = vpack.c.bf16 %v3978_v49, %v3977_v48  ;;  %v14292_v48 = vld [vmem:[%s17833_s2 + $0xf0] sm:$0xff]  }
 0x12d   : > { %12705 = vmatprep.subr.bf16.mxu1 %v14312_v5 }
 0x12e   : > { %12190 = vmatmul.mubr.bf16.vlgmr.msra.gmra.mrb[0].mxu0 %v1673_v63  ;;  %v3991_v63 = vpack.c.bf16 %v3982_v61, %v3981_v60  ;;  %v14295_v61 = vld [vmem:[%s17833_s2 + $0x108] sm:$0xff]  }
 0x12f   : > { %12442 = vmatmul.mubr.bf16.vlgmr.msra.gmra.mrb[0].mxu1 %v3520_v52  ;;  %12454 = vmatpush3.bf16.msra.mxu0 %v14262_v58  ;;  %v3980_v58 = vld [vmem:[%s14648_s26 + $0xdd] sm:$0xff]  ;;  %v14279_v52 = vld [vmem:[%s17833_s2 + $0x88] sm:$0xff]  }
 0x130   : > { %12455 = vmatprep.subr.bf16.mxu0 %v14263_v0  ;;  %12193 = vmatprep.mubr.bf16.mxu0 %v1674_v1  ;;  %v3990_v62 = vpack.c.bf16 %v3980_v58, %v3979_v56  ;;  %v3984_v1 = vld [vmem:[%s14648_s26 + $0xfd] sm:$0xff] }
 0x131   : > { %12445 = vmatprep.mubr.bf16.mxu1 %v3521_v2  ;;  %v14280_v2 = vld [vmem:[%s17833_s2 + $0x90] sm:$0xff]   ;;  %12706 = vmatpush3.bf16.msra.mxu1 %v14312_v5 }
 0x132   : > { %12707 = vmatprep.subr.bf16.mxu1 %v14314_v10 }
 0x133   : > { %12456 = vmatpush3.bf16.msra.mxu0 %v14263_v0  ;;  %v3983_v0 = vld [vmem:[%s14648_s26 + $0xf5] sm:$0xff] }
 0x134   : > { %12457 = vmatprep.subr.bf16.mxu0 %v14264_v6  ;;  %v3992_v4 = vpack.c.bf16 %v3984_v1, %v3983_v0 }
 0x135   : > { %12708 = vmatpush3.bf16.msra.mxu1 %v14314_v10 }
 0x136   : > { %12194 = vmatmul.mubr.bf16.gmra.mrb[4].mxu0 %v1675_v11  ;;  %v3988_v11 = vld [vmem:[%s14648_s26 + $0x11d] sm:$0xff] }
 0x137   : > { %12446 = vmatmul.mubr.bf16.gmra.mrb[4].mxu1 %v3522_v12  ;;  %12458 = vmatpush3.bf16.msra.mxu0 %v14264_v6  ;;  %v14281_v6 = vld [vmem:[%s17833_s2 + $0x98] sm:$0xff]   ;;  %v4303_v12 = vld [vmem:[%s14648_s26 + $0xc7] sm:$0xff] }
 0x138   : > { %12459 = vmatprep.subr.bf16.mxu0 %v14265_v13  ;;  %12197 = vmatprep.mubr.bf16.mxu0 %v1676_v14  ;;  %v3994_v14 = vpack.c.bf16 %v3988_v11, %v3987_v8 }
 0x139   : > { %12449 = vmatprep.mubr.bf16.mxu1 %v3523_v15  ;;  %v14316_v15 = vld [vmem:[%s17835_s4 + $0x50] sm:$0xff]  }
 0x13a   : > { %12709 = vmatprep.subr.bf16.mxu1 %v14316_v15 }
 0x13b   : > { %12460 = vmatpush3.bf16.msra.mxu0 %v14265_v13  ;;  %v4304_v13 = vld [vmem:[%s14648_s26 + $0xcf] sm:$0xff]  ;;  %12710 = vmatpush3.bf16.msra.mxu1 %v14316_v15 }
 0x13c   : > { %12461 = vmatprep.subr.bf16.mxu0 %v14266_v20  ;;  %v4315_v16 = vpack.c.bf16 %v4304_v13, %v4303_v12  ;;  %12711 = vmatprep.subr.bf16.mxu1 %v14318_v18  ;;  %v14297_v13 = vld [vmem:[%s17833_s2 + $0x118] sm:$0xff]  }
 0x13e   : > { %12198 = vmatmul.mubr.bf16.gmra.mrb[8].mxu0 %v1677_v23  ;;  %v4305_v23 = vld [vmem:[%s14648_s26 + $0xd7] sm:$0xff] }
 0x13f   : > { %12450 = vmatmul.mubr.bf16.gmra.mrb[8].mxu1 %v3524_v24  ;;  %12462 = vmatpush3.bf16.msra.mxu0 %v14266_v20  ;;  %v14320_v20 = vld [vmem:[%s17835_s4 + $0x60] sm:$0xff]   ;;  %v14322_v24 = vld [vmem:[%s17835_s4 + $0x68] sm:$0xff]  }
 0x140   : > { %12463 = vmatprep.subr.bf16.mxu0 %v14267_v25  ;;  %12469 = vmatprep.mubr.bf16.mxu0 %v4023_v26  ;;  %v4307_v26 = vld [vmem:[%s14648_s26 + $0xe7] sm:$0xff] }
 0x141   : > { %12712 = vmatpush3.bf16.msra.mxu1 %v14318_v18  ;;  %v4489_v18 = vld [vmem:[%s14648_s26 + $0x12f] sm:$0xff] }
 0x142   : > { %12713 = vmatprep.subr.bf16.mxu1 %v14320_v20 }
 0x143   : > { %12464 = vmatpush3.bf16.msra.mxu0 %v14267_v25  ;;  %v4306_v25 = vld [vmem:[%s14648_s26 + $0xdf] sm:$0xff] }
 0x144   : > { %12465 = vmatprep.subr.bf16.mxu0 %v14268_v27 }
 0x145   : > { %12714 = vmatpush3.bf16.msra.mxu1 %v14320_v20 }
 0x146   : > { %12715 = vmatprep.subr.bf16.mxu1 %v14322_v24 }
 0x147   : > { %12466 = vmatpush3.bf16.msra.mxu0 %v14268_v27  ;;  %v4308_v27 = vld [vmem:[%s14648_s26 + $0xef] sm:$0xff] }
 0x148   : > { %12467 = vmatprep.subr.bf16.mxu0 %v14269_v28  ;;  %v15426_v30 = vpack.c.bf16 %v4308_v27, %v4307_v26 }
 0x149   : > { %12716 = vmatpush3.bf16.msra.mxu1 %v14322_v24 }
 0x14a   : > { %12717 = vmatprep.subr.bf16.mxu1 %v14324_v29 }
 0x14b   : > { %12468 = vmatpush3.bf16.msra.mxu0 %v14269_v28  ;;  %v4316_v28 = vpack.c.bf16 %v4306_v25, %v4305_v23  ;;  %v4654_v23 = vld [vmem:[%s14648_s26 + $0xe0] sm:$0xff] }
 0x14c   : > { %12481 = vmatprep.subr.bf16.mxu0 %v14270_v31 }
 0x14d   : > { %12718 = vmatpush3.bf16.msra.mxu1 %v14324_v29 }
 0x14e   : > { %12470 = vmatmul.mubr.bf16.vlgmr.msra.gmra.mrb[12].mxu0 %v4024_v34  ;;  %v4309_v34 = vld [vmem:[%s14648_s26 + $0xf7] sm:$0xff]  ;;  %12719 = vmatprep.subr.bf16.mxu1 %v14326_v33 }
 0x14f   : > { %12482 = vmatpush3.bf16.msra.mxu0 %v14270_v31  ;;  %12473 = vmatprep.mubr.bf16.mxu0 %v4025_v35  ;;  %v14287_v31 = vld [vmem:[%s17833_s2 + $0xc8] sm:$0xff]   ;;  %v4310_v35 = vld [vmem:[%s14648_s26 + $0xff] sm:$0xff] }
 0x150   : > { %12483 = vmatprep.subr.bf16.mxu0 %v14271_v36  ;;  %v4318_v38 = vpack.c.bf16 %v4310_v35, %v4309_v34 }
 0x151   : > { %12720 = vmatpush3.bf16.msra.mxu1 %v14326_v33 }
 0x153   : > { %12484 = vmatpush3.bf16.msra.mxu0 %v14271_v36  ;;  %v4311_v36 = vld [vmem:[%s14648_s26 + $0x107] sm:$0xff] }
 0x154   : > { %12485 = vmatprep.subr.bf16.mxu0 %v14272_v39  ;;  %v15445_v40 = vpack.c.bf16 %v4312_v37, %v4311_v36 }
 0x156   : > { %12474 = vmatmul.mubr.bf16.gmra.mrb[16].mxu0 %v4026_v42  ;;  %v4313_v42 = vld [vmem:[%s14648_s26 + $0x117] sm:$0xff] }
 0x157   : > { %12486 = vmatpush3.bf16.msra.mxu0 %v14272_v39  ;;  %12477 = vmatprep.mubr.bf16.mxu0 %v4027_v44  ;;  %v14328_v39 = vld [vmem:[%s17835_s4] sm:$0xff]  }
 0x158   : > { %12487 = vmatprep.subr.bf16.mxu0 %v14273_v43  ;;  %12733 = vmatprep.subr.bf16.mxu1 %v14328_v39  ;;  %v14290_v44 = vld [vmem:[%s17833_s2 + $0xe0] sm:$0xff]  }
 0x15b   : > { %12488 = vmatpush3.bf16.msra.mxu0 %v14273_v43  ;;  %v4314_v43 = vld [vmem:[%s14648_s26 + $0x11f] sm:$0xff] }
 0x15c   : > { %12489 = vmatprep.subr.bf16.mxu0 %v14274_v47  ;;  %v15456_v45 = vpack.c.bf16 %v4314_v43, %v4313_v42 }
 0x15e   : > { %12478 = vmatmul.mubr.bf16.gmra.mrb[20].mxu0 %v4028_v50  ;;  %v14293_v50 = vld [vmem:[%s17833_s2 + $0xf8] sm:$0xff]  }
 0x15f   : > { %12490 = vmatpush3.bf16.msra.mxu0 %v14274_v47  ;;  %12497 = vmatprep.mubr.bf16.mxu0 %v3989_v51  ;;  %v1866_v47 = vlaneseq  ;;  %v14568_v51 = vmov 0.0  }
 0x160   : > { %12491 = vmatprep.subr.bf16.mxu0 %v14275_v53  ;;  %278 = vst [vmem:[#allocation2] sm:$0xff] %v14568_v51  ;;  %279 = vst [vmem:[#allocation2 + $0x8] sm:$0xff] %v14568_v51 }
 0x161   : > { %v15465_v49 = vshrl.u32 %v1866_v47, 7  ;;  %280 = vst [vmem:[#allocation2 + $0x10] sm:$0xff] %v14568_v51  ;;  %281 = vst [vmem:[#allocation2 + $0x138] sm:$0xff] %v14568_v51 }
 0x162   : > { %282 = vst [vmem:[#allocation2 + $0x140] sm:$0xff] %v14568_v51  ;;  %283 = vst [vmem:[#allocation2 + $0x148] sm:$0xff] %v14568_v51 }
 0x163   : > { %12492 = vmatpush3.bf16.msra.mxu0 %v14275_v53  ;;  %17861 = vst [vmem:[#allocation3_spill] sm:$0xff] %v15465_v49  ;;  %v15471_v53 = vadd.s32 16, %v15465_v49  ;;  %v15495_v1 = vadd.s32 96, %v15465_v49  ;;  %v15502_v57 = vadd.s32 8, %v15465_v49  ;;  %v15508_v5 = vadd.s32 48, %v15465_v49 }
 0x164   : > { %12493 = vmatprep.subr.bf16.mxu0 %v14276_v54  ;;  %v15549_v25 = vadd.s32 32, %v15465_v49 }
 0x165   : > { %17862 = vst [vmem:[#allocation4_spill] sm:$0xff] %v15471_v53  ;;  %v15480_v56 = vmul.u32.u64.low 3817748708, %v15471_v53  ;;  %v15481_v58 = vmul.u32.u64.high 3817748708, %v15471_v53, %v15480_v56  ;;  %17864 = vst [vmem:[#allocation6_spill] sm:$0xff] %v15502_v57  ;;  %v15523_v12 = vadd.s32 96, %v15502_v57 }
 0x166   : > { %17865 = vst [vmem:[#allocation7_spill] sm:$0xff] %v15508_v5  ;;  %17866 = vst [vmem:[#allocation8_spill] sm:$0xff] %v15549_v25  ;;  %v15566_v34 = vmul.u32.u64.low 3817748708, %v15549_v25  ;;  %v15567_v35 = vmul.u32.u64.high 3817748708, %v15549_v25, %v15566_v34  ;;  %v15570_v37 = vadd.s32 96, %v15549_v25 }
 0x167   : > { %12494 = vmatpush3.bf16.msra.mxu0 %v14276_v54  ;;  %v14294_v54 = vld [vmem:[%s17833_s2 + $0x100] sm:$0xff]  }
 0x168   : > { %12495 = vmatprep.subr.bf16.mxu0 %v14277_v55  ;;  %v5858_v60 = vld [vmem:[#allocation2 + $0xe] sm:$0xff] }
 0x16b   : > { %12496 = vmatpush3.bf16.msra.mxu0 %v14277_v55  ;;  %v15477_v55 = vadd.s32 96, %v15471_v53 }
 0x16c   : > { %12509 = vmatprep.subr.bf16.mxu0 %v14278_v59 }
 0x16e   : > { %12498 = vmatmul.mubr.bf16.vlgmr.msra.gmra.mrb[12].mxu0 %v3990_v62 }
 0x16f   : > { %12510 = vmatpush3.bf16.msra.mxu0 %v14278_v59  ;;  %12501 = vmatprep.mubr.bf16.mxu0 %v3991_v63  ;;  %v5857_v59 = vld [vmem:[#allocation2 + $0x6] sm:$0xff]  ;;  %v15487_v63 = vadd.s32 24, %v15465_v49 }
 0x170   : > { %12511 = vmatprep.subr.bf16.mxu0 %v14279_v52  ;;  %v5869_v62 = vpack.c.bf16 %v5858_v60, %v5857_v59  ;;  %v14300_v60 = vld [vmem:[%s17833_s2 + $0x130] sm:$0xff]  }
 0x171   : > { %17863 = vst [vmem:[#allocation5_spill] sm:$0xff] %v15487_v63  ;;  %v15519_v10 = vmul.u32.u64.low 3817748708, %v15487_v63  ;;  %v15520_v11 = vmul.u32.u64.high 3817748708, %v15487_v63, %v15519_v10 }
 0x172   : > { %12721 = vmatprep.mubr.bf16.mxu1 %v5869_v62 }
 0x173   : > { %12512 = vmatpush3.bf16.msra.mxu0 %v14279_v52  ;;  %v15491_v52 = vmul.u32.u64.low 3817748708, %v15477_v55  ;;  %v15492_v0 = vmul.u32.u64.high 3817748708, %v15477_v55, %v15491_v52 }
 0x174   : > { %12513 = vmatprep.subr.bf16.mxu0 %v14280_v2 }
 0x175   : > { %v3753_v24 = vshrl.u32 %v15492_v0, 4 }
 0x176   : > { %12502 = vmatmul.mubr.bf16.gmra.mrb[16].mxu0 %v3992_v4  ;;  %v14296_v4 = vld [vmem:[%s17833_s2 + $0x110] sm:$0xff]  }
 0x177   : > { %12514 = vmatpush3.bf16.msra.mxu0 %v14280_v2  ;;  %12505 = vmatprep.mubr.bf16.mxu0 %v3993_v7  ;;  %v15498_v2 = vmul.u32.u64.low 3817748708, %v15465_v49  ;;  %v15499_v3 = vmul.u32.u64.high 3817748708, %v15465_v49, %v15498_v2  ;;  %v15514_v7 = vmul.u32.u64.low 3817748708, %v15495_v1  ;;  %v15515_v8 = vmul.u32.u64.high 3817748708, %v15495_v1, %v15514_v7 }
 0x178   : > { %12515 = vmatprep.subr.bf16.mxu0 %v14281_v6  ;;  %v3754_v39 = vmul.u32 18, %v3753_v24  ;;  %v14301_v7 = vld [vmem:[%s17833_s2 + $0x138] sm:$0xff]  }
 0x179   : > { %v1885_v27 = vshrl.u32 %v15499_v3, 4  ;;  %v3731_v43 = vshrl.u32 %v15515_v8, 4 }
 0x17a   : > { %v15594_v56 = vsub.s32 %v15477_v55, %v3754_v39 }
 0x17b   : > { %12516 = vmatpush3.bf16.msra.mxu0 %v14281_v6  ;;  %v15511_v6 = vadd.s32 96, %v15487_v63  ;;  %v1886_v42 = vmul.u32 18, %v1885_v27  ;;  %v3732_v62 = vmul.u32 18, %v3731_v43 }
 0x17c   : > { %12517 = vmatprep.subr.bf16.mxu0 %v14282_v9  ;;  %v15619_v10 = vadd.s32 18, %v15594_v56  ;;  %vm3859_vm2 = vcmp.ne.s32.totalorder %v15594_v56, 0  ;;  %vm3871_vm3 = vcmp.lt.s32.totalorder %v15594_v56, 0 }
 0x17d   : > { %v15637_v24 = vsub.s32 %v15495_v1, %v3732_v62  ;;  %vm15890_vm13 = vmand %vm3871_vm3, %vm3859_vm2 }
 0x17e   : > { %12506 = vmatmul.mubr.bf16.gmra.mrb[20].mxu0 %v3994_v14  ;;  %v15529_v14 = vmul.u32.u64.low 3817748708, %v15502_v57  ;;  %v15530_v15 = vmul.u32.u64.high 3817748708, %v15502_v57, %v15529_v14 }
 0x17f   : > { %12518 = vmatpush3.bf16.msra.mxu0 %v14282_v9  ;;  %12525 = vmatprep.mubr.bf16.mxu0 %v4315_v16  ;;  %v1907_v9 = vshrl.u32 %v15481_v58, 4  ;;  %v15533_v16 = vadd.s32 96, %v15508_v5  ;;  %vm17886_vm2 = vcmp.ne.s32.totalorder %v15637_v24, 0  ;;  %vm17887_vm3 = vcmp.lt.s32.totalorder %v15637_v24, 0 }
 0x180   : > { %12519 = vmatprep.subr.bf16.mxu0 %v14283_v17 }
 0x181   : > { %v1908_v26 = vmul.u32 18, %v1907_v9  ;;  %v15616_v9 = vadd.s32 40, %v15465_v49 }
 0x183   : > { %12520 = vmatpush3.bf16.msra.mxu0 %v14283_v17  ;;  %v4488_v17 = vld [vmem:[%s14648_s26 + $0x127] sm:$0xff]  ;;  %17868 = vst [vmem:[#allocation10_spill] sm:$0xff] %v15616_v9 }
 0x184   : > { %12521 = vmatprep.subr.bf16.mxu0 %v14284_v19  ;;  %v4495_v36 = vpack.c.bf16 %v4489_v18, %v4488_v17  ;;  %v4656_v17 = vld [vmem:[%s14648_s26 + $0xf0] sm:$0xff] }
 0x187   : > { %12522 = vmatpush3.bf16.msra.mxu0 %v14284_v19  ;;  %v15538_v19 = vmul.u32.u64.low 3817748708, %v15511_v6  ;;  %v15539_v20 = vmul.u32.u64.high 3817748708, %v15511_v6, %v15538_v19 }
 0x188   : > { %12523 = vmatprep.subr.bf16.mxu0 %v14285_v21 }
 0x189   : > { %v3764_v47 = vshrl.u32 %v15539_v20, 4 }
 0x18b   : > { %12524 = vmatpush3.bf16.msra.mxu0 %v14285_v21  ;;  %v14298_v21 = vld [vmem:[%s17833_s2 + $0x120] sm:$0xff]   ;;  %v3765_v8 = vmul.u32 18, %v3764_v47  ;;  %v14303_v47 = vld [vmem:[%s17833_s2 + $0x148] sm:$0xff]  }
 0x18c   : > { %12537 = vmatprep.subr.bf16.mxu0 %v14286_v22 }
 0x18d   : > { %v15651_v1 = vsub.s32 %v15511_v6, %v3765_v8 }
 0x18e   : > { %12526 = vmatmul.mubr.bf16.vlgmr.msra.gmra.mrb[12].mxu0 %v4316_v28 }
 0x18f   : > { %12538 = vmatpush3.bf16.msra.mxu0 %v14286_v22  ;;  %12529 = vmatprep.mubr.bf16.mxu0 %v15426_v30  ;;  %v4653_v22 = vld [vmem:[%s14648_s26 + $0xd8] sm:$0xff]  ;;  %vm17894_vm9 = vcmp.ne.s32.totalorder %v15651_v1, 0  ;;  %vm17895_vm12 = vcmp.lt.s32.totalorder %v15651_v1, 0 }
 0x190   : > { %12539 = vmatprep.subr.bf16.mxu0 %v14287_v31  ;;  %vm15931_vm15 = vmand %vm17895_vm12, %vm17894_vm9 }
 0x193   : > { %12540 = vmatpush3.bf16.msra.mxu0 %v14287_v31 }
 0x194   : > { %12541 = vmatprep.subr.bf16.mxu0 %v14288_v32 }
 0x196   : > { %12530 = vmatmul.mubr.bf16.gmra.mrb[16].mxu0 %v4318_v38 }
 0x197   : > { %12542 = vmatpush3.bf16.msra.mxu0 %v14288_v32  ;;  %12533 = vmatprep.mubr.bf16.mxu0 %v15445_v40  ;;  %v15562_v32 = vmul.u32.u64.low 3817748708, %v15533_v16  ;;  %v15563_v33 = vmul.u32.u64.high 3817748708, %v15533_v16, %v15562_v32 }
 0x198   : > { %12543 = vmatprep.subr.bf16.mxu0 %v14289_v41 }
 0x199   : > { %v3797_v3 = vshrl.u32 %v15563_v33, 4 }
 0x19b   : > { %12544 = vmatpush3.bf16.msra.mxu0 %v14289_v41  ;;  %v14299_v41 = vld [vmem:[%s17833_s2 + $0x128] sm:$0xff]  }
 0x19c   : > { %12545 = vmatprep.subr.bf16.mxu0 %v14290_v44 }
 0x19e   : > { %12534 = vmatmul.mubr.bf16.gmra.mrb[20].mxu0 %v15456_v45 }
 0x19f   : > { %12546 = vmatpush3.bf16.msra.mxu0 %v14290_v44  ;;  %12553 = vmatprep.mubr.bf16.mxu0 %v4316_v28  ;;  %v15554_v28 = vmul.u32.u64.low 3817748708, %v15523_v12  ;;  %v15555_v29 = vmul.u32.u64.high 3817748708, %v15523_v12, %v15554_v28  ;;  %v1918_v44 = vshrl.u32 %v15520_v11, 4 }
 0x1a0   : > { %12547 = vmatprep.subr.bf16.mxu0 %v14291_v46  ;;  %v14302_v28 = vld [vmem:[%s17833_s2 + $0x140] sm:$0xff]  }
 0x1a1   : > { %v3742_v58 = vshrl.u32 %v15555_v29, 4  ;;  %v1919_v52 = vmul.u32 18, %v1918_v44 }
 0x1a3   : > { %12548 = vmatpush3.bf16.msra.mxu0 %v14291_v46  ;;  %v15582_v46 = vsub.s32 %v15471_v53, %v1908_v26  ;;  %v3743_v11 = vmul.u32 18, %v3742_v58  ;;  %v3798_v26 = vmul.u32 18, %v3797_v3  ;;  %v15643_v29 = vsub.s32 %v15487_v63, %v1919_v52  ;;  %v4660_v58 = vld [vmem:[%s14648_s26 + $0x110] sm:$0xff] }
 0x1a4   : > { %12549 = vmatprep.subr.bf16.mxu0 %v14292_v48  ;;  %v14304_v52 = vld [vmem:[%s17833_s2 + $0x150] sm:$0xff]   ;;  %v17904_v63 = vmov 0 }
 0x1a5   : > { %v15608_v0 = vadd.s32 18, %v15582_v46  ;;  %v15654_v33 = vsub.s32 %v15523_v12, %v3743_v11  ;;  %v15666_v6 = vadd.s32 18, %v15643_v29  ;;  %vm2013_vm0 = vcmp.ne.s32.totalorder %v15582_v46, 0 }
 0x1a6   : > { %vm2025_vm1 = vcmp.lt.s32.totalorder %v15582_v46, 0 }
 0x1a7   : > { %12550 = vmatpush3.bf16.msra.mxu0 %v14292_v48  ;;  %v15678_v43 = vadd.s32 18, %v15654_v33  ;;  %vm15878_vm11 = vmand %vm2025_vm1, %vm2013_vm0  ;;  %vm17891_vm1 = vcmp.lt.s32.totalorder %v15643_v29, 0 }
 0x1a8   : > { %12551 = vmatprep.subr.bf16.mxu0 %v14293_v50 }
 0x1ab   : > { %12552 = vmatpush3.bf16.msra.mxu0 %v14293_v50 }
 0x1ac   : > { %12565 = vmatprep.subr.bf16.mxu0 %v14294_v54 }
 0x1ae   : > { %12554 = vmatmul.mubr.bf16.vlgmr.msra.gmra.mrb[12].mxu0 %v15426_v30  ;;  %v15558_v30 = vmul.u32.u64.low 3817748708, %v15508_v5  ;;  %v15559_v31 = vmul.u32.u64.high 3817748708, %v15508_v5, %v15558_v30 }
 0x1af   : > { %12566 = vmatpush3.bf16.msra.mxu0 %v14294_v54  ;;  %12557 = vmatprep.mubr.bf16.mxu0 %v4318_v38  ;;  %v4665_v38 = vpack.c.bf16 %v4654_v23, %v4653_v22  ;;  %v15590_v51 = vmul.u32.u64.low 3817748708, %v15570_v37  ;;  %v15591_v54 = vmul.u32.u64.high 3817748708, %v15570_v37, %v15590_v51  ;;  %v4657_v22 = vld [vmem:[%s14648_s26 + $0xf8] sm:$0xff]  ;;  %v4658_v23 = vld [vmem:[%s14648_s26 + $0x100] sm:$0xff] }
 0x1b0   : > { %12567 = vmatprep.subr.bf16.mxu0 %v14295_v61  ;;  %v1951_v55 = vshrl.u32 %v15559_v31, 4  ;;  %v4667_v39 = vpack.c.bf16 %v4658_v23, %v4657_v22 }
 0x1b1   : > { %v3775_v31 = vshrl.u32 %v15591_v54, 4  ;;  %v4659_v54 = vld [vmem:[%s14648_s26 + $0x108] sm:$0xff] }
 0x1b2   : > { %v1952_v19 = vmul.u32 18, %v1951_v55  ;;  %v4661_v55 = vld [vmem:[%s14648_s26 + $0x118] sm:$0xff] }
 0x1b3   : > { %12568 = vmatpush3.bf16.msra.mxu0 %v14295_v61  ;;  %v15604_v61 = vsub.s32 %v15465_v49, %v1886_v42  ;;  %v15675_v42 = vadd.s32 18, %v15651_v1  ;;  %v3776_v44 = vmul.u32 18, %v3775_v31 }
 0x1b4   : > { %12569 = vmatprep.subr.bf16.mxu0 %v14296_v4  ;;  %v15657_v34 = vsub.s32 %v15508_v5, %v1952_v19 }
 0x1b5   : > { %v15628_v18 = vadd.s32 18, %v15604_v61  ;;  %vm2011_vm4 = vcmp.ne.s32.totalorder %v15604_v61, 0  ;;  %vm2023_vm5 = vcmp.lt.s32.totalorder %v15604_v61, 0 }
 0x1b6   : > { %12558 = vmatmul.mubr.bf16.gmra.mrb[16].mxu0 %v15445_v40  ;;  %v15573_v40 = vadd.s32 56, %v15465_v49  ;;  %vm15898_vm0 = vmand %vm2023_vm5, %vm2011_vm4  ;;  %vm17890_vm5 = vcmp.ne.s32.totalorder %v15643_v29, 0  ;;  %vm17906_vm9 = vcmp.ne.s32.totalorder %v15657_v34, 0  ;;  %vm17907_vm12 = vcmp.lt.s32.totalorder %v15657_v34, 0 }
 0x1b7   : > { %12570 = vmatpush3.bf16.msra.mxu0 %v14296_v4  ;;  %12561 = vmatprep.mubr.bf16.mxu0 %v15456_v45  ;;  %v1896_v45 = vshrl.u32 %v15530_v15, 4  ;;  %v1929_v4 = vshrl.u32 %v15567_v35, 4  ;;  %v4655_v15 = vld [vmem:[%s14648_s26 + $0xe8] sm:$0xff]  ;;  %vm15915_vm4 = vmand %vm17887_vm3, %vm17886_vm2 }
 0x1b8   : > { %12571 = vmatprep.subr.bf16.mxu0 %v14297_v13  ;;  %17867 = vst [vmem:[#allocation9_spill] sm:$0xff] %v15573_v40  ;;  %v15586_v48 = vmul.u32.u64.low 3817748708, %v15573_v40  ;;  %v15587_v50 = vmul.u32.u64.high 3817748708, %v15573_v40, %v15586_v48  ;;  %v15598_v59 = vadd.s32 96, %v15573_v40  ;;  %v4666_v35 = vpack.c.bf16 %v4656_v17, %v4655_v15  ;;  %vm15923_vm14 = vmand %vm17891_vm1, %vm17890_vm5 }
 0x1b9   : > { %v1897_v2 = vmul.u32 18, %v1896_v45  ;;  %v1930_v27 = vmul.u32 18, %v1929_v4  ;;  %v15681_v45 = vadd.s32 80, %v15465_v49  ;;  %vm17902_vm1 = vcmp.ne.s32.totalorder %v15654_v33, 0  ;;  %vm15955_vm8 = vmand %vm17907_vm12, %vm17906_vm9 }
 0x1ba   : > { %v1962_v32 = vshrl.u32 %v15587_v50, 4  ;;  %vm17903_vm5 = vcmp.lt.s32.totalorder %v15654_v33, 0 }
 0x1bb   : > { %12572 = vmatpush3.bf16.msra.mxu0 %v14297_v13  ;;  %v15622_v13 = vmul.u32.u64.low 3817748708, %v15598_v59  ;;  %v15623_v14 = vmul.u32.u64.high 3817748708, %v15598_v59, %v15622_v13  ;;  %v15646_v30 = vsub.s32 %v15502_v57, %v1897_v2  ;;  %17869 = vst [vmem:[#allocation11_spill] sm:$0xff] %v15681_v45  ;;  %v15690_v48 = vsub.s32 %v15549_v25, %v1930_v27  ;;  %v4662_v2 = vld [vmem:[%s14648_s26 + $0x120] sm:$0xff]  ;;  %v4664_v27 = vld [vmem:[%s14648_s26 + $0x130] sm:$0xff]  ;;  %vm15947_vm7 = vmand %vm17903_vm5, %vm17902_vm1 }
 0x1bc   : > { %12573 = vmatprep.subr.bf16.mxu0 %v14298_v21  ;;  %v1963_v50 = vmul.u32 18, %v1962_v32  ;;  %v15715_v13 = vadd.s32 96, %v15681_v45  ;;  %v15724_v17 = vmul.u32.u64.low 3817748708, %v15681_v45  ;;  %v15725_v19 = vmul.u32.u64.high 3817748708, %v15681_v45, %v15724_v17 }
 0x1bd   : > { %v15669_v12 = vadd.s32 18, %v15646_v30  ;;  %v3808_v51 = vshrl.u32 %v15623_v14, 4  ;;  %v15712_v8 = vadd.s32 18, %v15690_v48  ;;  %v15718_v14 = vadd.s32 64, %v15465_v49 }
 0x1be   : > { %12562 = vmatmul.mubr.bf16.gmra.mrb[20].mxu0 %v4495_v36  ;;  %v15660_v36 = vadd.s32 18, %v15637_v24  ;;  %v15721_v15 = vsub.s32 %v15573_v40, %v1963_v50  ;;  %vm17898_vm2 = vcmp.ne.s32.totalorder %v15646_v30, 0  ;;  %vm17899_vm3 = vcmp.lt.s32.totalorder %v15646_v30, 0 }
 0x1bf   : > { %12574 = vmatpush3.bf16.msra.mxu0 %v14298_v21  ;;  %12581 = vmatprep.mubr.bf16.mxu0 %v4665_v38  ;;  %v15631_v20 = vmul.u32.u64.low 3817748708, %v15616_v9  ;;  %v15632_v21 = vmul.u32.u64.high 3817748708, %v15616_v9, %v15631_v20  ;;  %v15663_v38 = vadd.s32 96, %v15616_v9  ;;  %v3809_v11 = vmul.u32 18, %v3808_v51  ;;  %17870 = vst [vmem:[#allocation12_spill] sm:$0xff] %v15718_v14  ;;  %vm15939_vm6 = vmand %vm17899_vm3, %vm17898_vm2 }
 0x1c0   : > { %12575 = vmatprep.subr.bf16.mxu0 %v14299_v41  ;;  %v4668_v20 = vpack.c.bf16 %v4660_v58, %v4659_v54  ;;  %v15740_v32 = vadd.s32 96, %v15718_v14  ;;  %v15751_v50 = vmul.u32.u64.low 3817748708, %v15715_v13  ;;  %v15752_v51 = vmul.u32.u64.high 3817748708, %v15715_v13, %v15751_v50 }
 0x1c1   : > { %v1940_v4 = vshrl.u32 %v15632_v21, 4  ;;  %v4669_v21 = vpack.c.bf16 %v4662_v2, %v4661_v55  ;;  %v15755_v54 = vmul.u32.u64.low 3817748708, %v15718_v14  ;;  %v15756_v58 = vmul.u32.u64.high 3817748708, %v15718_v14, %v15755_v54 }
 0x1c2   : > { %v1995_v55 = vshrl.u32 %v15725_v19, 4  ;;  %v15766_v2 = vadd.s32 72, %v15465_v49  ;;  %v3841_v50 = vshrl.u32 %v15752_v51, 4  ;;  %v17905_v63 = vsel %vm15947_vm7, 4294967295, %v17904_v63 }
 0x1c3   : > { %12576 = vmatpush3.bf16.msra.mxu0 %v14299_v41  ;;  %v15672_v41 = vsub.s32 %v15533_v16, %v3798_v26  ;;  %v15687_v16 = vadd.s32 18, %v15657_v34  ;;  %v1941_v23 = vmul.u32 18, %v1940_v4  ;;  %v4663_v26 = vld [vmem:[%s14648_s26 + $0x128] sm:$0xff]  ;;  %v1973_v54 = vshrl.u32 %v15756_v58, 4 }
 0x1c4   : > { %12577 = vmatprep.subr.bf16.mxu0 %v14300_v60  ;;  %17872 = vst [vmem:[#allocation14_spill] sm:$0xff] %v15766_v2  ;;  %v14307_v4 = vld [vmem:[%s17833_s2 + $0x168] sm:$0xff]   ;;  %v4670_v17 = vpack.c.bf16 %v4664_v27, %v4663_v26  ;;  %v1996_v27 = vmul.u32 18, %v1995_v55  ;;  %v15907_v25 = vmul.u32.u64.low 3817748708, %v15766_v2  ;;  %v15908_v5 = vmul.u32.u64.high 3817748708, %v15766_v2, %v15907_v25 }
 0x1c5   : > { %v15705_v3 = vadd.s32 18, %v15672_v41  ;;  %v4830_v55 = vld [vmem:[%s14648_s26 + $0xe9] sm:$0xff]  ;;  %vm3875_vm10 = vcmp.lt.s32.totalorder %v15672_v41, 0  ;;  %vm17911_vm3 = vcmp.ne.s32.totalorder %v15672_v41, 0  ;;  %vm17914_vm5 = vcmp.ne.s32.totalorder %v15690_v48, 0 }
 0x1c6   : > { %vm15970_vm1 = vmand %vm3875_vm10, %vm17911_vm3  ;;  %vm17915_vm9 = vcmp.lt.s32.totalorder %v15690_v48, 0  ;;  %vm17922_vm10 = vcmp.ne.s32.totalorder %v15721_v15, 0  ;;  %vm17923_vm3 = vcmp.lt.s32.totalorder %v15721_v15, 0  ;;  %v3908_v57 = vsel %vm15931_vm15, %v15675_v42, %v15651_v1 }
 0x1c7   : > { %12578 = vmatpush3.bf16.msra.mxu0 %v14300_v60  ;;  %v15696_v60 = vmul.u32.u64.low 3817748708, %v15663_v38  ;;  %v15697_v62 = vmul.u32.u64.high 3817748708, %v15663_v38, %v15696_v60  ;;  %vm15978_vm12 = vmand %vm17915_vm9, %vm17914_vm5 }
 0x1c8   : > { %12579 = vmatprep.subr.bf16.mxu0 %v14301_v7  ;;  %v15759_v60 = vsub.s32 %v15598_v59, %v3809_v11  ;;  %v15778_v11 = vmul.u32.u64.low 3817748708, %v15740_v32  ;;  %v15779_v19 = vmul.u32.u64.high 3817748708, %v15740_v32, %v15778_v11  ;;  %vm16003_vm5 = vmand %vm17923_vm3, %vm17922_vm10 }
 0x1c9   : > { %v3786_v31 = vshrl.u32 %v15697_v62, 4  ;;  %v15762_v62 = vsub.s32 %v15616_v9, %v1941_v23  ;;  %v14309_v11 = vld [vmem:[%s17833_s2 + $0x178] sm:$0xff]  }
 0x1cb   : > { %12580 = vmatpush3.bf16.msra.mxu0 %v14301_v7  ;;  %v15709_v7 = vsub.s32 %v15570_v37, %v3776_v44  ;;  %v14305_v37 = vld [vmem:[%s17833_s2 + $0x158] sm:$0xff]   ;;  %17871 = vst [vmem:[#allocation13_spill] sm:$0xff] %v15762_v62  ;;  %v15775_v59 = vadd.s32 18, %v15762_v62  ;;  %v3787_v26 = vmul.u32 18, %v3786_v31 }
 0x1cc   : > { %12593 = vmatprep.subr.bf16.mxu0 %v14302_v28  ;;  %v4828_v44 = vld [vmem:[%s14648_s26 + $0xd9] sm:$0xff] }
 0x1cd   : > { %v15731_v22 = vadd.s32 18, %v15709_v7  ;;  %17873 = vst [vmem:[#allocation15_spill] sm:$0xff] %v15775_v59  ;;  %v15810_v31 = vsub.s32 %v15663_v38, %v3787_v26  ;;  %v15825_v38 = vmul.u32 18, %v1973_v54  ;;  %v14310_v26 = vld [vmem:[%s17833_s2 + $0x180] sm:$0xff]   ;;  %vm17918_vm2 = vcmp.ne.s32.totalorder %v15709_v7, 0 }
 0x1ce   : > { %12582 = vmatmul.mubr.bf16.vlgmr.msra.gmra.mrb[12].mxu0 %v4666_v35  ;;  %v15743_v35 = vadd.s32 88, %v15465_v49  ;;  %v17908_v49 = vmov 0 }
 0x1cf   : > { %12594 = vmatpush3.bf16.msra.mxu0 %v14302_v28  ;;  %12585 = vmatprep.mubr.bf16.mxu0 %v4667_v39  ;;  %v15736_v28 = vadd.s32 18, %v15721_v15  ;;  %v14306_v39 = vld [vmem:[%s17833_s2 + $0x160] sm:$0xff]   ;;  %v17909_v49 = vsel %vm15955_vm8, 4294967295, %v17908_v49  ;;  %vm17919_vm8 = vcmp.lt.s32.totalorder %v15709_v7, 0  ;;  %vm17934_vm10 = vcmp.ne.s32.totalorder %v15810_v31, 0 }
 0x1d0   : > { %12595 = vmatprep.subr.bf16.mxu0 %v14303_v47  ;;  %vm15986_vm7 = vmand %vm17919_vm8, %vm17918_vm2  ;;  %vm17926_vm8 = vcmp.ne.s32.totalorder %v15759_v60, 0  ;;  %vm17927_vm2 = vcmp.lt.s32.totalorder %v15759_v60, 0  ;;  %vm17935_vm3 = vcmp.lt.s32.totalorder %v15810_v31, 0  ;;  %vm17954_vm15 = vnez %v17909_v49 }
 0x1d1   : > { %vm16011_vm9 = vmand %vm17927_vm2, %vm17926_vm8  ;;  %v2065_v1 = vsel %vm17954_vm15, %v15687_v16, %v15657_v34  ;;  %v16160_v16 = vld [vmem:[%s17834_s3] ss:$0 sm:$0xff]  ;;  %vm16162_vm15 = vcmp.lt.s32.totalorder %v3908_v57, 16  ;;  %v17984_v57 = vld [vmem:[#allocation14_spill] sm:$0xff] }
 0x1d2   : > { %vm16033_vm8 = vmand %vm17935_vm3, %vm17934_vm10 }
 0x1d3   : > { %12596 = vmatpush3.bf16.msra.mxu0 %v14303_v47  ;;  %v4829_v47 = vld [vmem:[%s14648_s26 + $0xe1] sm:$0xff] }
 0x1d4   : > { %12597 = vmatprep.subr.bf16.mxu0 %v14304_v52  ;;  %v17974_v59 = vld [vmem:[#allocation15_spill] sm:$0xff] }
 0x1d6   : > { %12586 = vmatmul.mubr.bf16.gmra.mrb[16].mxu0 %v4668_v20  ;;  %v15772_v20 = vadd.s32 18, %v15759_v60 }
 0x1d7   : > { %12598 = vmatpush3.bf16.msra.mxu0 %v14304_v52  ;;  %12589 = vmatprep.mubr.bf16.mxu0 %v4669_v21  ;;  %v4840_v52 = vpack.c.bf16 %v4829_v47, %v4828_v44  ;;  %v15782_v21 = vmul.u32.u64.low 3817748708, %v15743_v35  ;;  %v15783_v23 = vmul.u32.u64.high 3817748708, %v15743_v35, %v15782_v21  ;;  %v15789_v44 = vadd.s32 96, %v15743_v35 }
 0x1d8   : > { %12599 = vmatprep.subr.bf16.mxu0 %v14305_v37  ;;  %v15792_v47 = vadd.s32 96, %v15766_v2 }
 0x1d9   : > { %v15816_v51 = vmul.u32.u64.low 3817748708, %v15789_v44  ;;  %v15817_v58 = vmul.u32.u64.high 3817748708, %v15789_v44, %v15816_v51  ;;  %v2006_v21 = vshrl.u32 %v15783_v23, 4 }
 0x1da   : > { %17874 = vst [vmem:[#allocation16_spill] sm:$0xff] %v15792_v47  ;;  %v4833_v51 = vld [vmem:[%s14648_s26 + $0x101] sm:$0xff] }
 0x1db   : > { %12600 = vmatpush3.bf16.msra.mxu0 %v14305_v37  ;;  %v14308_v37 = vld [vmem:[%s17833_s2 + $0x170] sm:$0xff]  }
 0x1dc   : > { %12601 = vmatprep.subr.bf16.mxu0 %v14306_v39 }
 0x1de   : > { %12590 = vmatmul.mubr.bf16.gmra.mrb[20].mxu0 %v4670_v17  ;;  %v3842_v17 = vmul.u32 18, %v3841_v50  ;;  %v15856_v50 = vmul.u32 18, %v2006_v21  ;;  %v4836_v21 = vld [vmem:[%s14648_s26 + $0x119] sm:$0xff] }
 0x1df   : > { %12602 = vmatpush3.bf16.msra.mxu0 %v14306_v39  ;;  %12609 = vmatprep.mubr.bf16.mxu0 %v4840_v52  ;;  %v15813_v39 = vsub.s32 %v15681_v45, %v1996_v27  ;;  %v3819_v52 = vshrl.u32 %v15779_v19, 4  ;;  %v4832_v27 = vld [vmem:[%s14648_s26 + $0xf9] sm:$0xff]  ;;  %v15851_v19 = vadd.s32 18, %v15810_v31  ;;  %v14311_v45 = vld [vmem:[%s17833_s2 + $0x188] sm:$0xff]  }
 0x1e0   : > { %12603 = vmatprep.subr.bf16.mxu0 %v14307_v4  ;;  %v15866_v9 = vsub.s32 %v15715_v13, %v3842_v17  ;;  %v15868_v40 = vpack.c.bf16 %v4833_v51, %v4832_v27  ;;  %v14313_v13 = vld [vmem:[%s17833_s2 + $0x190] sm:$0xff]   ;;  %v4837_v27 = vld [vmem:[%s14648_s26 + $0x121] sm:$0xff]  ;;  %v3852_v51 = vshrl.u32 %v15817_v58, 4 }
 0x1e1   : > { %17875 = vst [vmem:[#allocation17_spill] sm:$0xff] %v15813_v39  ;;  %17876 = vst [vmem:[#allocation18_spill] sm:$0xff] %v15851_v19  ;;  %v15854_v23 = vadd.s32 18, %v15813_v39 }
 0x1e2   : > { %17879 = vst [vmem:[#allocation21_spill] sm:$0xff] %v15868_v40  ;;  %v15961_v53 = vadd.s32 18, %v15866_v9 }
 0x1e3   : > { %12604 = vmatpush3.bf16.msra.mxu0 %v14307_v4  ;;  %v4831_v4 = vld [vmem:[%s14648_s26 + $0xf1] sm:$0xff]  ;;  %17877 = vst [vmem:[#allocation19_spill] sm:$0xff] %v15854_v23  ;;  %v17912_v23 = vmov 0 }
 0x1e4   : > { %12605 = vmatprep.subr.bf16.mxu0 %v14308_v37  ;;  %v15858_v54 = vpack.c.bf16 %v4831_v4, %v4830_v55  ;;  %v4834_v55 = vld [vmem:[%s14648_s26 + $0x109] sm:$0xff]  ;;  %v4835_v4 = vld [vmem:[%s14648_s26 + $0x111] sm:$0xff]  ;;  %17910 = vst [vmem:[#allocation22_spill] sm:$0xff] %v15961_v53  ;;  %v17913_v23 = vsel %vm15970_vm1, 4294967295, %v17912_v23  ;;  %v17916_v53 = vmov 0 }
 0x1e5   : > { %v4843_v2 = vpack.c.bf16 %v4835_v4, %v4834_v55  ;;  %v17917_v53 = vsel %vm15978_vm12, 4294967295, %v17916_v53  ;;  %v17920_v55 = vmov 0  ;;  %v15992_v4 = vsub.s32 %v15718_v14, %v15825_v38 }
 0x1e6   : > { %17878 = vst [vmem:[#allocation20_spill] sm:$0xff] %v15858_v54  ;;  %v17921_v55 = vsel %vm15986_vm7, 4294967295, %v17920_v55  ;;  %vm17930_vm7 = vcmp.ne.s32.totalorder %v15762_v62, 0  ;;  %vm17931_vm12 = vcmp.lt.s32.totalorder %v15762_v62, 0  ;;  %v14317_v62 = vld [vmem:[%s17833_s2 + $0x1a0] sm:$0xff]  }
 0x1e7   : > { %12606 = vmatpush3.bf16.msra.mxu0 %v14308_v37  ;;  %v3820_v37 = vmul.u32 18, %v3819_v52  ;;  %vm16019_vm1 = vmand %vm17931_vm12, %vm17930_vm7  ;;  %vm17938_vm7 = vcmp.ne.s32.totalorder %v15813_v39, 0  ;;  %vm17939_vm12 = vcmp.lt.s32.totalorder %v15813_v39, 0  ;;  %vm2031_vm10 = vcmp.lt.s32.totalorder %v15992_v4, 0  ;;  %v16091_v52 = vld [vmem:[%s14648_s26 + $0x111] sm:$0xff] }
 0x1e8   : > { %12607 = vmatprep.subr.bf16.mxu0 %v14309_v11  ;;  %vm16044_vm2 = vmand %vm17939_vm12, %vm17938_vm7  ;;  %v2059_v39 = vsel %vm15898_vm0, %v15628_v18, %v15604_v61  ;;  %vm17943_vm7 = vcmp.ne.s32.totalorder %v15866_v9, 0  ;;  %vm17944_vm12 = vcmp.lt.s32.totalorder %v15866_v9, 0  ;;  %v14319_v61 = vld [vmem:[%s17833_s2 + $0x1a8] sm:$0xff]  }
 0x1e9   : > { %v15995_v19 = vsub.s32 %v15740_v32, %v3820_v37  ;;  %v16024_v32 = vmul.u32.u64.low 3817748708, %v15792_v47  ;;  %v16025_v37 = vmul.u32.u64.high 3817748708, %v15792_v47, %v16024_v32  ;;  %v3853_v47 = vmul.u32 18, %v3852_v51  ;;  %vm16068_vm3 = vmand %vm17944_vm12, %vm17943_vm7  ;;  %v16088_v18 = vld [vmem:[%s14648_s26 + $0x109] sm:$0xff] }
 0x1ea   : > { %v17940_v32 = vmov 0  ;;  %vm16109_vm0 = vcmp.lt.s32.totalorder %v2059_v39, 16 }
 0x1eb   : > { %12608 = vmatpush3.bf16.msra.mxu0 %v14309_v11  ;;  %v17941_v32 = vsel %vm16044_vm2, 4294967295, %v17940_v32  ;;  %v17979_v11 = vld [vmem:[#allocation19_spill] sm:$0xff]  ;;  %v17981_v58 = vld [vmem:[#allocation22_spill] sm:$0xff] }
 0x1ec   : > { %12621 = vmatprep.subr.bf16.mxu0 %v14310_v26  ;;  %17942 = vst [vmem:[#allocation23_spill] sm:$0xff] %v17941_v32  ;;  %v3907_v32 = vsel %vm15890_vm13, %v15619_v10, %v15594_v56  ;;  %v3905_v56 = vsel %vm15915_vm4, %v15660_v36, %v15637_v24  ;;  %v2060_v24 = vsel %vm15939_vm6, %v15669_v12, %v15646_v30  ;;  %v3830_v12 = vshrl.u32 %v16025_v37, 4 }
 0x1ed   : > { %vm17953_vm4 = vnez %v17905_v63  ;;  %vm16133_vm7 = vcmp.lt.s32.totalorder %v3905_v56, 16  ;;  %v3915_v25 = vsel %vm16068_vm3, %v17981_v58, %v15866_v9  ;;  %v17982_v56 = vmov 0 }
 0x1ee   : > { %12610 = vmatmul.mubr.bf16.vlgmr.msra.gmra.mrb[12].mxu0 %v15858_v54  ;;  %v15997_v54 = vpack.c.bf16 %v4837_v27, %v4836_v21  ;;  %v4838_v21 = vld [vmem:[%s14648_s26 + $0x129] sm:$0xff]  ;;  %v4839_v27 = vld [vmem:[%s14648_s26 + $0x131] sm:$0xff]  ;;  %v3906_v36 = vsel %vm17953_vm4, %v15678_v43, %v15654_v33  ;;  %vm17963_vm4 = vnez %v17921_v55  ;;  %v16155_v43 = vsub.s32 %v15743_v35, %v15856_v50 }
 0x1ef   : > { %12622 = vmatpush3.bf16.msra.mxu0 %v14310_v26  ;;  %12613 = vmatprep.mubr.bf16.mxu0 %v15868_v40  ;;  %v14315_v40 = vld [vmem:[%s17833_s2 + $0x198] sm:$0xff]   ;;  %v16085_v10 = vpack.c.bf16 %v4839_v27, %v4838_v21  ;;  %v3909_v42 = vsel %vm17963_vm4, %v15731_v22, %v15709_v7  ;;  %v16184_v7 = vadd.s32 18, %v15995_v19  ;;  %v3831_v26 = vmul.u32 18, %v3830_v12 }
 0x1f0   : > { %12623 = vmatprep.subr.bf16.mxu0 %v14311_v45  ;;  %v17976_v50 = vld [vmem:[#allocation20_spill] sm:$0xff]  ;;  %v16226_v14 = vadd.s32 18, %v16155_v43 }
 0x1f3   : > { %12624 = vmatpush3.bf16.msra.mxu0 %v14311_v45  ;;  %v17932_v45 = vmov 0 }
 0x1f4   : > { %12625 = vmatprep.subr.bf16.mxu0 %v14313_v13  ;;  %v17933_v45 = vsel %vm16019_vm1, 4294967295, %v17932_v45  ;;  %vm2019_vm1 = vcmp.ne.s32.totalorder %v15992_v4, 0 }
 0x1f5   : > { %vm16125_vm6 = vmand %vm2031_vm10, %vm2019_vm1  ;;  %vm17961_vm1 = vnez %v17913_v23  ;;  %vm17962_vm10 = vnez %v17917_v53  ;;  %v17966_v53 = vmov 0 }
 0x1f6   : > { %12614 = vmatmul.mubr.bf16.gmra.mrb[16].mxu0 %v4843_v2  ;;  %v2061_v2 = vsel %vm15878_vm11, %v15608_v0, %v15582_v46  ;;  %vm3877_vm11 = vcmp.lt.s32.totalorder %v15995_v19, 0  ;;  %v1984_v46 = vshrl.u32 %v15908_v5, 4  ;;  %v2062_v0 = vsel %vm15923_vm14, %v15666_v6, %v15643_v29 }
 0x1f7   : > { %12626 = vmatpush3.bf16.msra.mxu0 %v14313_v13  ;;  %12617 = vmatprep.mubr.bf16.mxu0 %v15997_v54  ;;  %vm16093_vm13 = vcmp.lt.s32.totalorder %v2061_v2, 16  ;;  %vm16105_vm14 = vcmp.lt.s32.totalorder %v3907_v32, 16  ;;  %v16130_v6 = vadd.s32 18, %v15992_v4  ;;  %vm16137_vm12 = vcmp.lt.s32.totalorder %v2062_v0, 16  ;;  %v14327_v13 = vld [vmem:[%s17833_s2 + $0x1c8] sm:$0xff]  }
 0x1f8   : > { %12627 = vmatprep.subr.bf16.mxu0 %v14315_v40  ;;  %v3911_v33 = vsel %vm17961_vm1, %v15705_v3, %v15672_v41  ;;  %v2063_v34 = vsel %vm17962_vm10, %v15712_v8, %v15690_v48  ;;  %vm16166_vm1 = vcmp.lt.s32.totalorder %v2060_v24, 16  ;;  %v2066_v48 = vsel %vm16003_vm5, %v15736_v28, %v15721_v15  ;;  %v17973_v28 = vld [vmem:[#allocation13_spill] sm:$0xff] }
 0x1f9   : > { %v17967_v53 = vsel %vm16166_vm1, 4294967295, %v17966_v53  ;;  %vm17968_vm10 = vcmp.ne.s32.totalorder %v15995_v19, 0  ;;  %v16187_v8 = vsub.s32 %v15789_v44, %v3853_v47  ;;  %v1985_v22 = vmul.u32 18, %v1984_v46  ;;  %v17977_v47 = vld [vmem:[#allocation18_spill] sm:$0xff] }
 0x1fa   : > { %vm16179_vm4 = vmand %vm3877_vm11, %vm17968_vm10  ;;  %vm16189_vm1 = vcmp.lt.s32.totalorder %v3906_v36, 16  ;;  %v3912_v15 = vsel %vm16011_vm9, %v15772_v20, %v15759_v60  ;;  %vm17975_vm5 = vnez %v17933_v45  ;;  %v5017_v44 = vpack.c.bf16 %v16091_v52, %v16088_v18  ;;  %v17978_v20 = vld [vmem:[#allocation17_spill] sm:$0xff]  ;;  %v14329_v18 = vld [vmem:[%s17833_s2 + $0x1d0] sm:$0xff]  }
 0x1fb   : > { %12628 = vmatpush3.bf16.msra.mxu0 %v14315_v40  ;;  %v2064_v23 = vsel %vm17975_vm5, %v17974_v59, %v17973_v28  ;;  %v3910_v60 = vsel %vm16033_vm8, %v17977_v47, %v15810_v31  ;;  %v2069_v51 = vsel %vm16044_vm2, %v17979_v11, %v17978_v20  ;;  %v2067_v38 = vsel %vm16125_vm6, %v16130_v6, %v15992_v4  ;;  %v17989_v47 = vld [vmem:[#allocation16_spill] sm:$0xff]  ;;  %v14325_v40 = vld [vmem:[%s17833_s2 + $0x1c0] sm:$0xff]  }
 0x1fc   : > { %12629 = vmatprep.subr.bf16.mxu0 %v14317_v62  ;;  %v3913_v21 = vsel %vm16179_vm4, %v16184_v7, %v15995_v19  ;;  %vm16237_vm5 = vcmp.lt.s32.totalorder %v2065_v1, 16  ;;  %v16242_v0 = vadd.s32 18, %v16187_v8  ;;  %v16245_v24 = vsub.s32 %v17984_v57, %v1985_v22  ;;  %v14323_v22 = vld [vmem:[%s17833_s2 + $0x1b8] sm:$0xff]  }
 0x1fd   : > { %v17983_v56 = vsel %vm16237_vm5, 4294967295, %v17982_v56  ;;  %vm16249_vm10 = vcmp.lt.s32.totalorder %v3911_v33, 16  ;;  %vm16253_vm11 = vcmp.lt.s32.totalorder %v2063_v34, 16  ;;  %v17987_v1 = vmov 0 }
 0x1fe   : > { %12618 = vmatmul.mubr.bf16.gmra.mrb[20].mxu0 %v16085_v10  ;;  %v17988_v1 = vsel %vm16253_vm11, 4294967295, %v17987_v1  ;;  %vm16265_vm8 = vcmp.lt.s32.totalorder %v3909_v42, 16  ;;  %vm16269_vm9 = vcmp.lt.s32.totalorder %v2066_v48, 16  ;;  %v17992_v34 = vmov 0 }
 0x1ff   : > { %12630 = vmatpush3.bf16.msra.mxu0 %v14317_v62  ;;  %12637 = vmatprep.mubr.bf16.mxu0 %v17976_v50  ;;  %v14321_v62 = vld [vmem:[%s17833_s2 + $0x1b0] sm:$0xff]   ;;  %v17993_v34 = vsel %vm16269_vm9, 4294967295, %v17992_v34  ;;  %vm17994_vm11 = vcmp.ne.s32.totalorder %v16155_v43, 0  ;;  %vm16288_vm9 = vcmp.lt.s32.totalorder %v2064_v23, 16  ;;  %vm16355_vm2 = vcmp.lt.s32.totalorder %v3915_v25, 16 }
 0x200   : > { %12631 = vmatprep.subr.bf16.mxu0 %v14319_v61  ;;  %vm16379_vm6 = vcmp.lt.s32.totalorder %v3913_v21, 16 }
 0x201   : > { %v12191_v55 = vpop.f32.mrb[0].mxu0 }
 0x202   : > { %v1844_v31 = vadd.f32 %v12191_v55, %v16160_v16  ;;  %v12443_v45 = vpop.f32.mrb[0].mxu1  ;;  %v1776_v37 = vpop.f32.mrb[1].mxu0  ;;  %v16261_v55 = vsub.s32 %v17989_v47, %v3831_v26  ;;  %v5185_v47 = vld [vmem:[%s14648_s26 + $0x122] sm:$0xff] }
 0x203   : > { %v3691_v27 = vadd.f32 %v12443_v45, %v16160_v16  ;;  %v1842_v32 = vadd.f32 %v16160_v16, %v1776_v37  ;;  %v3623_v2 = vpop.f32.mrb[1].mxu1  ;;  %v12192_v46 = vpop.f32.mrb[2].mxu0  ;;  %12632 = vmatpush3.bf16.msra.mxu0 %v14319_v61  ;;  %v17985_v61 = vmov 0 }
 0x204   : > { %v1856_v36 = vmax.f32 %v1844_v31, 0.0  ;;  %v3689_v12 = vadd.f32 %v16160_v16, %v3623_v2  ;;  %v1845_v28 = vadd.f32 %v12192_v46, %v16160_v16  ;;  %v12444_v59 = vpop.f32.mrb[2].mxu1  ;;  %v1779_v50 = vpop.f32.mrb[3].mxu0  ;;  %12633 = vmatprep.subr.bf16.mxu0 %v14321_v62  ;;  %v17986_v61 = vsel %vm16249_vm10, 4294967295, %v17985_v61 }
 0x205   : > { %v3703_v31 = vmax.f32 %v3691_v27, 0.0  ;;  %v1854_v45 = vmax.f32 %v1842_v32, 0.0  ;;  %v3692_v37 = vadd.f32 %v12444_v59, %v16160_v16  ;;  %v1843_v33 = vadd.f32 %v16160_v16, %v1779_v50  ;;  %v3626_v2 = vpop.f32.mrb[3].mxu1 }
 0x206   : > { %v17990_v46 = vmov 0  ;;  %vm17995_vm10 = vcmp.lt.s32.totalorder %v16155_v43, 0  ;;  %v2109_v27 = vsel %vm16093_vm13, %v1856_v36, 0.0  ;;  %v3701_v32 = vmax.f32 %v3689_v12, 0.0  ;;  %v14342_v12 = vld [vmem:[%s17835_s4 + $0x38] sm:$0xff]  }
 0x207   : > { %v17991_v46 = vsel %vm16265_vm8, 4294967295, %v17990_v46  ;;  %vm16277_vm5 = vmand %vm17995_vm10, %vm17994_vm11  ;;  %v1857_v42 = vmax.f32 %v1845_v28, 0.0  ;;  %v3690_v59 = vadd.f32 %v16160_v16, %v3626_v2  ;;  %vm16284_vm8 = vcmp.lt.s32.totalorder %v3912_v15, 16  ;;  %2121 = vst [vmem:[#allocation2 + $0x28] sm:$0xff] %v2109_v27  ;;  %12634 = vmatpush3.bf16.msra.mxu0 %v14321_v62 }
 0x208   : > { %vm18002_vm11 = vcmp.ne.s32.totalorder %v16187_v8, 0  ;;  %vm18003_vm10 = vcmp.lt.s32.totalorder %v16187_v8, 0  ;;  %v3955_v5 = vsel %vm16105_vm14, %v3703_v31, 0.0  ;;  %v2107_v15 = vsel %vm16109_vm0, %v1854_v45, 0.0  ;;  %12635 = vmatprep.subr.bf16.mxu0 %v14323_v22 }
 0x209   : > { %vm16296_vm4 = vmand %vm18003_vm10, %vm18002_vm11  ;;  %v3704_v36 = vmax.f32 %v3692_v37, 0.0  ;;  %v1855_v23 = vmax.f32 %v1843_v33, 0.0  ;;  %vm16304_vm13 = vcmp.lt.s32.totalorder %v3910_v60, 16  ;;  %3967 = vst [vmem:[#allocation2 + $0x88] sm:$0xff] %v3955_v5  ;;  %v3953_v28 = vsel %vm16133_vm7, %v3701_v32, 0.0  ;;  %v12195_v60 = vpop.f32.mrb[4].mxu0 }
 0x20a   : > { %2119 = vst [vmem:[#allocation2 + $0x18] sm:$0xff] %v2107_v15  ;;  %v2110_v2 = vsel %vm16137_vm12, %v1857_v42, 0.0  ;;  %v3702_v29 = vmax.f32 %v3690_v59, 0.0  ;;  %v2070_v62 = vsel %vm16277_vm5, %v16226_v14, %v16155_v43  ;;  %3965 = vst [vmem:[#allocation2 + $0x78] sm:$0xff] %v3953_v28  ;;  %vm18008_vm14 = vnez %v17967_v53  ;;  %v12447_v41 = vpop.f32.mrb[4].mxu1  ;;  %v1792_v45 = vpop.f32.mrb[5].mxu0 }
 0x20b   : > { %2122 = vst [vmem:[#allocation2 + $0x30] sm:$0xff] %v2110_v2  ;;  %v3956_v63 = vsel %vm16162_vm15, %v3704_v36, 0.0  ;;  %v2108_v49 = vsel %vm18008_vm14, %v1855_v23, 0.0  ;;  %v3916_v31 = vsel %vm16296_vm4, %v16242_v0, %v16187_v8  ;;  %vm2020_vm0 = vcmp.ne.s32.totalorder %v16245_v24, 0  ;;  %v3639_v26 = vpop.f32.mrb[5].mxu1  ;;  %v12196_v27 = vpop.f32.mrb[6].mxu0  ;;  %12636 = vmatpush3.bf16.msra.mxu0 %v14323_v22 }
 0x20c   : > { %3968 = vst [vmem:[#allocation2 + $0x90] sm:$0xff] %v3956_v63  ;;  %2120 = vst [vmem:[#allocation2 + $0x20] sm:$0xff] %v2108_v49  ;;  %v3954_v43 = vsel %vm16189_vm1, %v3702_v29, 0.0  ;;  %v1848_v14 = vadd.f32 %v12195_v60, %v16160_v16  ;;  %vm2032_vm7 = vcmp.lt.s32.totalorder %v16245_v24, 0  ;;  %v16333_v53 = vadd.s32 18, %v16245_v24  ;;  %v12448_v5 = vpop.f32.mrb[6].mxu1  ;;  %12649 = vmatprep.subr.bf16.mxu0 %v14325_v40 }
 0x20d   : > { %3966 = vst [vmem:[#allocation2 + $0x80] sm:$0xff] %v3954_v43  ;;  %v3695_v37 = vadd.f32 %v12447_v41, %v16160_v16  ;;  %v1846_v33 = vadd.f32 %v16160_v16, %v1792_v45  ;;  %vm16342_vm12 = vcmp.lt.s32.totalorder %v2069_v51, 16  ;;  %vm3866_vm15 = vcmp.ne.s32.totalorder %v16261_v55, 0  ;;  %v1795_v22 = vpop.f32.mrb[7].mxu0  ;;  %v3642_v30 = vpop.f32.mrb[7].mxu1  ;;  %vm16391_vm10 = vmand %vm2032_vm7, %vm2020_vm0  ;;  %v18023_v15 = vld [vmem:[#allocation21_spill] sm:$0xff] }
 0x20e   : > { %vm3878_vm1 = vcmp.lt.s32.totalorder %v16261_v55, 0  ;;  %v1860_v32 = vmax.f32 %v1848_v14, 0.0  ;;  %v3693_v42 = vadd.f32 %v16160_v16, %v3639_v26  ;;  %v1849_v59 = vadd.f32 %v12196_v27, %v16160_v16  ;;  %12638 = vmatmul.mubr.bf16.vlgmr.msra.gmra.mrb[12].mxu0 %v18023_v15  ;;  %v14330_v45 = vld [vmem:[%s17835_s4 + $0x8] sm:$0xff]   ;;  %v14331_v8 = vld [vmem:[%s17833_s2 + $0x1d8] sm:$0xff]  }
 0x20f   : > { %vm16364_vm5 = vcmp.lt.s32.totalorder %v2067_v38, 16  ;;  %v3902_v17 = vadd.s32 18, %v16261_v55  ;;  %v3707_v9 = vmax.f32 %v3695_v37, 0.0  ;;  %v1858_v51 = vmax.f32 %v1846_v33, 0.0  ;;  %vm16403_vm3 = vmand %vm3878_vm1, %vm3866_vm15  ;;  %12650 = vmatpush3.bf16.msra.mxu0 %v14325_v40  ;;  %12641 = vmatprep.mubr.bf16.mxu0 %v5017_v44  ;;  %v14332_v38 = vld [vmem:[%s17835_s4 + $0x10] sm:$0xff]   ;;  %v5014_v15 = vld [vmem:[%s14648_s26 + $0x141] sm:$0xff] }
 0x210   : > { %v3696_v58 = vadd.f32 %v12448_v5, %v16160_v16  ;;  %v1847_v25 = vadd.f32 %v16160_v16, %v1795_v22  ;;  %vm16383_vm11 = vcmp.lt.s32.totalorder %v2070_v62, 16  ;;  %vm18022_vm14 = vnez %v17983_v56  ;;  %12651 = vmatprep.subr.bf16.mxu0 %v14327_v13 }
 0x211   : > { %v2113_v3 = vsel %vm18022_vm14, %v1860_v32, 0.0  ;;  %v3705_v19 = vmax.f32 %v3693_v42, 0.0  ;;  %v1861_v7 = vmax.f32 %v1849_v59, 0.0  ;;  %v3694_v21 = vadd.f32 %v16160_v16, %v3642_v30  ;;  %v5859_v63 = vld [vmem:[#allocation2 + $0x16] sm:$0xff] }
 0x212   : > { %2125 = vst [vmem:[#allocation2 + $0x48] sm:$0xff] %v2113_v3  ;;  %vm18026_vm0 = vnez %v17986_v61  ;;  %vm18027_vm7 = vnez %v17988_v1  ;;  %v3708_v28 = vmax.f32 %v3696_v58, 0.0  ;;  %v1859_v2 = vmax.f32 %v1847_v25, 0.0  ;;  %v5862_v40 = vld [vmem:[#allocation2 + $0x2e] sm:$0xff]  ;;  %v12451_v48 = vpop.f32.mrb[8].mxu1  ;;  %v14333_v3 = vld [vmem:[%s17833_s2 + $0x1e0] sm:$0xff]  }
 0x213   : > { %v3959_v23 = vsel %vm18026_vm0, %v3707_v9, 0.0  ;;  %v2111_v56 = vsel %vm18027_vm7, %v1858_v51, 0.0  ;;  %vm18028_vm15 = vnez %v17991_v46  ;;  %vm18029_vm1 = vnez %v17993_v34  ;;  %v12199_v46 = vpop.f32.mrb[8].mxu0  ;;  %v5861_v49 = vld [vmem:[#allocation2 + $0x26] sm:$0xff]  ;;  %v3655_v37 = vpop.f32.mrb[9].mxu1  ;;  %12652 = vmatpush3.bf16.msra.mxu0 %v14327_v13 }
 0x214   : > { %3971 = vst [vmem:[#allocation2 + $0xa8] sm:$0xff] %v3959_v23  ;;  %2123 = vst [vmem:[#allocation2 + $0x38] sm:$0xff] %v2111_v56  ;;  %v3957_v29 = vsel %vm18028_vm15, %v3705_v19, 0.0  ;;  %v2114_v62 = vsel %vm18029_vm1, %v1861_v7, 0.0  ;;  %v3706_v61 = vmax.f32 %v3694_v21, 0.0  ;;  %v2068_v1 = vsel %vm16391_vm10, %v16333_v53, %v16245_v24  ;;  %v5860_v24 = vld [vmem:[#allocation2 + $0x1e] sm:$0xff]  ;;  %12653 = vmatprep.subr.bf16.mxu0 %v14329_v18 }
 0x215   : > { %3969 = vst [vmem:[#allocation2 + $0x98] sm:$0xff] %v3957_v29  ;;  %2126 = vst [vmem:[#allocation2 + $0x50] sm:$0xff] %v2114_v62  ;;  %v3960_v52 = vsel %vm16284_vm8, %v3708_v28, 0.0  ;;  %v2112_v44 = vsel %vm16288_vm9, %v1859_v2, 0.0  ;;  %v3914_v34 = vsel %vm16403_vm3, %v3902_v17, %v16261_v55  ;;  %v1852_v43 = vadd.f32 %v12199_v46, %v16160_v16  ;;  %v1808_v14 = vpop.f32.mrb[9].mxu0  ;;  %v12452_v59 = vpop.f32.mrb[10].mxu1 }
 0x216   : > { %3972 = vst [vmem:[#allocation2 + $0xb0] sm:$0xff] %v3960_v52  ;;  %2124 = vst [vmem:[#allocation2 + $0x40] sm:$0xff] %v2112_v44  ;;  %v3958_v60 = vsel %vm16304_vm13, %v3706_v61, 0.0  ;;  %v5870_v41 = vpack.c.bf16 %v5860_v24, %v5859_v63  ;;  %v5871_v50 = vpack.c.bf16 %v5862_v40, %v5861_v49  ;;  %v3699_v55 = vadd.f32 %v12451_v48, %v16160_v16  ;;  %v12200_v33 = vpop.f32.mrb[10].mxu0  ;;  %v3658_v17 = vpop.f32.mrb[11].mxu1  ;;  %v14550_v9 = vld [vmem:[%s17835_s4] sm:$0xff]  }
 0x217   : > { %3970 = vst [vmem:[#allocation2 + $0xa0] sm:$0xff] %v3958_v60  ;;  %v1850_v53 = vadd.f32 %v16160_v16, %v1808_v14  ;;  %vm16445_vm9 = vcmp.lt.s32.totalorder %v3916_v31, 16  ;;  %vm16449_vm8 = vcmp.lt.s32.totalorder %v2068_v1, 16  ;;  %v1864_v27 = vmax.f32 %v1852_v43, 0.0  ;;  %v1811_v5 = vpop.f32.mrb[11].mxu0  ;;  %12642 = vmatmul.mubr.bf16.gmra.mrb[16].mxu0 %v15997_v54  ;;  %v5013_v21 = vld [vmem:[%s14648_s26 + $0x139] sm:$0xff] }
 0x218   : > { %v3697_v32 = vadd.f32 %v16160_v16, %v3655_v37  ;;  %v1853_v42 = vadd.f32 %v12200_v33, %v16160_v16  ;;  %vm16455_vm13 = vcmp.lt.s32.totalorder %v3914_v34, 16  ;;  %12722 = vmatmul.mubr.bf16.vlgmr.msra.gmra.mrb[12].mxu1 %v5870_v41  ;;  %v3711_v0 = vmax.f32 %v3699_v55, 0.0  ;;  %12654 = vmatpush3.bf16.msra.mxu0 %v14329_v18  ;;  %v5178_v23 = vld [vmem:[%s14648_s26 + $0xea] sm:$0xff]  ;;  %v5179_v56 = vld [vmem:[%s14648_s26 + $0xf2] sm:$0xff]  ;;  %v14336_v44 = vld [vmem:[%s17835_s4 + $0x20] sm:$0xff]  }
 0x219   : > { %v1862_v31 = vmax.f32 %v1850_v53, 0.0  ;;  %v3700_v22 = vadd.f32 %v12452_v59, %v16160_v16  ;;  %v1851_v13 = vadd.f32 %v16160_v16, %v1811_v5  ;;  %12734 = vmatpush3.bf16.msra.mxu1 %v14550_v9  ;;  %12725 = vmatprep.mubr.bf16.mxu1 %v5871_v50  ;;  %v2117_v51 = vsel %vm16342_vm12, %v1864_v27, 0.0  ;;  %v14334_v1 = vld [vmem:[%s17835_s4 + $0x18] sm:$0xff]   ;;  %v14335_v52 = vld [vmem:[%s17833_s2 + $0x1e8] sm:$0xff]   ;;  %v14337_v63 = vld [vmem:[%s17833_s2 + $0x1f0] sm:$0xff]  }
 0x21a   : > { %v3709_v58 = vmax.f32 %v3697_v32, 0.0  ;;  %v1865_v25 = vmax.f32 %v1853_v42, 0.0  ;;  %v3698_v30 = vadd.f32 %v16160_v16, %v3658_v17  ;;  %12735 = vmatprep.subr.bf16.mxu1 %v14330_v45  ;;  %2129 = vst [vmem:[#allocation2 + $0x68] sm:$0xff] %v2117_v51  ;;  %v3963_v39 = vsel %vm16355_vm2, %v3711_v0, 0.0  ;;  %12645 = vmatprep.mubr.bf16.mxu0 %v16085_v10  ;;  %v5823_v46 = vld [vmem:[#allocation2 + $0x5] sm:$0xff]  ;;  %v5824_v34 = vld [vmem:[#allocation2 + $0xd] sm:$0xff] }
 0x21b   : > { %v2115_v16 = vsel %vm16364_vm5, %v1862_v31, 0.0  ;;  %v3712_v19 = vmax.f32 %v3700_v22, 0.0  ;;  %v1863_v7 = vmax.f32 %v1851_v13, 0.0  ;;  %3975 = vst [vmem:[#allocation2 + $0xc8] sm:$0xff] %v3963_v39  ;;  %12655 = vmatprep.subr.bf16.mxu0 %v14331_v8  ;;  %v5863_v2 = vld [vmem:[#allocation2 + $0x36] sm:$0xff]  ;;  %v5020_v40 = vpack.c.bf16 %v5014_v15, %v5013_v21  ;;  %v14338_v48 = vld [vmem:[%s17835_s4 + $0x28] sm:$0xff]  }
 0x21c   : > { %2127 = vst [vmem:[#allocation2 + $0x58] sm:$0xff] %v2115_v16  ;;  %v3961_v54 = vsel %vm16379_vm6, %v3709_v58, 0.0  ;;  %v2118_v20 = vsel %vm16383_vm11, %v1865_v25, 0.0  ;;  %v3710_v36 = vmax.f32 %v3698_v30, 0.0  ;;  %v5866_v11 = vld [vmem:[#allocation2 + $0x4e] sm:$0xff]  ;;  %12656 = vmatpush3.bf16.msra.mxu0 %v14331_v8  ;;  %v5190_v18 = vpack.c.bf16 %v5179_v56, %v5178_v23  ;;  %v14339_v14 = vld [vmem:[%s17833_s2 + $0x1f8] sm:$0xff]  }
 0x21d   : > { %3973 = vst [vmem:[#allocation2 + $0xb8] sm:$0xff] %v3961_v54  ;;  %2130 = vst [vmem:[#allocation2 + $0x70] sm:$0xff] %v2118_v20  ;;  %v3964_v10 = vsel %vm16445_vm9, %v3712_v19, 0.0  ;;  %v2116_v28 = vsel %vm16449_vm8, %v1863_v7, 0.0  ;;  %12736 = vmatpush3.bf16.msra.mxu1 %v14330_v45  ;;  %v5864_v4 = vld [vmem:[#allocation2 + $0x3e] sm:$0xff]  ;;  %v5865_v29 = vld [vmem:[#allocation2 + $0x46] sm:$0xff]  ;;  %12657 = vmatprep.subr.bf16.mxu0 %v14333_v3  ;;  %v5835_v60 = vpack.c.bf16 %v5824_v34, %v5823_v46 }
 0x21e   : > { %3976 = vst [vmem:[#allocation2 + $0xd0] sm:$0xff] %v3964_v10  ;;  %2128 = vst [vmem:[#allocation2 + $0x60] sm:$0xff] %v2116_v28  ;;  %v3962_v6 = vsel %vm16455_vm13, %v3710_v36, 0.0  ;;  %12737 = vmatprep.subr.bf16.mxu1 %v14332_v38  ;;  %v5872_v62 = vpack.c.bf16 %v5864_v4, %v5863_v2  ;;  %v5873_v61 = vpack.c.bf16 %v5866_v11, %v5865_v29  ;;  %v14340_v41 = vld [vmem:[%s17835_s4 + $0x30] sm:$0xff]   ;;  %v5180_v50 = vld [vmem:[%s14648_s26 + $0xfa] sm:$0xff] }
 0x21f   : > { %3974 = vst [vmem:[#allocation2 + $0xc0] sm:$0xff] %v3962_v6  ;;  %12646 = vmatmul.mubr.bf16.gmra.mrb[20].mxu0 %v5020_v40  ;;  %v5181_v45 = vld [vmem:[%s14648_s26 + $0x102] sm:$0xff]  ;;  %v5182_v53 = vld [vmem:[%s14648_s26 + $0x10a] sm:$0xff]  ;;  %v5183_v37 = vld [vmem:[%s14648_s26 + $0x112] sm:$0xff] }
 0x220   : > { %12726 = vmatmul.mubr.bf16.gmra.mrb[16].mxu1 %v5872_v62  ;;  %12658 = vmatpush3.bf16.msra.mxu0 %v14333_v3  ;;  %v14341_v55 = vld [vmem:[%s17833_s2 + $0x200] sm:$0xff]   ;;  %v5191_v33 = vpack.c.bf16 %v5181_v45, %v5180_v50  ;;  %v5192_v26 = vpack.c.bf16 %v5183_v37, %v5182_v53  ;;  %v14343_v27 = vld [vmem:[%s17833_s2 + $0x208] sm:$0xff]   ;;  %v14345_v42 = vld [vmem:[%s17833_s2 + $0x210] sm:$0xff]  }
 0x221   : > { %12738 = vmatpush3.bf16.msra.mxu1 %v14332_v38  ;;  %12729 = vmatprep.mubr.bf16.mxu1 %v5873_v61  ;;  %v14344_v32 = vld [vmem:[%s17835_s4 + $0x80] sm:$0xff]   ;;  %v5186_v8 = vld [vmem:[%s14648_s26 + $0x12a] sm:$0xff]  ;;  %v5187_v22 = vld [vmem:[%s14648_s26 + $0x132] sm:$0xff] }
 0x222   : > { %12739 = vmatprep.subr.bf16.mxu1 %v14334_v1  ;;  %12665 = vmatprep.mubr.bf16.mxu0 %v5190_v18  ;;  %v5184_v59 = vld [vmem:[%s14648_s26 + $0x11a] sm:$0xff]  ;;  %v5827_v0 = vld [vmem:[#allocation2 + $0x25] sm:$0xff]  ;;  %v5828_v31 = vld [vmem:[#allocation2 + $0x2d] sm:$0xff]  ;;  %v5194_v25 = vpack.c.bf16 %v5187_v22, %v5186_v8 }
 0x223   : > { %12659 = vmatprep.subr.bf16.mxu0 %v14335_v52  ;;  %v5867_v24 = vld [vmem:[#allocation2 + $0x56] sm:$0xff]  ;;  %v14346_v9 = vld [vmem:[%s17835_s4 + $0x88] sm:$0xff]   ;;  %v5193_v51 = vpack.c.bf16 %v5185_v47, %v5184_v59  ;;  %v5837_v58 = vpack.c.bf16 %v5828_v31, %v5827_v0  ;;  %v14349_v3 = vld [vmem:[%s17833_s2 + $0x220] sm:$0xff]  }
 0x224   : > { %12660 = vmatpush3.bf16.msra.mxu0 %v14335_v52  ;;  %v5826_v5 = vld [vmem:[#allocation2 + $0x1d] sm:$0xff]  ;;  %v5825_v13 = vld [vmem:[#allocation2 + $0x15] sm:$0xff]  ;;  %v5353_v7 = vld [vmem:[%s14648_s26 + $0xeb] sm:$0xff] }
 0x225   : > { %12740 = vmatpush3.bf16.msra.mxu1 %v14334_v1  ;;  %v5868_v49 = vld [vmem:[#allocation2 + $0x5e] sm:$0xff]  ;;  %12661 = vmatprep.subr.bf16.mxu0 %v14337_v63  ;;  %v5836_v17 = vpack.c.bf16 %v5826_v5, %v5825_v13  ;;  %v14348_v38 = vld [vmem:[%s17835_s4 + $0x90] sm:$0xff]   ;;  %v14351_v28 = vld [vmem:[%s17833_s2 + $0x228] sm:$0xff]  }
 0x226   : > { %12741 = vmatprep.subr.bf16.mxu1 %v14336_v44  ;;  %v5874_v43 = vpack.c.bf16 %v5868_v49, %v5867_v24  ;;  %v14347_v30 = vld [vmem:[%s17833_s2 + $0x218] sm:$0xff]   ;;  %v5189_v19 = vld [vmem:[%s14648_s26 + $0x142] sm:$0xff]  ;;  %v5832_v15 = vld [vmem:[#allocation2 + $0x4d] sm:$0xff] }
 0x227   : > { %v5188_v39 = vld [vmem:[%s14648_s26 + $0x13a] sm:$0xff]  ;;  %v5831_v21 = vld [vmem:[#allocation2 + $0x45] sm:$0xff]  ;;  %v6150_v29 = vld [vmem:[#allocation2 + $0xf] sm:$0xff] }
 0x228   : > { %12730 = vmatmul.mubr.bf16.gmra.mrb[20].mxu1 %v5874_v43  ;;  %12662 = vmatpush3.bf16.msra.mxu0 %v14337_v63  ;;  %v5830_v16 = vld [vmem:[#allocation2 + $0x3d] sm:$0xff]  ;;  %v5354_v54 = vld [vmem:[%s14648_s26 + $0xf3] sm:$0xff]  ;;  %v5195_v23 = vpack.c.bf16 %v5189_v19, %v5188_v39  ;;  %v5839_v56 = vpack.c.bf16 %v5832_v15, %v5831_v21  ;;  %v6149_v4 = vld [vmem:[#allocation2 + $0x7] sm:$0xff] }
 0x229   : > { %12742 = vmatpush3.bf16.msra.mxu1 %v14336_v44  ;;  %12749 = vmatprep.mubr.bf16.mxu1 %v5835_v60  ;;  %v5829_v20 = vld [vmem:[#allocation2 + $0x35] sm:$0xff]  ;;  %v5365_v10 = vpack.c.bf16 %v5354_v54, %v5353_v7  ;;  %v14352_v2 = vld [vmem:[%s17835_s4 + $0xa0] sm:$0xff]   ;;  %v6161_v1 = vpack.c.bf16 %v6150_v29, %v6149_v4  ;;  %v14354_v18 = vld [vmem:[%s17835_s4 + $0xa8] sm:$0xff]  }
 0x22a   : > { %12743 = vmatprep.subr.bf16.mxu1 %v14338_v48  ;;  %12663 = vmatprep.subr.bf16.mxu0 %v14339_v14  ;;  %v5838_v36 = vpack.c.bf16 %v5830_v16, %v5829_v20  ;;  %v14350_v11 = vld [vmem:[%s17835_s4 + $0x98] sm:$0xff]   ;;  %v14353_v62 = vld [vmem:[%s17833_s2 + $0x230] sm:$0xff]   ;;  %v5356_v34 = vld [vmem:[%s14648_s26 + $0x103] sm:$0xff] }
 0x22b   : > { %v5834_v6 = vld [vmem:[#allocation2 + $0x5d] sm:$0xff]  ;;  %v5833_v61 = vld [vmem:[#allocation2 + $0x55] sm:$0xff]  ;;  %v5357_v24 = vld [vmem:[%s14648_s26 + $0x10b] sm:$0xff] }
 0x22c   : > { %12664 = vmatpush3.bf16.msra.mxu0 %v14339_v14  ;;  %v5840_v40 = vpack.c.bf16 %v5834_v6, %v5833_v61  ;;  %v14355_v52 = vld [vmem:[%s17833_s2 + $0x238] sm:$0xff]   ;;  %v14356_v44 = vld [vmem:[%s17835_s4 + $0xb0] sm:$0xff]   ;;  %v14357_v63 = vld [vmem:[%s17835_s4 + $0x40] sm:$0xff]  }
 0x22d   : > { %12744 = vmatpush3.bf16.msra.mxu1 %v14338_v48  ;;  %12677 = vmatprep.subr.bf16.mxu0 %v14341_v55  ;;  %v5355_v46 = vld [vmem:[%s14648_s26 + $0xfb] sm:$0xff]  ;;  %v5358_v49 = vld [vmem:[%s14648_s26 + $0x113] sm:$0xff]  ;;  %v14359_v14 = vld [vmem:[%s17835_s4 + $0x48] sm:$0xff]  }
 0x22e   : > { %12745 = vmatprep.subr.bf16.mxu1 %v14340_v41  ;;  %v5366_v60 = vpack.c.bf16 %v5356_v34, %v5355_v46  ;;  %v14358_v43 = vld [vmem:[%s17835_s4 + $0xb8] sm:$0xff]   ;;  %v5367_v48 = vpack.c.bf16 %v5358_v49, %v5357_v24  ;;  %v5360_v45 = vld [vmem:[%s14648_s26 + $0x123] sm:$0xff]  ;;  %v14361_v53 = vld [vmem:[%s17835_s4 + $0x50] sm:$0xff]  }
 0x22f   : > { %12666 = vmatmul.mubr.bf16.vlgmr.msra.gmra.mrb[12].mxu0 %v5191_v33  ;;  %v5359_v50 = vld [vmem:[%s14648_s26 + $0x11b] sm:$0xff]  ;;  %v5361_v37 = vld [vmem:[%s14648_s26 + $0x12b] sm:$0xff]  ;;  %v5364_v13 = vld [vmem:[%s14648_s26 + $0x143] sm:$0xff] }
 0x230   : > { %12678 = vmatpush3.bf16.msra.mxu0 %v14341_v55  ;;  %12669 = vmatprep.mubr.bf16.mxu0 %v5192_v26  ;;  %v6152_v55 = vld [vmem:[#allocation2 + $0x1f] sm:$0xff]  ;;  %v6153_v33 = vld [vmem:[#allocation2 + $0x27] sm:$0xff]  ;;  %v5362_v26 = vld [vmem:[%s14648_s26 + $0x133] sm:$0xff] }
 0x231   : > { %12746 = vmatpush3.bf16.msra.mxu1 %v14340_v41  ;;  %12679 = vmatprep.subr.bf16.mxu0 %v14343_v27  ;;  %v14360_v41 = vld [vmem:[%s17835_s4 + $0xc0] sm:$0xff]   ;;  %v14362_v59 = vld [vmem:[%s17835_s4 + $0xc8] sm:$0xff]   ;;  %v5369_v47 = vpack.c.bf16 %v5362_v26, %v5361_v37  ;;  %v14363_v8 = vld [vmem:[%s17835_s4 + $0x58] sm:$0xff]  }
 0x232   : > { %12747 = vmatprep.subr.bf16.mxu1 %v14342_v12  ;;  %v14364_v0 = vld [vmem:[%s17835_s4 + $0xd0] sm:$0xff]   ;;  %v6156_v31 = vld [vmem:[#allocation2 + $0x3f] sm:$0xff]  ;;  %v14367_v19 = vld [vmem:[%s17835_s4 + $0x68] sm:$0xff]  }
 0x233   : > { %v5363_v22 = vld [vmem:[%s14648_s26 + $0x13b] sm:$0xff]  ;;  %v7476_v39 = vld [vmem:[#allocation2 + $0x6e] sm:$0xff]  ;;  %v7479_v4 = vld [vmem:[#allocation2 + $0x86] sm:$0xff]  ;;  %s10751_s26 = sshll.u32 %s18097_s16, 3 }
 0x234   : > { %12680 = vmatpush3.bf16.msra.mxu0 %v14343_v27  ;;  %v6151_v27 = vld [vmem:[#allocation2 + $0x17] sm:$0xff]  ;;  %v14368_v21 = vld [vmem:[%s17835_s4 + $0xe0] sm:$0xff]   ;;  %v7480_v29 = vld [vmem:[#allocation2 + $0x8e] sm:$0xff]  ;;  %s17650_s29 = scalar_lea.vmem %s17832_s1, %s10751_s26  ;;  %s17673_s14 = scalar_lea.vmem %s17837_s6, %s10751_s26 }
 0x235   : > { %12748 = vmatpush3.bf16.msra.mxu1 %v14342_v12  ;;  %12681 = vmatprep.subr.bf16.mxu0 %v14345_v42  ;;  %v6154_v12 = vld [vmem:[#allocation2 + $0x2f] sm:$0xff]  ;;  %v6160_v15 = vld [vmem:[#allocation2 + $0x5f] sm:$0xff]  ;;  %v6159_v20 = vld [vmem:[#allocation2 + $0x57] sm:$0xff] }
 0x236   : > { %12761 = vmatprep.subr.bf16.mxu1 %v14344_v32  ;;  %v16603_v5 = vpack.c.bf16 %v6154_v12, %v6153_v33  ;;  %v14369_v54 = vld [vmem:[%s17835_s4 + $0x70] sm:$0xff]   ;;  %v7478_v6 = vld [vmem:[#allocation2 + $0x7e] sm:$0xff]  ;;  %v14375_v61 = vld [vmem:[%s17835_s4 + $0x8] sm:$0xff]  }
 0x237   : > { %12670 = vmatmul.mubr.bf16.gmra.mrb[16].mxu0 %v5193_v51  ;;  %v14365_v51 = vld [vmem:[%s17835_s4 + $0x60] sm:$0xff]   ;;  %v7484_v34 = vld [vmem:[#allocation2 + $0xae] sm:$0xff]  ;;  %v14379_v49 = vld [vmem:[%s17835_s4 + $0x18] sm:$0xff]  }
 0x238   : > { %12750 = vmatmul.mubr.bf16.vlgmr.msra.gmra.mrb[12].mxu1 %v5836_v17  ;;  %12682 = vmatpush3.bf16.msra.mxu0 %v14345_v42  ;;  %v5368_v42 = vpack.c.bf16 %v5360_v45, %v5359_v50  ;;  %v6157_v17 = vld [vmem:[#allocation2 + $0x47] sm:$0xff] }
 0x239   : > { %12753 = vmatprep.mubr.bf16.mxu1 %v5837_v58  ;;  %12762 = vmatpush3.bf16.msra.mxu1 %v14344_v32  ;;  %v6162_v32 = vpack.c.bf16 %v6152_v55, %v6151_v27  ;;  %v6155_v58 = vld [vmem:[#allocation2 + $0x37] sm:$0xff]  ;;  %v7483_v46 = vld [vmem:[#allocation2 + $0xa6] sm:$0xff]  ;;  %v6335_v27 = vld [vmem:[#allocation2 + $0x6f] sm:$0xff] }
 0x23a   : > { %12763 = vmatprep.subr.bf16.mxu1 %v14346_v9  ;;  %12673 = vmatprep.mubr.bf16.mxu0 %v5194_v25  ;;  %v16617_v25 = vpack.c.bf16 %v6156_v31, %v6155_v58  ;;  %v7441_v50 = vld [vmem:[#allocation2 + $0x65] sm:$0xff]  ;;  %v7442_v45 = vld [vmem:[#allocation2 + $0x6d] sm:$0xff]  ;;  %v7485_v55 = vld [vmem:[#allocation2 + $0xb6] sm:$0xff] }
 0x23b   : > { %12683 = vmatprep.subr.bf16.mxu0 %v14347_v30  ;;  %v14383_v37 = vld [vmem:[%s17835_s4 + $0x28] sm:$0xff]   ;;  %v7453_v33 = vpack.c.bf16 %v7442_v45, %v7441_v50  ;;  %v14384_v12 = vld [vmem:[%s17835_s4 + $0x120] sm:$0xff]   ;;  %v14388_v31 = vld [vmem:[%s17835_s4 + $0x130] sm:$0xff]  }
 0x23c   : > { %12684 = vmatpush3.bf16.msra.mxu0 %v14347_v30  ;;  %v5370_v30 = vpack.c.bf16 %v5364_v13, %v5363_v22  ;;  %v6334_v26 = vld [vmem:[#allocation2 + $0x67] sm:$0xff]  ;;  %v7443_v13 = vld [vmem:[#allocation2 + $0x75] sm:$0xff]  ;;  %v7444_v58 = vld [vmem:[#allocation2 + $0x7d] sm:$0xff] }
 0x23d   : > { %12764 = vmatpush3.bf16.msra.mxu1 %v14346_v9  ;;  %12685 = vmatprep.subr.bf16.mxu0 %v14349_v3  ;;  %v6158_v9 = vld [vmem:[#allocation2 + $0x4f] sm:$0xff]  ;;  %v14389_v22 = vld [vmem:[%s17835_s4 + $0x80] sm:$0xff]  }
 0x23e   : > { %12765 = vmatprep.subr.bf16.mxu1 %v14348_v38  ;;  %v16622_v16 = vpack.c.bf16 %v6158_v9, %v6157_v17  ;;  %v14390_v17 = vld [vmem:[%s17835_s4 + $0x138] sm:$0xff]   ;;  %v7445_v9 = vld [vmem:[#allocation2 + $0x85] sm:$0xff] }
 0x23f   : > { %12674 = vmatmul.mubr.bf16.gmra.mrb[20].mxu0 %v5195_v23  ;;  %v14371_v23 = vld [vmem:[%s17835_s4 + $0x78] sm:$0xff]   ;;  %v14402_v50 = vld [vmem:[%s17835_s4 + $0x168] sm:$0xff]  }
 0x240   : > { %12754 = vmatmul.mubr.bf16.gmra.mrb[16].mxu1 %v5838_v36  ;;  %12686 = vmatpush3.bf16.msra.mxu0 %v14349_v3  ;;  %v7475_v3 = vld [vmem:[#allocation2 + $0x66] sm:$0xff]  ;;  %v16635_v36 = vpack.c.bf16 %v6160_v15, %v6159_v20  ;;  %v7448_v15 = vld [vmem:[#allocation2 + $0x9d] sm:$0xff] }
 0x241   : > { %12757 = vmatprep.mubr.bf16.mxu1 %v5839_v56  ;;  %12766 = vmatpush3.bf16.msra.mxu1 %v14348_v38  ;;  %v14366_v38 = vld [vmem:[%s17835_s4 + $0xd8] sm:$0xff]   ;;  %v7487_v7 = vpack.c.bf16 %v7476_v39, %v7475_v3  ;;  %v14372_v56 = vld [vmem:[%s17835_s4 + $0xf0] sm:$0xff]   ;;  %v14392_v3 = vld [vmem:[%s17835_s4 + $0x140] sm:$0xff]  }
 0x242   : > { %12767 = vmatprep.subr.bf16.mxu1 %v14350_v11  ;;  %12693 = vmatprep.mubr.bf16.mxu0 %v5365_v10  ;;  %v14373_v10 = vld [vmem:[%s17835_s4] sm:$0xff]   ;;  %v6502_v39 = vld [vmem:[#allocation2 + $0x30] sm:$0xff]  ;;  %v14394_v20 = vld [vmem:[%s17835_s4 + $0x148] sm:$0xff]  }
 0x243   : > { %12687 = vmatprep.subr.bf16.mxu0 %v14351_v28 }
 0x244   : > { %12688 = vmatpush3.bf16.msra.mxu0 %v14351_v28  ;;  %v7477_v28 = vld [vmem:[#allocation2 + $0x76] sm:$0xff] }
 0x245   : > { %12768 = vmatpush3.bf16.msra.mxu1 %v14350_v11  ;;  %12689 = vmatprep.subr.bf16.mxu0 %v14353_v62  ;;  %v14370_v11 = vld [vmem:[%s17835_s4 + $0xe8] sm:$0xff]  }
 0x246   : > { %12769 = vmatprep.subr.bf16.mxu1 %v14352_v2 }
 0x248   : > { %12758 = vmatmul.mubr.bf16.gmra.mrb[20].mxu1 %v5840_v40  ;;  %12690 = vmatpush3.bf16.msra.mxu0 %v14353_v62  ;;  %v7488_v62 = vpack.c.bf16 %v7478_v6, %v7477_v28  ;;  %v14376_v40 = vld [vmem:[%s17835_s4 + $0x100] sm:$0xff]   ;;  %v14395_v28 = vld [vmem:[%s17835_s4 + $0x98] sm:$0xff]  }
 0x249   : > { %12770 = vmatpush3.bf16.msra.mxu1 %v14352_v2  ;;  %12777 = vmatprep.mubr.bf16.mxu1 %v6161_v1  ;;  %v14374_v2 = vld [vmem:[%s17835_s4 + $0xf8] sm:$0xff]   ;;  %v7489_v1 = vpack.c.bf16 %v7480_v29, %v7479_v4  ;;  %v14396_v4 = vld [vmem:[%s17835_s4 + $0x150] sm:$0xff]   ;;  %v6508_v6 = vld [vmem:[#allocation2 + $0x60] sm:$0xff] }
 0x24a   : > { %12771 = vmatprep.subr.bf16.mxu1 %v14354_v18  ;;  %12691 = vmatprep.subr.bf16.mxu0 %v14355_v52  ;;  %v6506_v29 = vld [vmem:[#allocation2 + $0x50] sm:$0xff] }
 0x24c   : > { %12692 = vmatpush3.bf16.msra.mxu0 %v14355_v52  ;;  %v7482_v52 = vld [vmem:[#allocation2 + $0x9e] sm:$0xff] }
 0x24d   : > { %12772 = vmatpush3.bf16.msra.mxu1 %v14354_v18  ;;  %12957 = vmatprep.subr.bf16.mxu0 %v14357_v63  ;;  %v14377_v18 = vld [vmem:[%s17835_s4 + $0x10] sm:$0xff]  }
 0x24e   : > { %12773 = vmatprep.subr.bf16.mxu1 %v14356_v44 }
 0x24f   : > { %12694 = vmatmul.mubr.bf16.vlgmr.msra.gmra.mrb[12].mxu0 %v5366_v60  ;;  %v7491_v60 = vpack.c.bf16 %v7484_v34, %v7483_v46  ;;  %v7451_v46 = vld [vmem:[#allocation2 + $0xb5] sm:$0xff] }
 0x250   : > { %12958 = vmatpush3.bf16.msra.mxu0 %v14357_v63  ;;  %12697 = vmatprep.mubr.bf16.mxu0 %v5367_v48  ;;  %v7481_v63 = vld [vmem:[#allocation2 + $0x96] sm:$0xff]  ;;  %v14381_v48 = vld [vmem:[%s17835_s4 + $0x20] sm:$0xff]  }
 0x251   : > { %12774 = vmatpush3.bf16.msra.mxu1 %v14356_v44  ;;  %12959 = vmatprep.subr.bf16.mxu0 %v14359_v14  ;;  %v14378_v44 = vld [vmem:[%s17835_s4 + $0x108] sm:$0xff]   ;;  %v7490_v24 = vpack.c.bf16 %v7482_v52, %v7481_v63  ;;  %v14398_v52 = vld [vmem:[%s17835_s4 + $0x158] sm:$0xff]  }
 0x252   : > { %12775 = vmatprep.subr.bf16.mxu1 %v14358_v43  ;;  %v14399_v63 = vld [vmem:[%s17835_s4 + $0xa8] sm:$0xff]  }
 0x254   : > { %12960 = vmatpush3.bf16.msra.mxu0 %v14359_v14  ;;  %v7486_v14 = vld [vmem:[#allocation2 + $0xbe] sm:$0xff] }
 0x255   : > { %12776 = vmatpush3.bf16.msra.mxu1 %v14358_v43  ;;  %12961 = vmatprep.subr.bf16.mxu0 %v14361_v53  ;;  %v14380_v43 = vld [vmem:[%s17835_s4 + $0x110] sm:$0xff]  }
 0x256   : > { %12789 = vmatprep.subr.bf16.mxu1 %v14360_v41 }
 0x257   : > { %12698 = vmatmul.mubr.bf16.gmra.mrb[16].mxu0 %v5368_v42  ;;  %v14385_v42 = vld [vmem:[%s17835_s4 + $0x30] sm:$0xff]  }
 0x258   : > { %12778 = vmatmul.mubr.bf16.vlgmr.msra.gmra.mrb[12].mxu1 %v6162_v32  ;;  %12962 = vmatpush3.bf16.msra.mxu0 %v14361_v53  ;;  %v7492_v53 = vpack.c.bf16 %v7486_v14, %v7485_v55  ;;  %v6509_v14 = vld [vmem:[#allocation2 + $0x68] sm:$0xff]  ;;  %v14403_v55 = vld [vmem:[%s17835_s4 + $0xb8] sm:$0xff]  }
 0x259   : > { %12781 = vmatprep.mubr.bf16.mxu1 %v16603_v5  ;;  %12790 = vmatpush3.bf16.msra.mxu1 %v14360_v41  ;;  %v14382_v41 = vld [vmem:[%s17835_s4 + $0x118] sm:$0xff]  }
 0x25a   : > { %12791 = vmatprep.subr.bf16.mxu1 %v14362_v59  ;;  %12701 = vmatprep.mubr.bf16.mxu0 %v5369_v47  ;;  %v14386_v47 = vld [vmem:[%s17835_s4 + $0x128] sm:$0xff]  }
 0x25b   : > { %12963 = vmatprep.subr.bf16.mxu0 %v14363_v8 }
 0x25c   : > { %12964 = vmatpush3.bf16.msra.mxu0 %v14363_v8 }
 0x25d   : > { %12792 = vmatpush3.bf16.msra.mxu1 %v14362_v59  ;;  %12965 = vmatprep.subr.bf16.mxu0 %v14365_v51  ;;  %v16690_v59 = vpack.c.bf16 %v6335_v27, %v6334_v26  ;;  %v7771_v26 = vld [vmem:[#allocation2 + $0x87] sm:$0xff]  ;;  %v7772_v27 = vld [vmem:[#allocation2 + $0x8f] sm:$0xff] }
 0x25e   : > { %12793 = vmatprep.subr.bf16.mxu1 %v14364_v0 }
 0x25f   : > { %12702 = vmatmul.mubr.bf16.gmra.mrb[20].mxu0 %v5370_v30  ;;  %v14391_v30 = vld [vmem:[%s17835_s4 + $0x88] sm:$0xff]  }
 0x260   : > { %12782 = vmatmul.mubr.bf16.gmra.mrb[16].mxu1 %v16617_v25  ;;  %12966 = vmatpush3.bf16.msra.mxu0 %v14365_v51  ;;  %v7446_v51 = vld [vmem:[#allocation2 + $0x8d] sm:$0xff] }
 0x261   : > { %12785 = vmatprep.mubr.bf16.mxu1 %v16622_v16  ;;  %12794 = vmatpush3.bf16.msra.mxu1 %v14364_v0  ;;  %v14387_v0 = vld [vmem:[%s17835_s4 + $0x38] sm:$0xff]  }
 0x262   : > { %12795 = vmatprep.subr.bf16.mxu1 %v14366_v38  ;;  %12973 = vmatprep.mubr.bf16.mxu0 %v7487_v7  ;;  %v6501_v7 = vld [vmem:[#allocation2 + $0x28] sm:$0xff] }
 0x263   : > { %12967 = vmatprep.subr.bf16.mxu0 %v14367_v19 }
 0x264   : > { %12968 = vmatpush3.bf16.msra.mxu0 %v14367_v19  ;;  %v14393_v19 = vld [vmem:[%s17835_s4 + $0x90] sm:$0xff]  }
 0x265   : > { %12796 = vmatpush3.bf16.msra.mxu1 %v14366_v38  ;;  %12969 = vmatprep.subr.bf16.mxu0 %v14369_v54  ;;  %v7455_v38 = vpack.c.bf16 %v7446_v51, %v7445_v9  ;;  %v14410_v51 = vld [vmem:[%s17835_s4 + $0x188] sm:$0xff]  }
 0x266   : > { %12797 = vmatprep.subr.bf16.mxu1 %v14368_v21 }
 0x268   : > { %12786 = vmatmul.mubr.bf16.gmra.mrb[20].mxu1 %v16635_v36  ;;  %12970 = vmatpush3.bf16.msra.mxu0 %v14369_v54  ;;  %v6512_v54 = vpack.c.bf16 %v6502_v39, %v6501_v7  ;;  %v14411_v39 = vld [vmem:[%s17835_s4 + $0xd8] sm:$0xff]  }
 0x269   : > { %12798 = vmatpush3.bf16.msra.mxu1 %v14368_v21  ;;  %12805 = vmatprep.mubr.bf16.mxu1 %v6162_v32  ;;  %v6500_v32 = vld [vmem:[#allocation2 + $0x20] sm:$0xff]  ;;  %v6503_v21 = vld [vmem:[#allocation2 + $0x38] sm:$0xff] }
 0x26a   : > { %12799 = vmatprep.subr.bf16.mxu1 %v14370_v11  ;;  %12971 = vmatprep.subr.bf16.mxu0 %v14371_v23  ;;  %v6681_v7 = vld [vmem:[#allocation2 + $0x51] sm:$0xff] }
 0x26c   : > { %12972 = vmatpush3.bf16.msra.mxu0 %v14371_v23 }
 0x26d   : > { %12800 = vmatpush3.bf16.msra.mxu1 %v14370_v11  ;;  %12985 = vmatprep.subr.bf16.mxu0 %v14373_v10  ;;  %v7450_v11 = vld [vmem:[#allocation2 + $0xad] sm:$0xff] }
 0x26e   : > { %12801 = vmatprep.subr.bf16.mxu1 %v14372_v56 }
 0x26f   : > { %12974 = vmatmul.mubr.bf16.vlgmr.msra.gmra.mrb[24].mxu0 %v7488_v62  ;;  %v14397_v62 = vld [vmem:[%s17835_s4 + $0xa0] sm:$0xff]  }
 0x270   : > { %12977 = vmatprep.mubr.bf16.mxu0 %v7489_v1  ;;  %12986 = vmatpush3.bf16.msra.mxu0 %v14373_v10  ;;  %v7452_v1 = vld [vmem:[#allocation2 + $0xbd] sm:$0xff] }
 0x271   : > { %12802 = vmatpush3.bf16.msra.mxu1 %v14372_v56  ;;  %12987 = vmatprep.subr.bf16.mxu0 %v14375_v61  ;;  %v7447_v56 = vld [vmem:[#allocation2 + $0x95] sm:$0xff]  ;;  %v7458_v34 = vpack.c.bf16 %v7452_v1, %v7451_v46  ;;  %v14418_v1 = vld [vmem:[%s17835_s4 + $0x1a8] sm:$0xff]  }
 0x272   : > { %12803 = vmatprep.subr.bf16.mxu1 %v14374_v2  ;;  %v7456_v10 = vpack.c.bf16 %v7448_v15, %v7447_v56  ;;  %v6683_v15 = vld [vmem:[#allocation2 + $0x61] sm:$0xff] }
 0x273   : > { %v14423_v46 = vld [vmem:[%s17835_s4 + $0x108] sm:$0xff]  }
 0x274   : > { %12988 = vmatpush3.bf16.msra.mxu0 %v14375_v61  ;;  %v6505_v61 = vld [vmem:[#allocation2 + $0x48] sm:$0xff] }
 0x275   : > { %12804 = vmatpush3.bf16.msra.mxu1 %v14374_v2  ;;  %12989 = vmatprep.subr.bf16.mxu0 %v14377_v18 }
 0x276   : > { %12817 = vmatprep.subr.bf16.mxu1 %v14376_v40 }
 0x277   : > { %12978 = vmatmul.mubr.bf16.gmra.mrb[28].mxu0 %v7490_v24  ;;  %v14400_v24 = vld [vmem:[%s17835_s4 + $0x160] sm:$0xff]  }
 0x278   : > { %12806 = vmatmul.mubr.bf16.vlgmr.msra.gmra.mrb[12].mxu1 %v16603_v5  ;;  %12981 = vmatprep.mubr.bf16.mxu0 %v7491_v60  ;;  %v6499_v5 = vld [vmem:[#allocation2 + $0x18] sm:$0xff] }
 0x279   : > { %12809 = vmatprep.mubr.bf16.mxu1 %v16617_v25  ;;  %12818 = vmatpush3.bf16.msra.mxu1 %v14376_v40  ;;  %v6511_v8 = vpack.c.bf16 %v6500_v32, %v6499_v5  ;;  %v7454_v25 = vpack.c.bf16 %v7444_v58, %v7443_v13  ;;  %v6514_v40 = vpack.c.bf16 %v6506_v29, %v6505_v61  ;;  %v6674_v60 = vld [vmem:[#allocation2 + $0x19] sm:$0xff]  ;;  %v6676_v13 = vld [vmem:[#allocation2 + $0x29] sm:$0xff] }
 0x27a   : > { %12819 = vmatprep.subr.bf16.mxu1 %v14378_v44  ;;  %12990 = vmatpush3.bf16.msra.mxu0 %v14377_v18  ;;  %v6507_v18 = vld [vmem:[#allocation2 + $0x58] sm:$0xff]  ;;  %v16760_v5 = vpack.c.bf16 %v7772_v27, %v7771_v26  ;;  %v7775_v58 = vld [vmem:[#allocation2 + $0xa7] sm:$0xff] }
 0x27b   : > { %12991 = vmatprep.subr.bf16.mxu0 %v14379_v49  ;;  %v7770_v32 = vld [vmem:[#allocation2 + $0x7f] sm:$0xff]  ;;  %v6684_v29 = vld [vmem:[#allocation2 + $0x69] sm:$0xff]  ;;  %v7025_v27 = vld [vmem:[#allocation2 + $0x32] sm:$0xff] }
 0x27c   : > { %v6860_v26 = vld [vmem:[#allocation2 + $0x81] sm:$0xff] }
 0x27d   : > { %12820 = vmatpush3.bf16.msra.mxu1 %v14378_v44  ;;  %v6515_v44 = vpack.c.bf16 %v6508_v6, %v6507_v18  ;;  %v6685_v6 = vld [vmem:[#allocation2 + $0x71] sm:$0xff] }
 0x27e   : > { %12821 = vmatprep.subr.bf16.mxu1 %v14380_v43  ;;  %12992 = vmatpush3.bf16.msra.mxu0 %v14379_v49  ;;  %v6510_v49 = vld [vmem:[#allocation2 + $0x70] sm:$0xff]  ;;  %v6691_v61 = vpack.c.bf16 %v6685_v6, %v6684_v29  ;;  %v7031_v29 = vld [vmem:[#allocation2 + $0x62] sm:$0xff] }
 0x27f   : > { %12993 = vmatprep.subr.bf16.mxu0 %v14381_v48  ;;  %12982 = vmatmul.mubr.bf16.gmra.mrb[32].mxu0 %v7492_v53  ;;  %v14404_v53 = vld [vmem:[%s17835_s4 + $0x170] sm:$0xff]  }
 0x280   : > { %12810 = vmatmul.mubr.bf16.gmra.mrb[16].mxu1 %v16622_v16  ;;  %13001 = vmatprep.mubr.bf16.mxu0 %v7453_v33  ;;  %v6504_v16 = vld [vmem:[#allocation2 + $0x40] sm:$0xff]  ;;  %v7769_v33 = vld [vmem:[#allocation2 + $0x77] sm:$0xff]  ;;  %v7032_v6 = vld [vmem:[#allocation2 + $0x6a] sm:$0xff] }
 0x281   : > { %12813 = vmatprep.mubr.bf16.mxu1 %v16635_v36  ;;  %12822 = vmatpush3.bf16.msra.mxu1 %v14380_v43  ;;  %v7449_v36 = vld [vmem:[#allocation2 + $0xa5] sm:$0xff]  ;;  %v6513_v23 = vpack.c.bf16 %v6504_v16, %v6503_v21  ;;  %v6682_v21 = vld [vmem:[#allocation2 + $0x59] sm:$0xff]  ;;  %v14420_v18 = vld [vmem:[%s17835_s4 + $0x1b0] sm:$0xff]  }
 0x282   : > { %12823 = vmatprep.subr.bf16.mxu1 %v14382_v41  ;;  %12994 = vmatpush3.bf16.msra.mxu0 %v14381_v48  ;;  %v7457_v2 = vpack.c.bf16 %v7450_v11, %v7449_v36  ;;  %v6675_v43 = vld [vmem:[#allocation2 + $0x21] sm:$0xff]  ;;  %v14401_v48 = vld [vmem:[%s17835_s4 + $0xb0] sm:$0xff]   ;;  %v16793_v56 = vpack.c.bf16 %v6683_v15, %v6682_v21 }
 0x283   : > { %12995 = vmatprep.subr.bf16.mxu0 %v14383_v37  ;;  %v6686_v45 = vpack.c.bf16 %v6675_v43, %v6674_v60  ;;  %v7778_v36 = vld [vmem:[#allocation2 + $0xbf] sm:$0xff]  ;;  %v14428_v60 = vld [vmem:[%s17835_s4 + $0x1d0] sm:$0xff]  }
 0x284   : > { %v14429_v43 = vld [vmem:[%s17835_s4 + $0x120] sm:$0xff]   ;;  %v7028_v15 = vld [vmem:[#allocation2 + $0x4a] sm:$0xff] }
 0x285   : > { %12824 = vmatpush3.bf16.msra.mxu1 %v14382_v41  ;;  %v6516_v41 = vpack.c.bf16 %v6510_v49, %v6509_v14  ;;  %v14427_v49 = vld [vmem:[%s17835_s4 + $0x118] sm:$0xff]   ;;  %v7953_v14 = vld [vmem:[#allocation2 + $0xcf] sm:$0xff] }
 0x286   : > { %12825 = vmatprep.subr.bf16.mxu1 %v14384_v12  ;;  %12996 = vmatpush3.bf16.msra.mxu0 %v14383_v37  ;;  %v14405_v37 = vld [vmem:[%s17835_s4 + $0xc0] sm:$0xff]  }
 0x287   : > { %12997 = vmatprep.subr.bf16.mxu0 %v14385_v42 }
 0x288   : > { %12814 = vmatmul.mubr.bf16.gmra.mrb[20].mxu1 %v16690_v59 }
 0x289   : > { %12826 = vmatpush3.bf16.msra.mxu1 %v14384_v12  ;;  %12833 = vmatprep.mubr.bf16.mxu1 %v6511_v8  ;;  %v14406_v12 = vld [vmem:[%s17835_s4 + $0x178] sm:$0xff]  }
 0x28a   : > { %12827 = vmatprep.subr.bf16.mxu1 %v14386_v47  ;;  %12998 = vmatpush3.bf16.msra.mxu0 %v14385_v42  ;;  %v7780_v42 = vpack.c.bf16 %v7770_v32, %v7769_v33  ;;  %v6677_v8 = vld [vmem:[#allocation2 + $0x31] sm:$0xff]  ;;  %v14432_v33 = vld [vmem:[%s17835_s4 + $0x1e0] sm:$0xff]  }
 0x28b   : > { %12999 = vmatprep.subr.bf16.mxu0 %v14387_v0  ;;  %v6687_v9 = vpack.c.bf16 %v6677_v8, %v6676_v13  ;;  %v14433_v32 = vld [vmem:[%s17835_s4 + $0x130] sm:$0xff]   ;;  %v14435_v8 = vld [vmem:[%s17835_s4 + $0x138] sm:$0xff]  }
 0x28c   : > { %v14438_v13 = vld [vmem:[%s17835_s4 + $0x1f8] sm:$0xff]  }
 0x28d   : > { %12828 = vmatpush3.bf16.msra.mxu1 %v14386_v47  ;;  %v14408_v47 = vld [vmem:[%s17835_s4 + $0x180] sm:$0xff]  }
 0x28e   : > { %12829 = vmatprep.subr.bf16.mxu1 %v14388_v31  ;;  %13000 = vmatpush3.bf16.msra.mxu0 %v14387_v0  ;;  %v6678_v0 = vld [vmem:[#allocation2 + $0x39] sm:$0xff] }
 0x28f   : > { %13013 = vmatprep.subr.bf16.mxu0 %v14389_v22 }
 0x291   : > { %12830 = vmatpush3.bf16.msra.mxu1 %v14388_v31  ;;  %13002 = vmatmul.mubr.bf16.vlgmr.msra.gmra.mrb[24].mxu0 %v7454_v25  ;;  %v6679_v31 = vld [vmem:[#allocation2 + $0x41] sm:$0xff]  ;;  %v7776_v25 = vld [vmem:[#allocation2 + $0xaf] sm:$0xff] }
 0x292   : > { %12831 = vmatprep.subr.bf16.mxu1 %v14390_v17  ;;  %13005 = vmatprep.mubr.bf16.mxu0 %v7455_v38  ;;  %v7773_v38 = vld [vmem:[#allocation2 + $0x97] sm:$0xff]  ;;  %v16780_v16 = vpack.c.bf16 %v7776_v25, %v7775_v58  ;;  %v14439_v25 = vld [vmem:[%s17835_s4 + $0x148] sm:$0xff]  }
 0x293   : > { %13014 = vmatpush3.bf16.msra.mxu0 %v14389_v22  ;;  %v14409_v22 = vld [vmem:[%s17835_s4 + $0xd0] sm:$0xff]   ;;  %v8121_v58 = vld [vmem:[#allocation2 + $0x98] sm:$0xff] }
 0x294   : > { %13015 = vmatprep.subr.bf16.mxu0 %v14391_v30 }
 0x295   : > { %12832 = vmatpush3.bf16.msra.mxu1 %v14390_v17  ;;  %v7774_v17 = vld [vmem:[#allocation2 + $0x9f] sm:$0xff] }
 0x296   : > { %12845 = vmatprep.subr.bf16.mxu1 %v14392_v3 }
 0x297   : > { %13016 = vmatpush3.bf16.msra.mxu0 %v14391_v30  ;;  %v16772_v30 = vpack.c.bf16 %v6679_v31, %v6678_v0  ;;  %v14436_v0 = vld [vmem:[%s17835_s4 + $0x1f0] sm:$0xff]   ;;  %v14437_v31 = vld [vmem:[%s17835_s4 + $0x140] sm:$0xff]  }
 0x298   : > { %12834 = vmatmul.mubr.bf16.vlgmr.msra.gmra.mrb[12].mxu1 %v6512_v54  ;;  %13017 = vmatprep.subr.bf16.mxu0 %v14393_v19  ;;  %v14413_v54 = vld [vmem:[%s17835_s4 + $0xe0] sm:$0xff]  }
 0x299   : > { %12837 = vmatprep.mubr.bf16.mxu1 %v6513_v23  ;;  %12846 = vmatpush3.bf16.msra.mxu1 %v14392_v3  ;;  %v16774_v3 = vpack.c.bf16 %v7774_v17, %v7773_v38  ;;  %v14414_v23 = vld [vmem:[%s17835_s4 + $0x198] sm:$0xff]   ;;  %v8122_v17 = vld [vmem:[#allocation2 + $0xa0] sm:$0xff] }
 0x29a   : > { %13006 = vmatmul.mubr.bf16.gmra.mrb[28].mxu0 %v7456_v10  ;;  %12847 = vmatprep.subr.bf16.mxu1 %v14394_v20  ;;  %v7777_v10 = vld [vmem:[#allocation2 + $0xb7] sm:$0xff]  ;;  %v14440_v38 = vld [vmem:[%s17835_s4 + $0x200] sm:$0xff]  }
 0x29b   : > { %13009 = vmatprep.mubr.bf16.mxu0 %v7457_v2  ;;  %13018 = vmatpush3.bf16.msra.mxu0 %v14393_v19  ;;  %v14412_v19 = vld [vmem:[%s17835_s4 + $0x190] sm:$0xff]   ;;  %v14415_v2 = vld [vmem:[%s17835_s4 + $0xe8] sm:$0xff]  }
 0x29c   : > { %13019 = vmatprep.subr.bf16.mxu0 %v14395_v28 }
 0x29d   : > { %12848 = vmatpush3.bf16.msra.mxu1 %v14394_v20  ;;  %v6680_v20 = vld [vmem:[#allocation2 + $0x49] sm:$0xff] }
 0x29e   : > { %12849 = vmatprep.subr.bf16.mxu1 %v14396_v4  ;;  %v6689_v11 = vpack.c.bf16 %v6681_v7, %v6680_v20  ;;  %v8124_v7 = vld [vmem:[#allocation2 + $0xb0] sm:$0xff]  ;;  %v8126_v20 = vld [vmem:[#allocation2 + $0xc0] sm:$0xff] }
 0x29f   : > { %13020 = vmatpush3.bf16.msra.mxu0 %v14395_v28  ;;  %v7784_v28 = vpack.c.bf16 %v7778_v36, %v7777_v10  ;;  %v14443_v10 = vld [vmem:[%s17835_s4 + $0x158] sm:$0xff]  }
 0x2a0   : > { %12838 = vmatmul.mubr.bf16.gmra.mrb[16].mxu1 %v6514_v40  ;;  %13021 = vmatprep.subr.bf16.mxu0 %v14397_v62  ;;  %v14419_v40 = vld [vmem:[%s17835_s4 + $0xf8] sm:$0xff]  }
 0x2a1   : > { %12841 = vmatprep.mubr.bf16.mxu1 %v6515_v44  ;;  %12850 = vmatpush3.bf16.msra.mxu1 %v14396_v4  ;;  %v14416_v4 = vld [vmem:[%s17835_s4 + $0x1a0] sm:$0xff]   ;;  %v14422_v44 = vld [vmem:[%s17835_s4 + $0x1b8] sm:$0xff]  }
 0x2a2   : > { %13010 = vmatmul.mubr.bf16.gmra.mrb[32].mxu0 %v7458_v34  ;;  %12851 = vmatprep.subr.bf16.mxu1 %v14398_v52  ;;  %v14424_v34 = vld [vmem:[%s17835_s4 + $0x1c0] sm:$0xff]  }
 0x2a3   : > { %13022 = vmatpush3.bf16.msra.mxu0 %v14397_v62  ;;  %13029 = vmatprep.mubr.bf16.mxu0 %v16690_v59  ;;  %v14407_v59 = vld [vmem:[%s17835_s4 + $0xc8] sm:$0xff]   ;;  %v14417_v62 = vld [vmem:[%s17835_s4 + $0xf0] sm:$0xff]  }
 0x2a4   : > { %13023 = vmatprep.subr.bf16.mxu0 %v14399_v63 }
 0x2a5   : > { %12852 = vmatpush3.bf16.msra.mxu1 %v14398_v52  ;;  %v14421_v52 = vld [vmem:[%s17835_s4 + $0x100] sm:$0xff]  }
 0x2a6   : > { %12853 = vmatprep.subr.bf16.mxu1 %v14400_v24 }
 0x2a7   : > { %13024 = vmatpush3.bf16.msra.mxu0 %v14399_v63  ;;  %v14425_v63 = vld [vmem:[%s17835_s4 + $0x110] sm:$0xff]  }
 0x2a8   : > { %12842 = vmatmul.mubr.bf16.gmra.mrb[20].mxu1 %v6516_v41  ;;  %13025 = vmatprep.subr.bf16.mxu0 %v14401_v48  ;;  %v14430_v41 = vld [vmem:[%s17835_s4 + $0x1d8] sm:$0xff]  }
 0x2a9   : > { %12854 = vmatpush3.bf16.msra.mxu1 %v14400_v24  ;;  %12861 = vmatprep.mubr.bf16.mxu1 %v6686_v45  ;;  %v14426_v24 = vld [vmem:[%s17835_s4 + $0x1c8] sm:$0xff]  }
 0x2aa   : > { %12855 = vmatprep.subr.bf16.mxu1 %v14402_v50 }
 0x2ab   : > { %13026 = vmatpush3.bf16.msra.mxu0 %v14401_v48  ;;  %v7952_v48 = vld [vmem:[#allocation2 + $0xc7] sm:$0xff] }
 0x2ac   : > { %13027 = vmatprep.subr.bf16.mxu0 %v14403_v55  ;;  %v7959_v45 = vpack.c.bf16 %v7953_v14, %v7952_v48  ;;  %v18038_v48 = vld [vmem:[#allocation5_spill] sm:$0xff] }
 0x2ad   : > { %12856 = vmatpush3.bf16.msra.mxu1 %v14402_v50  ;;  %v8118_v50 = vld [vmem:[#allocation2 + $0x80] sm:$0xff]  ;;  %v16913_v14 = vadd.s32 192, %v18038_v48 }
 0x2ae   : > { %12857 = vmatprep.subr.bf16.mxu1 %v14404_v53 }
 0x2af   : > { %13028 = vmatpush3.bf16.msra.mxu0 %v14403_v55  ;;  %v8117_v55 = vld [vmem:[#allocation2 + $0x78] sm:$0xff] }
 0x2b0   : > { %13041 = vmatprep.subr.bf16.mxu0 %v14405_v37 }
 0x2b1   : > { %12858 = vmatpush3.bf16.msra.mxu1 %v14404_v53  ;;  %v14431_v53 = vld [vmem:[%s17835_s4 + $0x128] sm:$0xff]  }
 0x2b2   : > { %13030 = vmatmul.mubr.bf16.vlgmr.msra.gmra.mrb[24].mxu0 %v7780_v42  ;;  %12859 = vmatprep.subr.bf16.mxu1 %v14406_v12 }
 0x2b3   : > { %13033 = vmatprep.mubr.bf16.mxu0 %v16760_v5  ;;  %13042 = vmatpush3.bf16.msra.mxu0 %v14405_v37  ;;  %v8129_v37 = vpack.c.bf16 %v8118_v50, %v8117_v55  ;;  %v7035_v50 = vld [vmem:[#allocation2 + $0x82] sm:$0xff] }
 0x2b4   : > { %13043 = vmatprep.subr.bf16.mxu0 %v14407_v59 }
 0x2b5   : > { %12860 = vmatpush3.bf16.msra.mxu1 %v14406_v12  ;;  %v6859_v12 = vld [vmem:[#allocation2 + $0x79] sm:$0xff] }
 0x2b6   : > { %12873 = vmatprep.subr.bf16.mxu1 %v14408_v47 }
 0x2b7   : > { %13044 = vmatpush3.bf16.msra.mxu0 %v14407_v59  ;;  %v7024_v59 = vld [vmem:[#allocation2 + $0x2a] sm:$0xff] }
 0x2b8   : > { %12862 = vmatmul.mubr.bf16.vlgmr.msra.gmra.mrb[12].mxu1 %v6687_v9  ;;  %13045 = vmatprep.subr.bf16.mxu0 %v14409_v22 }
 0x2b9   : > { %12865 = vmatprep.mubr.bf16.mxu1 %v16772_v30  ;;  %12874 = vmatpush3.bf16.msra.mxu1 %v14408_v47  ;;  %v7036_v47 = vpack.c.bf16 %v7025_v27, %v7024_v59  ;;  %v14450_v59 = vld [vmem:[%s17835_s4 + $0x228] sm:$0xff]  }
 0x2ba   : > { %13034 = vmatmul.mubr.bf16.gmra.mrb[28].mxu0 %v16774_v3  ;;  %12875 = vmatprep.subr.bf16.mxu1 %v14410_v51 }
 0x2bb   : > { %13037 = vmatprep.mubr.bf16.mxu0 %v16780_v16  ;;  %13046 = vmatpush3.bf16.msra.mxu0 %v14409_v22  ;;  %v8120_v22 = vld [vmem:[#allocation2 + $0x90] sm:$0xff] }
 0x2bc   : > { %13047 = vmatprep.subr.bf16.mxu0 %v14411_v39 }
 0x2bd   : > { %12876 = vmatpush3.bf16.msra.mxu1 %v14410_v51 }
 0x2be   : > { %12877 = vmatprep.subr.bf16.mxu1 %v14412_v19 }
 0x2bf   : > { %13048 = vmatpush3.bf16.msra.mxu0 %v14411_v39  ;;  %v7027_v39 = vld [vmem:[#allocation2 + $0x42] sm:$0xff] }
 0x2c0   : > { %12866 = vmatmul.mubr.bf16.gmra.mrb[16].mxu1 %v6689_v11  ;;  %13049 = vmatprep.subr.bf16.mxu0 %v14413_v54 }
 0x2c1   : > { %12869 = vmatprep.mubr.bf16.mxu1 %v16793_v56  ;;  %12878 = vmatpush3.bf16.msra.mxu1 %v14412_v19  ;;  %v14441_v19 = vld [vmem:[%s17835_s4 + $0x150] sm:$0xff]  }
 0x2c2   : > { %13038 = vmatmul.mubr.bf16.gmra.mrb[32].mxu0 %v7784_v28  ;;  %12879 = vmatprep.subr.bf16.mxu1 %v14414_v23 }
 0x2c3   : > { %13050 = vmatpush3.bf16.msra.mxu0 %v14413_v54  ;;  %13057 = vmatprep.mubr.bf16.mxu0 %v7780_v42  ;;  %v16858_v42 = vpack.c.bf16 %v6860_v26, %v6859_v12  ;;  %v14442_v54 = vld [vmem:[%s17835_s4 + $0x208] sm:$0xff]  }
 0x2c4   : > { %13051 = vmatprep.subr.bf16.mxu0 %v14415_v2  ;;  %v18039_v26 = vld [vmem:[#allocation6_spill] sm:$0xff] }
 0x2c5   : > { %12880 = vmatpush3.bf16.msra.mxu1 %v14414_v23  ;;  %v16928_v27 = vadd.s32 192, %v18039_v26 }
 0x2c6   : > { %12881 = vmatprep.subr.bf16.mxu1 %v14416_v4 }
 0x2c7   : > { %13052 = vmatpush3.bf16.msra.mxu0 %v14415_v2  ;;  %v14444_v2 = vld [vmem:[%s17835_s4 + $0x210] sm:$0xff]  }
 0x2c8   : > { %12870 = vmatmul.mubr.bf16.gmra.mrb[20].mxu1 %v6691_v61  ;;  %13053 = vmatprep.subr.bf16.mxu0 %v14417_v62 }
 0x2c9   : > { %12882 = vmatpush3.bf16.msra.mxu1 %v14416_v4  ;;  %12889 = vmatprep.mubr.bf16.mxu1 %v6687_v9  ;;  %v8119_v9 = vld [vmem:[#allocation2 + $0x88] sm:$0xff]  ;;  %v7030_v4 = vld [vmem:[#allocation2 + $0x5a] sm:$0xff] }
 0x2ca   : > { %12883 = vmatprep.subr.bf16.mxu1 %v14418_v1  ;;  %v8130_v51 = vpack.c.bf16 %v8120_v22, %v8119_v9  ;;  %v18041_v9 = vld [vmem:[#allocation8_spill] sm:$0xff] }
 0x2cb   : > { %13054 = vmatpush3.bf16.msra.mxu0 %v14417_v62  ;;  %v7033_v62 = vld [vmem:[#allocation2 + $0x72] sm:$0xff] }
 0x2cc   : > { %13055 = vmatprep.subr.bf16.mxu0 %v14419_v40 }
 0x2cd   : > { %12884 = vmatpush3.bf16.msra.mxu1 %v14418_v1  ;;  %v8128_v1 = vld [vmem:[#allocation2 + $0xd0] sm:$0xff] }
 0x2ce   : > { %12885 = vmatprep.subr.bf16.mxu1 %v14420_v18 }
 0x2cf   : > { %13056 = vmatpush3.bf16.msra.mxu0 %v14419_v40  ;;  %v7039_v40 = vpack.c.bf16 %v7031_v29, %v7030_v4 }
 0x2d0   : > { %13069 = vmatprep.subr.bf16.mxu0 %v14421_v52 }
 0x2d1   : > { %12886 = vmatpush3.bf16.msra.mxu1 %v14420_v18  ;;  %v14446_v18 = vld [vmem:[%s17835_s4 + $0x218] sm:$0xff]  }
 0x2d2   : > { %13058 = vmatmul.mubr.bf16.vlgmr.msra.gmra.mrb[24].mxu0 %v16760_v5  ;;  %12887 = vmatprep.subr.bf16.mxu1 %v14422_v44  ;;  %v14434_v5 = vld [vmem:[%s17835_s4 + $0x1e8] sm:$0xff]  }
 0x2d3   : > { %13061 = vmatprep.mubr.bf16.mxu0 %v16774_v3  ;;  %13070 = vmatpush3.bf16.msra.mxu0 %v14421_v52  ;;  %v7026_v3 = vld [vmem:[#allocation2 + $0x3a] sm:$0xff]  ;;  %v7040_v52 = vpack.c.bf16 %v7033_v62, %v7032_v6  ;;  %v14458_v6 = vld [vmem:[%s17835_s4 + $0x188] sm:$0xff]  }
 0x2d4   : > { %13071 = vmatprep.subr.bf16.mxu0 %v14423_v46  ;;  %v7037_v21 = vpack.c.bf16 %v7027_v39, %v7026_v3  ;;  %v14456_v3 = vld [vmem:[%s17835_s4 + $0x180] sm:$0xff]  }
 0x2d5   : > { %12888 = vmatpush3.bf16.msra.mxu1 %v14422_v44  ;;  %v8127_v44 = vld [vmem:[#allocation2 + $0xc8] sm:$0xff] }
 0x2d6   : > { %12901 = vmatprep.subr.bf16.mxu1 %v14424_v34 }
 0x2d7   : > { %13072 = vmatpush3.bf16.msra.mxu0 %v14423_v46  ;;  %v18036_v46 = vld [vmem:[#allocation4_spill] sm:$0xff] }
 0x2d8   : > { %12890 = vmatmul.mubr.bf16.vlgmr.msra.gmra.mrb[12].mxu1 %v16772_v30  ;;  %13073 = vmatprep.subr.bf16.mxu0 %v14425_v63  ;;  %v8131_v30 = vpack.c.bf16 %v8122_v17, %v8121_v58  ;;  %v14452_v58 = vld [vmem:[%s17835_s4 + $0x230] sm:$0xff]  }
 0x2d9   : > { %12893 = vmatprep.mubr.bf16.mxu1 %v6689_v11  ;;  %12902 = vmatpush3.bf16.msra.mxu1 %v14424_v34  ;;  %v8123_v11 = vld [vmem:[#allocation2 + $0xa8] sm:$0xff]  ;;  %v16901_v34 = vadd.s32 192, %v18036_v46  ;;  %v8299_v46 = vld [vmem:[#allocation2 + $0xb1] sm:$0xff] }
 0x2da   : > { %13062 = vmatmul.mubr.bf16.gmra.mrb[28].mxu0 %v16780_v16  ;;  %12903 = vmatprep.subr.bf16.mxu1 %v14426_v24  ;;  %v7029_v16 = vld [vmem:[#allocation2 + $0x52] sm:$0xff]  ;;  %v8132_v23 = vpack.c.bf16 %v8124_v7, %v8123_v11 }
 0x2db   : > { %13065 = vmatprep.mubr.bf16.mxu0 %v7784_v28  ;;  %13074 = vmatpush3.bf16.msra.mxu0 %v14425_v63  ;;  %v7038_v36 = vpack.c.bf16 %v7029_v16, %v7028_v15  ;;  %v8134_v63 = vpack.c.bf16 %v8128_v1, %v8127_v44  ;;  %v8295_v7 = vld [vmem:[#allocation2 + $0x91] sm:$0xff] }
 0x2dc   : > { %13075 = vmatprep.subr.bf16.mxu0 %v14427_v49  ;;  %v7204_v44 = vld [vmem:[#allocation2 + $0x53] sm:$0xff] }
 0x2dd   : > { %12904 = vmatpush3.bf16.msra.mxu1 %v14426_v24  ;;  %v14447_v24 = vld [vmem:[%s17835_s4 + $0x168] sm:$0xff]  }
 0x2de   : > { %12905 = vmatprep.subr.bf16.mxu1 %v14428_v60 }
 0x2df   : > { %13076 = vmatpush3.bf16.msra.mxu0 %v14427_v49  ;;  %v18037_v49 = vld [vmem:[#allocation3_spill] sm:$0xff] }
 0x2e0   : > { %12894 = vmatmul.mubr.bf16.gmra.mrb[16].mxu1 %v16793_v56  ;;  %13077 = vmatprep.subr.bf16.mxu0 %v14429_v43  ;;  %v8125_v56 = vld [vmem:[#allocation2 + $0xb8] sm:$0xff] }
 0x2e1   : > { %12897 = vmatprep.mubr.bf16.mxu1 %v6691_v61  ;;  %12906 = vmatpush3.bf16.msra.mxu1 %v14428_v60  ;;  %v8133_v28 = vpack.c.bf16 %v8126_v20, %v8125_v56  ;;  %v14445_v61 = vld [vmem:[%s17835_s4 + $0x160] sm:$0xff]   ;;  %v16907_v60 = vadd.s32 192, %v18037_v49 }
 0x2e2   : > { %13066 = vmatmul.mubr.bf16.gmra.mrb[32].mxu0 %v7959_v45  ;;  %12907 = vmatprep.subr.bf16.mxu1 %v14430_v41  ;;  %v16917_v45 = vmul.u32.u64.low 3817748708, %v16901_v34  ;;  %v16918_v55 = vmul.u32.u64.high 3817748708, %v16901_v34, %v16917_v45  ;;  %v8296_v20 = vld [vmem:[#allocation2 + $0x99] sm:$0xff]  ;;  %v8301_v49 = vld [vmem:[#allocation2 + $0xc1] sm:$0xff] }
 0x2e3   : > { %13078 = vmatpush3.bf16.msra.mxu0 %v14429_v43  ;;  %13085 = vmatprep.mubr.bf16.mxu0 %v8129_v37  ;;  %v14448_v43 = vld [vmem:[%s17835_s4 + $0x220] sm:$0xff]   ;;  %v14449_v37 = vld [vmem:[%s17835_s4 + $0x170] sm:$0xff]  }
 0x2e4   : > { %13079 = vmatprep.subr.bf16.mxu0 %v14431_v53  ;;  %v7203_v45 = vld [vmem:[#allocation2 + $0x4b] sm:$0xff] }
 0x2e5   : > { %12908 = vmatpush3.bf16.msra.mxu1 %v14430_v41  ;;  %v7034_v41 = vld [vmem:[#allocation2 + $0x7a] sm:$0xff] }
 0x2e6   : > { %12909 = vmatprep.subr.bf16.mxu1 %v14432_v33 }
 0x2e7   : > { %13080 = vmatpush3.bf16.msra.mxu0 %v14431_v53  ;;  %v7200_v53 = vld [vmem:[#allocation2 + $0x33] sm:$0xff] }
 0x2e8   : > { %12898 = vmatmul.mubr.bf16.gmra.mrb[20].mxu1 %v16858_v42  ;;  %13081 = vmatprep.subr.bf16.mxu0 %v14433_v32 }
 0x2e9   : > { %12910 = vmatpush3.bf16.msra.mxu1 %v14432_v33  ;;  %12917 = vmatprep.mubr.bf16.mxu1 %v7036_v47  ;;  %v16924_v33 = vmul.u32.u64.low 3817748708, %v16907_v60  ;;  %v16925_v12 = vmul.u32.u64.high 3817748708, %v16907_v60, %v16924_v33 }
 0x2ea   : > { %12911 = vmatprep.subr.bf16.mxu1 %v14434_v5 }
 0x2eb   : > { %13082 = vmatpush3.bf16.msra.mxu0 %v14433_v32  ;;  %v7041_v32 = vpack.c.bf16 %v7035_v50, %v7034_v41  ;;  %v5577_v39 = vshrl.u32 %v16925_v12, 4 }
 0x2ec   : > { %13083 = vmatprep.subr.bf16.mxu0 %v14435_v8 }
 0x2ed   : > { %12912 = vmatpush3.bf16.msra.mxu1 %v14434_v5  ;;  %v16934_v5 = vmul.u32.u64.low 3817748708, %v16913_v14  ;;  %v16935_v47 = vmul.u32.u64.high 3817748708, %v16913_v14, %v16934_v5  ;;  %v5578_v62 = vmul.u32 18, %v5577_v39  ;;  %v14457_v39 = vld [vmem:[%s17835_s4 + $0x50] sm:$0xff]  }
 0x2ee   : > { %12913 = vmatprep.subr.bf16.mxu1 %v14436_v0 }
 0x2ef   : > { %13084 = vmatpush3.bf16.msra.mxu0 %v14435_v8  ;;  %v5610_v11 = vshrl.u32 %v16935_v47, 4 }
 0x2f0   : > { %13097 = vmatprep.subr.bf16.mxu0 %v14437_v31 }
 0x2f1   : > { %12914 = vmatpush3.bf16.msra.mxu1 %v14436_v0  ;;  %v14451_v0 = vld [vmem:[%s17835_s4 + $0x178] sm:$0xff]  }
 0x2f2   : > { %13086 = vmatmul.mubr.bf16.vlgmr.msra.gmra.mrb[24].mxu0 %v8130_v51  ;;  %12915 = vmatprep.subr.bf16.mxu1 %v14438_v13  ;;  %v16948_v51 = vadd.s32 192, %v18041_v9  ;;  %v14462_v9 = vld [vmem:[%s17835_s4 + $0x198] sm:$0xff]  }
 0x2f3   : > { %13089 = vmatprep.mubr.bf16.mxu0 %v8131_v30  ;;  %13098 = vmatpush3.bf16.msra.mxu0 %v14437_v31  ;;  %v16941_v31 = vmul.u32.u64.low 3817748708, %v16928_v27  ;;  %v16942_v22 = vmul.u32.u64.high 3817748708, %v16928_v27, %v16941_v31 }
 0x2f4   : > { %13099 = vmatprep.subr.bf16.mxu0 %v14439_v25 }
 0x2f5   : > { %12916 = vmatpush3.bf16.msra.mxu1 %v14438_v13  ;;  %v18040_v13 = vld [vmem:[#allocation7_spill] sm:$0xff] }
 0x2f6   : > { %12929 = vmatprep.subr.bf16.mxu1 %v14440_v38  ;;  %v16945_v17 = vadd.s32 192, %v18040_v13  ;;  %v17031_v13 = vadd.s32 192, %v15743_v35 }
 0x2f7   : > { %13100 = vmatpush3.bf16.msra.mxu0 %v14439_v25  ;;  %v18042_v25 = vld [vmem:[#allocation9_spill] sm:$0xff] }
 0x2f8   : > { %12918 = vmatmul.mubr.bf16.vlgmr.msra.gmra.mrb[12].mxu1 %v7037_v21  ;;  %13101 = vmatprep.subr.bf16.mxu0 %v14441_v19  ;;  %v16954_v30 = vadd.s32 192, %v18042_v25  ;;  %v16966_v21 = vmul.u32.u64.low 3817748708, %v16948_v51  ;;  %v16967_v15 = vmul.u32.u64.high 3817748708, %v16948_v51, %v16966_v21 }
 0x2f9   : > { %12921 = vmatprep.mubr.bf16.mxu1 %v7038_v36  ;;  %12930 = vmatpush3.bf16.msra.mxu1 %v14440_v38  ;;  %v5599_v38 = vshrl.u32 %v16918_v55, 4  ;;  %v8297_v36 = vld [vmem:[#allocation2 + $0xa1] sm:$0xff]  ;;  %v8298_v55 = vld [vmem:[#allocation2 + $0xa9] sm:$0xff] }
 0x2fa   : > { %13090 = vmatmul.mubr.bf16.gmra.mrb[28].mxu0 %v8132_v23  ;;  %12931 = vmatprep.subr.bf16.mxu1 %v14442_v54  ;;  %v16974_v23 = vmul.u32.u64.low 3817748708, %v16954_v30  ;;  %v16975_v56 = vmul.u32.u64.high 3817748708, %v16954_v30, %v16974_v23  ;;  %v16986_v1 = vpack.c.bf16 %v8297_v36, %v8296_v20  ;;  %v17007_v26 = vpack.c.bf16 %v8299_v46, %v8298_v55  ;;  %v7206_v21 = vld [vmem:[#allocation2 + $0x63] sm:$0xff]  ;;  %v7208_v36 = vld [vmem:[#allocation2 + $0x73] sm:$0xff] }
 0x2fb   : > { %13093 = vmatprep.mubr.bf16.mxu0 %v8133_v28  ;;  %13102 = vmatpush3.bf16.msra.mxu0 %v14441_v19  ;;  %v16962_v16 = vmul.u32.u64.low 3817748708, %v16945_v17  ;;  %v16963_v19 = vmul.u32.u64.high 3817748708, %v16945_v17, %v16962_v16  ;;  %v5600_v28 = vmul.u32 18, %v5599_v38 }
 0x2fc   : > { %13103 = vmatprep.subr.bf16.mxu0 %v14443_v10 }
 0x2fd   : > { %12932 = vmatpush3.bf16.msra.mxu1 %v14442_v54  ;;  %v14453_v54 = vld [vmem:[%s17835_s4 + $0x238] sm:$0xff]   ;;  %v5643_v12 = vshrl.u32 %v16963_v19, 4 }
 0x2fe   : > { %12933 = vmatprep.subr.bf16.mxu1 %v14444_v2 }
 0x2ff   : > { %13104 = vmatpush3.bf16.msra.mxu0 %v14443_v10  ;;  %v8294_v10 = vld [vmem:[#allocation2 + $0x89] sm:$0xff] }
 0x300   : > { %12922 = vmatmul.mubr.bf16.gmra.mrb[16].mxu1 %v7039_v40  ;;  %13105 = vmatprep.subr.bf16.mxu0 %v14445_v61  ;;  %v16980_v29 = vpack.c.bf16 %v8295_v7, %v8294_v10  ;;  %v7201_v40 = vld [vmem:[#allocation2 + $0x3b] sm:$0xff] }
 0x301   : > { %12925 = vmatprep.mubr.bf16.mxu1 %v7040_v52  ;;  %12934 = vmatpush3.bf16.msra.mxu1 %v14444_v2  ;;  %v18043_v2 = vld [vmem:[#allocation10_spill] sm:$0xff]  ;;  %v14454_v52 = vld [vmem:[%s17835_s4 + $0x40] sm:$0xff]  }
 0x302   : > { %13094 = vmatmul.mubr.bf16.gmra.mrb[32].mxu0 %v8134_v63  ;;  %12935 = vmatprep.subr.bf16.mxu1 %v14446_v18  ;;  %v16978_v4 = vadd.s32 192, %v18043_v2  ;;  %v5611_v63 = vmul.u32 18, %v5610_v11  ;;  %v14470_v2 = vld [vmem:[%s17835_s4 + $0x1b8] sm:$0xff]  }
 0x303   : > { %13106 = vmatpush3.bf16.msra.mxu0 %v14445_v61  ;;  %13113 = vmatprep.mubr.bf16.mxu0 %v16858_v42  ;;  %v7199_v42 = vld [vmem:[#allocation2 + $0x2b] sm:$0xff]  ;;  %v5588_v61 = vshrl.u32 %v16942_v22, 4 }
 0x304   : > { %13107 = vmatprep.subr.bf16.mxu0 %v14447_v24  ;;  %v7211_v8 = vpack.c.bf16 %v7200_v53, %v7199_v42  ;;  %v16997_v48 = vmul.u32.u64.low 3817748708, %v16978_v4  ;;  %v16998_v41 = vmul.u32.u64.high 3817748708, %v16978_v4, %v16997_v48  ;;  %v14460_v53 = vld [vmem:[%s17835_s4 + $0x190] sm:$0xff]   ;;  %v17019_v47 = vsub.s32 %v16913_v14, %v5611_v63 }
 0x305   : > { %12936 = vmatpush3.bf16.msra.mxu1 %v14446_v18  ;;  %v7202_v18 = vld [vmem:[#allocation2 + $0x43] sm:$0xff]  ;;  %v5589_v33 = vmul.u32 18, %v5588_v61  ;;  %v18044_v42 = vld [vmem:[#allocation11_spill] sm:$0xff] }
 0x306   : > { %12937 = vmatprep.subr.bf16.mxu1 %v14448_v43  ;;  %v7212_v50 = vpack.c.bf16 %v7202_v18, %v7201_v40  ;;  %vm5706_vm6 = vcmp.ne.s32.totalorder %v17019_v47, 0  ;;  %vm5718_vm11 = vcmp.lt.s32.totalorder %v17019_v47, 0  ;;  %v14459_v40 = vld [vmem:[%s17835_s4 + $0x58] sm:$0xff]  }
 0x307   : > { %13108 = vmatpush3.bf16.msra.mxu0 %v14447_v24  ;;  %v8300_v24 = vld [vmem:[#allocation2 + $0xb9] sm:$0xff]  ;;  %v17036_v14 = vsub.s32 %v16928_v27, %v5589_v33  ;;  %vm17108_vm7 = vmand %vm5718_vm11, %vm5706_vm6 }
 0x308   : > { %12926 = vmatmul.mubr.bf16.gmra.mrb[20].mxu1 %v7041_v32  ;;  %13109 = vmatprep.subr.bf16.mxu0 %v14449_v37  ;;  %v5621_v32 = vshrl.u32 %v16967_v15, 4  ;;  %v17013_v5 = vpack.c.bf16 %v8301_v49, %v8300_v24  ;;  %v7205_v27 = vld [vmem:[#allocation2 + $0x5b] sm:$0xff]  ;;  %v5632_v15 = vshrl.u32 %v16998_v41, 4  ;;  %v7210_v41 = vld [vmem:[#allocation2 + $0x83] sm:$0xff] }
 0x309   : > { %12938 = vmatpush3.bf16.msra.mxu1 %v14448_v43  ;;  %12945 = vmatprep.mubr.bf16.mxu1 %v7211_v8  ;;  %v16994_v43 = vsub.s32 %v16901_v34, %v5600_v28  ;;  %v7213_v34 = vpack.c.bf16 %v7204_v44, %v7203_v45  ;;  %v5654_v8 = vshrl.u32 %v16975_v56, 4  ;;  %v17076_v56 = vadd.s32 18, %v17019_v47  ;;  %v14464_v28 = vld [vmem:[%s17835_s4 + $0x1a0] sm:$0xff]   ;;  %v9094_v45 = vld [vmem:[#allocation2 + $0xce] sm:$0xff] }
 0x30a   : > { %12939 = vmatprep.subr.bf16.mxu1 %v14450_v59  ;;  %v5622_v25 = vmul.u32 18, %v5621_v32  ;;  %vm5704_vm14 = vcmp.ne.s32.totalorder %v17036_v14, 0  ;;  %vm5716_vm0 = vcmp.lt.s32.totalorder %v17036_v14, 0  ;;  %v7214_v61 = vpack.c.bf16 %v7206_v21, %v7205_v27  ;;  %v7209_v49 = vld [vmem:[#allocation2 + $0x7b] sm:$0xff]  ;;  %v14463_v21 = vld [vmem:[%s17835_s4 + $0x68] sm:$0xff]  }
 0x30b   : > { %13110 = vmatpush3.bf16.msra.mxu0 %v14449_v37  ;;  %v17004_v37 = vsub.s32 %v16907_v60, %v5578_v62  ;;  %v14455_v60 = vld [vmem:[%s17835_s4 + $0x48] sm:$0xff]   ;;  %vm5705_vm4 = vcmp.ne.s32.totalorder %v16994_v43, 0  ;;  %vm5717_vm12 = vcmp.lt.s32.totalorder %v16994_v43, 0  ;;  %v17028_v22 = vadd.s32 18, %v16994_v43  ;;  %vm17128_vm15 = vmand %vm5716_vm0, %vm5704_vm14 }
 0x30c   : > { %13111 = vmatprep.subr.bf16.mxu0 %v14451_v0  ;;  %v5655_v16 = vmul.u32 18, %v5654_v8  ;;  %vm17068_vm10 = vmand %vm5717_vm12, %vm5705_vm4  ;;  %v5740_v44 = vadd.s32 18, %v17036_v14  ;;  %v5633_v46 = vmul.u32 18, %v5632_v15  ;;  %v5754_v48 = vsel %vm17108_vm7, %v17076_v56, %v17019_v47 }
 0x30d   : > { %12940 = vmatpush3.bf16.msra.mxu1 %v14450_v59  ;;  %v17011_v59 = vadd.s32 192, %v18044_v42  ;;  %vm5703_vm2 = vcmp.ne.s32.totalorder %v17004_v37, 0  ;;  %vm5715_vm5 = vcmp.lt.s32.totalorder %v17004_v37, 0  ;;  %v17073_v23 = vadd.s32 18, %v17004_v37 }
 0x30e   : > { %12941 = vmatprep.subr.bf16.mxu1 %v14452_v58  ;;  %vm17089_vm3 = vmand %vm5715_vm5, %vm5703_vm2  ;;  %v5753_v63 = vsel %vm17068_vm10, %v17028_v22, %v16994_v43  ;;  %v14466_v43 = vld [vmem:[%s17835_s4 + $0x1a8] sm:$0xff]   ;;  %vm17194_vm10 = vcmp.lt.s32.totalorder %v5754_v48, 16 }
 0x30f   : > { %13112 = vmatpush3.bf16.msra.mxu0 %v14451_v0  ;;  %v18045_v0 = vld [vmem:[#allocation12_spill] sm:$0xff]  ;;  %v17042_v35 = vmul.u32.u64.low 3817748708, %v17011_v59  ;;  %v17043_v38 = vmul.u32.u64.high 3817748708, %v17011_v59, %v17042_v35  ;;  %v5751_v24 = vsel %vm17089_vm3, %v17073_v23, %v17004_v37  ;;  %vm17174_vm5 = vcmp.lt.s32.totalorder %v5753_v63, 16 }
 0x310   : > { %13125 = vmatprep.subr.bf16.mxu0 %v14456_v3  ;;  %v17023_v31 = vadd.s32 192, %v18045_v0  ;;  %v7216_v0 = vpack.c.bf16 %v7210_v41, %v7209_v49  ;;  %vm17190_vm11 = vcmp.lt.s32.totalorder %v5751_v24, 16  ;;  %v14480_v35 = vld [vmem:[%s17835_s4 + $0x1e0] sm:$0xff]  }
 0x311   : > { %12942 = vmatpush3.bf16.msra.mxu1 %v14452_v58  ;;  %v5644_v58 = vmul.u32 18, %v5643_v12  ;;  %v5687_v55 = vshrl.u32 %v17043_v38, 4  ;;  %v17156_v12 = vld [vmem:[%s17834_s3] ss:$0 sm:$0xff] }
 0x312   : > { %13114 = vmatmul.mubr.bf16.vlgmr.msra.gmra.mrb[24].mxu0 %v16980_v29  ;;  %12943 = vmatprep.subr.bf16.mxu1 %v14453_v54  ;;  %v17054_v19 = vmul.u32.u64.low 3817748708, %v17023_v31  ;;  %v17055_v7 = vmul.u32.u64.high 3817748708, %v17023_v31, %v17054_v19  ;;  %v14469_v38 = vld [vmem:[%s17835_s4] sm:$0xff]  }
 0x313   : > { %13117 = vmatprep.mubr.bf16.mxu0 %v16986_v1  ;;  %13126 = vmatpush3.bf16.msra.mxu0 %v14456_v3  ;;  %v17046_v3 = vadd.s32 192, %v17984_v57  ;;  %v7207_v57 = vld [vmem:[#allocation2 + $0x6b] sm:$0xff]  ;;  %v17080_v10 = vsub.s32 %v16945_v17, %v5644_v58  ;;  %v5688_v27 = vmul.u32 18, %v5687_v55 }
 0x314   : > { %13127 = vmatprep.subr.bf16.mxu0 %v14458_v6  ;;  %v5665_v33 = vshrl.u32 %v17055_v7, 4 }
 0x315   : > { %12944 = vmatpush3.bf16.msra.mxu1 %v14453_v54  ;;  %v17061_v54 = vmul.u32.u64.low 3817748708, %v17031_v13  ;;  %v17062_v20 = vmul.u32.u64.high 3817748708, %v17031_v13, %v17061_v54  ;;  %v17098_v17 = vmul.u32.u64.low 3817748708, %v17046_v3  ;;  %v17099_v62 = vmul.u32.u64.high 3817748708, %v17046_v3, %v17098_v17 }
 0x316   : > { %13209 = vmatprep.subr.bf16.mxu1 %v14454_v52  ;;  %vm5709_vm1 = vcmp.ne.s32.totalorder %v17080_v10, 0  ;;  %vm5721_vm9 = vcmp.lt.s32.totalorder %v17080_v10, 0  ;;  %v17148_v37 = vadd.s32 18, %v17080_v10  ;;  %v5666_v15 = vmul.u32 18, %v5665_v33 }
 0x317   : > { %13128 = vmatpush3.bf16.msra.mxu0 %v14458_v6  ;;  %v17095_v6 = vsub.s32 %v16948_v51, %v5622_v25  ;;  %v17113_v51 = vsub.s32 %v16954_v30, %v5655_v16  ;;  %vm17165_vm2 = vmand %vm5721_vm9, %vm5709_vm1  ;;  %v5698_v47 = vshrl.u32 %v17062_v20, 4  ;;  %v14521_v25 = vld [vmem:[%s17835_s4 + $0x158] sm:$0xff]  }
 0x318   : > { %12946 = vmatmul.mubr.bf16.vlgmr.msra.gmra.mrb[12].mxu1 %v7212_v50  ;;  %13129 = vmatprep.subr.bf16.mxu0 %v14460_v53  ;;  %v9093_v50 = vld [vmem:[#allocation2 + $0xc6] sm:$0xff] }
 0x319   : > { %12949 = vmatprep.mubr.bf16.mxu1 %v7213_v34  ;;  %13210 = vmatpush3.bf16.msra.mxu1 %v14454_v52  ;;  %v7215_v52 = vpack.c.bf16 %v7208_v36, %v7207_v57  ;;  %vm5707_vm8 = vcmp.ne.s32.totalorder %v17095_v6, 0  ;;  %vm5719_vm13 = vcmp.lt.s32.totalorder %v17095_v6, 0  ;;  %vm5710_vm4 = vcmp.ne.s32.totalorder %v17113_v51, 0 }
 0x31a   : > { %13118 = vmatmul.mubr.bf16.gmra.mrb[28].mxu0 %v17007_v26  ;;  %13211 = vmatprep.subr.bf16.mxu1 %v14455_v60  ;;  %vm5722_vm12 = vcmp.lt.s32.totalorder %v17113_v51, 0  ;;  %v5752_v34 = vsel %vm17128_vm15, %v5740_v44, %v17036_v14  ;;  %v5743_v42 = vadd.s32 18, %v17095_v6  ;;  %v9105_v22 = vpack.c.bf16 %v9094_v45, %v9093_v50  ;;  %vm17182_vm6 = vmand %vm5719_vm13, %vm5707_vm8 }
 0x31b   : > { %13121 = vmatprep.mubr.bf16.mxu0 %v17013_v5  ;;  %13130 = vmatpush3.bf16.msra.mxu0 %v14460_v53  ;;  %v14461_v53 = vld [vmem:[%s17835_s4 + $0x60] sm:$0xff]   ;;  %vm17202_vm14 = vmand %vm5722_vm12, %vm5710_vm4  ;;  %vm17208_vm3 = vcmp.lt.s32.totalorder %v5752_v34, 16  ;;  %v5757_v57 = vsel %vm17165_vm2, %v17148_v37, %v17080_v10  ;;  %v5699_v11 = vmul.u32 18, %v5698_v47  ;;  %v17243_v44 = vsub.s32 %v17023_v31, %v5666_v15  ;;  %v14467_v37 = vld [vmem:[%s17835_s4 + $0x78] sm:$0xff]  }
 0x31c   : > { %13131 = vmatprep.subr.bf16.mxu0 %v14462_v9  ;;  %v5755_v36 = vsel %vm17182_vm6, %v5743_v42, %v17095_v6  ;;  %vm17260_vm1 = vcmp.lt.s32.totalorder %v5757_v57, 16  ;;  %v14476_v47 = vld [vmem:[%s17835_s4 + $0x1d0] sm:$0xff]  }
 0x31d   : > { %13212 = vmatpush3.bf16.msra.mxu1 %v14455_v60  ;;  %v17171_v60 = vsub.s32 %v16978_v4, %v5633_v46  ;;  %v14468_v4 = vld [vmem:[%s17835_s4 + $0x1b0] sm:$0xff]   ;;  %v17256_v24 = vsub.s32 %v17031_v13, %v5699_v11  ;;  %vm17264_vm9 = vcmp.lt.s32.totalorder %v5755_v36, 16  ;;  %v17275_v13 = vld [vmem:[%s17835_s4 + $0x1c0] sm:$0xff]   ;;  %vm5711_vm12 = vcmp.ne.s32.totalorder %v17243_v44, 0 }
 0x31e   : > { %13213 = vmatprep.subr.bf16.mxu1 %v14457_v39  ;;  %vm5723_vm2 = vcmp.lt.s32.totalorder %v17243_v44, 0  ;;  %v5747_v8 = vadd.s32 18, %v17243_v44 }
 0x31f   : > { %13132 = vmatpush3.bf16.msra.mxu0 %v14462_v9  ;;  %v5746_v9 = vadd.s32 18, %v17113_v51  ;;  %vm5708_vm0 = vcmp.ne.s32.totalorder %v17171_v60, 0  ;;  %vm5720_vm7 = vcmp.lt.s32.totalorder %v17171_v60, 0  ;;  %vm5726_vm6 = vcmp.lt.s32.totalorder %v17256_v24, 0 }
 0x320   : > { %12950 = vmatmul.mubr.bf16.gmra.mrb[16].mxu1 %v7214_v61  ;;  %13133 = vmatprep.subr.bf16.mxu0 %v14464_v28  ;;  %vm17251_vm15 = vmand %vm5720_vm7, %vm5708_vm0 }
 0x321   : > { %12953 = vmatprep.mubr.bf16.mxu1 %v7215_v52  ;;  %13214 = vmatpush3.bf16.msra.mxu1 %v14457_v39  ;;  %v5676_v39 = vshrl.u32 %v17099_v62, 4  ;;  %v5758_v10 = vsel %vm17202_vm14, %v5746_v9, %v17113_v51  ;;  %v17234_v62 = vsub.s32 %v17011_v59, %v5688_v27  ;;  %v14465_v51 = vld [vmem:[%s17835_s4 + $0x70] sm:$0xff]   ;;  %v5744_v52 = vadd.s32 18, %v17171_v60 }
 0x322   : > { %13215 = vmatprep.subr.bf16.mxu1 %v14459_v40  ;;  %v12695_v58 = vpop.f32.mrb[12].mxu0  ;;  %vm17268_vm8 = vcmp.lt.s32.totalorder %v5758_v10, 16 }
 0x323   : > { %13134 = vmatpush3.bf16.msra.mxu0 %v14464_v28  ;;  %v5537_v16 = vadd.f32 %v12695_v58, %v17156_v12  ;;  %v5469_v19 = vpop.f32.mrb[13].mxu0  ;;  %v5677_v61 = vmul.u32 18, %v5676_v39  ;;  %vm5713_vm13 = vcmp.ne.s32.totalorder %v17234_v62, 0  ;;  %vm5725_vm4 = vcmp.lt.s32.totalorder %v17234_v62, 0 }
 0x324   : > { %13135 = vmatprep.subr.bf16.mxu0 %v14466_v43  ;;  %v5535_v54 = vadd.f32 %v17156_v12, %v5469_v19  ;;  %v12696_v20 = vpop.f32.mrb[14].mxu0  ;;  %v5749_v34 = vadd.s32 18, %v17234_v62 }
 0x325   : > { %13216 = vmatpush3.bf16.msra.mxu1 %v14459_v40  ;;  %v5549_v23 = vmax.f32 %v5537_v16, 0.0  ;;  %v5538_v56 = vadd.f32 %v12696_v20, %v17156_v12  ;;  %v5472_v28 = vpop.f32.mrb[15].mxu0  ;;  %v17282_v50 = vsub.s32 %v17046_v3, %v5677_v61  ;;  %v8302_v16 = vld [vmem:[#allocation2 + $0xc9] sm:$0xff] }
 0x326   : > { %13217 = vmatprep.subr.bf16.mxu1 %v14461_v53  ;;  %v5547_v6 = vmax.f32 %v5535_v54, 0.0  ;;  %v5536_v17 = vadd.f32 %v17156_v12, %v5472_v28  ;;  %v14484_v54 = vld [vmem:[%s17835_s4 + $0x1f0] sm:$0xff]  }
 0x327   : > { %13136 = vmatpush3.bf16.msra.mxu0 %v14466_v43  ;;  %v5801_v40 = vsel %vm17174_vm5, %v5549_v23, 0.0  ;;  %v5550_v18 = vmax.f32 %v5538_v56, 0.0  ;;  %vm5714_vm5 = vcmp.ne.s32.totalorder %v17256_v24, 0  ;;  %vm5712_vm14 = vcmp.ne.s32.totalorder %v17282_v50, 0 }
 0x328   : > { %12954 = vmatmul.mubr.bf16.gmra.mrb[20].mxu1 %v7216_v0  ;;  %13137 = vmatprep.subr.bf16.mxu0 %v14468_v4  ;;  %5813 = vst [vmem:[#allocation2 + $0xe8] sm:$0xff] %v5801_v40  ;;  %v5799_v59 = vsel %vm17190_vm11, %v5547_v6, 0.0  ;;  %v5548_v46 = vmax.f32 %v5536_v17, 0.0  ;;  %vm17302_vm11 = vmand %vm5725_vm4, %vm5713_vm13  ;;  %v5750_v0 = vadd.s32 18, %v17256_v24  ;;  %v5748_v7 = vadd.s32 18, %v17282_v50  ;;  %v14471_v40 = vld [vmem:[%s17835_s4 + $0x8] sm:$0xff]  }
 0x329   : > { %13218 = vmatpush3.bf16.msra.mxu1 %v14461_v53  ;;  %13225 = vmatprep.mubr.bf16.mxu1 %v9105_v22  ;;  %5811 = vst [vmem:[#allocation2 + $0xd8] sm:$0xff] %v5799_v59  ;;  %v5802_v31 = vsel %vm17194_vm10, %v5550_v18, 0.0  ;;  %v5756_v53 = vsel %vm17251_vm15, %v5744_v52, %v17171_v60  ;;  %vm17316_vm10 = vmand %vm5723_vm2, %vm5711_vm12  ;;  %v5761_v57 = vsel %vm17302_vm11, %v5749_v34, %v17234_v62  ;;  %vm14569_vm4 = vmmov 1   ;;  %v14525_v18 = vld [vmem:[%s17835_s4 + $0x178] sm:$0xff]  }
 0x32a   : > { %13219 = vmatprep.subr.bf16.mxu1 %v14463_v21  ;;  %5814 = vst [vmem:[#allocation2 + $0xf0] sm:$0xff] %v5802_v31  ;;  %v5800_v48 = vsel %vm17208_vm3, %v5548_v46, 0.0  ;;  %v12699_v41 = vpop.f32.mrb[16].mxu0  ;;  %vm5724_vm3 = vcmp.lt.s32.totalorder %v17282_v50, 0  ;;  %vm17324_vm0 = vcmp.lt.s32.totalorder %v5756_v53, 16  ;;  %vm17332_vm7 = vmand %vm5726_vm6, %vm5714_vm5  ;;  %v5759_v23 = vsel %vm17316_vm10, %v5747_v8, %v17243_v44  ;;  %v9060_v8 = vld [vmem:[#allocation2 + $0xcd] sm:$0xff] }
 0x32b   : > { %13138 = vmatpush3.bf16.msra.mxu0 %v14468_v4  ;;  %5812 = vst [vmem:[#allocation2 + $0xe0] sm:$0xff] %v5800_v48  ;;  %v5541_v45 = vadd.f32 %v12699_v41, %v17156_v12  ;;  %v5485_v55 = vpop.f32.mrb[17].mxu0  ;;  %vm17354_vm15 = vmand %vm5724_vm3, %vm5712_vm14  ;;  %v5762_v56 = vsel %vm17332_vm7, %v5750_v0, %v17256_v24  ;;  %v14473_v41 = vld [vmem:[%s17835_s4 + $0x10] sm:$0xff]   ;;  %v14523_v46 = vld [vmem:[%s17835_s4 + $0x168] sm:$0xff]  }
 0x32c   : > { %13139 = vmatprep.subr.bf16.mxu0 %v14470_v2  ;;  %v5539_v3 = vadd.f32 %v17156_v12, %v5485_v55  ;;  %v12700_v33 = vpop.f32.mrb[18].mxu0  ;;  %v5760_v44 = vsel %vm17354_vm15, %v5748_v7, %v17282_v50  ;;  %v14474_v55 = vld [vmem:[%s17835_s4 + $0x1c8] sm:$0xff]   ;;  %vm14551_vm12 = vmpackc.low %vm17324_vm0, %vm14569_vm4 }
 0x32d   : > { %13220 = vmatpush3.bf16.msra.mxu1 %v14463_v21  ;;  %v5553_v32 = vmax.f32 %v5541_v45, 0.0  ;;  %v5542_v42 = vadd.f32 %v12700_v33, %v17156_v12  ;;  %v5488_v60 = vpop.f32.mrb[19].mxu0  ;;  %vm17407_vm13 = vcmp.lt.s32.totalorder %v5760_v44, 16  ;;  %v8642_v7 = vld [vmem:[#allocation2 + $0x8a] sm:$0xff] }
 0x32e   : > { %13221 = vmatprep.subr.bf16.mxu1 %v14465_v51  ;;  %v5551_v22 = vmax.f32 %v5539_v3, 0.0  ;;  %v17310_v14 = vadd.f32 %v17156_v12, %v5488_v60  ;;  %v14475_v60 = vld [vmem:[%s17835_s4 + $0x18] sm:$0xff]   ;;  %v14489_v44 = vld [vmem:[%s17835_s4 + $0x90] sm:$0xff]   ;;  %v14527_v48 = vld [vmem:[%s17835_s4 + $0x188] sm:$0xff]  }
 0x32f   : > { %13140 = vmatpush3.bf16.msra.mxu0 %v14470_v2  ;;  %v5805_v4 = vsel %vm17260_vm1, %v5553_v32, 0.0  ;;  %v5554_v58 = vmax.f32 %v5542_v42, 0.0  ;;  %vm17375_vm1 = vcmp.lt.s32.totalorder %v5761_v57, 16 }
 0x330   : > { %13153 = vmatprep.subr.bf16.mxu0 %v17275_v13  ;;  %5817 = vst [vmem:[#allocation2 + $0x108] sm:$0xff] %v5805_v4  ;;  %v5803_v27 = vsel %vm17264_vm9, %v5551_v22, 0.0  ;;  %v5552_v39 = vmax.f32 %v17310_v14, 0.0  ;;  %v8303_v19 = vld [vmem:[#allocation2 + $0xd1] sm:$0xff]  ;;  %vm17387_vm9 = vcmp.lt.s32.totalorder %v5759_v23, 16  ;;  %v14479_v4 = vld [vmem:[%s17835_s4 + $0x28] sm:$0xff]  }
 0x331   : > { %13222 = vmatpush3.bf16.msra.mxu1 %v14465_v51  ;;  %5815 = vst [vmem:[#allocation2 + $0xf8] sm:$0xff] %v5803_v27  ;;  %v5806_v21 = vsel %vm17268_vm8, %v5554_v58, 0.0  ;;  %v17348_v15 = vpack.c.bf16 %v8303_v19, %v8302_v16  ;;  %v9098_v20 = vld [vmem:[#allocation2 + $0xee] sm:$0xff]  ;;  %v9095_v28 = vld [vmem:[#allocation2 + $0xd6] sm:$0xff]  ;;  %vm17395_vm8 = vcmp.lt.s32.totalorder %v5762_v56, 16  ;;  %vm14554_vm2 = vmpackc.low %vm17407_vm13, %vm17387_vm9 }
 0x332   : > { %13223 = vmatprep.subr.bf16.mxu1 %v14467_v37  ;;  %5818 = vst [vmem:[#allocation2 + $0x110] sm:$0xff] %v5806_v21  ;;  %v5804_v36 = vsel %vm17324_vm0, %v5552_v39, 0.0  ;;  %v12703_v11 = vpop.f32.mrb[20].mxu0  ;;  %v9096_v10 = vld [vmem:[#allocation2 + $0xde] sm:$0xff]  ;;  %v9097_v2 = vld [vmem:[#allocation2 + $0xe6] sm:$0xff]  ;;  %v8643_v27 = vld [vmem:[#allocation2 + $0x92] sm:$0xff] }
 0x333   : > { %5816 = vst [vmem:[#allocation2 + $0x100] sm:$0xff] %v5804_v36  ;;  %v17369_v6 = vadd.f32 %v12703_v11, %v17156_v12  ;;  %v5501_v17 = vpop.f32.mrb[21].mxu0  ;;  %13122 = vmatmul.mubr.bf16.gmra.mrb[32].mxu0 %v17348_v15  ;;  %v9106_v62 = vpack.c.bf16 %v9096_v10, %v9095_v28  ;;  %v9107_v61 = vpack.c.bf16 %v9098_v20, %v9097_v2  ;;  %v14481_v16 = vld [vmem:[%s17835_s4 + $0x30] sm:$0xff]   ;;  %v14482_v21 = vld [vmem:[%s17835_s4 + $0x1e8] sm:$0xff]   ;;  %v14485_v20 = vld [vmem:[%s17835_s4 + $0x80] sm:$0xff]  }
 0x334   : > { %v17380_v51 = vadd.f32 %v17156_v12, %v5501_v17  ;;  %v12704_v52 = vpop.f32.mrb[22].mxu0  ;;  %13141 = vmatprep.mubr.bf16.mxu0 %v16980_v29  ;;  %v8654_v57 = vpack.c.bf16 %v8643_v27, %v8642_v7  ;;  %v9062_v36 = vld [vmem:[#allocation2 + $0xdd] sm:$0xff]  ;;  %v9063_v11 = vld [vmem:[#allocation2 + $0xe5] sm:$0xff]  ;;  %v9064_v23 = vld [vmem:[#allocation2 + $0xed] sm:$0xff] }
 0x335   : > { %13224 = vmatpush3.bf16.msra.mxu1 %v14467_v37  ;;  %v5557_v59 = vmax.f32 %v17369_v6, 0.0  ;;  %v17392_v63 = vadd.f32 %v12704_v52, %v17156_v12  ;;  %v5504_v24 = vpop.f32.mrb[23].mxu0  ;;  %v14486_v56 = vld [vmem:[%s17835_s4 + $0x1f8] sm:$0xff]   ;;  %v14487_v2 = vld [vmem:[%s17835_s4 + $0x88] sm:$0xff]   ;;  %v9073_v17 = vpack.c.bf16 %v9064_v23, %v9063_v11  ;;  %v14496_v27 = vld [vmem:[%s17835_s4 + $0x220] sm:$0xff]  }
 0x336   : > { %13237 = vmatprep.subr.bf16.mxu1 %v14469_v38  ;;  %v5555_v31 = vmax.f32 %v17380_v51, 0.0  ;;  %v17400_v29 = vadd.f32 %v17156_v12, %v5504_v24  ;;  %v9061_v28 = vld [vmem:[#allocation2 + $0xd5] sm:$0xff]  ;;  %v8646_v24 = vld [vmem:[#allocation2 + $0xaa] sm:$0xff]  ;;  %v8653_v7 = vld [vmem:[#allocation2 + $0xe2] sm:$0xff] }
 0x337   : > { %v5809_v30 = vsel %vm17375_vm1, %v5557_v59, 0.0  ;;  %v5558_v43 = vmax.f32 %v17392_v63, 0.0  ;;  %v9072_v10 = vpack.c.bf16 %v9062_v36, %v9061_v28  ;;  %v8647_v52 = vld [vmem:[#allocation2 + $0xb2] sm:$0xff]  ;;  %v9388_v28 = vld [vmem:[#allocation2 + $0xdf] sm:$0xff]  ;;  %vm14557_vm5 = vmpackc.low %vm17395_vm8, %vm17375_vm1 }
 0x338   : > { %13226 = vmatmul.mubr.bf16.vlgmr.msra.gmra.mrb[24].mxu1 %v9106_v62  ;;  %5821 = vst [vmem:[#allocation2 + $0x128] sm:$0xff] %v5809_v30  ;;  %v5807_v12 = vsel %vm17387_vm9, %v5555_v31, 0.0  ;;  %v5556_v50 = vmax.f32 %v17400_v29, 0.0  ;;  %v9099_v3 = vld [vmem:[#allocation2 + $0xf6] sm:$0xff]  ;;  %v14488_v62 = vld [vmem:[%s17835_s4 + $0x200] sm:$0xff]   ;;  %v9912_v29 = vld [vmem:[#allocation2 + $0xe9] sm:$0xff] }
 0x339   : > { %13238 = vmatpush3.bf16.msra.mxu1 %v14469_v38  ;;  %13229 = vmatprep.mubr.bf16.mxu1 %v9107_v61  ;;  %5819 = vst [vmem:[#allocation2 + $0x118] sm:$0xff] %v5807_v12  ;;  %v5810_v45 = vsel %vm17395_vm8, %v5558_v43, 0.0  ;;  %v9102_v53 = vld [vmem:[#allocation2 + $0x10e] sm:$0xff]  ;;  %v8477_v38 = vld [vmem:[#allocation2 + $0xd9] sm:$0xff]  ;;  %v14558_v51 = vpack.c.bf16 %v5558_v43, %v5557_v59 }
 0x33a   : > { %13239 = vmatprep.subr.bf16.mxu1 %v14471_v40  ;;  %5822 = vst [vmem:[#allocation2 + $0x130] sm:$0xff] %v5810_v45  ;;  %v5808_v37 = vsel %vm17407_vm13, %v5556_v50, 0.0  ;;  %v9100_v33 = vld [vmem:[#allocation2 + $0xfe] sm:$0xff]  ;;  %v9101_v34 = vld [vmem:[#allocation2 + $0x106] sm:$0xff]  ;;  %v14500_v23 = vld [vmem:[%s17835_s4 + $0x230] sm:$0xff]   ;;  %v14555_v14 = vpack.c.bf16 %v5556_v50, %v5555_v31 }
 0x33b   : > { %5820 = vst [vmem:[#allocation2 + $0x120] sm:$0xff] %v5808_v37  ;;  %13142 = vmatmul.mubr.bf16.vlgmr.msra.gmra.mrb[24].mxu0 %v16986_v1  ;;  %v9108_v32 = vpack.c.bf16 %v9100_v33, %v9099_v3  ;;  %v9109_v42 = vpack.c.bf16 %v9102_v53, %v9101_v34  ;;  %v14477_v1 = vld [vmem:[%s17835_s4 + $0x20] sm:$0xff]   ;;  %v9068_v45 = vld [vmem:[#allocation2 + $0x10d] sm:$0xff]  ;;  %v8656_v53 = vpack.c.bf16 %v8647_v52, %v8646_v24  ;;  %v9065_v37 = vld [vmem:[#allocation2 + $0xf5] sm:$0xff] }
 0x33c   : > { %13154 = vmatpush3.bf16.msra.mxu0 %v17275_v13  ;;  %13145 = vmatprep.mubr.bf16.mxu0 %v17007_v26  ;;  %v14478_v13 = vld [vmem:[%s17835_s4 + $0x1d8] sm:$0xff]   ;;  %v9059_v26 = vld [vmem:[#allocation2 + $0xc5] sm:$0xff]  ;;  %v14524_v31 = vld [vmem:[%s17835_s4 + $0x170] sm:$0xff]  }
 0x33d   : > { %13240 = vmatpush3.bf16.msra.mxu1 %v14471_v40  ;;  %13155 = vmatprep.subr.bf16.mxu0 %v14474_v55  ;;  %v9071_v58 = vpack.c.bf16 %v9060_v8, %v9059_v26  ;;  %v8644_v61 = vld [vmem:[#allocation2 + $0x9a] sm:$0xff]  ;;  %v8645_v40 = vld [vmem:[#allocation2 + $0xa2] sm:$0xff]  ;;  %v9913_v59 = vld [vmem:[#allocation2 + $0xf1] sm:$0xff] }
 0x33e   : > { %13241 = vmatprep.subr.bf16.mxu1 %v14473_v41  ;;  %v9066_v30 = vld [vmem:[#allocation2 + $0xfd] sm:$0xff]  ;;  %v9067_v12 = vld [vmem:[#allocation2 + $0x105] sm:$0xff]  ;;  %v9923_v43 = vpack.c.bf16 %v9913_v59, %v9912_v29  ;;  %v14536_v59 = vld [vmem:[%s17835_s4 + $0x1d0] sm:$0xff]  }
 0x33f   : > { %v9074_v3 = vpack.c.bf16 %v9066_v30, %v9065_v37  ;;  %v14491_v33 = vld [vmem:[%s17835_s4 + $0x98] sm:$0xff]   ;;  %v9075_v34 = vpack.c.bf16 %v9068_v45, %v9067_v12  ;;  %v8820_v24 = vld [vmem:[#allocation2 + $0xa3] sm:$0xff]  ;;  %v9394_v37 = vld [vmem:[#allocation2 + $0x10f] sm:$0xff] }
 0x340   : > { %13230 = vmatmul.mubr.bf16.gmra.mrb[28].mxu1 %v9108_v32  ;;  %13156 = vmatpush3.bf16.msra.mxu0 %v14474_v55  ;;  %v9103_v0 = vld [vmem:[#allocation2 + $0x116] sm:$0xff]  ;;  %v14490_v55 = vld [vmem:[%s17835_s4 + $0x208] sm:$0xff]   ;;  %v9392_v12 = vld [vmem:[#allocation2 + $0xff] sm:$0xff] }
 0x341   : > { %13242 = vmatpush3.bf16.msra.mxu1 %v14473_v41  ;;  %13233 = vmatprep.mubr.bf16.mxu1 %v9109_v42  ;;  %v8655_v41 = vpack.c.bf16 %v8645_v40, %v8644_v61  ;;  %v14492_v32 = vld [vmem:[%s17835_s4 + $0x210] sm:$0xff]   ;;  %v8648_v42 = vld [vmem:[#allocation2 + $0xba] sm:$0xff]  ;;  %v14503_v40 = vld [vmem:[%s17835_s4 + $0xc8] sm:$0xff]  }
 0x342   : > { %13243 = vmatprep.subr.bf16.mxu1 %v14475_v60  ;;  %13157 = vmatprep.subr.bf16.mxu0 %v14476_v47  ;;  %v9104_v22 = vld [vmem:[#allocation2 + $0x11e] sm:$0xff]  ;;  %v8822_v30 = vld [vmem:[#allocation2 + $0xb3] sm:$0xff] }
 0x343   : > { %13146 = vmatmul.mubr.bf16.gmra.mrb[28].mxu0 %v17013_v5  ;;  %v9110_v9 = vpack.c.bf16 %v9104_v22, %v9103_v0  ;;  %v8478_v5 = vld [vmem:[#allocation2 + $0xe1] sm:$0xff]  ;;  %v9386_v22 = vld [vmem:[#allocation2 + $0xcf] sm:$0xff]  ;;  %v14499_v11 = vld [vmem:[%s17835_s4 + $0xb8] sm:$0xff]  }
 0x344   : > { %13158 = vmatpush3.bf16.msra.mxu0 %v14476_v47  ;;  %13149 = vmatprep.mubr.bf16.mxu0 %v17348_v15  ;;  %v17456_v19 = vpack.c.bf16 %v8478_v5, %v8477_v38  ;;  %v14483_v15 = vld [vmem:[%s17835_s4 + $0x38] sm:$0xff]   ;;  %v9385_v0 = vld [vmem:[#allocation2 + $0xc7] sm:$0xff]  ;;  %v7403_v29 = vld [vmem:[%s17650_s29 + $0x50] sm:$0xff] }
 0x345   : > { %13244 = vmatpush3.bf16.msra.mxu1 %v14475_v60  ;;  %13159 = vmatprep.subr.bf16.mxu0 %v14478_v13  ;;  %v8649_v60 = vld [vmem:[#allocation2 + $0xc2] sm:$0xff]  ;;  %v8651_v47 = vld [vmem:[#allocation2 + $0xd2] sm:$0xff]  ;;  %v9397_v5 = vpack.c.bf16 %v9386_v22, %v9385_v0 }
 0x346   : > { %13245 = vmatprep.subr.bf16.mxu1 %v14477_v1  ;;  %v9070_v26 = vld [vmem:[#allocation2 + $0x11d] sm:$0xff]  ;;  %v8657_v8 = vpack.c.bf16 %v8649_v60, %v8648_v42  ;;  %v14495_v38 = vld [vmem:[%s17835_s4 + $0xa8] sm:$0xff]  }
 0x347   : > { %v8823_v60 = vld [vmem:[#allocation2 + $0xbb] sm:$0xff]  ;;  %v8825_v0 = vld [vmem:[#allocation2 + $0xcb] sm:$0xff] }
 0x348   : > { %13234 = vmatmul.mubr.bf16.gmra.mrb[32].mxu1 %v9110_v9  ;;  %13160 = vmatpush3.bf16.msra.mxu0 %v14478_v13  ;;  %v8650_v13 = vld [vmem:[#allocation2 + $0xca] sm:$0xff]  ;;  %v14494_v9 = vld [vmem:[%s17835_s4 + $0x218] sm:$0xff]   ;;  %v14526_v6 = vld [vmem:[%s17835_s4 + $0x180] sm:$0xff]  }
 0x349   : > { %13246 = vmatpush3.bf16.msra.mxu1 %v14477_v1  ;;  %13253 = vmatprep.mubr.bf16.mxu1 %v9071_v58  ;;  %v14493_v1 = vld [vmem:[%s17835_s4 + $0xa0] sm:$0xff]   ;;  %v9069_v58 = vld [vmem:[#allocation2 + $0x115] sm:$0xff] }
 0x34a   : > { %13247 = vmatprep.subr.bf16.mxu1 %v14479_v4  ;;  %13161 = vmatprep.subr.bf16.mxu0 %v14480_v35  ;;  %v9914_v63 = vld [vmem:[#allocation2 + $0xf9] sm:$0xff]  ;;  %v9915_v49 = vld [vmem:[#allocation2 + $0x101] sm:$0xff] }
 0x34b   : > { %13150 = vmatmul.mubr.bf16.gmra.mrb[32].mxu0 %v17456_v19  ;;  %v17618_v50 = vpack.c.bf16 %v9915_v49, %v9914_v63 }
 0x34c   : > { %13162 = vmatpush3.bf16.msra.mxu0 %v14480_v35  ;;  %13169 = vmatprep.mubr.bf16.mxu0 %v8654_v57  ;;  %v9076_v35 = vpack.c.bf16 %v9070_v26, %v9069_v58  ;;  %v14497_v57 = vld [vmem:[%s17835_s4 + $0xb0] sm:$0xff]   ;;  %v9396_v26 = vld [vmem:[#allocation2 + $0x11f] sm:$0xff]  ;;  %v14507_v58 = vld [vmem:[%s17835_s4 + $0xe8] sm:$0xff]  }
 0x34d   : > { %13248 = vmatpush3.bf16.msra.mxu1 %v14479_v4  ;;  %13163 = vmatprep.subr.bf16.mxu0 %v14482_v21  ;;  %v8658_v4 = vpack.c.bf16 %v8651_v47, %v8650_v13  ;;  %v8824_v47 = vld [vmem:[#allocation2 + $0xc3] sm:$0xff] }
 0x34e   : > { %13249 = vmatprep.subr.bf16.mxu1 %v14481_v16  ;;  %v14506_v13 = vld [vmem:[%s17835_s4 + $0xe0] sm:$0xff]  }
 0x350   : > { %13164 = vmatpush3.bf16.msra.mxu0 %v14482_v21  ;;  %v8818_v21 = vld [vmem:[#allocation2 + $0x93] sm:$0xff] }
 0x351   : > { %13250 = vmatpush3.bf16.msra.mxu1 %v14481_v16  ;;  %13165 = vmatprep.subr.bf16.mxu0 %v14484_v54  ;;  %v8652_v16 = vld [vmem:[#allocation2 + $0xda] sm:$0xff] }
 0x352   : > { %13251 = vmatprep.subr.bf16.mxu1 %v14483_v15 }
 0x354   : > { %13166 = vmatpush3.bf16.msra.mxu0 %v14484_v54  ;;  %v8817_v54 = vld [vmem:[#allocation2 + $0x8b] sm:$0xff] }
 0x355   : > { %13252 = vmatpush3.bf16.msra.mxu1 %v14483_v15  ;;  %13167 = vmatprep.subr.bf16.mxu0 %v14486_v56  ;;  %v8659_v15 = vpack.c.bf16 %v8653_v7, %v8652_v16  ;;  %v8829_v36 = vpack.c.bf16 %v8818_v21, %v8817_v54  ;;  %v14509_v16 = vld [vmem:[%s17835_s4 + $0xf8] sm:$0xff]   ;;  %v14510_v7 = vld [vmem:[%s17835_s4 + $0x100] sm:$0xff]   ;;  %v14511_v21 = vld [vmem:[%s17835_s4 + $0x108] sm:$0xff]  }
 0x356   : > { %13265 = vmatprep.subr.bf16.mxu1 %v14485_v20  ;;  %v14514_v54 = vld [vmem:[%s17835_s4 + $0x120] sm:$0xff]  }
 0x358   : > { %13254 = vmatmul.mubr.bf16.vlgmr.msra.gmra.mrb[24].mxu1 %v9072_v10  ;;  %13168 = vmatpush3.bf16.msra.mxu0 %v14486_v56  ;;  %v14501_v56 = vld [vmem:[%s17835_s4 + $0xc0] sm:$0xff]  }
 0x359   : > { %13257 = vmatprep.mubr.bf16.mxu1 %v9073_v17  ;;  %13266 = vmatpush3.bf16.msra.mxu1 %v14485_v20  ;;  %v14498_v20 = vld [vmem:[%s17835_s4 + $0x228] sm:$0xff]   ;;  %v14502_v17 = vld [vmem:[%s17835_s4 + $0x238] sm:$0xff]  }
 0x35a   : > { %13267 = vmatprep.subr.bf16.mxu1 %v14487_v2  ;;  %13181 = vmatprep.subr.bf16.mxu0 %v14488_v62  ;;  %v9389_v10 = vld [vmem:[#allocation2 + $0xe7] sm:$0xff] }
 0x35b   : > { %13170 = vmatmul.mubr.bf16.vlgmr.msra.gmra.mrb[24].mxu0 %v8655_v41  ;;  %v14504_v41 = vld [vmem:[%s17835_s4 + $0xd0] sm:$0xff]  }
 0x35c   : > { %13173 = vmatprep.mubr.bf16.mxu0 %v8656_v53  ;;  %13182 = vmatpush3.bf16.msra.mxu0 %v14488_v62  ;;  %v9387_v62 = vld [vmem:[#allocation2 + $0xd7] sm:$0xff]  ;;  %v9393_v53 = vld [vmem:[#allocation2 + $0x107] sm:$0xff] }
 0x35d   : > { %13268 = vmatpush3.bf16.msra.mxu1 %v14487_v2  ;;  %13183 = vmatprep.subr.bf16.mxu0 %v14490_v55  ;;  %v9390_v2 = vld [vmem:[#allocation2 + $0xef] sm:$0xff]  ;;  %v9398_v61 = vpack.c.bf16 %v9388_v28, %v9387_v62  ;;  %v9401_v42 = vpack.c.bf16 %v9394_v37, %v9393_v53  ;;  %v14518_v62 = vld [vmem:[%s17835_s4 + $0x140] sm:$0xff]  }
 0x35e   : > { %13269 = vmatprep.subr.bf16.mxu1 %v14489_v44  ;;  %v9399_v52 = vpack.c.bf16 %v9390_v2, %v9389_v10  ;;  %v14515_v28 = vld [vmem:[%s17835_s4 + $0x128] sm:$0xff]   ;;  %v14516_v2 = vld [vmem:[%s17835_s4 + $0x130] sm:$0xff]   ;;  %v9918_v37 = vld [vmem:[#allocation2 + $0x119] sm:$0xff] }
 0x35f   : > { %v9917_v53 = vld [vmem:[#allocation2 + $0x111] sm:$0xff] }
 0x360   : > { %13258 = vmatmul.mubr.bf16.gmra.mrb[28].mxu1 %v9074_v3  ;;  %13184 = vmatpush3.bf16.msra.mxu0 %v14490_v55  ;;  %v8821_v55 = vld [vmem:[#allocation2 + $0xab] sm:$0xff] }
 0x361   : > { %13261 = vmatprep.mubr.bf16.mxu1 %v9075_v34  ;;  %13270 = vmatpush3.bf16.msra.mxu1 %v14489_v44  ;;  %v8819_v44 = vld [vmem:[#allocation2 + $0x9b] sm:$0xff]  ;;  %v8831_v3 = vpack.c.bf16 %v8822_v30, %v8821_v55 }
 0x362   : > { %13271 = vmatprep.subr.bf16.mxu1 %v14491_v33  ;;  %13185 = vmatprep.subr.bf16.mxu0 %v14492_v32  ;;  %v8830_v45 = vpack.c.bf16 %v8820_v24, %v8819_v44  ;;  %v14519_v24 = vld [vmem:[%s17835_s4 + $0x148] sm:$0xff]  }
 0x363   : > { %13174 = vmatmul.mubr.bf16.gmra.mrb[28].mxu0 %v8657_v8  ;;  %v8832_v8 = vpack.c.bf16 %v8824_v47, %v8823_v60  ;;  %v14530_v60 = vld [vmem:[%s17835_s4 + $0x1a0] sm:$0xff]   ;;  %v9920_v47 = vld [vmem:[#allocation2 + $0x129] sm:$0xff] }
 0x364   : > { %13177 = vmatprep.mubr.bf16.mxu0 %v8658_v4  ;;  %13186 = vmatpush3.bf16.msra.mxu0 %v14492_v32  ;;  %v14505_v32 = vld [vmem:[%s17835_s4 + $0xd8] sm:$0xff]  }
 0x365   : > { %13272 = vmatpush3.bf16.msra.mxu1 %v14491_v33  ;;  %13187 = vmatprep.subr.bf16.mxu0 %v14494_v9  ;;  %v9391_v33 = vld [vmem:[#allocation2 + $0xf7] sm:$0xff] }
 0x366   : > { %13273 = vmatprep.subr.bf16.mxu1 %v14493_v1  ;;  %v9400_v34 = vpack.c.bf16 %v9392_v12, %v9391_v33  ;;  %v9742_v12 = vld [vmem:[#allocation2 + $0x110] sm:$0xff] }
 0x367   : > { %v9916_v33 = vld [vmem:[#allocation2 + $0x109] sm:$0xff] }
 0x368   : > { %13262 = vmatmul.mubr.bf16.gmra.mrb[32].mxu1 %v9076_v35  ;;  %13188 = vmatpush3.bf16.msra.mxu0 %v14494_v9  ;;  %v9395_v9 = vld [vmem:[#allocation2 + $0x117] sm:$0xff] }
 0x369   : > { %13274 = vmatpush3.bf16.msra.mxu1 %v14493_v1  ;;  %13281 = vmatprep.mubr.bf16.mxu1 %v9397_v5  ;;  %v8826_v1 = vld [vmem:[#allocation2 + $0xd3] sm:$0xff]  ;;  %v9402_v4 = vpack.c.bf16 %v9396_v26, %v9395_v9  ;;  %v8827_v35 = vld [vmem:[#allocation2 + $0xdb] sm:$0xff]  ;;  %v14531_v26 = vld [vmem:[%s17835_s4 + $0x1a8] sm:$0xff]  }
 0x36a   : > { %13275 = vmatprep.subr.bf16.mxu1 %v14495_v38  ;;  %13189 = vmatprep.subr.bf16.mxu0 %v14496_v27  ;;  %v8833_v22 = vpack.c.bf16 %v8826_v1, %v8825_v0  ;;  %v14508_v5 = vld [vmem:[%s17835_s4 + $0xf0] sm:$0xff]  }
 0x36b   : > { %13178 = vmatmul.mubr.bf16.gmra.mrb[32].mxu0 %v8659_v15  ;;  %v14513_v15 = vld [vmem:[%s17835_s4 + $0x118] sm:$0xff]   ;;  %v14532_v0 = vld [vmem:[%s17835_s4 + $0x1b0] sm:$0xff]  }
 0x36c   : > { %13190 = vmatpush3.bf16.msra.mxu0 %v14496_v27  ;;  %13197 = vmatprep.mubr.bf16.mxu0 %v8829_v36  ;;  %v9571_v36 = vld [vmem:[#allocation2 + $0x12f] sm:$0xff] }
 0x36d   : > { %13276 = vmatpush3.bf16.msra.mxu1 %v14495_v38  ;;  %13191 = vmatprep.subr.bf16.mxu0 %v14498_v20  ;;  %v8828_v38 = vld [vmem:[#allocation2 + $0xe3] sm:$0xff]  ;;  %v9921_v1 = vld [vmem:[#allocation2 + $0x131] sm:$0xff] }
 0x36e   : > { %13277 = vmatprep.subr.bf16.mxu1 %v14497_v57  ;;  %v8834_v27 = vpack.c.bf16 %v8828_v38, %v8827_v35  ;;  %v7395_v9 = vld [vmem:[%s17650_s29 + $0x10] sm:$0xff]  ;;  %v7393_v35 = vld [vmem:[%s17650_s29] sm:$0xff] }
 0x370   : > { %13192 = vmatpush3.bf16.msra.mxu0 %v14498_v20  ;;  %v9570_v20 = vld [vmem:[#allocation2 + $0x127] sm:$0xff] }
 0x371   : > { %13278 = vmatpush3.bf16.msra.mxu1 %v14497_v57  ;;  %13193 = vmatprep.subr.bf16.mxu0 %v14500_v23  ;;  %v14512_v57 = vld [vmem:[%s17835_s4 + $0x110] sm:$0xff]  }
 0x372   : > { %13279 = vmatprep.subr.bf16.mxu1 %v14499_v11 }
 0x374   : > { %13194 = vmatpush3.bf16.msra.mxu0 %v14500_v23  ;;  %v9577_v23 = vpack.c.bf16 %v9571_v36, %v9570_v20 }
 0x375   : > { %13280 = vmatpush3.bf16.msra.mxu1 %v14499_v11  ;;  %13195 = vmatprep.subr.bf16.mxu0 %v14502_v17  ;;  %v9736_v11 = vld [vmem:[#allocation2 + $0xe0] sm:$0xff] }
 0x376   : > { %13293 = vmatprep.subr.bf16.mxu1 %v14501_v56 }
 0x378   : > { %13282 = vmatmul.mubr.bf16.vlgmr.msra.gmra.mrb[24].mxu1 %v9398_v61  ;;  %13196 = vmatpush3.bf16.msra.mxu0 %v14502_v17  ;;  %v14517_v17 = vld [vmem:[%s17835_s4 + $0x138] sm:$0xff]  }
 0x379   : > { %13285 = vmatprep.mubr.bf16.mxu1 %v9399_v52  ;;  %13294 = vmatpush3.bf16.msra.mxu1 %v14501_v56  ;;  %v9735_v56 = vld [vmem:[#allocation2 + $0xd8] sm:$0xff] }
 0x37a   : > { %13295 = vmatprep.subr.bf16.mxu1 %v14503_v40  ;;  %v9747_v10 = vpack.c.bf16 %v9736_v11, %v9735_v56 }
 0x37b   : > { %13198 = vmatmul.mubr.bf16.vlgmr.msra.gmra.mrb[24].mxu0 %v8830_v45  ;;  %v9741_v45 = vld [vmem:[#allocation2 + $0x108] sm:$0xff] }
 0x37c   : > { %13201 = vmatprep.mubr.bf16.mxu0 %v8831_v3  ;;  %v9750_v55 = vpack.c.bf16 %v9742_v12, %v9741_v45  ;;  %v9919_v3 = vld [vmem:[#allocation2 + $0x121] sm:$0xff] }
 0x37d   : > { %13296 = vmatpush3.bf16.msra.mxu1 %v14503_v40  ;;  %v9739_v40 = vld [vmem:[#allocation2 + $0xf8] sm:$0xff] }
 0x37e   : > { %13297 = vmatprep.subr.bf16.mxu1 %v14504_v41  ;;  %v14552_v30 = vpack.c.bf16 %v5552_v39, %v9739_v40  ;;  %v14522_v39 = vld [vmem:[%s17835_s4 + $0x160] sm:$0xff]  }
 0x380   : > { %13286 = vmatmul.mubr.bf16.gmra.mrb[28].mxu1 %v9400_v34 }
 0x381   : > { %13289 = vmatprep.mubr.bf16.mxu1 %v9401_v42  ;;  %13298 = vmatpush3.bf16.msra.mxu1 %v14504_v41  ;;  %v14520_v41 = vld [vmem:[%s17835_s4 + $0x150] sm:$0xff]  }
 0x382   : > { %13299 = vmatprep.subr.bf16.mxu1 %v14505_v32 }
 0x383   : > { %13202 = vmatmul.mubr.bf16.gmra.mrb[28].mxu0 %v8832_v8  ;;  %v17655_v8 = vld [vmem:[%s17836_s5] ss:$0 sm:$0xff] }
 0x384   : > { %13205 = vmatprep.mubr.bf16.mxu0 %v8833_v22 }
 0x385   : > { %13300 = vmatpush3.bf16.msra.mxu1 %v14505_v32  ;;  %v14529_v32 = vld [vmem:[%s17835_s4 + $0x198] sm:$0xff]  }
 0x386   : > { %13301 = vmatprep.subr.bf16.mxu1 %v14506_v13 }
 0x388   : > { %13290 = vmatmul.mubr.bf16.gmra.mrb[32].mxu1 %v9402_v4 }
 0x389   : > { %13302 = vmatpush3.bf16.msra.mxu1 %v14506_v13  ;;  %13309 = vmatprep.mubr.bf16.mxu1 %v9398_v61  ;;  %v9738_v61 = vld [vmem:[#allocation2 + $0xf0] sm:$0xff]  ;;  %v17641_v13 = vpack.c.bf16 %v9921_v1, %v9920_v47 }
 0x38a   : > { %13303 = vmatprep.subr.bf16.mxu1 %v14507_v58 }
 0x38b   : > { %13206 = vmatmul.mubr.bf16.gmra.mrb[32].mxu0 %v8834_v27  ;;  %v7396_v27 = vld [vmem:[%s17650_s29 + $0x18] sm:$0xff] }
 0x38d   : > { %13304 = vmatpush3.bf16.msra.mxu1 %v14507_v58 }
 0x38e   : > { %13305 = vmatprep.subr.bf16.mxu1 %v14508_v5 }
 0x391   : > { %13306 = vmatpush3.bf16.msra.mxu1 %v14508_v5 }
 0x392   : > { %13307 = vmatprep.subr.bf16.mxu1 %v14509_v16 }
 0x395   : > { %13308 = vmatpush3.bf16.msra.mxu1 %v14509_v16 }
 0x396   : > { %13321 = vmatprep.subr.bf16.mxu1 %v14510_v7 }
 0x398   : > { %13310 = vmatmul.mubr.bf16.vlgmr.msra.gmra.mrb[24].mxu1 %v9399_v52  ;;  %v9737_v52 = vld [vmem:[#allocation2 + $0xe8] sm:$0xff] }
 0x399   : > { %13313 = vmatprep.mubr.bf16.mxu1 %v9400_v34  ;;  %13322 = vmatpush3.bf16.msra.mxu1 %v14510_v7  ;;  %v9748_v44 = vpack.c.bf16 %v9738_v61, %v9737_v52  ;;  %v17626_v34 = vpack.c.bf16 %v9917_v53, %v9916_v33  ;;  %v7397_v52 = vld [vmem:[%s17650_s29 + $0x20] sm:$0xff] }
 0x39a   : > { %13323 = vmatprep.subr.bf16.mxu1 %v14511_v21 }
 0x39d   : > { %13324 = vmatpush3.bf16.msra.mxu1 %v14511_v21 }
 0x39e   : > { %13325 = vmatprep.subr.bf16.mxu1 %v14512_v57 }
 0x3a0   : > { %13314 = vmatmul.mubr.bf16.gmra.mrb[28].mxu1 %v9401_v42  ;;  %v17631_v42 = vpack.c.bf16 %v9919_v3, %v9918_v37  ;;  %v7404_v37 = vld [vmem:[%s17650_s29 + $0x58] sm:$0xff] }
 0x3a1   : > { %13317 = vmatprep.mubr.bf16.mxu1 %v9402_v4  ;;  %13326 = vmatpush3.bf16.msra.mxu1 %v14512_v57  ;;  %v7394_v57 = vld [vmem:[%s17650_s29 + $0x8] sm:$0xff] }
 0x3a2   : > { %13327 = vmatprep.subr.bf16.mxu1 %v14513_v15 }
 0x3a5   : > { %13328 = vmatpush3.bf16.msra.mxu1 %v14513_v15  ;;  %v14533_v15 = vld [vmem:[%s17835_s4 + $0x1b8] sm:$0xff]  }
 0x3a6   : > { %13329 = vmatprep.subr.bf16.mxu1 %v14514_v54 }
 0x3a8   : > { %13318 = vmatmul.mubr.bf16.gmra.mrb[32].mxu1 %v9577_v23 }
 0x3a9   : > { %13330 = vmatpush3.bf16.msra.mxu1 %v14514_v54  ;;  %13337 = vmatprep.mubr.bf16.mxu1 %v9747_v10  ;;  %v14534_v10 = vld [vmem:[%s17835_s4 + $0x1c0] sm:$0xff]  }
 0x3aa   : > { %13331 = vmatprep.subr.bf16.mxu1 %v14515_v28 }
 0x3ad   : > { %13332 = vmatpush3.bf16.msra.mxu1 %v14515_v28 }
 0x3ae   : > { %13333 = vmatprep.subr.bf16.mxu1 %v14516_v2 }
 0x3b1   : > { %13334 = vmatpush3.bf16.msra.mxu1 %v14516_v2 }
 0x3b2   : > { %13335 = vmatprep.subr.bf16.mxu1 %v14517_v17 }
 0x3b5   : > { %13336 = vmatpush3.bf16.msra.mxu1 %v14517_v17 }
 0x3b6   : > { %13349 = vmatprep.subr.bf16.mxu1 %v14518_v62 }
 0x3b8   : > { %13338 = vmatmul.mubr.bf16.vlgmr.msra.gmra.mrb[24].mxu1 %v9748_v44 }
 0x3b9   : > { %14553 = vmatprep.mubr.msk.bf16.mxu1 %vm14551_vm12, %v14552_v30  ;;  %13350 = vmatpush3.bf16.msra.mxu1 %v14518_v62  ;;  %v7399_v62 = vld [vmem:[%s17650_s29 + $0x30] sm:$0xff]  ;;  %v7400_v30 = vld [vmem:[%s17650_s29 + $0x38] sm:$0xff] }
 0x3ba   : > { %13351 = vmatprep.subr.bf16.mxu1 %v14519_v24 }
 0x3bd   : > { %13352 = vmatpush3.bf16.msra.mxu1 %v14519_v24 }
 0x3be   : > { %13353 = vmatprep.subr.bf16.mxu1 %v14520_v41 }
 0x3c0   : > { %13342 = vmatmul.mubr.bf16.gmra.mrb[28].mxu1 %v9750_v55  ;;  %v7398_v55 = vld [vmem:[%s17650_s29 + $0x28] sm:$0xff] }
 0x3c1   : > { %14556 = vmatprep.mubr.msk.bf16.mxu1 %vm14554_vm2, %v14555_v14  ;;  %13354 = vmatpush3.bf16.msra.mxu1 %v14520_v41 }
 0x3c2   : > { %13355 = vmatprep.subr.bf16.mxu1 %v14521_v25 }
 0x3c5   : > { %13356 = vmatpush3.bf16.msra.mxu1 %v14521_v25  ;;  %v14535_v25 = vld [vmem:[%s17835_s4 + $0x1c8] sm:$0xff]  }
 0x3c6   : > { %13357 = vmatprep.subr.bf16.mxu1 %v14522_v39 }
 0x3c8   : > { %14559 = vmatmul.mubr.msk.bf16.gmra.mrb[32].mxu1 %vm14557_vm5, %v14558_v51 }
 0x3c9   : > { %13358 = vmatpush3.bf16.msra.mxu1 %v14522_v39  ;;  %13365 = vmatprep.mubr.bf16.mxu1 %v17456_v19  ;;  %v14528_v19 = vld [vmem:[%s17835_s4 + $0x190] sm:$0xff]  }
 0x3ca   : > { %13359 = vmatprep.subr.bf16.mxu1 %v14523_v46 }
 0x3cd   : > { %13360 = vmatpush3.bf16.msra.mxu1 %v14523_v46 }
 0x3ce   : > { %13361 = vmatprep.subr.bf16.mxu1 %v14524_v31 }
 0x3d1   : > { %13362 = vmatpush3.bf16.msra.mxu1 %v14524_v31 }
 0x3d2   : > { %13363 = vmatprep.subr.bf16.mxu1 %v14525_v18 }
 0x3d5   : > { %13364 = vmatpush3.bf16.msra.mxu1 %v14525_v18 }
 0x3d6   : > { %13377 = vmatprep.subr.bf16.mxu1 %v14526_v6 }
 0x3d8   : > { %13366 = vmatmul.mubr.bf16.vlgmr.msra.gmra.mrb[24].mxu1 %v9923_v43 }
 0x3d9   : > { %13369 = vmatprep.mubr.bf16.mxu1 %v17618_v50  ;;  %13378 = vmatpush3.bf16.msra.mxu1 %v14526_v6 }
 0x3da   : > { %13379 = vmatprep.subr.bf16.mxu1 %v14527_v48 }
 0x3dd   : > { %13380 = vmatpush3.bf16.msra.mxu1 %v14527_v48 }
 0x3de   : > { %13381 = vmatprep.subr.bf16.mxu1 %v14528_v19 }
 0x3e0   : > { %13370 = vmatmul.mubr.bf16.gmra.mrb[28].mxu1 %v17626_v34 }
 0x3e1   : > { %13373 = vmatprep.mubr.bf16.mxu1 %v17631_v42  ;;  %13382 = vmatpush3.bf16.msra.mxu1 %v14528_v19 }
 0x3e2   : > { %13383 = vmatprep.subr.bf16.mxu1 %v14529_v32 }
 0x3e5   : > { %13384 = vmatpush3.bf16.msra.mxu1 %v14529_v32  ;;  %v7402_v32 = vld [vmem:[%s17650_s29 + $0x48] sm:$0xff] }
 0x3e6   : > { %13385 = vmatprep.subr.bf16.mxu1 %v14530_v60 }
 0x3e8   : > { %13374 = vmatmul.mubr.bf16.gmra.mrb[32].mxu1 %v17641_v13 }
 0x3e9   : > { %13386 = vmatpush3.bf16.msra.mxu1 %v14530_v60  ;;  %13393 = vmatprep.mubr.bf16.mxu1 %v9923_v43  ;;  %v14537_v60 = vld [vmem:[%s17835_s4 + $0x1d8] sm:$0xff]  }
 0x3ea   : > { %13387 = vmatprep.subr.bf16.mxu1 %v14531_v26 }
 0x3eb   : > { %v12947_v22 = vpop.f32.mrb[12].mxu1 }
 0x3ec   : > { %v7383_v4 = vadd.f32 %v12947_v22, %v17655_v8  ;;  %v7315_v58 = vpop.f32.mrb[13].mxu1 }
 0x3ed   : > { %v7381_v38 = vadd.f32 %v17655_v8, %v7315_v58  ;;  %v12948_v5 = vpop.f32.mrb[14].mxu1  ;;  %13388 = vmatpush3.bf16.msra.mxu1 %v14531_v26  ;;  %v10096_v58 = vld [vmem:[#allocation2 + $0x141] sm:$0xff] }
 0x3ee   : > { %v7407_v16 = vadd.f32 %v7395_v9, %v7383_v4  ;;  %v7384_v7 = vadd.f32 %v12948_v5, %v17655_v8  ;;  %v7318_v21 = vpop.f32.mrb[15].mxu1  ;;  %13389 = vmatprep.subr.bf16.mxu1 %v14532_v0  ;;  %v10095_v4 = vld [vmem:[#allocation2 + $0x139] sm:$0xff] }
 0x3ef   : > { %v7405_v54 = vadd.f32 %v7393_v35, %v7381_v38  ;;  %v7382_v20 = vadd.f32 %v17655_v8, %v7318_v21  ;;  %v14538_v38 = vld [vmem:[%s17835_s4 + $0x1e0] sm:$0xff]   ;;  %v14540_v21 = vld [vmem:[%s17835_s4 + $0x1f0] sm:$0xff]  }
 0x3f0   : > { %v7419_v36 = vmax.f32 %v7407_v16, 0.0  ;;  %v7408_v11 = vadd.f32 %v7396_v27, %v7384_v7  ;;  %v10102_v27 = vpack.c.bf16 %v10096_v58, %v10095_v4  ;;  %v10260_v16 = vld [vmem:[#allocation2 + $0xea] sm:$0xff] }
 0x3f1   : > { %v7417_v23 = vmax.f32 %v7405_v54, 0.0  ;;  %v7406_v56 = vadd.f32 %v7394_v57, %v7382_v20  ;;  %13390 = vmatpush3.bf16.msra.mxu1 %v14532_v0  ;;  %v14541_v57 = vld [vmem:[%s17835_s4 + $0x1f8] sm:$0xff]   ;;  %v10263_v20 = vld [vmem:[#allocation2 + $0x102] sm:$0xff] }
 0x3f2   : > { %7431 = vst [vmem:[%s17673_s14 + $0x10] sm:$0xff] %v7419_v36  ;;  %v7420_v28 = vmax.f32 %v7408_v11, 0.0  ;;  %13391 = vmatprep.subr.bf16.mxu1 %v14533_v15  ;;  %v10262_v54 = vld [vmem:[#allocation2 + $0xfa] sm:$0xff]  ;;  %v10265_v36 = vld [vmem:[#allocation2 + $0x112] sm:$0xff]  ;;  %v9012_v58 = vld [vmem:[%s17650_s29 + $0x68] sm:$0xff] }
 0x3f3   : > { %7429 = vst [vmem:[%s17673_s14] sm:$0xff] %v7417_v23  ;;  %v7418_v2 = vmax.f32 %v7406_v56, 0.0  ;;  %v12951_v17 = vpop.f32.mrb[16].mxu1  ;;  %v10273_v11 = vpack.c.bf16 %v10263_v20, %v10262_v54  ;;  %v10264_v23 = vld [vmem:[#allocation2 + $0x10a] sm:$0xff]  ;;  %v9015_v20 = vld [vmem:[%s17650_s29 + $0x80] sm:$0xff] }
 0x3f4   : > { %7432 = vst [vmem:[%s17673_s14 + $0x18] sm:$0xff] %v7420_v28  ;;  %v7387_v61 = vadd.f32 %v12951_v17, %v17655_v8  ;;  %v7331_v40 = vpop.f32.mrb[17].mxu1  ;;  %v14543_v56 = vld [vmem:[%s17835_s4 + $0x208] sm:$0xff]   ;;  %v10274_v28 = vpack.c.bf16 %v10265_v36, %v10264_v23  ;;  %v9018_v23 = vld [vmem:[%s17650_s29 + $0x98] sm:$0xff] }
 0x3f5   : > { %7430 = vst [vmem:[%s17673_s14 + $0x8] sm:$0xff] %v7418_v2  ;;  %v7385_v44 = vadd.f32 %v17655_v8, %v7331_v40  ;;  %v12952_v24 = vpop.f32.mrb[18].mxu1  ;;  %13392 = vmatpush3.bf16.msra.mxu1 %v14533_v15  ;;  %v14542_v15 = vld [vmem:[%s17835_s4 + $0x200] sm:$0xff]  }
 0x3f6   : > { %v7411_v41 = vadd.f32 %v7399_v62, %v7387_v61  ;;  %v7388_v12 = vadd.f32 %v12952_v24, %v17655_v8  ;;  %v7334_v45 = vpop.f32.mrb[19].mxu1  ;;  %13405 = vmatprep.subr.bf16.mxu1 %v14534_v10  ;;  %v10266_v2 = vld [vmem:[#allocation2 + $0x11a] sm:$0xff]  ;;  %v10267_v17 = vld [vmem:[#allocation2 + $0x122] sm:$0xff]  ;;  %v10268_v62 = vld [vmem:[#allocation2 + $0x12a] sm:$0xff] }
 0x3f7   : > { %v7409_v14 = vadd.f32 %v7397_v52, %v7385_v44  ;;  %v7386_v39 = vadd.f32 %v17655_v8, %v7334_v45  ;;  %v10269_v61 = vld [vmem:[#allocation2 + $0x132] sm:$0xff]  ;;  %v10275_v40 = vpack.c.bf16 %v10267_v17, %v10266_v2  ;;  %v10270_v24 = vld [vmem:[#allocation2 + $0x13a] sm:$0xff]  ;;  %v9016_v2 = vld [vmem:[%s17650_s29 + $0x88] sm:$0xff] }
 0x3f8   : > { %v7423_v46 = vmax.f32 %v7411_v41, 0.0  ;;  %v7412_v51 = vadd.f32 %v7400_v30, %v7388_v12  ;;  %13394 = vmatmul.mubr.bf16.vlgmr.msra.gmra.mrb[24].mxu1 %v17618_v50  ;;  %v7401_v50 = vld [vmem:[%s17650_s29 + $0x40] sm:$0xff]  ;;  %v14545_v52 = vld [vmem:[%s17835_s4 + $0x218] sm:$0xff]   ;;  %v10276_v44 = vpack.c.bf16 %v10269_v61, %v10268_v62 }
 0x3f9   : > { %v7421_v31 = vmax.f32 %v7409_v14, 0.0  ;;  %v7410_v18 = vadd.f32 %v7398_v55, %v7386_v39  ;;  %13397 = vmatprep.mubr.bf16.mxu1 %v17626_v34  ;;  %13406 = vmatpush3.bf16.msra.mxu1 %v14534_v10  ;;  %v14544_v10 = vld [vmem:[%s17835_s4 + $0x210] sm:$0xff]   ;;  %v10271_v30 = vld [vmem:[#allocation2 + $0x142] sm:$0xff] }
 0x3fa   : > { %7435 = vst [vmem:[%s17673_s14 + $0x30] sm:$0xff] %v7423_v46  ;;  %v7424_v6 = vmax.f32 %v7412_v51, 0.0  ;;  %13407 = vmatprep.subr.bf16.mxu1 %v14535_v25  ;;  %v14546_v41 = vld [vmem:[%s17835_s4 + $0x220] sm:$0xff]   ;;  %v10277_v12 = vpack.c.bf16 %v10271_v30, %v10270_v24  ;;  %v10436_v45 = vld [vmem:[#allocation2 + $0xf3] sm:$0xff]  ;;  %v10435_v55 = vld [vmem:[#allocation2 + $0xeb] sm:$0xff] }
 0x3fb   : > { %7433 = vst [vmem:[%s17673_s14 + $0x20] sm:$0xff] %v7421_v31  ;;  %v7422_v63 = vmax.f32 %v7410_v18, 0.0  ;;  %v12955_v49 = vpop.f32.mrb[20].mxu1  ;;  %v10447_v14 = vpack.c.bf16 %v10436_v45, %v10435_v55  ;;  %v14548_v39 = vld [vmem:[%s17835_s4 + $0x230] sm:$0xff]   ;;  %v14549_v46 = vld [vmem:[%s17835_s4 + $0x238] sm:$0xff]   ;;  %v10438_v31 = vld [vmem:[#allocation2 + $0x103] sm:$0xff] }
 0x3fc   : > { %7436 = vst [vmem:[%s17673_s14 + $0x38] sm:$0xff] %v7424_v6  ;;  %v7391_v43 = vadd.f32 %v12955_v49, %v17655_v8  ;;  %v7347_v48 = vpop.f32.mrb[21].mxu1  ;;  %v10437_v51 = vld [vmem:[#allocation2 + $0xfb] sm:$0xff]  ;;  %v10440_v18 = vld [vmem:[#allocation2 + $0x113] sm:$0xff] }
 0x3fd   : > { %7434 = vst [vmem:[%s17673_s14 + $0x28] sm:$0xff] %v7422_v63  ;;  %v7389_v19 = vadd.f32 %v17655_v8, %v7347_v48  ;;  %v12956_v53 = vpop.f32.mrb[22].mxu1  ;;  %13408 = vmatpush3.bf16.msra.mxu1 %v14535_v25  ;;  %v14547_v25 = vld [vmem:[%s17835_s4 + $0x228] sm:$0xff]   ;;  %v10448_v6 = vpack.c.bf16 %v10438_v31, %v10437_v51  ;;  %v10441_v49 = vld [vmem:[#allocation2 + $0x11b] sm:$0xff]  ;;  %v10444_v48 = vld [vmem:[#allocation2 + $0x133] sm:$0xff] }
 0x3fe   : > { %v7415_v3 = vadd.f32 %v7403_v29, %v7391_v43  ;;  %v7392_v33 = vadd.f32 %v12956_v53, %v17655_v8  ;;  %v7350_v34 = vpop.f32.mrb[23].mxu1  ;;  %13409 = vmatprep.subr.bf16.mxu1 %v14536_v59  ;;  %v10442_v29 = vld [vmem:[#allocation2 + $0x123] sm:$0xff]  ;;  %v10443_v43 = vld [vmem:[#allocation2 + $0x12b] sm:$0xff]  ;;  %v10445_v53 = vld [vmem:[#allocation2 + $0x13b] sm:$0xff] }
 0x3ff   : > { %v7413_v47 = vadd.f32 %v7401_v50, %v7389_v19  ;;  %v7390_v1 = vadd.f32 %v17655_v8, %v7350_v34  ;;  %v10450_v50 = vpack.c.bf16 %v10442_v29, %v10441_v49  ;;  %v10451_v19 = vpack.c.bf16 %v10444_v48, %v10443_v43  ;;  %v9013_v34 = vld [vmem:[%s17650_s29 + $0x70] sm:$0xff] }
 0x400   : > { %v7427_v26 = vmax.f32 %v7415_v3, 0.0  ;;  %v7416_v0 = vadd.f32 %v7404_v37, %v7392_v33  ;;  %13398 = vmatmul.mubr.bf16.gmra.mrb[28].mxu1 %v17631_v42  ;;  %v10261_v42 = vld [vmem:[#allocation2 + $0xf2] sm:$0xff]  ;;  %v10446_v37 = vld [vmem:[#allocation2 + $0x143] sm:$0xff] }
 0x401   : > { %v7425_v22 = vmax.f32 %v7413_v47, 0.0  ;;  %v7414_v9 = vadd.f32 %v7402_v32, %v7390_v1  ;;  %13401 = vmatprep.mubr.bf16.mxu1 %v17641_v13  ;;  %13410 = vmatpush3.bf16.msra.mxu1 %v14536_v59  ;;  %v14539_v13 = vld [vmem:[%s17835_s4 + $0x1e8] sm:$0xff]   ;;  %v10272_v7 = vpack.c.bf16 %v10261_v42, %v10260_v16  ;;  %v10452_v3 = vpack.c.bf16 %v10446_v37, %v10445_v53  ;;  %v9011_v47 = vld [vmem:[%s17650_s29 + $0x60] sm:$0xff]  ;;  %v10631_v37 = vld [vmem:[%s17650_s29 + $0xd0] sm:$0xff] }
 0x402   : > { %7439 = vst [vmem:[%s17673_s14 + $0x50] sm:$0xff] %v7427_v26  ;;  %v7428_v35 = vmax.f32 %v7416_v0, 0.0  ;;  %13411 = vmatprep.subr.bf16.mxu1 %v14537_v60  ;;  %v10439_v59 = vld [vmem:[#allocation2 + $0x10b] sm:$0xff]  ;;  %v9014_v0 = vld [vmem:[%s17650_s29 + $0x78] sm:$0xff] }
 0x403   : > { %7437 = vst [vmem:[%s17673_s14 + $0x40] sm:$0xff] %v7425_v22  ;;  %v7426_v5 = vmax.f32 %v7414_v9, 0.0  ;;  %v10449_v63 = vpack.c.bf16 %v10440_v18, %v10439_v59 }
 0x404   : > { %7440 = vst [vmem:[%s17673_s14 + $0x58] sm:$0xff] %v7428_v35 }
 0x405   : > { %7438 = vst [vmem:[%s17673_s14 + $0x48] sm:$0xff] %v7426_v5  ;;  %13412 = vmatpush3.bf16.msra.mxu1 %v14537_v60 }
 0x406   : > { %13413 = vmatprep.subr.bf16.mxu1 %v14538_v38 }
 0x408   : > { %13402 = vmatmul.mubr.bf16.gmra.mrb[32].mxu1 %v10102_v27 }
 0x409   : > { %13414 = vmatpush3.bf16.msra.mxu1 %v14538_v38  ;;  %13421 = vmatprep.mubr.bf16.mxu1 %v10272_v7 }
 0x40a   : > { %13415 = vmatprep.subr.bf16.mxu1 %v14539_v13 }
 0x40d   : > { %13416 = vmatpush3.bf16.msra.mxu1 %v14539_v13 }
 0x40e   : > { %13417 = vmatprep.subr.bf16.mxu1 %v14540_v21 }
 0x411   : > { %13418 = vmatpush3.bf16.msra.mxu1 %v14540_v21 }
 0x412   : > { %13419 = vmatprep.subr.bf16.mxu1 %v14541_v57 }
 0x415   : > { %13420 = vmatpush3.bf16.msra.mxu1 %v14541_v57  ;;  %v9017_v57 = vld [vmem:[%s17650_s29 + $0x90] sm:$0xff] }
 0x416   : > { %13433 = vmatprep.subr.bf16.mxu1 %v14542_v15 }
 0x418   : > { %13422 = vmatmul.mubr.bf16.vlgmr.msra.gmra.mrb[24].mxu1 %v10273_v11 }
 0x419   : > { %13425 = vmatprep.mubr.bf16.mxu1 %v10274_v28  ;;  %13434 = vmatpush3.bf16.msra.mxu1 %v14542_v15 }
 0x41a   : > { %13435 = vmatprep.subr.bf16.mxu1 %v14543_v56 }
 0x41d   : > { %13436 = vmatpush3.bf16.msra.mxu1 %v14543_v56 }
 0x41e   : > { %13437 = vmatprep.subr.bf16.mxu1 %v14544_v10 }
 0x420   : > { %13426 = vmatmul.mubr.bf16.gmra.mrb[28].mxu1 %v10275_v40 }
 0x421   : > { %13429 = vmatprep.mubr.bf16.mxu1 %v10276_v44  ;;  %13438 = vmatpush3.bf16.msra.mxu1 %v14544_v10 }
 0x422   : > { %13439 = vmatprep.subr.bf16.mxu1 %v14545_v52 }
 0x425   : > { %13440 = vmatpush3.bf16.msra.mxu1 %v14545_v52 }
 0x426   : > { %13441 = vmatprep.subr.bf16.mxu1 %v14546_v41 }
 0x428   : > { %13430 = vmatmul.mubr.bf16.gmra.mrb[32].mxu1 %v10277_v12  ;;  %v9021_v12 = vld [vmem:[%s17650_s29 + $0xb0] sm:$0xff] }
 0x429   : > { %13442 = vmatpush3.bf16.msra.mxu1 %v14546_v41  ;;  %13449 = vmatprep.mubr.bf16.mxu1 %v10447_v14 }
 0x42a   : > { %13443 = vmatprep.subr.bf16.mxu1 %v14547_v25 }
 0x42d   : > { %13444 = vmatpush3.bf16.msra.mxu1 %v14547_v25  ;;  %v9019_v25 = vld [vmem:[%s17650_s29 + $0xa0] sm:$0xff] }
 0x42e   : > { %13445 = vmatprep.subr.bf16.mxu1 %v14548_v39 }
 0x431   : > { %13446 = vmatpush3.bf16.msra.mxu1 %v14548_v39 }
 0x432   : > { %13447 = vmatprep.subr.bf16.mxu1 %v14549_v46 }
 0x435   : > { %13448 = vmatpush3.bf16.msra.mxu1 %v14549_v46  ;;  %v9022_v46 = vld [vmem:[%s17650_s29 + $0xb8] sm:$0xff] }
 0x438   : > { %13450 = vmatmul.mubr.bf16.vlgmr.msra.gmra.mrb[24].mxu1 %v10448_v6  ;;  %v9020_v6 = vld [vmem:[%s17650_s29 + $0xa8] sm:$0xff] }
 0x439   : > { %13453 = vmatprep.mubr.bf16.mxu1 %v10449_v63 }
 0x440   : > { %13454 = vmatmul.mubr.bf16.gmra.mrb[28].mxu1 %v10450_v50 }
 0x441   : > { %13457 = vmatprep.mubr.bf16.mxu1 %v10451_v19 }
 0x448   : > { %13458 = vmatmul.mubr.bf16.gmra.mrb[32].mxu1 %v10452_v3 }
 0x44e   : > { %v13199_v33 = vpop.f32.mrb[24].mxu0 }
 0x44f   : > { %v9001_v32 = vadd.f32 %v13199_v33, %v17655_v8  ;;  %v8933_v60 = vpop.f32.mrb[25].mxu0 }
 0x450   : > { %v8999_v1 = vadd.f32 %v17655_v8, %v8933_v60  ;;  %v13200_v26 = vpop.f32.mrb[26].mxu0 }
 0x451   : > { %v9025_v22 = vadd.f32 %v9013_v34, %v9001_v32  ;;  %v9002_v9 = vadd.f32 %v13200_v26, %v17655_v8  ;;  %v8936_v4 = vpop.f32.mrb[27].mxu0  ;;  %v10629_v34 = vld [vmem:[%s17650_s29 + $0xc0] sm:$0xff] }
 0x452   : > { %v9023_v35 = vadd.f32 %v9011_v47, %v8999_v1  ;;  %v9000_v38 = vadd.f32 %v17655_v8, %v8936_v4  ;;  %v10632_v47 = vld [vmem:[%s17650_s29 + $0xd8] sm:$0xff] }
 0x453   : > { %v9037_v5 = vmax.f32 %v9025_v22, 0.0  ;;  %v9026_v27 = vadd.f32 %v9014_v0, %v9002_v9  ;;  %v10630_v22 = vld [vmem:[%s17650_s29 + $0xc8] sm:$0xff] }
 0x454   : > { %v9035_v42 = vmax.f32 %v9023_v35, 0.0  ;;  %v9024_v16 = vadd.f32 %v9012_v58, %v9000_v38 }
 0x455   : > { %9049 = vst [vmem:[%s17673_s14 + $0x70] sm:$0xff] %v9037_v5  ;;  %v9038_v13 = vmax.f32 %v9026_v27, 0.0 }
 0x456   : > { %9047 = vst [vmem:[%s17673_s14 + $0x60] sm:$0xff] %v9035_v42  ;;  %v9036_v7 = vmax.f32 %v9024_v16, 0.0  ;;  %v13203_v21 = vpop.f32.mrb[28].mxu0 }
 0x457   : > { %9050 = vst [vmem:[%s17673_s14 + $0x78] sm:$0xff] %v9038_v13  ;;  %v9005_v15 = vadd.f32 %v13203_v21, %v17655_v8  ;;  %v8949_v54 = vpop.f32.mrb[29].mxu0  ;;  %v10635_v13 = vld [vmem:[%s17650_s29 + $0xf0] sm:$0xff] }
 0x458   : > { %9048 = vst [vmem:[%s17673_s14 + $0x68] sm:$0xff] %v9036_v7  ;;  %v9003_v36 = vadd.f32 %v17655_v8, %v8949_v54  ;;  %v13204_v11 = vpop.f32.mrb[30].mxu0 }
 0x459   : > { %v9029_v56 = vadd.f32 %v9017_v57, %v9005_v15  ;;  %v9006_v28 = vadd.f32 %v13204_v11, %v17655_v8  ;;  %v8952_v10 = vpop.f32.mrb[31].mxu0  ;;  %v10633_v57 = vld [vmem:[%s17650_s29 + $0xe0] sm:$0xff] }
 0x45a   : > { %v9027_v17 = vadd.f32 %v9015_v20, %v9003_v36  ;;  %v9004_v62 = vadd.f32 %v17655_v8, %v8952_v10  ;;  %v10636_v20 = vld [vmem:[%s17650_s29 + $0xf8] sm:$0xff] }
 0x45b   : > { %v9041_v61 = vmax.f32 %v9029_v56, 0.0  ;;  %v9030_v40 = vadd.f32 %v9018_v23, %v9006_v28  ;;  %v10634_v56 = vld [vmem:[%s17650_s29 + $0xe8] sm:$0xff] }
 0x45c   : > { %v9039_v52 = vmax.f32 %v9027_v17, 0.0  ;;  %v9028_v44 = vadd.f32 %v9016_v2, %v9004_v62 }
 0x45d   : > { %9053 = vst [vmem:[%s17673_s14 + $0x90] sm:$0xff] %v9041_v61  ;;  %v9042_v24 = vmax.f32 %v9030_v40, 0.0 }
 0x45e   : > { %9051 = vst [vmem:[%s17673_s14 + $0x80] sm:$0xff] %v9039_v52  ;;  %v9040_v30 = vmax.f32 %v9028_v44, 0.0  ;;  %v13207_v41 = vpop.f32.mrb[32].mxu0 }
 0x45f   : > { %9054 = vst [vmem:[%s17673_s14 + $0x98] sm:$0xff] %v9042_v24  ;;  %v9009_v45 = vadd.f32 %v13207_v41, %v17655_v8  ;;  %v8965_v55 = vpop.f32.mrb[33].mxu0  ;;  %v10639_v24 = vld [vmem:[%s17650_s29 + $0x110] sm:$0xff] }
 0x460   : > { %9052 = vst [vmem:[%s17673_s14 + $0x88] sm:$0xff] %v9040_v30  ;;  %v9007_v14 = vadd.f32 %v17655_v8, %v8965_v55  ;;  %v13208_v39 = vpop.f32.mrb[34].mxu0 }
 0x461   : > { %v9033_v51 = vadd.f32 %v9021_v12, %v9009_v45  ;;  %v9010_v31 = vadd.f32 %v13208_v39, %v17655_v8  ;;  %v8968_v18 = vpop.f32.mrb[35].mxu0  ;;  %v10637_v12 = vld [vmem:[%s17650_s29 + $0x100] sm:$0xff] }
 0x462   : > { %v9031_v59 = vadd.f32 %v9019_v25, %v9007_v14  ;;  %v9008_v63 = vadd.f32 %v17655_v8, %v8968_v18  ;;  %v10640_v25 = vld [vmem:[%s17650_s29 + $0x118] sm:$0xff] }
 0x463   : > { %v9045_v49 = vmax.f32 %v9033_v51, 0.0  ;;  %v9034_v29 = vadd.f32 %v9022_v46, %v9010_v31  ;;  %v10638_v51 = vld [vmem:[%s17650_s29 + $0x108] sm:$0xff] }
 0x464   : > { %v9043_v43 = vmax.f32 %v9031_v59, 0.0  ;;  %v9032_v48 = vadd.f32 %v9020_v6, %v9008_v63 }
 0x465   : > { %9057 = vst [vmem:[%s17673_s14 + $0xb0] sm:$0xff] %v9045_v49  ;;  %v9046_v50 = vmax.f32 %v9034_v29, 0.0 }
 0x466   : > { %9055 = vst [vmem:[%s17673_s14 + $0xa0] sm:$0xff] %v9043_v43  ;;  %v9044_v19 = vmax.f32 %v9032_v48, 0.0 }
 0x467   : > { %9058 = vst [vmem:[%s17673_s14 + $0xb8] sm:$0xff] %v9046_v50 }
 0x468   : > { %9056 = vst [vmem:[%s17673_s14 + $0xa8] sm:$0xff] %v9044_v19 }
 0x50b   : > { %v13451_v53 = vpop.f32.mrb[24].mxu1 }
 0x50c   : > { %v10619_v3 = vadd.f32 %v13451_v53, %v17655_v8  ;;  %v10551_v33 = vpop.f32.mrb[25].mxu1 }
 0x50d   : > { %v10617_v32 = vadd.f32 %v17655_v8, %v10551_v33  ;;  %v13452_v60 = vpop.f32.mrb[26].mxu1 }
 0x50e   : > { %v10643_v1 = vadd.f32 %v10631_v37, %v10619_v3  ;;  %v10620_v26 = vadd.f32 %v13452_v60, %v17655_v8  ;;  %v10554_v0 = vpop.f32.mrb[27].mxu1 }
 0x50f   : > { %v10641_v9 = vadd.f32 %v10629_v34, %v10617_v32  ;;  %v10618_v4 = vadd.f32 %v17655_v8, %v10554_v0 }
 0x510   : > { %v10655_v58 = vmax.f32 %v10643_v1, 0.0  ;;  %v10644_v35 = vadd.f32 %v10632_v47, %v10620_v26 }
 0x511   : > { %v10653_v38 = vmax.f32 %v10641_v9, 0.0  ;;  %v10642_v5 = vadd.f32 %v10630_v22, %v10618_v4 }
 0x512   : > { %10667 = vst [vmem:[%s17673_s14 + $0xd0] sm:$0xff] %v10655_v58  ;;  %v10656_v27 = vmax.f32 %v10644_v35, 0.0 }
 0x513   : > { %10665 = vst [vmem:[%s17673_s14 + $0xc0] sm:$0xff] %v10653_v38  ;;  %v10654_v42 = vmax.f32 %v10642_v5, 0.0  ;;  %v13455_v16 = vpop.f32.mrb[28].mxu1 }
 0x514   : > { %10668 = vst [vmem:[%s17673_s14 + $0xd8] sm:$0xff] %v10656_v27  ;;  %v10623_v7 = vadd.f32 %v13455_v16, %v17655_v8  ;;  %v10567_v21 = vpop.f32.mrb[29].mxu1 }
 0x515   : > { %10666 = vst [vmem:[%s17673_s14 + $0xc8] sm:$0xff] %v10654_v42  ;;  %v10621_v15 = vadd.f32 %v17655_v8, %v10567_v21  ;;  %v13456_v54 = vpop.f32.mrb[30].mxu1 }
 0x516   : > { %v10647_v36 = vadd.f32 %v10635_v13, %v10623_v7  ;;  %v10624_v11 = vadd.f32 %v13456_v54, %v17655_v8  ;;  %v10570_v23 = vpop.f32.mrb[31].mxu1 }
 0x517   : > { %v10645_v28 = vadd.f32 %v10633_v57, %v10621_v15  ;;  %v10622_v10 = vadd.f32 %v17655_v8, %v10570_v23 }
 0x518   : > { %v10659_v2 = vmax.f32 %v10647_v36, 0.0  ;;  %v10648_v17 = vadd.f32 %v10636_v20, %v10624_v11 }
 0x519   : > { %v10657_v62 = vmax.f32 %v10645_v28, 0.0  ;;  %v10646_v61 = vadd.f32 %v10634_v56, %v10622_v10 }
 0x51a   : > { %10671 = vst [vmem:[%s17673_s14 + $0xf0] sm:$0xff] %v10659_v2  ;;  %v10660_v40 = vmax.f32 %v10648_v17, 0.0 }
 0x51b   : > { %10669 = vst [vmem:[%s17673_s14 + $0xe0] sm:$0xff] %v10657_v62  ;;  %v10658_v52 = vmax.f32 %v10646_v61, 0.0  ;;  %v13459_v44 = vpop.f32.mrb[32].mxu1 }
 0x51c   : > { %10672 = vst [vmem:[%s17673_s14 + $0xf8] sm:$0xff] %v10660_v40  ;;  %v10627_v30 = vadd.f32 %v13459_v44, %v17655_v8  ;;  %v10583_v41 = vpop.f32.mrb[33].mxu1 }
 0x51d   : > { %10670 = vst [vmem:[%s17673_s14 + $0xe8] sm:$0xff] %v10658_v52  ;;  %v10625_v45 = vadd.f32 %v17655_v8, %v10583_v41  ;;  %v13460_v55 = vpop.f32.mrb[34].mxu1 }
 0x51e   : > { %v10651_v14 = vadd.f32 %v10639_v24, %v10627_v30  ;;  %v10628_v39 = vadd.f32 %v13460_v55, %v17655_v8  ;;  %v10586_v46 = vpop.f32.mrb[35].mxu1 }
 0x51f   : > { %v10649_v31 = vadd.f32 %v10637_v12, %v10625_v45  ;;  %v10626_v18 = vadd.f32 %v17655_v8, %v10586_v46 }
 0x520   : > { %v10663_v6 = vmax.f32 %v10651_v14, 0.0  ;;  %v10652_v59 = vadd.f32 %v10640_v25, %v10628_v39 }
 0x521   : > { %v10661_v63 = vmax.f32 %v10649_v31, 0.0  ;;  %v10650_v49 = vadd.f32 %v10638_v51, %v10626_v18 }
 0x522   : > { %10675 = vst [vmem:[%s17673_s14 + $0x110] sm:$0xff] %v10663_v6  ;;  %v10664_v29 = vmax.f32 %v10652_v59, 0.0 }
 0x523   : > { %10673 = vst [vmem:[%s17673_s14 + $0x100] sm:$0xff] %v10661_v63  ;;  %v10662_v43 = vmax.f32 %v10650_v49, 0.0 }
 0x524   : > { %10676 = vst [vmem:[%s17673_s14 + $0x118] sm:$0xff] %v10664_v29 }
 0x525   : > { %10674 = vst [vmem:[%s17673_s14 + $0x108] sm:$0xff] %v10662_v43 }
 0x526 PF: > { %s16_s21 = sadd.s32 1, %s14566_s21  }
 0x527   : > { %p13_p5 = scmp.ge.s32.totalorder %s16_s21, 4  }
 0x529   :  { %15 = sbr.rel (!%p13_p5) target bundleno = 1 (0x1), region = 77 }

</bundles_post_ra>
